<compile_context>
chip_gen: v7x
topology: tpu7x:2x2x1
jax: 0.10.0
libtpu: 0.0.40
codegen_flags: <defaults>
</compile_context>

<pallas_src>
import functools

import jax
import jax.numpy as jnp
from jax.experimental import pallas as pl
from jax.experimental.pallas import tpu as pltpu


VOCAB = 5
LAYER_SIZES = [4096, 2048, 1024]  # matches the PyTorch module (intention=True)


# ---------------------------------------------------------------------------
# Fused MLP kernel: out = relu( relu(x @ W0 + b0) @ W1 + b1 )
# Grid = (H // th,) over the shared hidden dim (layer-0 output cols ==
# layer-1 reduction rows).  Output block is resident across the grid.
# ---------------------------------------------------------------------------
def _fused_mlp_kernel(x_ref, w0_ref, b0_ref, w1_ref, b1_ref, o_ref):
    j = pl.program_id(0)

    @pl.when(j == 0)
    def _():
        o_ref[...] = jnp.zeros_like(o_ref)

    # Layer 0 tile: (M, th) f32, full-K matmul (x is fully VMEM-resident).
    h = jnp.dot(x_ref[...], w0_ref[...], preferred_element_type=jnp.float32)
    h = jnp.maximum(h + b0_ref[...], 0.0)

    # Layer 1 partial sum over this hidden tile, accumulated in f32 output.
    o_ref[...] += jnp.dot(
        h.astype(w1_ref.dtype), w1_ref[...], preferred_element_type=jnp.float32
    )

    @pl.when(j == pl.num_programs(0) - 1)
    def _():
        o_ref[...] = jnp.maximum(o_ref[...] + b1_ref[...], 0.0)


def fused_mlp(x, w0, b0, w1, b1, *, th=512):
    """out = relu(relu(x @ w0 + b0) @ w1 + b1), single fused Pallas call.

    x: (M, K) bf16, w0: (K, H) bf16, b0: (H,) f32, w1: (H, N) bf16, b1: (N,) f32
    Returns (M, N) f32.  M must be a multiple of 8 (pad B*S if needed).
    """
    M, K = x.shape
    K0, H = w0.shape
    H1, N = w1.shape
    assert K == K0 and H == H1 and b0.shape == (H,) and b1.shape == (N,)
    assert H % th == 0 and M % 8 == 0

    b0_2d = b0.reshape(1, H).astype(jnp.float32)
    b1_2d = b1.reshape(1, N).astype(jnp.float32)

    grid = (H // th,)
    return pl.pallas_call(
        _fused_mlp_kernel,
        out_shape=jax.ShapeDtypeStruct((M, N), jnp.float32),
        grid_spec=pltpu.PrefetchScalarGridSpec(
            num_scalar_prefetch=0,
            grid=grid,
            in_specs=[
                pl.BlockSpec((M, K), lambda j: (0, 0)),    # x: fully resident
                pl.BlockSpec((K, th), lambda j: (0, j)),   # W0 column tile
                pl.BlockSpec((1, th), lambda j: (0, j)),   # b0 tile
                pl.BlockSpec((th, N), lambda j: (j, 0)),   # W1 row tile
                pl.BlockSpec((1, N), lambda j: (0, 0)),    # b1: resident
            ],
            out_specs=pl.BlockSpec((M, N), lambda j: (0, 0)),  # resident / acc
        ),
        compiler_params=pltpu.CompilerParams(
            dimension_semantics=("arbitrary",),      # hidden axis is a reduction
            vmem_limit_bytes=32 * 1024 * 1024,
        ),
    )(x, w0, b0_2d, w1, b1_2d)


# ---------------------------------------------------------------------------
# LanguageNetEncoder forward
# ---------------------------------------------------------------------------
def init_params(key):
    """Deterministic synthetic parameters matching the PyTorch module shapes."""
    ks = jax.random.split(key, 5)
    params = {
        # nn.Embedding(5, 4096)
        "embedding": jax.random.normal(ks[0], (VOCAB, LAYER_SIZES[0]), jnp.float32)
        * 0.02,
    }
    # nn.Linear(in, out): weight (out, in), bias (out,)
    for i, (in_size, out_size) in enumerate(zip(LAYER_SIZES[:-1], LAYER_SIZES[1:])):
        w = jax.random.normal(ks[1 + 2 * i], (out_size, in_size), jnp.float32) * (
            1.0 / jnp.sqrt(in_size)
        )
        bias = jax.random.normal(ks[2 + 2 * i], (out_size,), jnp.float32) * 0.01
        params[f"L{i}_w"] = w
        params[f"L{i}_b"] = bias
    return params


@jax.jit
def language_net_encoder_forward(params, obj_language):
    """obj_language: int token ids, shape (B, S). Returns (B, S, 1024) f32."""
    idx = obj_language.astype(jnp.int32)
    B, S = idx.shape

    # Embedding lookup in plain JAX (tiny 5 x 4096 table), then bf16 cast for
    # the weight-bandwidth-bound MLP.
    emb = jnp.take(params["embedding"], idx, axis=0)          # (B, S, 4096) f32
    x = emb.reshape(B * S, LAYER_SIZES[0]).astype(jnp.bfloat16)

    # PyTorch nn.Linear weight is (out, in); transpose to (in, out) so the
    # kernel computes x @ W + b  ==  x @ weight.T + bias.
    w0 = params["L0_w"].T.astype(jnp.bfloat16)
    w1 = params["L1_w"].T.astype(jnp.bfloat16)

    out = fused_mlp(x, w0, params["L0_b"], w1, params["L1_b"], th=512)
    return out.reshape(B, S, LAYER_SIZES[-1])


def reference_forward(params, obj_language):
    """Pure-JAX reference matching the kernel's bf16-weight numerics."""
    idx = obj_language.astype(jnp.int32)
    B, S = idx.shape
    emb = jnp.take(params["embedding"], idx, axis=0)
    x = emb.reshape(B * S, LAYER_SIZES[0]).astype(jnp.bfloat16)
    w0 = params["L0_w"].T.astype(jnp.bfloat16)
    w1 = params["L1_w"].T.astype(jnp.bfloat16)
    h = jnp.maximum(
        jnp.dot(x, w0, preferred_element_type=jnp.float32) + params["L0_b"], 0.0
    )
    out = jnp.maximum(
        jnp.dot(h.astype(jnp.bfloat16), w1, preferred_element_type=jnp.float32)
        + params["L1_b"],
        0.0,
    )
    return out.reshape(B, S, LAYER_SIZES[-1])


if __name__ == "__main__":
    key = jax.random.PRNGKey(0)
    pkey, dkey = jax.random.split(key)

    params = init_params(pkey)

    # Small input: batch=2, seq=8 token ids in [0, 5)  ->  M = B*S = 16.
    B, S = 2, 8
    obj_language = jax.random.randint(dkey, (B, S), 0, VOCAB, dtype=jnp.int32)

    out = language_net_encoder_forward(params, obj_language)
    out = jax.block_until_ready(out)

    ref = jax.block_until_ready(reference_forward(params, obj_language))
    assert out.shape == (B, S, LAYER_SIZES[-1]), out.shape
    assert jnp.allclose(out, ref, atol=1e-2, rtol=1e-2), "mismatch vs reference"

    print("KERNEL_OK")
</pallas_src>

<mosaic_0001>
module attributes {stable_mosaic.version = 11 : i64} {
  func.func @_fused_mlp_kernel(%arg0: i32, %arg1: memref<16x4096xbf16, #tpu.memory_space<vmem>>, %arg2: memref<4096x512xbf16, #tpu.memory_space<vmem>>, %arg3: memref<1x512xf32, #tpu.memory_space<vmem>>, %arg4: memref<512x1024xbf16, #tpu.memory_space<vmem>>, %arg5: memref<1x1024xf32, #tpu.memory_space<vmem>>, %arg6: memref<16x1024xf32, #tpu.memory_space<vmem>>) attributes {dimension_semantics = [#tpu.dimension_semantics<arbitrary>], iteration_bounds = array<i64: 4>, scalar_prefetch = 0 : i64, scratch_operands = 0 : i64, tpu.core_type = #tpu.core_type<tc>, window_params = [{pipeline_mode = #tpu.pipeline_mode<synchronous>, transform_indices = @transform_0, window_bounds = array<i64: 16, 4096>}, {transform_indices = @transform_1, window_bounds = array<i64: 4096, 512>}, {transform_indices = @transform_2, window_bounds = array<i64: 1, 512>}, {transform_indices = @transform_3, window_bounds = array<i64: 512, 1024>}, {pipeline_mode = #tpu.pipeline_mode<synchronous>, transform_indices = @transform_4, window_bounds = array<i64: 1, 1024>}, {pipeline_mode = #tpu.pipeline_mode<synchronous>, transform_indices = @transform_5, window_bounds = array<i64: 16, 1024>}]} {
    %c0_i32 = arith.constant 0 : i32
    %0 = arith.cmpi eq, %arg0, %c0_i32 : i32
    %1 = arith.extui %0 : i1 to i32
    %c0_i32_0 = arith.constant 0 : i32
    %2 = arith.cmpi ne, %1, %c0_i32_0 : i32
    scf.if %2 {
      %cst_15 = arith.constant 0.000000e+00 : f32
      %20 = vector.broadcast %cst_15 : f32 to vector<16x1024xf32>
      %c0_16 = arith.constant 0 : index
      %c0_17 = arith.constant 0 : index
      %21 = vector.load %arg6[%c0_16, %c0_17] : memref<16x1024xf32, #tpu.memory_space<vmem>>, vector<16x1024xf32>
      tpu.vector_store %arg6[%c0_16, %c0_17], %20 {strides = array<i32>} : memref<16x1024xf32, #tpu.memory_space<vmem>>, vector<16x1024xf32>,
    } else {
    }
    %c0 = arith.constant 0 : index
    %c0_1 = arith.constant 0 : index
    %3 = vector.load %arg1[%c0, %c0_1] : memref<16x4096xbf16, #tpu.memory_space<vmem>>, vector<16x4096xbf16>
    %c0_2 = arith.constant 0 : index
    %c0_3 = arith.constant 0 : index
    %4 = vector.load %arg2[%c0_2, %c0_3] : memref<4096x512xbf16, #tpu.memory_space<vmem>>, vector<4096x512xbf16>
    %cst = arith.constant dense<0.000000e+00> : vector<16x512xf32>
    %5 = tpu.matmul %3, %4, %cst {dimension_numbers = #tpu.dot_dimension_numbers<[1], [0], [0], [1], [0, 0, 1, 1], [], []>} : vector<16x4096xbf16>, vector<4096x512xbf16>, vector<16x512xf32> -> vector<16x512xf32>
    %c0_4 = arith.constant 0 : index
    %c0_5 = arith.constant 0 : index
    %6 = vector.load %arg3[%c0_4, %c0_5] : memref<1x512xf32, #tpu.memory_space<vmem>>, vector<1x512xf32>
    %7 = vector.broadcast %6 : vector<1x512xf32> to vector<16x512xf32>
    %8 = arith.addf %5, %7 : vector<16x512xf32>
    %cst_6 = arith.constant 0.000000e+00 : f32
    %9 = vector.broadcast %cst_6 : f32 to vector<16x512xf32>
    %10 = arith.maximumf %8, %9 : vector<16x512xf32>
    %c0_7 = arith.constant 0 : index
    %c0_8 = arith.constant 0 : index
    %11 = vector.load %arg6[%c0_7, %c0_8] : memref<16x1024xf32, #tpu.memory_space<vmem>>, vector<16x1024xf32>
    %12 = arith.truncf %10 : vector<16x512xf32> to vector<16x512xbf16>
    %c0_9 = arith.constant 0 : index
    %c0_10 = arith.constant 0 : index
    %13 = vector.load %arg4[%c0_9, %c0_10] : memref<512x1024xbf16, #tpu.memory_space<vmem>>, vector<512x1024xbf16>
    %cst_11 = arith.constant dense<0.000000e+00> : vector<16x1024xf32>
    %14 = tpu.matmul %12, %13, %cst_11 {dimension_numbers = #tpu.dot_dimension_numbers<[1], [0], [0], [1], [0, 0, 1, 1], [], []>} : vector<16x512xbf16>, vector<512x1024xbf16>, vector<16x1024xf32> -> vector<16x1024xf32>
    %15 = arith.addf %11, %14 : vector<16x1024xf32>
    %c0_12 = arith.constant 0 : index
    %c0_13 = arith.constant 0 : index
    %16 = vector.load %arg6[%c0_12, %c0_13] : memref<16x1024xf32, #tpu.memory_space<vmem>>, vector<16x1024xf32>
    tpu.vector_store %arg6[%c0_12, %c0_13], %15 {strides = array<i32>} : memref<16x1024xf32, #tpu.memory_space<vmem>>, vector<16x1024xf32>,
    %c3_i32 = arith.constant 3 : i32
    %17 = arith.cmpi eq, %arg0, %c3_i32 : i32
    %18 = arith.extui %17 : i1 to i32
    %c0_i32_14 = arith.constant 0 : i32
    %19 = arith.cmpi ne, %18, %c0_i32_14 : i32
    scf.if %19 {
      %c0_15 = arith.constant 0 : index
      %c0_16 = arith.constant 0 : index
      %20 = vector.load %arg6[%c0_15, %c0_16] : memref<16x1024xf32, #tpu.memory_space<vmem>>, vector<16x1024xf32>
      %c0_17 = arith.constant 0 : index
      %c0_18 = arith.constant 0 : index
      %21 = vector.load %arg5[%c0_17, %c0_18] : memref<1x1024xf32, #tpu.memory_space<vmem>>, vector<1x1024xf32>
      %22 = vector.broadcast %21 : vector<1x1024xf32> to vector<16x1024xf32>
      %23 = arith.addf %20, %22 : vector<16x1024xf32>
      %cst_19 = arith.constant 0.000000e+00 : f32
      %24 = vector.broadcast %cst_19 : f32 to vector<16x1024xf32>
      %25 = arith.maximumf %23, %24 : vector<16x1024xf32>
      %c0_20 = arith.constant 0 : index
      %c0_21 = arith.constant 0 : index
      %26 = vector.load %arg6[%c0_20, %c0_21] : memref<16x1024xf32, #tpu.memory_space<vmem>>, vector<16x1024xf32>
      tpu.vector_store %arg6[%c0_20, %c0_21], %25 {strides = array<i32>} : memref<16x1024xf32, #tpu.memory_space<vmem>>, vector<16x1024xf32>,
    } else {
    }
    return
  }
  func.func @transform_0(%arg0: i32) -> (i32, i32) {
    %c0_i32 = arith.constant 0 : i32
    %c0_i32_0 = arith.constant 0 : i32
    %c0_i32_1 = arith.constant 0 : i32
    return %c0_i32, %c0_i32_0 : i32, i32
  }
  func.func @transform_1(%arg0: i32) -> (i32, i32) {
    %c0_i32 = arith.constant 0 : i32
    %c0_i32_0 = arith.constant 0 : i32
    return %c0_i32, %arg0 : i32, i32
  }
  func.func @transform_2(%arg0: i32) -> (i32, i32) {
    %c0_i32 = arith.constant 0 : i32
    %c0_i32_0 = arith.constant 0 : i32
    return %c0_i32, %arg0 : i32, i32
  }
  func.func @transform_3(%arg0: i32) -> (i32, i32) {
    %c0_i32 = arith.constant 0 : i32
    %c0_i32_0 = arith.constant 0 : i32
    return %arg0, %c0_i32 : i32, i32
  }
  func.func @transform_4(%arg0: i32) -> (i32, i32) {
    %c0_i32 = arith.constant 0 : i32
    %c0_i32_0 = arith.constant 0 : i32
    %c0_i32_1 = arith.constant 0 : i32
    return %c0_i32, %c0_i32_0 : i32, i32
  }
  func.func @transform_5(%arg0: i32) -> (i32, i32) {
    %c0_i32 = arith.constant 0 : i32
    %c0_i32_0 = arith.constant 0 : i32
    %c0_i32_1 = arith.constant 0 : i32
    return %c0_i32, %c0_i32_0 : i32, i32
  }
}

</mosaic_0001>

<bundles_post_ra>
// kernel: language_net_encoder_forward.1
= control target key start
LH: loop header
LB: loop body
LE: loop exit
PB: predicated region body
PF: predicated region fallthrough
CT: control target
= control target key end

     0   :  { %10 = vsyncpa [#allocation4], 0  ;;  %s16482_s18 = smov 0   ;;  %s16484_s19 = smov 0   ;;  %s19212_s0 = inlined_call_operand.vmem [shape: bf16[16,4096], index: 0, kind: input, shape index: {}]   ;;  %s19213_s1 = inlined_call_operand.vmem [shape: bf16[4096,2048], index: 1, kind: input, shape index: {}]   ;;  %s19214_s2 = inlined_call_operand.vmem [shape: f32[1,2048], index: 2, kind: input, shape index: {}]   ;;  %s19215_s3 = inlined_call_operand.vmem [shape: bf16[2048,1024], index: 3, kind: input, shape index: {}]   ;;  %s19216_s4 = inlined_call_operand.vmem [shape: f32[1,1024], index: 4, kind: input, shape index: {}]   ;;  %s19217_s5 = inlined_call_operand.hbm [shape: f32[16,1024], index: 5, kind: output, shape index: {}]  }
   0x1   :  { %s16486_s20 = smov 0  }
   0x2 LB: > { %s16498_s21 = sadd.s32 4294967295, %s16430_s20   ;;  %s16501_s22 = sadd.s32 1, %s16430_s20   ;;  %s16430_s20 = sphi %s16486_s20, %s19225_s20   ;;  %s16426_s19 = sphi %s16484_s19, %s19224_s19   ;;  %s16422_s18 = sphi %s16482_s18, %s19223_s18  }
   0x3   : > { %s41_s23 = ssub.s32 %s16430_s20, %s16501_s22  ;;  %s44_s24 = sadd.s32 1, %s16426_s19 }
   0x4   : > { %p42_p0 = scmp.eq.s32.totalorder %s41_s23, 0  ;;  %p51_p1 = scmp.ne.s32.totalorder %s16426_s19, %s16422_s18 }
   0x5   : > { %p52_p2 = scmp.eq.s32.totalorder %s16430_s20, 0  ;;  %p13284_p4 = scmp.ge.s32.totalorder %s16430_s20, 4 }
   0x6   : > { %s16510_s25 = scalar_select %p42_p0, %s16426_s19, %s44_s24  }
   0x7   : > { %p53_p3 = por %p52_p2, %p51_p1  ;;  %177 = sbr.rel (%p13284_p4) target bundleno = 534 (0x216), region = 24 }
   0xe   : > { %180 = sbr.rel (!%p53_p3) target bundleno = 534 (0x216), region = 28  ;;  %s182_s26 = sand.u32 (%p53_p3), 1, %s16426_s19  }
   0xf   : > { %s14614_s27 = sshll.u32 (%p53_p3), %s16430_s20, 4  ;;  %s16515_s28 = sshll.u32 (%p53_p3), %s182_s26, 13 }
  0x10   : > { %s16520_s6 = scalar_lea.vmem (%p53_p3), %s19213_s1, %s14614_s27   ;;  %s184_s7 = scalar_lea.vmem (%p53_p3), [#allocation2], %s16515_s28  }
  0x11   : > { %s19218_s8 = smov (%p53_p3), %s184_s7  ;;  %s19219_s9 = smov (%p53_p3), %s16520_s6 }
  0x12   : > { %s16530_s10 = smov (%p53_p3), 0   ;;  %s16532_s11 = smov (%p53_p3), 0  }
  0x15 LB: >> { %v203_v0 = vld [vmem:[%s16438_s9] sm:$0xff]  ;;  %s1227_s12 = sadd.s32 1, %s16442_s10  ;;  %s199_s11 = sadd.s32 1, %s16446_s11   ;;  %s16446_s11 = sphi %s16532_s11, %s199_s11   ;;  %s16442_s10 = sphi %s16530_s10, %s19222_s10   ;;  %s16438_s9 = sphi %s19219_s9, %s19221_s9   ;;  %s16434_s8 = sphi %s19218_s8, %s19220_s8  }
  0x16   : >> { %v205_v1 = vld [vmem:[%s16438_s9 + $0x40] sm:$0xff]  ;;  %204 = vst [vmem:[%s16434_s8] sm:$0xff] %v203_v0  ;;  %p1228_p5 = scmp.ge.s32.totalorder %s1227_s12, 2  ;;  %p196_p6 = scmp.ge.s32.totalorder %s199_s11, 2  }
  0x17   : >> { %v207_v2 = vld [vmem:[%s16438_s9 + $0x80] sm:$0xff]  ;;  %206 = vst [vmem:[%s16434_s8 + $0x10] sm:$0xff] %v205_v1 }
  0x18   : >> { %208 = vst [vmem:[%s16434_s8 + $0x20] sm:$0xff] %v207_v2  ;;  %v209_v3 = vld [vmem:[%s16438_s9 + $0xc0] sm:$0xff]  ;;  %s19227_s12 = smov (%p1228_p5, %s1227_s12), 0 }
  0x19   : >> { %v211_v4 = vld [vmem:[%s16438_s9 + $0x100] sm:$0xff]  ;;  %210 = vst [vmem:[%s16434_s8 + $0x30] sm:$0xff] %v209_v3  ;;  %s13288_s13 = sshll.u32 %s19227_s12, 3  ;;  %s19222_s10 = smov %s19227_s12 }
  0x1a   : >> { %v213_v5 = vld [vmem:[%s16438_s9 + $0x140] sm:$0xff]  ;;  %212 = vst [vmem:[%s16434_s8 + $0x40] sm:$0xff] %v211_v4  ;;  %s16812_s14 = scalar_lea.vmem %s16520_s6, %s13288_s13   ;;  %s16816_s15 = scalar_lea.vmem %s184_s7, %s13288_s13 [#allocation2]  }
  0x1b   : >> { %214 = vst [vmem:[%s16434_s8 + $0x50] sm:$0xff] %v213_v5  ;;  %v215_v6 = vld [vmem:[%s16438_s9 + $0x180] sm:$0xff] }
  0x1c   : >> { %v217_v7 = vld [vmem:[%s16438_s9 + $0x1c0] sm:$0xff]  ;;  %216 = vst [vmem:[%s16434_s8 + $0x60] sm:$0xff] %v215_v6 }
  0x1d   : >> { %v219_v8 = vld [vmem:[%s16438_s9 + $0x200] sm:$0xff]  ;;  %218 = vst [vmem:[%s16434_s8 + $0x70] sm:$0xff] %v217_v7 }
  0x1e   : >> { %220 = vst [vmem:[%s16434_s8 + $0x80] sm:$0xff] %v219_v8  ;;  %v221_v9 = vld [vmem:[%s16438_s9 + $0x240] sm:$0xff] }
  0x1f   : >> { %v223_v10 = vld [vmem:[%s16438_s9 + $0x280] sm:$0xff]  ;;  %222 = vst [vmem:[%s16434_s8 + $0x90] sm:$0xff] %v221_v9 }
  0x20   : >> { %v225_v11 = vld [vmem:[%s16438_s9 + $0x2c0] sm:$0xff]  ;;  %224 = vst [vmem:[%s16434_s8 + $0xa0] sm:$0xff] %v223_v10 }
  0x21   : >> { %226 = vst [vmem:[%s16434_s8 + $0xb0] sm:$0xff] %v225_v11  ;;  %v227_v12 = vld [vmem:[%s16438_s9 + $0x300] sm:$0xff] }
  0x22   : >> { %v229_v13 = vld [vmem:[%s16438_s9 + $0x340] sm:$0xff]  ;;  %228 = vst [vmem:[%s16434_s8 + $0xc0] sm:$0xff] %v227_v12 }
  0x23   : >> { %v231_v14 = vld [vmem:[%s16438_s9 + $0x380] sm:$0xff]  ;;  %230 = vst [vmem:[%s16434_s8 + $0xd0] sm:$0xff] %v229_v13 }
  0x24   : >> { %232 = vst [vmem:[%s16434_s8 + $0xe0] sm:$0xff] %v231_v14  ;;  %v233_v15 = vld [vmem:[%s16438_s9 + $0x3c0] sm:$0xff] }
  0x25   : >> { %v235_v16 = vld [vmem:[%s16438_s9 + $0x400] sm:$0xff]  ;;  %234 = vst [vmem:[%s16434_s8 + $0xf0] sm:$0xff] %v233_v15 }
  0x26   : >> { %v237_v17 = vld [vmem:[%s16438_s9 + $0x440] sm:$0xff]  ;;  %236 = vst [vmem:[%s16434_s8 + $0x100] sm:$0xff] %v235_v16 }
  0x27   : >> { %238 = vst [vmem:[%s16434_s8 + $0x110] sm:$0xff] %v237_v17  ;;  %v239_v18 = vld [vmem:[%s16438_s9 + $0x480] sm:$0xff] }
  0x28   : >> { %v241_v19 = vld [vmem:[%s16438_s9 + $0x4c0] sm:$0xff]  ;;  %240 = vst [vmem:[%s16434_s8 + $0x120] sm:$0xff] %v239_v18 }
  0x29   : >> { %v243_v20 = vld [vmem:[%s16438_s9 + $0x500] sm:$0xff]  ;;  %242 = vst [vmem:[%s16434_s8 + $0x130] sm:$0xff] %v241_v19 }
  0x2a   : >> { %244 = vst [vmem:[%s16434_s8 + $0x140] sm:$0xff] %v243_v20  ;;  %v245_v21 = vld [vmem:[%s16438_s9 + $0x540] sm:$0xff] }
  0x2b   : >> { %v247_v22 = vld [vmem:[%s16438_s9 + $0x580] sm:$0xff]  ;;  %246 = vst [vmem:[%s16434_s8 + $0x150] sm:$0xff] %v245_v21 }
  0x2c   : >> { %v249_v23 = vld [vmem:[%s16438_s9 + $0x5c0] sm:$0xff]  ;;  %248 = vst [vmem:[%s16434_s8 + $0x160] sm:$0xff] %v247_v22 }
  0x2d   : >> { %250 = vst [vmem:[%s16434_s8 + $0x170] sm:$0xff] %v249_v23  ;;  %v251_v24 = vld [vmem:[%s16438_s9 + $0x600] sm:$0xff] }
  0x2e   : >> { %v253_v25 = vld [vmem:[%s16438_s9 + $0x640] sm:$0xff]  ;;  %252 = vst [vmem:[%s16434_s8 + $0x180] sm:$0xff] %v251_v24 }
  0x2f   : >> { %v255_v26 = vld [vmem:[%s16438_s9 + $0x680] sm:$0xff]  ;;  %254 = vst [vmem:[%s16434_s8 + $0x190] sm:$0xff] %v253_v25 }
  0x30   : >> { %256 = vst [vmem:[%s16434_s8 + $0x1a0] sm:$0xff] %v255_v26  ;;  %v257_v27 = vld [vmem:[%s16438_s9 + $0x6c0] sm:$0xff] }
  0x31   : >> { %v259_v28 = vld [vmem:[%s16438_s9 + $0x700] sm:$0xff]  ;;  %258 = vst [vmem:[%s16434_s8 + $0x1b0] sm:$0xff] %v257_v27 }
  0x32   : >> { %v261_v29 = vld [vmem:[%s16438_s9 + $0x740] sm:$0xff]  ;;  %260 = vst [vmem:[%s16434_s8 + $0x1c0] sm:$0xff] %v259_v28 }
  0x33   : >> { %262 = vst [vmem:[%s16434_s8 + $0x1d0] sm:$0xff] %v261_v29  ;;  %v263_v30 = vld [vmem:[%s16438_s9 + $0x780] sm:$0xff] }
  0x34   : >> { %v265_v31 = vld [vmem:[%s16438_s9 + $0x7c0] sm:$0xff]  ;;  %264 = vst [vmem:[%s16434_s8 + $0x1e0] sm:$0xff] %v263_v30 }
  0x35   : >> { %v267_v32 = vld [vmem:[%s16438_s9 + $0x800] sm:$0xff]  ;;  %266 = vst [vmem:[%s16434_s8 + $0x1f0] sm:$0xff] %v265_v31 }
  0x36   : >> { %268 = vst [vmem:[%s16434_s8 + $0x200] sm:$0xff] %v267_v32  ;;  %v269_v33 = vld [vmem:[%s16438_s9 + $0x840] sm:$0xff] }
  0x37   : >> { %v271_v34 = vld [vmem:[%s16438_s9 + $0x880] sm:$0xff]  ;;  %270 = vst [vmem:[%s16434_s8 + $0x210] sm:$0xff] %v269_v33 }
  0x38   : >> { %v273_v35 = vld [vmem:[%s16438_s9 + $0x8c0] sm:$0xff]  ;;  %272 = vst [vmem:[%s16434_s8 + $0x220] sm:$0xff] %v271_v34 }
  0x39   : >> { %274 = vst [vmem:[%s16434_s8 + $0x230] sm:$0xff] %v273_v35  ;;  %v275_v36 = vld [vmem:[%s16438_s9 + $0x900] sm:$0xff] }
  0x3a   : >> { %v277_v37 = vld [vmem:[%s16438_s9 + $0x940] sm:$0xff]  ;;  %276 = vst [vmem:[%s16434_s8 + $0x240] sm:$0xff] %v275_v36 }
  0x3b   : >> { %v279_v38 = vld [vmem:[%s16438_s9 + $0x980] sm:$0xff]  ;;  %278 = vst [vmem:[%s16434_s8 + $0x250] sm:$0xff] %v277_v37 }
  0x3c   : >> { %280 = vst [vmem:[%s16434_s8 + $0x260] sm:$0xff] %v279_v38  ;;  %v281_v39 = vld [vmem:[%s16438_s9 + $0x9c0] sm:$0xff] }
  0x3d   : >> { %v283_v40 = vld [vmem:[%s16438_s9 + $0xa00] sm:$0xff]  ;;  %282 = vst [vmem:[%s16434_s8 + $0x270] sm:$0xff] %v281_v39 }
  0x3e   : >> { %v285_v41 = vld [vmem:[%s16438_s9 + $0xa40] sm:$0xff]  ;;  %284 = vst [vmem:[%s16434_s8 + $0x280] sm:$0xff] %v283_v40 }
  0x3f   : >> { %286 = vst [vmem:[%s16434_s8 + $0x290] sm:$0xff] %v285_v41  ;;  %v287_v42 = vld [vmem:[%s16438_s9 + $0xa80] sm:$0xff] }
  0x40   : >> { %v289_v43 = vld [vmem:[%s16438_s9 + $0xac0] sm:$0xff]  ;;  %288 = vst [vmem:[%s16434_s8 + $0x2a0] sm:$0xff] %v287_v42 }
  0x41   : >> { %v291_v44 = vld [vmem:[%s16438_s9 + $0xb00] sm:$0xff]  ;;  %290 = vst [vmem:[%s16434_s8 + $0x2b0] sm:$0xff] %v289_v43 }
  0x42   : >> { %292 = vst [vmem:[%s16434_s8 + $0x2c0] sm:$0xff] %v291_v44  ;;  %v293_v45 = vld [vmem:[%s16438_s9 + $0xb40] sm:$0xff] }
  0x43   : >> { %v295_v46 = vld [vmem:[%s16438_s9 + $0xb80] sm:$0xff]  ;;  %294 = vst [vmem:[%s16434_s8 + $0x2d0] sm:$0xff] %v293_v45 }
  0x44   : >> { %v297_v47 = vld [vmem:[%s16438_s9 + $0xbc0] sm:$0xff]  ;;  %296 = vst [vmem:[%s16434_s8 + $0x2e0] sm:$0xff] %v295_v46 }
  0x45   : >> { %298 = vst [vmem:[%s16434_s8 + $0x2f0] sm:$0xff] %v297_v47  ;;  %v299_v48 = vld [vmem:[%s16438_s9 + $0xc00] sm:$0xff] }
  0x46   : >> { %v301_v49 = vld [vmem:[%s16438_s9 + $0xc40] sm:$0xff]  ;;  %300 = vst [vmem:[%s16434_s8 + $0x300] sm:$0xff] %v299_v48 }
  0x47   : >> { %v303_v50 = vld [vmem:[%s16438_s9 + $0xc80] sm:$0xff]  ;;  %302 = vst [vmem:[%s16434_s8 + $0x310] sm:$0xff] %v301_v49 }
  0x48   : >> { %304 = vst [vmem:[%s16434_s8 + $0x320] sm:$0xff] %v303_v50  ;;  %v305_v51 = vld [vmem:[%s16438_s9 + $0xcc0] sm:$0xff] }
  0x49   : >> { %v307_v52 = vld [vmem:[%s16438_s9 + $0xd00] sm:$0xff]  ;;  %306 = vst [vmem:[%s16434_s8 + $0x330] sm:$0xff] %v305_v51 }
  0x4a   : >> { %v309_v53 = vld [vmem:[%s16438_s9 + $0xd40] sm:$0xff]  ;;  %308 = vst [vmem:[%s16434_s8 + $0x340] sm:$0xff] %v307_v52 }
  0x4b   : >> { %310 = vst [vmem:[%s16434_s8 + $0x350] sm:$0xff] %v309_v53  ;;  %v311_v54 = vld [vmem:[%s16438_s9 + $0xd80] sm:$0xff] }
  0x4c   : >> { %v313_v55 = vld [vmem:[%s16438_s9 + $0xdc0] sm:$0xff]  ;;  %312 = vst [vmem:[%s16434_s8 + $0x360] sm:$0xff] %v311_v54 }
  0x4d   : >> { %v315_v56 = vld [vmem:[%s16438_s9 + $0xe00] sm:$0xff]  ;;  %314 = vst [vmem:[%s16434_s8 + $0x370] sm:$0xff] %v313_v55 }
  0x4e   : >> { %316 = vst [vmem:[%s16434_s8 + $0x380] sm:$0xff] %v315_v56  ;;  %v317_v57 = vld [vmem:[%s16438_s9 + $0xe40] sm:$0xff] }
  0x4f   : >> { %v319_v58 = vld [vmem:[%s16438_s9 + $0xe80] sm:$0xff]  ;;  %318 = vst [vmem:[%s16434_s8 + $0x390] sm:$0xff] %v317_v57 }
  0x50   : >> { %v321_v59 = vld [vmem:[%s16438_s9 + $0xec0] sm:$0xff]  ;;  %320 = vst [vmem:[%s16434_s8 + $0x3a0] sm:$0xff] %v319_v58 }
  0x51   : >> { %322 = vst [vmem:[%s16434_s8 + $0x3b0] sm:$0xff] %v321_v59  ;;  %v323_v60 = vld [vmem:[%s16438_s9 + $0xf00] sm:$0xff] }
  0x52   : >> { %v325_v61 = vld [vmem:[%s16438_s9 + $0xf40] sm:$0xff]  ;;  %324 = vst [vmem:[%s16434_s8 + $0x3c0] sm:$0xff] %v323_v60 }
  0x53   : >> { %v327_v62 = vld [vmem:[%s16438_s9 + $0xf80] sm:$0xff]  ;;  %326 = vst [vmem:[%s16434_s8 + $0x3d0] sm:$0xff] %v325_v61 }
  0x54   : >> { %328 = vst [vmem:[%s16434_s8 + $0x3e0] sm:$0xff] %v327_v62  ;;  %v329_v63 = vld [vmem:[%s16438_s9 + $0xfc0] sm:$0xff] }
  0x55   : >> { %v331_v0 = vld [vmem:[%s16438_s9 + $0x1000] sm:$0xff]  ;;  %330 = vst [vmem:[%s16434_s8 + $0x3f0] sm:$0xff] %v329_v63 }
  0x56   : >> { %v333_v1 = vld [vmem:[%s16438_s9 + $0x1040] sm:$0xff]  ;;  %332 = vst [vmem:[%s16434_s8 + $0x400] sm:$0xff] %v331_v0 }
  0x57   : >> { %334 = vst [vmem:[%s16434_s8 + $0x410] sm:$0xff] %v333_v1  ;;  %v335_v2 = vld [vmem:[%s16438_s9 + $0x1080] sm:$0xff] }
  0x58   : >> { %v337_v3 = vld [vmem:[%s16438_s9 + $0x10c0] sm:$0xff]  ;;  %336 = vst [vmem:[%s16434_s8 + $0x420] sm:$0xff] %v335_v2 }
  0x59   : >> { %v339_v4 = vld [vmem:[%s16438_s9 + $0x1100] sm:$0xff]  ;;  %338 = vst [vmem:[%s16434_s8 + $0x430] sm:$0xff] %v337_v3 }
  0x5a   : >> { %340 = vst [vmem:[%s16434_s8 + $0x440] sm:$0xff] %v339_v4  ;;  %v341_v5 = vld [vmem:[%s16438_s9 + $0x1140] sm:$0xff] }
  0x5b   : >> { %v343_v6 = vld [vmem:[%s16438_s9 + $0x1180] sm:$0xff]  ;;  %342 = vst [vmem:[%s16434_s8 + $0x450] sm:$0xff] %v341_v5 }
  0x5c   : >> { %v345_v7 = vld [vmem:[%s16438_s9 + $0x11c0] sm:$0xff]  ;;  %344 = vst [vmem:[%s16434_s8 + $0x460] sm:$0xff] %v343_v6 }
  0x5d   : >> { %346 = vst [vmem:[%s16434_s8 + $0x470] sm:$0xff] %v345_v7  ;;  %v347_v8 = vld [vmem:[%s16438_s9 + $0x1200] sm:$0xff] }
  0x5e   : >> { %v349_v9 = vld [vmem:[%s16438_s9 + $0x1240] sm:$0xff]  ;;  %348 = vst [vmem:[%s16434_s8 + $0x480] sm:$0xff] %v347_v8 }
  0x5f   : >> { %v351_v10 = vld [vmem:[%s16438_s9 + $0x1280] sm:$0xff]  ;;  %350 = vst [vmem:[%s16434_s8 + $0x490] sm:$0xff] %v349_v9 }
  0x60   : >> { %352 = vst [vmem:[%s16434_s8 + $0x4a0] sm:$0xff] %v351_v10  ;;  %v353_v11 = vld [vmem:[%s16438_s9 + $0x12c0] sm:$0xff] }
  0x61   : >> { %v355_v12 = vld [vmem:[%s16438_s9 + $0x1300] sm:$0xff]  ;;  %354 = vst [vmem:[%s16434_s8 + $0x4b0] sm:$0xff] %v353_v11 }
  0x62   : >> { %v357_v13 = vld [vmem:[%s16438_s9 + $0x1340] sm:$0xff]  ;;  %356 = vst [vmem:[%s16434_s8 + $0x4c0] sm:$0xff] %v355_v12 }
  0x63   : >> { %358 = vst [vmem:[%s16434_s8 + $0x4d0] sm:$0xff] %v357_v13  ;;  %v359_v14 = vld [vmem:[%s16438_s9 + $0x1380] sm:$0xff] }
  0x64   : >> { %v361_v15 = vld [vmem:[%s16438_s9 + $0x13c0] sm:$0xff]  ;;  %360 = vst [vmem:[%s16434_s8 + $0x4e0] sm:$0xff] %v359_v14 }
  0x65   : >> { %v363_v16 = vld [vmem:[%s16438_s9 + $0x1400] sm:$0xff]  ;;  %362 = vst [vmem:[%s16434_s8 + $0x4f0] sm:$0xff] %v361_v15 }
  0x66   : >> { %364 = vst [vmem:[%s16434_s8 + $0x500] sm:$0xff] %v363_v16  ;;  %v365_v17 = vld [vmem:[%s16438_s9 + $0x1440] sm:$0xff] }
  0x67   : >> { %v367_v18 = vld [vmem:[%s16438_s9 + $0x1480] sm:$0xff]  ;;  %366 = vst [vmem:[%s16434_s8 + $0x510] sm:$0xff] %v365_v17 }
  0x68   : >> { %v369_v19 = vld [vmem:[%s16438_s9 + $0x14c0] sm:$0xff]  ;;  %368 = vst [vmem:[%s16434_s8 + $0x520] sm:$0xff] %v367_v18 }
  0x69   : >> { %370 = vst [vmem:[%s16434_s8 + $0x530] sm:$0xff] %v369_v19  ;;  %v371_v20 = vld [vmem:[%s16438_s9 + $0x1500] sm:$0xff] }
  0x6a   : >> { %v373_v21 = vld [vmem:[%s16438_s9 + $0x1540] sm:$0xff]  ;;  %372 = vst [vmem:[%s16434_s8 + $0x540] sm:$0xff] %v371_v20 }
  0x6b   : >> { %v375_v22 = vld [vmem:[%s16438_s9 + $0x1580] sm:$0xff]  ;;  %374 = vst [vmem:[%s16434_s8 + $0x550] sm:$0xff] %v373_v21 }
  0x6c   : >> { %376 = vst [vmem:[%s16434_s8 + $0x560] sm:$0xff] %v375_v22  ;;  %v377_v23 = vld [vmem:[%s16438_s9 + $0x15c0] sm:$0xff] }
  0x6d   : >> { %v379_v24 = vld [vmem:[%s16438_s9 + $0x1600] sm:$0xff]  ;;  %378 = vst [vmem:[%s16434_s8 + $0x570] sm:$0xff] %v377_v23 }
  0x6e   : >> { %v381_v25 = vld [vmem:[%s16438_s9 + $0x1640] sm:$0xff]  ;;  %380 = vst [vmem:[%s16434_s8 + $0x580] sm:$0xff] %v379_v24 }
  0x6f   : >> { %382 = vst [vmem:[%s16434_s8 + $0x590] sm:$0xff] %v381_v25  ;;  %v383_v26 = vld [vmem:[%s16438_s9 + $0x1680] sm:$0xff] }
  0x70   : >> { %v385_v27 = vld [vmem:[%s16438_s9 + $0x16c0] sm:$0xff]  ;;  %384 = vst [vmem:[%s16434_s8 + $0x5a0] sm:$0xff] %v383_v26 }
  0x71   : >> { %v387_v28 = vld [vmem:[%s16438_s9 + $0x1700] sm:$0xff]  ;;  %386 = vst [vmem:[%s16434_s8 + $0x5b0] sm:$0xff] %v385_v27 }
  0x72   : >> { %388 = vst [vmem:[%s16434_s8 + $0x5c0] sm:$0xff] %v387_v28  ;;  %v389_v29 = vld [vmem:[%s16438_s9 + $0x1740] sm:$0xff] }
  0x73   : >> { %v391_v30 = vld [vmem:[%s16438_s9 + $0x1780] sm:$0xff]  ;;  %390 = vst [vmem:[%s16434_s8 + $0x5d0] sm:$0xff] %v389_v29 }
  0x74   : >> { %v393_v31 = vld [vmem:[%s16438_s9 + $0x17c0] sm:$0xff]  ;;  %392 = vst [vmem:[%s16434_s8 + $0x5e0] sm:$0xff] %v391_v30 }
  0x75   : >> { %394 = vst [vmem:[%s16434_s8 + $0x5f0] sm:$0xff] %v393_v31  ;;  %v395_v32 = vld [vmem:[%s16438_s9 + $0x1800] sm:$0xff] }
  0x76   : >> { %v397_v33 = vld [vmem:[%s16438_s9 + $0x1840] sm:$0xff]  ;;  %396 = vst [vmem:[%s16434_s8 + $0x600] sm:$0xff] %v395_v32 }
  0x77   : >> { %v399_v34 = vld [vmem:[%s16438_s9 + $0x1880] sm:$0xff]  ;;  %398 = vst [vmem:[%s16434_s8 + $0x610] sm:$0xff] %v397_v33 }
  0x78   : >> { %400 = vst [vmem:[%s16434_s8 + $0x620] sm:$0xff] %v399_v34  ;;  %v401_v35 = vld [vmem:[%s16438_s9 + $0x18c0] sm:$0xff] }
  0x79   : >> { %v403_v36 = vld [vmem:[%s16438_s9 + $0x1900] sm:$0xff]  ;;  %402 = vst [vmem:[%s16434_s8 + $0x630] sm:$0xff] %v401_v35 }
  0x7a   : >> { %v405_v37 = vld [vmem:[%s16438_s9 + $0x1940] sm:$0xff]  ;;  %404 = vst [vmem:[%s16434_s8 + $0x640] sm:$0xff] %v403_v36 }
  0x7b   : >> { %406 = vst [vmem:[%s16434_s8 + $0x650] sm:$0xff] %v405_v37  ;;  %v407_v38 = vld [vmem:[%s16438_s9 + $0x1980] sm:$0xff] }
  0x7c   : >> { %v409_v39 = vld [vmem:[%s16438_s9 + $0x19c0] sm:$0xff]  ;;  %408 = vst [vmem:[%s16434_s8 + $0x660] sm:$0xff] %v407_v38 }
  0x7d   : >> { %v411_v40 = vld [vmem:[%s16438_s9 + $0x1a00] sm:$0xff]  ;;  %410 = vst [vmem:[%s16434_s8 + $0x670] sm:$0xff] %v409_v39 }
  0x7e   : >> { %412 = vst [vmem:[%s16434_s8 + $0x680] sm:$0xff] %v411_v40  ;;  %v413_v41 = vld [vmem:[%s16438_s9 + $0x1a40] sm:$0xff] }
  0x7f   : >> { %v415_v42 = vld [vmem:[%s16438_s9 + $0x1a80] sm:$0xff]  ;;  %414 = vst [vmem:[%s16434_s8 + $0x690] sm:$0xff] %v413_v41 }
  0x80   : >> { %v417_v43 = vld [vmem:[%s16438_s9 + $0x1ac0] sm:$0xff]  ;;  %416 = vst [vmem:[%s16434_s8 + $0x6a0] sm:$0xff] %v415_v42 }
  0x81   : >> { %418 = vst [vmem:[%s16434_s8 + $0x6b0] sm:$0xff] %v417_v43  ;;  %v419_v44 = vld [vmem:[%s16438_s9 + $0x1b00] sm:$0xff] }
  0x82   : >> { %v421_v45 = vld [vmem:[%s16438_s9 + $0x1b40] sm:$0xff]  ;;  %420 = vst [vmem:[%s16434_s8 + $0x6c0] sm:$0xff] %v419_v44 }
  0x83   : >> { %v423_v46 = vld [vmem:[%s16438_s9 + $0x1b80] sm:$0xff]  ;;  %422 = vst [vmem:[%s16434_s8 + $0x6d0] sm:$0xff] %v421_v45 }
  0x84   : >> { %424 = vst [vmem:[%s16434_s8 + $0x6e0] sm:$0xff] %v423_v46  ;;  %v425_v47 = vld [vmem:[%s16438_s9 + $0x1bc0] sm:$0xff] }
  0x85   : >> { %v427_v48 = vld [vmem:[%s16438_s9 + $0x1c00] sm:$0xff]  ;;  %426 = vst [vmem:[%s16434_s8 + $0x6f0] sm:$0xff] %v425_v47 }
  0x86   : >> { %v429_v49 = vld [vmem:[%s16438_s9 + $0x1c40] sm:$0xff]  ;;  %428 = vst [vmem:[%s16434_s8 + $0x700] sm:$0xff] %v427_v48 }
  0x87   : >> { %430 = vst [vmem:[%s16434_s8 + $0x710] sm:$0xff] %v429_v49  ;;  %v431_v50 = vld [vmem:[%s16438_s9 + $0x1c80] sm:$0xff] }
  0x88   : >> { %v433_v51 = vld [vmem:[%s16438_s9 + $0x1cc0] sm:$0xff]  ;;  %432 = vst [vmem:[%s16434_s8 + $0x720] sm:$0xff] %v431_v50 }
  0x89   : >> { %v435_v52 = vld [vmem:[%s16438_s9 + $0x1d00] sm:$0xff]  ;;  %434 = vst [vmem:[%s16434_s8 + $0x730] sm:$0xff] %v433_v51 }
  0x8a   : >> { %436 = vst [vmem:[%s16434_s8 + $0x740] sm:$0xff] %v435_v52  ;;  %v437_v53 = vld [vmem:[%s16438_s9 + $0x1d40] sm:$0xff] }
  0x8b   : >> { %v439_v54 = vld [vmem:[%s16438_s9 + $0x1d80] sm:$0xff]  ;;  %438 = vst [vmem:[%s16434_s8 + $0x750] sm:$0xff] %v437_v53 }
  0x8c   : >> { %v441_v55 = vld [vmem:[%s16438_s9 + $0x1dc0] sm:$0xff]  ;;  %440 = vst [vmem:[%s16434_s8 + $0x760] sm:$0xff] %v439_v54 }
  0x8d   : >> { %442 = vst [vmem:[%s16434_s8 + $0x770] sm:$0xff] %v441_v55  ;;  %v443_v56 = vld [vmem:[%s16438_s9 + $0x1e00] sm:$0xff] }
  0x8e   : >> { %v445_v57 = vld [vmem:[%s16438_s9 + $0x1e40] sm:$0xff]  ;;  %444 = vst [vmem:[%s16434_s8 + $0x780] sm:$0xff] %v443_v56 }
  0x8f   : >> { %v447_v58 = vld [vmem:[%s16438_s9 + $0x1e80] sm:$0xff]  ;;  %446 = vst [vmem:[%s16434_s8 + $0x790] sm:$0xff] %v445_v57 }
  0x90   : >> { %448 = vst [vmem:[%s16434_s8 + $0x7a0] sm:$0xff] %v447_v58  ;;  %v449_v59 = vld [vmem:[%s16438_s9 + $0x1ec0] sm:$0xff] }
  0x91   : >> { %v451_v60 = vld [vmem:[%s16438_s9 + $0x1f00] sm:$0xff]  ;;  %450 = vst [vmem:[%s16434_s8 + $0x7b0] sm:$0xff] %v449_v59 }
  0x92   : >> { %v453_v61 = vld [vmem:[%s16438_s9 + $0x1f40] sm:$0xff]  ;;  %452 = vst [vmem:[%s16434_s8 + $0x7c0] sm:$0xff] %v451_v60 }
  0x93   : >> { %454 = vst [vmem:[%s16434_s8 + $0x7d0] sm:$0xff] %v453_v61  ;;  %v455_v62 = vld [vmem:[%s16438_s9 + $0x1f80] sm:$0xff] }
  0x94   : >> { %v457_v63 = vld [vmem:[%s16438_s9 + $0x1fc0] sm:$0xff]  ;;  %456 = vst [vmem:[%s16434_s8 + $0x7e0] sm:$0xff] %v455_v62 }
  0x95   : >> { %v459_v0 = vld [vmem:[%s16438_s9 + $0x2000] sm:$0xff]  ;;  %458 = vst [vmem:[%s16434_s8 + $0x7f0] sm:$0xff] %v457_v63 }
  0x96   : >> { %460 = vst [vmem:[%s16434_s8 + $0x800] sm:$0xff] %v459_v0  ;;  %v461_v1 = vld [vmem:[%s16438_s9 + $0x2040] sm:$0xff] }
  0x97   : >> { %v463_v2 = vld [vmem:[%s16438_s9 + $0x2080] sm:$0xff]  ;;  %462 = vst [vmem:[%s16434_s8 + $0x810] sm:$0xff] %v461_v1 }
  0x98   : >> { %v465_v3 = vld [vmem:[%s16438_s9 + $0x20c0] sm:$0xff]  ;;  %464 = vst [vmem:[%s16434_s8 + $0x820] sm:$0xff] %v463_v2 }
  0x99   : >> { %466 = vst [vmem:[%s16434_s8 + $0x830] sm:$0xff] %v465_v3  ;;  %v467_v4 = vld [vmem:[%s16438_s9 + $0x2100] sm:$0xff] }
  0x9a   : >> { %v469_v5 = vld [vmem:[%s16438_s9 + $0x2140] sm:$0xff]  ;;  %468 = vst [vmem:[%s16434_s8 + $0x840] sm:$0xff] %v467_v4 }
  0x9b   : >> { %v471_v6 = vld [vmem:[%s16438_s9 + $0x2180] sm:$0xff]  ;;  %470 = vst [vmem:[%s16434_s8 + $0x850] sm:$0xff] %v469_v5 }
  0x9c   : >> { %472 = vst [vmem:[%s16434_s8 + $0x860] sm:$0xff] %v471_v6  ;;  %v473_v7 = vld [vmem:[%s16438_s9 + $0x21c0] sm:$0xff] }
  0x9d   : >> { %v475_v8 = vld [vmem:[%s16438_s9 + $0x2200] sm:$0xff]  ;;  %474 = vst [vmem:[%s16434_s8 + $0x870] sm:$0xff] %v473_v7 }
  0x9e   : >> { %v477_v9 = vld [vmem:[%s16438_s9 + $0x2240] sm:$0xff]  ;;  %476 = vst [vmem:[%s16434_s8 + $0x880] sm:$0xff] %v475_v8 }
  0x9f   : >> { %478 = vst [vmem:[%s16434_s8 + $0x890] sm:$0xff] %v477_v9  ;;  %v479_v10 = vld [vmem:[%s16438_s9 + $0x2280] sm:$0xff] }
  0xa0   : >> { %v481_v11 = vld [vmem:[%s16438_s9 + $0x22c0] sm:$0xff]  ;;  %480 = vst [vmem:[%s16434_s8 + $0x8a0] sm:$0xff] %v479_v10 }
  0xa1   : >> { %v483_v12 = vld [vmem:[%s16438_s9 + $0x2300] sm:$0xff]  ;;  %482 = vst [vmem:[%s16434_s8 + $0x8b0] sm:$0xff] %v481_v11 }
  0xa2   : >> { %484 = vst [vmem:[%s16434_s8 + $0x8c0] sm:$0xff] %v483_v12  ;;  %v485_v13 = vld [vmem:[%s16438_s9 + $0x2340] sm:$0xff] }
  0xa3   : >> { %v487_v14 = vld [vmem:[%s16438_s9 + $0x2380] sm:$0xff]  ;;  %486 = vst [vmem:[%s16434_s8 + $0x8d0] sm:$0xff] %v485_v13 }
  0xa4   : >> { %v489_v15 = vld [vmem:[%s16438_s9 + $0x23c0] sm:$0xff]  ;;  %488 = vst [vmem:[%s16434_s8 + $0x8e0] sm:$0xff] %v487_v14 }
  0xa5   : >> { %490 = vst [vmem:[%s16434_s8 + $0x8f0] sm:$0xff] %v489_v15  ;;  %v491_v16 = vld [vmem:[%s16438_s9 + $0x2400] sm:$0xff] }
  0xa6   : >> { %v493_v17 = vld [vmem:[%s16438_s9 + $0x2440] sm:$0xff]  ;;  %492 = vst [vmem:[%s16434_s8 + $0x900] sm:$0xff] %v491_v16 }
  0xa7   : >> { %v495_v18 = vld [vmem:[%s16438_s9 + $0x2480] sm:$0xff]  ;;  %494 = vst [vmem:[%s16434_s8 + $0x910] sm:$0xff] %v493_v17 }
  0xa8   : >> { %496 = vst [vmem:[%s16434_s8 + $0x920] sm:$0xff] %v495_v18  ;;  %v497_v19 = vld [vmem:[%s16438_s9 + $0x24c0] sm:$0xff] }
  0xa9   : >> { %v499_v20 = vld [vmem:[%s16438_s9 + $0x2500] sm:$0xff]  ;;  %498 = vst [vmem:[%s16434_s8 + $0x930] sm:$0xff] %v497_v19 }
  0xaa   : >> { %v501_v21 = vld [vmem:[%s16438_s9 + $0x2540] sm:$0xff]  ;;  %500 = vst [vmem:[%s16434_s8 + $0x940] sm:$0xff] %v499_v20 }
  0xab   : >> { %502 = vst [vmem:[%s16434_s8 + $0x950] sm:$0xff] %v501_v21  ;;  %v503_v22 = vld [vmem:[%s16438_s9 + $0x2580] sm:$0xff] }
  0xac   : >> { %v505_v23 = vld [vmem:[%s16438_s9 + $0x25c0] sm:$0xff]  ;;  %504 = vst [vmem:[%s16434_s8 + $0x960] sm:$0xff] %v503_v22 }
  0xad   : >> { %v507_v24 = vld [vmem:[%s16438_s9 + $0x2600] sm:$0xff]  ;;  %506 = vst [vmem:[%s16434_s8 + $0x970] sm:$0xff] %v505_v23 }
  0xae   : >> { %508 = vst [vmem:[%s16434_s8 + $0x980] sm:$0xff] %v507_v24  ;;  %v509_v25 = vld [vmem:[%s16438_s9 + $0x2640] sm:$0xff] }
  0xaf   : >> { %v511_v26 = vld [vmem:[%s16438_s9 + $0x2680] sm:$0xff]  ;;  %510 = vst [vmem:[%s16434_s8 + $0x990] sm:$0xff] %v509_v25 }
  0xb0   : >> { %v513_v27 = vld [vmem:[%s16438_s9 + $0x26c0] sm:$0xff]  ;;  %512 = vst [vmem:[%s16434_s8 + $0x9a0] sm:$0xff] %v511_v26 }
  0xb1   : >> { %514 = vst [vmem:[%s16434_s8 + $0x9b0] sm:$0xff] %v513_v27  ;;  %v515_v28 = vld [vmem:[%s16438_s9 + $0x2700] sm:$0xff] }
  0xb2   : >> { %v517_v29 = vld [vmem:[%s16438_s9 + $0x2740] sm:$0xff]  ;;  %516 = vst [vmem:[%s16434_s8 + $0x9c0] sm:$0xff] %v515_v28 }
  0xb3   : >> { %v519_v30 = vld [vmem:[%s16438_s9 + $0x2780] sm:$0xff]  ;;  %518 = vst [vmem:[%s16434_s8 + $0x9d0] sm:$0xff] %v517_v29 }
  0xb4   : >> { %520 = vst [vmem:[%s16434_s8 + $0x9e0] sm:$0xff] %v519_v30  ;;  %v521_v31 = vld [vmem:[%s16438_s9 + $0x27c0] sm:$0xff] }
  0xb5   : >> { %v523_v32 = vld [vmem:[%s16438_s9 + $0x2800] sm:$0xff]  ;;  %522 = vst [vmem:[%s16434_s8 + $0x9f0] sm:$0xff] %v521_v31 }
  0xb6   : >> { %v525_v33 = vld [vmem:[%s16438_s9 + $0x2840] sm:$0xff]  ;;  %524 = vst [vmem:[%s16434_s8 + $0xa00] sm:$0xff] %v523_v32 }
  0xb7   : >> { %526 = vst [vmem:[%s16434_s8 + $0xa10] sm:$0xff] %v525_v33  ;;  %v527_v34 = vld [vmem:[%s16438_s9 + $0x2880] sm:$0xff] }
  0xb8   : >> { %v529_v35 = vld [vmem:[%s16438_s9 + $0x28c0] sm:$0xff]  ;;  %528 = vst [vmem:[%s16434_s8 + $0xa20] sm:$0xff] %v527_v34 }
  0xb9   : >> { %v531_v36 = vld [vmem:[%s16438_s9 + $0x2900] sm:$0xff]  ;;  %530 = vst [vmem:[%s16434_s8 + $0xa30] sm:$0xff] %v529_v35 }
  0xba   : >> { %532 = vst [vmem:[%s16434_s8 + $0xa40] sm:$0xff] %v531_v36  ;;  %v533_v37 = vld [vmem:[%s16438_s9 + $0x2940] sm:$0xff] }
  0xbb   : >> { %v535_v38 = vld [vmem:[%s16438_s9 + $0x2980] sm:$0xff]  ;;  %534 = vst [vmem:[%s16434_s8 + $0xa50] sm:$0xff] %v533_v37 }
  0xbc   : >> { %v537_v39 = vld [vmem:[%s16438_s9 + $0x29c0] sm:$0xff]  ;;  %536 = vst [vmem:[%s16434_s8 + $0xa60] sm:$0xff] %v535_v38 }
  0xbd   : >> { %538 = vst [vmem:[%s16434_s8 + $0xa70] sm:$0xff] %v537_v39  ;;  %v539_v40 = vld [vmem:[%s16438_s9 + $0x2a00] sm:$0xff] }
  0xbe   : >> { %v541_v41 = vld [vmem:[%s16438_s9 + $0x2a40] sm:$0xff]  ;;  %540 = vst [vmem:[%s16434_s8 + $0xa80] sm:$0xff] %v539_v40 }
  0xbf   : >> { %v543_v42 = vld [vmem:[%s16438_s9 + $0x2a80] sm:$0xff]  ;;  %542 = vst [vmem:[%s16434_s8 + $0xa90] sm:$0xff] %v541_v41 }
  0xc0   : >> { %544 = vst [vmem:[%s16434_s8 + $0xaa0] sm:$0xff] %v543_v42  ;;  %v545_v43 = vld [vmem:[%s16438_s9 + $0x2ac0] sm:$0xff] }
  0xc1   : >> { %v547_v44 = vld [vmem:[%s16438_s9 + $0x2b00] sm:$0xff]  ;;  %546 = vst [vmem:[%s16434_s8 + $0xab0] sm:$0xff] %v545_v43 }
  0xc2   : >> { %v549_v45 = vld [vmem:[%s16438_s9 + $0x2b40] sm:$0xff]  ;;  %548 = vst [vmem:[%s16434_s8 + $0xac0] sm:$0xff] %v547_v44 }
  0xc3   : >> { %550 = vst [vmem:[%s16434_s8 + $0xad0] sm:$0xff] %v549_v45  ;;  %v551_v46 = vld [vmem:[%s16438_s9 + $0x2b80] sm:$0xff] }
  0xc4   : >> { %v553_v47 = vld [vmem:[%s16438_s9 + $0x2bc0] sm:$0xff]  ;;  %552 = vst [vmem:[%s16434_s8 + $0xae0] sm:$0xff] %v551_v46 }
  0xc5   : >> { %v555_v48 = vld [vmem:[%s16438_s9 + $0x2c00] sm:$0xff]  ;;  %554 = vst [vmem:[%s16434_s8 + $0xaf0] sm:$0xff] %v553_v47 }
  0xc6   : >> { %556 = vst [vmem:[%s16434_s8 + $0xb00] sm:$0xff] %v555_v48  ;;  %v557_v49 = vld [vmem:[%s16438_s9 + $0x2c40] sm:$0xff] }
  0xc7   : >> { %v559_v50 = vld [vmem:[%s16438_s9 + $0x2c80] sm:$0xff]  ;;  %558 = vst [vmem:[%s16434_s8 + $0xb10] sm:$0xff] %v557_v49 }
  0xc8   : >> { %v561_v51 = vld [vmem:[%s16438_s9 + $0x2cc0] sm:$0xff]  ;;  %560 = vst [vmem:[%s16434_s8 + $0xb20] sm:$0xff] %v559_v50 }
  0xc9   : >> { %562 = vst [vmem:[%s16434_s8 + $0xb30] sm:$0xff] %v561_v51  ;;  %v563_v52 = vld [vmem:[%s16438_s9 + $0x2d00] sm:$0xff] }
  0xca   : >> { %v565_v53 = vld [vmem:[%s16438_s9 + $0x2d40] sm:$0xff]  ;;  %564 = vst [vmem:[%s16434_s8 + $0xb40] sm:$0xff] %v563_v52 }
  0xcb   : >> { %v567_v54 = vld [vmem:[%s16438_s9 + $0x2d80] sm:$0xff]  ;;  %566 = vst [vmem:[%s16434_s8 + $0xb50] sm:$0xff] %v565_v53 }
  0xcc   : >> { %568 = vst [vmem:[%s16434_s8 + $0xb60] sm:$0xff] %v567_v54  ;;  %v569_v55 = vld [vmem:[%s16438_s9 + $0x2dc0] sm:$0xff] }
  0xcd   : >> { %v571_v56 = vld [vmem:[%s16438_s9 + $0x2e00] sm:$0xff]  ;;  %570 = vst [vmem:[%s16434_s8 + $0xb70] sm:$0xff] %v569_v55 }
  0xce   : >> { %v573_v57 = vld [vmem:[%s16438_s9 + $0x2e40] sm:$0xff]  ;;  %572 = vst [vmem:[%s16434_s8 + $0xb80] sm:$0xff] %v571_v56 }
  0xcf   : >> { %574 = vst [vmem:[%s16434_s8 + $0xb90] sm:$0xff] %v573_v57  ;;  %v575_v58 = vld [vmem:[%s16438_s9 + $0x2e80] sm:$0xff] }
  0xd0   : >> { %v577_v59 = vld [vmem:[%s16438_s9 + $0x2ec0] sm:$0xff]  ;;  %576 = vst [vmem:[%s16434_s8 + $0xba0] sm:$0xff] %v575_v58 }
  0xd1   : >> { %v579_v60 = vld [vmem:[%s16438_s9 + $0x2f00] sm:$0xff]  ;;  %578 = vst [vmem:[%s16434_s8 + $0xbb0] sm:$0xff] %v577_v59 }
  0xd2   : >> { %580 = vst [vmem:[%s16434_s8 + $0xbc0] sm:$0xff] %v579_v60  ;;  %v581_v61 = vld [vmem:[%s16438_s9 + $0x2f40] sm:$0xff] }
  0xd3   : >> { %v583_v62 = vld [vmem:[%s16438_s9 + $0x2f80] sm:$0xff]  ;;  %582 = vst [vmem:[%s16434_s8 + $0xbd0] sm:$0xff] %v581_v61 }
  0xd4   : >> { %v585_v63 = vld [vmem:[%s16438_s9 + $0x2fc0] sm:$0xff]  ;;  %584 = vst [vmem:[%s16434_s8 + $0xbe0] sm:$0xff] %v583_v62 }
  0xd5   : >> { %586 = vst [vmem:[%s16434_s8 + $0xbf0] sm:$0xff] %v585_v63  ;;  %v587_v0 = vld [vmem:[%s16438_s9 + $0x3000] sm:$0xff] }
  0xd6   : >> { %v589_v1 = vld [vmem:[%s16438_s9 + $0x3040] sm:$0xff]  ;;  %588 = vst [vmem:[%s16434_s8 + $0xc00] sm:$0xff] %v587_v0 }
  0xd7   : >> { %v591_v2 = vld [vmem:[%s16438_s9 + $0x3080] sm:$0xff]  ;;  %590 = vst [vmem:[%s16434_s8 + $0xc10] sm:$0xff] %v589_v1 }
  0xd8   : >> { %592 = vst [vmem:[%s16434_s8 + $0xc20] sm:$0xff] %v591_v2  ;;  %v593_v3 = vld [vmem:[%s16438_s9 + $0x30c0] sm:$0xff] }
  0xd9   : >> { %v595_v4 = vld [vmem:[%s16438_s9 + $0x3100] sm:$0xff]  ;;  %594 = vst [vmem:[%s16434_s8 + $0xc30] sm:$0xff] %v593_v3 }
  0xda   : >> { %v597_v5 = vld [vmem:[%s16438_s9 + $0x3140] sm:$0xff]  ;;  %596 = vst [vmem:[%s16434_s8 + $0xc40] sm:$0xff] %v595_v4 }
  0xdb   : >> { %598 = vst [vmem:[%s16434_s8 + $0xc50] sm:$0xff] %v597_v5  ;;  %v599_v6 = vld [vmem:[%s16438_s9 + $0x3180] sm:$0xff] }
  0xdc   : >> { %v601_v7 = vld [vmem:[%s16438_s9 + $0x31c0] sm:$0xff]  ;;  %600 = vst [vmem:[%s16434_s8 + $0xc60] sm:$0xff] %v599_v6 }
  0xdd   : >> { %v603_v8 = vld [vmem:[%s16438_s9 + $0x3200] sm:$0xff]  ;;  %602 = vst [vmem:[%s16434_s8 + $0xc70] sm:$0xff] %v601_v7 }
  0xde   : >> { %604 = vst [vmem:[%s16434_s8 + $0xc80] sm:$0xff] %v603_v8  ;;  %v605_v9 = vld [vmem:[%s16438_s9 + $0x3240] sm:$0xff] }
  0xdf   : >> { %v607_v10 = vld [vmem:[%s16438_s9 + $0x3280] sm:$0xff]  ;;  %606 = vst [vmem:[%s16434_s8 + $0xc90] sm:$0xff] %v605_v9 }
  0xe0   : >> { %v609_v11 = vld [vmem:[%s16438_s9 + $0x32c0] sm:$0xff]  ;;  %608 = vst [vmem:[%s16434_s8 + $0xca0] sm:$0xff] %v607_v10 }
  0xe1   : >> { %610 = vst [vmem:[%s16434_s8 + $0xcb0] sm:$0xff] %v609_v11  ;;  %v611_v12 = vld [vmem:[%s16438_s9 + $0x3300] sm:$0xff] }
  0xe2   : >> { %v613_v13 = vld [vmem:[%s16438_s9 + $0x3340] sm:$0xff]  ;;  %612 = vst [vmem:[%s16434_s8 + $0xcc0] sm:$0xff] %v611_v12 }
  0xe3   : >> { %v615_v14 = vld [vmem:[%s16438_s9 + $0x3380] sm:$0xff]  ;;  %614 = vst [vmem:[%s16434_s8 + $0xcd0] sm:$0xff] %v613_v13 }
  0xe4   : >> { %616 = vst [vmem:[%s16434_s8 + $0xce0] sm:$0xff] %v615_v14  ;;  %v617_v15 = vld [vmem:[%s16438_s9 + $0x33c0] sm:$0xff] }
  0xe5   : >> { %v619_v16 = vld [vmem:[%s16438_s9 + $0x3400] sm:$0xff]  ;;  %618 = vst [vmem:[%s16434_s8 + $0xcf0] sm:$0xff] %v617_v15 }
  0xe6   : >> { %v621_v17 = vld [vmem:[%s16438_s9 + $0x3440] sm:$0xff]  ;;  %620 = vst [vmem:[%s16434_s8 + $0xd00] sm:$0xff] %v619_v16 }
  0xe7   : >> { %622 = vst [vmem:[%s16434_s8 + $0xd10] sm:$0xff] %v621_v17  ;;  %v623_v18 = vld [vmem:[%s16438_s9 + $0x3480] sm:$0xff] }
  0xe8   : >> { %v625_v19 = vld [vmem:[%s16438_s9 + $0x34c0] sm:$0xff]  ;;  %624 = vst [vmem:[%s16434_s8 + $0xd20] sm:$0xff] %v623_v18 }
  0xe9   : >> { %v627_v20 = vld [vmem:[%s16438_s9 + $0x3500] sm:$0xff]  ;;  %626 = vst [vmem:[%s16434_s8 + $0xd30] sm:$0xff] %v625_v19 }
  0xea   : >> { %628 = vst [vmem:[%s16434_s8 + $0xd40] sm:$0xff] %v627_v20  ;;  %v629_v21 = vld [vmem:[%s16438_s9 + $0x3540] sm:$0xff] }
  0xeb   : >> { %v631_v22 = vld [vmem:[%s16438_s9 + $0x3580] sm:$0xff]  ;;  %630 = vst [vmem:[%s16434_s8 + $0xd50] sm:$0xff] %v629_v21 }
  0xec   : >> { %v633_v23 = vld [vmem:[%s16438_s9 + $0x35c0] sm:$0xff]  ;;  %632 = vst [vmem:[%s16434_s8 + $0xd60] sm:$0xff] %v631_v22 }
  0xed   : >> { %634 = vst [vmem:[%s16434_s8 + $0xd70] sm:$0xff] %v633_v23  ;;  %v635_v24 = vld [vmem:[%s16438_s9 + $0x3600] sm:$0xff] }
  0xee   : >> { %v637_v25 = vld [vmem:[%s16438_s9 + $0x3640] sm:$0xff]  ;;  %636 = vst [vmem:[%s16434_s8 + $0xd80] sm:$0xff] %v635_v24 }
  0xef   : >> { %v639_v26 = vld [vmem:[%s16438_s9 + $0x3680] sm:$0xff]  ;;  %638 = vst [vmem:[%s16434_s8 + $0xd90] sm:$0xff] %v637_v25 }
  0xf0   : >> { %640 = vst [vmem:[%s16434_s8 + $0xda0] sm:$0xff] %v639_v26  ;;  %v641_v27 = vld [vmem:[%s16438_s9 + $0x36c0] sm:$0xff] }
  0xf1   : >> { %v643_v28 = vld [vmem:[%s16438_s9 + $0x3700] sm:$0xff]  ;;  %642 = vst [vmem:[%s16434_s8 + $0xdb0] sm:$0xff] %v641_v27 }
  0xf2   : >> { %v645_v29 = vld [vmem:[%s16438_s9 + $0x3740] sm:$0xff]  ;;  %644 = vst [vmem:[%s16434_s8 + $0xdc0] sm:$0xff] %v643_v28 }
  0xf3   : >> { %646 = vst [vmem:[%s16434_s8 + $0xdd0] sm:$0xff] %v645_v29  ;;  %v647_v30 = vld [vmem:[%s16438_s9 + $0x3780] sm:$0xff] }
  0xf4   : >> { %v649_v31 = vld [vmem:[%s16438_s9 + $0x37c0] sm:$0xff]  ;;  %648 = vst [vmem:[%s16434_s8 + $0xde0] sm:$0xff] %v647_v30 }
  0xf5   : >> { %v651_v32 = vld [vmem:[%s16438_s9 + $0x3800] sm:$0xff]  ;;  %650 = vst [vmem:[%s16434_s8 + $0xdf0] sm:$0xff] %v649_v31 }
  0xf6   : >> { %652 = vst [vmem:[%s16434_s8 + $0xe00] sm:$0xff] %v651_v32  ;;  %v653_v33 = vld [vmem:[%s16438_s9 + $0x3840] sm:$0xff] }
  0xf7   : >> { %v655_v34 = vld [vmem:[%s16438_s9 + $0x3880] sm:$0xff]  ;;  %654 = vst [vmem:[%s16434_s8 + $0xe10] sm:$0xff] %v653_v33 }
  0xf8   : >> { %v657_v35 = vld [vmem:[%s16438_s9 + $0x38c0] sm:$0xff]  ;;  %656 = vst [vmem:[%s16434_s8 + $0xe20] sm:$0xff] %v655_v34 }
  0xf9   : >> { %658 = vst [vmem:[%s16434_s8 + $0xe30] sm:$0xff] %v657_v35  ;;  %v659_v36 = vld [vmem:[%s16438_s9 + $0x3900] sm:$0xff] }
  0xfa   : >> { %v661_v37 = vld [vmem:[%s16438_s9 + $0x3940] sm:$0xff]  ;;  %660 = vst [vmem:[%s16434_s8 + $0xe40] sm:$0xff] %v659_v36 }
  0xfb   : >> { %v663_v38 = vld [vmem:[%s16438_s9 + $0x3980] sm:$0xff]  ;;  %662 = vst [vmem:[%s16434_s8 + $0xe50] sm:$0xff] %v661_v37 }
  0xfc   : >> { %664 = vst [vmem:[%s16434_s8 + $0xe60] sm:$0xff] %v663_v38  ;;  %v665_v39 = vld [vmem:[%s16438_s9 + $0x39c0] sm:$0xff] }
  0xfd   : >> { %v667_v40 = vld [vmem:[%s16438_s9 + $0x3a00] sm:$0xff]  ;;  %666 = vst [vmem:[%s16434_s8 + $0xe70] sm:$0xff] %v665_v39 }
  0xfe   : >> { %v669_v41 = vld [vmem:[%s16438_s9 + $0x3a40] sm:$0xff]  ;;  %668 = vst [vmem:[%s16434_s8 + $0xe80] sm:$0xff] %v667_v40 }
  0xff   : >> { %670 = vst [vmem:[%s16434_s8 + $0xe90] sm:$0xff] %v669_v41  ;;  %v671_v42 = vld [vmem:[%s16438_s9 + $0x3a80] sm:$0xff] }
 0x100   : >> { %v673_v43 = vld [vmem:[%s16438_s9 + $0x3ac0] sm:$0xff]  ;;  %672 = vst [vmem:[%s16434_s8 + $0xea0] sm:$0xff] %v671_v42 }
 0x101   : >> { %v675_v44 = vld [vmem:[%s16438_s9 + $0x3b00] sm:$0xff]  ;;  %674 = vst [vmem:[%s16434_s8 + $0xeb0] sm:$0xff] %v673_v43 }
 0x102   : >> { %676 = vst [vmem:[%s16434_s8 + $0xec0] sm:$0xff] %v675_v44  ;;  %v677_v45 = vld [vmem:[%s16438_s9 + $0x3b40] sm:$0xff] }
 0x103   : >> { %v679_v46 = vld [vmem:[%s16438_s9 + $0x3b80] sm:$0xff]  ;;  %678 = vst [vmem:[%s16434_s8 + $0xed0] sm:$0xff] %v677_v45 }
 0x104   : >> { %v681_v47 = vld [vmem:[%s16438_s9 + $0x3bc0] sm:$0xff]  ;;  %680 = vst [vmem:[%s16434_s8 + $0xee0] sm:$0xff] %v679_v46 }
 0x105   : >> { %682 = vst [vmem:[%s16434_s8 + $0xef0] sm:$0xff] %v681_v47  ;;  %v683_v48 = vld [vmem:[%s16438_s9 + $0x3c00] sm:$0xff] }
 0x106   : >> { %v685_v49 = vld [vmem:[%s16438_s9 + $0x3c40] sm:$0xff]  ;;  %684 = vst [vmem:[%s16434_s8 + $0xf00] sm:$0xff] %v683_v48 }
 0x107   : >> { %v687_v50 = vld [vmem:[%s16438_s9 + $0x3c80] sm:$0xff]  ;;  %686 = vst [vmem:[%s16434_s8 + $0xf10] sm:$0xff] %v685_v49 }
 0x108   : >> { %688 = vst [vmem:[%s16434_s8 + $0xf20] sm:$0xff] %v687_v50  ;;  %v689_v51 = vld [vmem:[%s16438_s9 + $0x3cc0] sm:$0xff] }
 0x109   : >> { %v691_v52 = vld [vmem:[%s16438_s9 + $0x3d00] sm:$0xff]  ;;  %690 = vst [vmem:[%s16434_s8 + $0xf30] sm:$0xff] %v689_v51 }
 0x10a   : >> { %v693_v53 = vld [vmem:[%s16438_s9 + $0x3d40] sm:$0xff]  ;;  %692 = vst [vmem:[%s16434_s8 + $0xf40] sm:$0xff] %v691_v52 }
 0x10b   : >> { %694 = vst [vmem:[%s16434_s8 + $0xf50] sm:$0xff] %v693_v53  ;;  %v695_v54 = vld [vmem:[%s16438_s9 + $0x3d80] sm:$0xff] }
 0x10c   : >> { %v697_v55 = vld [vmem:[%s16438_s9 + $0x3dc0] sm:$0xff]  ;;  %696 = vst [vmem:[%s16434_s8 + $0xf60] sm:$0xff] %v695_v54 }
 0x10d   : >> { %v699_v56 = vld [vmem:[%s16438_s9 + $0x3e00] sm:$0xff]  ;;  %698 = vst [vmem:[%s16434_s8 + $0xf70] sm:$0xff] %v697_v55 }
 0x10e   : >> { %700 = vst [vmem:[%s16434_s8 + $0xf80] sm:$0xff] %v699_v56  ;;  %v701_v57 = vld [vmem:[%s16438_s9 + $0x3e40] sm:$0xff] }
 0x10f   : >> { %v703_v58 = vld [vmem:[%s16438_s9 + $0x3e80] sm:$0xff]  ;;  %702 = vst [vmem:[%s16434_s8 + $0xf90] sm:$0xff] %v701_v57 }
 0x110   : >> { %v705_v59 = vld [vmem:[%s16438_s9 + $0x3ec0] sm:$0xff]  ;;  %704 = vst [vmem:[%s16434_s8 + $0xfa0] sm:$0xff] %v703_v58 }
 0x111   : >> { %706 = vst [vmem:[%s16434_s8 + $0xfb0] sm:$0xff] %v705_v59  ;;  %v707_v60 = vld [vmem:[%s16438_s9 + $0x3f00] sm:$0xff] }
 0x112   : >> { %v709_v61 = vld [vmem:[%s16438_s9 + $0x3f40] sm:$0xff]  ;;  %708 = vst [vmem:[%s16434_s8 + $0xfc0] sm:$0xff] %v707_v60 }
 0x113   : >> { %v711_v62 = vld [vmem:[%s16438_s9 + $0x3f80] sm:$0xff]  ;;  %710 = vst [vmem:[%s16434_s8 + $0xfd0] sm:$0xff] %v709_v61 }
 0x114   : >> { %712 = vst [vmem:[%s16434_s8 + $0xfe0] sm:$0xff] %v711_v62  ;;  %v713_v63 = vld [vmem:[%s16438_s9 + $0x3fc0] sm:$0xff] }
 0x115   : >> { %v715_v0 = vld [vmem:[%s16438_s9 + $0x4000] sm:$0xff]  ;;  %714 = vst [vmem:[%s16434_s8 + $0xff0] sm:$0xff] %v713_v63 }
 0x116   : >> { %v717_v1 = vld [vmem:[%s16438_s9 + $0x4040] sm:$0xff]  ;;  %716 = vst [vmem:[%s16434_s8 + $0x1000] sm:$0xff] %v715_v0 }
 0x117   : >> { %718 = vst [vmem:[%s16434_s8 + $0x1010] sm:$0xff] %v717_v1  ;;  %v719_v2 = vld [vmem:[%s16438_s9 + $0x4080] sm:$0xff] }
 0x118   : >> { %v721_v3 = vld [vmem:[%s16438_s9 + $0x40c0] sm:$0xff]  ;;  %720 = vst [vmem:[%s16434_s8 + $0x1020] sm:$0xff] %v719_v2 }
 0x119   : >> { %v723_v4 = vld [vmem:[%s16438_s9 + $0x4100] sm:$0xff]  ;;  %722 = vst [vmem:[%s16434_s8 + $0x1030] sm:$0xff] %v721_v3 }
 0x11a   : >> { %724 = vst [vmem:[%s16434_s8 + $0x1040] sm:$0xff] %v723_v4  ;;  %v725_v5 = vld [vmem:[%s16438_s9 + $0x4140] sm:$0xff] }
 0x11b   : >> { %v727_v6 = vld [vmem:[%s16438_s9 + $0x4180] sm:$0xff]  ;;  %726 = vst [vmem:[%s16434_s8 + $0x1050] sm:$0xff] %v725_v5 }
 0x11c   : >> { %v729_v7 = vld [vmem:[%s16438_s9 + $0x41c0] sm:$0xff]  ;;  %728 = vst [vmem:[%s16434_s8 + $0x1060] sm:$0xff] %v727_v6 }
 0x11d   : >> { %730 = vst [vmem:[%s16434_s8 + $0x1070] sm:$0xff] %v729_v7  ;;  %v731_v8 = vld [vmem:[%s16438_s9 + $0x4200] sm:$0xff] }
 0x11e   : >> { %v733_v9 = vld [vmem:[%s16438_s9 + $0x4240] sm:$0xff]  ;;  %732 = vst [vmem:[%s16434_s8 + $0x1080] sm:$0xff] %v731_v8 }
 0x11f   : >> { %v735_v10 = vld [vmem:[%s16438_s9 + $0x4280] sm:$0xff]  ;;  %734 = vst [vmem:[%s16434_s8 + $0x1090] sm:$0xff] %v733_v9 }
 0x120   : >> { %736 = vst [vmem:[%s16434_s8 + $0x10a0] sm:$0xff] %v735_v10  ;;  %v737_v11 = vld [vmem:[%s16438_s9 + $0x42c0] sm:$0xff] }
 0x121   : >> { %v739_v12 = vld [vmem:[%s16438_s9 + $0x4300] sm:$0xff]  ;;  %738 = vst [vmem:[%s16434_s8 + $0x10b0] sm:$0xff] %v737_v11 }
 0x122   : >> { %v741_v13 = vld [vmem:[%s16438_s9 + $0x4340] sm:$0xff]  ;;  %740 = vst [vmem:[%s16434_s8 + $0x10c0] sm:$0xff] %v739_v12 }
 0x123   : >> { %742 = vst [vmem:[%s16434_s8 + $0x10d0] sm:$0xff] %v741_v13  ;;  %v743_v14 = vld [vmem:[%s16438_s9 + $0x4380] sm:$0xff] }
 0x124   : >> { %v745_v15 = vld [vmem:[%s16438_s9 + $0x43c0] sm:$0xff]  ;;  %744 = vst [vmem:[%s16434_s8 + $0x10e0] sm:$0xff] %v743_v14 }
 0x125   : >> { %v747_v16 = vld [vmem:[%s16438_s9 + $0x4400] sm:$0xff]  ;;  %746 = vst [vmem:[%s16434_s8 + $0x10f0] sm:$0xff] %v745_v15 }
 0x126   : >> { %748 = vst [vmem:[%s16434_s8 + $0x1100] sm:$0xff] %v747_v16  ;;  %v749_v17 = vld [vmem:[%s16438_s9 + $0x4440] sm:$0xff] }
 0x127   : >> { %v751_v18 = vld [vmem:[%s16438_s9 + $0x4480] sm:$0xff]  ;;  %750 = vst [vmem:[%s16434_s8 + $0x1110] sm:$0xff] %v749_v17 }
 0x128   : >> { %v753_v19 = vld [vmem:[%s16438_s9 + $0x44c0] sm:$0xff]  ;;  %752 = vst [vmem:[%s16434_s8 + $0x1120] sm:$0xff] %v751_v18 }
 0x129   : >> { %754 = vst [vmem:[%s16434_s8 + $0x1130] sm:$0xff] %v753_v19  ;;  %v755_v20 = vld [vmem:[%s16438_s9 + $0x4500] sm:$0xff] }
 0x12a   : >> { %v757_v21 = vld [vmem:[%s16438_s9 + $0x4540] sm:$0xff]  ;;  %756 = vst [vmem:[%s16434_s8 + $0x1140] sm:$0xff] %v755_v20 }
 0x12b   : >> { %v759_v22 = vld [vmem:[%s16438_s9 + $0x4580] sm:$0xff]  ;;  %758 = vst [vmem:[%s16434_s8 + $0x1150] sm:$0xff] %v757_v21 }
 0x12c   : >> { %760 = vst [vmem:[%s16434_s8 + $0x1160] sm:$0xff] %v759_v22  ;;  %v761_v23 = vld [vmem:[%s16438_s9 + $0x45c0] sm:$0xff] }
 0x12d   : >> { %v763_v24 = vld [vmem:[%s16438_s9 + $0x4600] sm:$0xff]  ;;  %762 = vst [vmem:[%s16434_s8 + $0x1170] sm:$0xff] %v761_v23 }
 0x12e   : >> { %v765_v25 = vld [vmem:[%s16438_s9 + $0x4640] sm:$0xff]  ;;  %764 = vst [vmem:[%s16434_s8 + $0x1180] sm:$0xff] %v763_v24 }
 0x12f   : >> { %766 = vst [vmem:[%s16434_s8 + $0x1190] sm:$0xff] %v765_v25  ;;  %v767_v26 = vld [vmem:[%s16438_s9 + $0x4680] sm:$0xff] }
 0x130   : >> { %v769_v27 = vld [vmem:[%s16438_s9 + $0x46c0] sm:$0xff]  ;;  %768 = vst [vmem:[%s16434_s8 + $0x11a0] sm:$0xff] %v767_v26 }
 0x131   : >> { %v771_v28 = vld [vmem:[%s16438_s9 + $0x4700] sm:$0xff]  ;;  %770 = vst [vmem:[%s16434_s8 + $0x11b0] sm:$0xff] %v769_v27 }
 0x132   : >> { %772 = vst [vmem:[%s16434_s8 + $0x11c0] sm:$0xff] %v771_v28  ;;  %v773_v29 = vld [vmem:[%s16438_s9 + $0x4740] sm:$0xff] }
 0x133   : >> { %v775_v30 = vld [vmem:[%s16438_s9 + $0x4780] sm:$0xff]  ;;  %774 = vst [vmem:[%s16434_s8 + $0x11d0] sm:$0xff] %v773_v29 }
 0x134   : >> { %v777_v31 = vld [vmem:[%s16438_s9 + $0x47c0] sm:$0xff]  ;;  %776 = vst [vmem:[%s16434_s8 + $0x11e0] sm:$0xff] %v775_v30 }
 0x135   : >> { %778 = vst [vmem:[%s16434_s8 + $0x11f0] sm:$0xff] %v777_v31  ;;  %v779_v32 = vld [vmem:[%s16438_s9 + $0x4800] sm:$0xff] }
 0x136   : >> { %v781_v33 = vld [vmem:[%s16438_s9 + $0x4840] sm:$0xff]  ;;  %780 = vst [vmem:[%s16434_s8 + $0x1200] sm:$0xff] %v779_v32 }
 0x137   : >> { %v783_v34 = vld [vmem:[%s16438_s9 + $0x4880] sm:$0xff]  ;;  %782 = vst [vmem:[%s16434_s8 + $0x1210] sm:$0xff] %v781_v33 }
 0x138   : >> { %784 = vst [vmem:[%s16434_s8 + $0x1220] sm:$0xff] %v783_v34  ;;  %v785_v35 = vld [vmem:[%s16438_s9 + $0x48c0] sm:$0xff] }
 0x139   : >> { %v787_v36 = vld [vmem:[%s16438_s9 + $0x4900] sm:$0xff]  ;;  %786 = vst [vmem:[%s16434_s8 + $0x1230] sm:$0xff] %v785_v35 }
 0x13a   : >> { %v789_v37 = vld [vmem:[%s16438_s9 + $0x4940] sm:$0xff]  ;;  %788 = vst [vmem:[%s16434_s8 + $0x1240] sm:$0xff] %v787_v36 }
 0x13b   : >> { %790 = vst [vmem:[%s16434_s8 + $0x1250] sm:$0xff] %v789_v37  ;;  %v791_v38 = vld [vmem:[%s16438_s9 + $0x4980] sm:$0xff] }
 0x13c   : >> { %v793_v39 = vld [vmem:[%s16438_s9 + $0x49c0] sm:$0xff]  ;;  %792 = vst [vmem:[%s16434_s8 + $0x1260] sm:$0xff] %v791_v38 }
 0x13d   : >> { %v795_v40 = vld [vmem:[%s16438_s9 + $0x4a00] sm:$0xff]  ;;  %794 = vst [vmem:[%s16434_s8 + $0x1270] sm:$0xff] %v793_v39 }
 0x13e   : >> { %796 = vst [vmem:[%s16434_s8 + $0x1280] sm:$0xff] %v795_v40  ;;  %v797_v41 = vld [vmem:[%s16438_s9 + $0x4a40] sm:$0xff] }
 0x13f   : >> { %v799_v42 = vld [vmem:[%s16438_s9 + $0x4a80] sm:$0xff]  ;;  %798 = vst [vmem:[%s16434_s8 + $0x1290] sm:$0xff] %v797_v41 }
 0x140   : >> { %v801_v43 = vld [vmem:[%s16438_s9 + $0x4ac0] sm:$0xff]  ;;  %800 = vst [vmem:[%s16434_s8 + $0x12a0] sm:$0xff] %v799_v42 }
 0x141   : >> { %802 = vst [vmem:[%s16434_s8 + $0x12b0] sm:$0xff] %v801_v43  ;;  %v803_v44 = vld [vmem:[%s16438_s9 + $0x4b00] sm:$0xff] }
 0x142   : >> { %v805_v45 = vld [vmem:[%s16438_s9 + $0x4b40] sm:$0xff]  ;;  %804 = vst [vmem:[%s16434_s8 + $0x12c0] sm:$0xff] %v803_v44 }
 0x143   : >> { %v807_v46 = vld [vmem:[%s16438_s9 + $0x4b80] sm:$0xff]  ;;  %806 = vst [vmem:[%s16434_s8 + $0x12d0] sm:$0xff] %v805_v45 }
 0x144   : >> { %808 = vst [vmem:[%s16434_s8 + $0x12e0] sm:$0xff] %v807_v46  ;;  %v809_v47 = vld [vmem:[%s16438_s9 + $0x4bc0] sm:$0xff] }
 0x145   : >> { %v811_v48 = vld [vmem:[%s16438_s9 + $0x4c00] sm:$0xff]  ;;  %810 = vst [vmem:[%s16434_s8 + $0x12f0] sm:$0xff] %v809_v47 }
 0x146   : >> { %v813_v49 = vld [vmem:[%s16438_s9 + $0x4c40] sm:$0xff]  ;;  %812 = vst [vmem:[%s16434_s8 + $0x1300] sm:$0xff] %v811_v48 }
 0x147   : >> { %814 = vst [vmem:[%s16434_s8 + $0x1310] sm:$0xff] %v813_v49  ;;  %v815_v50 = vld [vmem:[%s16438_s9 + $0x4c80] sm:$0xff] }
 0x148   : >> { %v817_v51 = vld [vmem:[%s16438_s9 + $0x4cc0] sm:$0xff]  ;;  %816 = vst [vmem:[%s16434_s8 + $0x1320] sm:$0xff] %v815_v50 }
 0x149   : >> { %v819_v52 = vld [vmem:[%s16438_s9 + $0x4d00] sm:$0xff]  ;;  %818 = vst [vmem:[%s16434_s8 + $0x1330] sm:$0xff] %v817_v51 }
 0x14a   : >> { %820 = vst [vmem:[%s16434_s8 + $0x1340] sm:$0xff] %v819_v52  ;;  %v821_v53 = vld [vmem:[%s16438_s9 + $0x4d40] sm:$0xff] }
 0x14b   : >> { %v823_v54 = vld [vmem:[%s16438_s9 + $0x4d80] sm:$0xff]  ;;  %822 = vst [vmem:[%s16434_s8 + $0x1350] sm:$0xff] %v821_v53 }
 0x14c   : >> { %v825_v55 = vld [vmem:[%s16438_s9 + $0x4dc0] sm:$0xff]  ;;  %824 = vst [vmem:[%s16434_s8 + $0x1360] sm:$0xff] %v823_v54 }
 0x14d   : >> { %826 = vst [vmem:[%s16434_s8 + $0x1370] sm:$0xff] %v825_v55  ;;  %v827_v56 = vld [vmem:[%s16438_s9 + $0x4e00] sm:$0xff] }
 0x14e   : >> { %v829_v57 = vld [vmem:[%s16438_s9 + $0x4e40] sm:$0xff]  ;;  %828 = vst [vmem:[%s16434_s8 + $0x1380] sm:$0xff] %v827_v56 }
 0x14f   : >> { %v831_v58 = vld [vmem:[%s16438_s9 + $0x4e80] sm:$0xff]  ;;  %830 = vst [vmem:[%s16434_s8 + $0x1390] sm:$0xff] %v829_v57 }
 0x150   : >> { %832 = vst [vmem:[%s16434_s8 + $0x13a0] sm:$0xff] %v831_v58  ;;  %v833_v59 = vld [vmem:[%s16438_s9 + $0x4ec0] sm:$0xff] }
 0x151   : >> { %v835_v60 = vld [vmem:[%s16438_s9 + $0x4f00] sm:$0xff]  ;;  %834 = vst [vmem:[%s16434_s8 + $0x13b0] sm:$0xff] %v833_v59 }
 0x152   : >> { %v837_v61 = vld [vmem:[%s16438_s9 + $0x4f40] sm:$0xff]  ;;  %836 = vst [vmem:[%s16434_s8 + $0x13c0] sm:$0xff] %v835_v60 }
 0x153   : >> { %838 = vst [vmem:[%s16434_s8 + $0x13d0] sm:$0xff] %v837_v61  ;;  %v839_v62 = vld [vmem:[%s16438_s9 + $0x4f80] sm:$0xff] }
 0x154   : >> { %v841_v63 = vld [vmem:[%s16438_s9 + $0x4fc0] sm:$0xff]  ;;  %840 = vst [vmem:[%s16434_s8 + $0x13e0] sm:$0xff] %v839_v62 }
 0x155   : >> { %v843_v0 = vld [vmem:[%s16438_s9 + $0x5000] sm:$0xff]  ;;  %842 = vst [vmem:[%s16434_s8 + $0x13f0] sm:$0xff] %v841_v63 }
 0x156   : >> { %844 = vst [vmem:[%s16434_s8 + $0x1400] sm:$0xff] %v843_v0  ;;  %v845_v1 = vld [vmem:[%s16438_s9 + $0x5040] sm:$0xff] }
 0x157   : >> { %v847_v2 = vld [vmem:[%s16438_s9 + $0x5080] sm:$0xff]  ;;  %846 = vst [vmem:[%s16434_s8 + $0x1410] sm:$0xff] %v845_v1 }
 0x158   : >> { %v849_v3 = vld [vmem:[%s16438_s9 + $0x50c0] sm:$0xff]  ;;  %848 = vst [vmem:[%s16434_s8 + $0x1420] sm:$0xff] %v847_v2 }
 0x159   : >> { %850 = vst [vmem:[%s16434_s8 + $0x1430] sm:$0xff] %v849_v3  ;;  %v851_v4 = vld [vmem:[%s16438_s9 + $0x5100] sm:$0xff] }
 0x15a   : >> { %v853_v5 = vld [vmem:[%s16438_s9 + $0x5140] sm:$0xff]  ;;  %852 = vst [vmem:[%s16434_s8 + $0x1440] sm:$0xff] %v851_v4 }
 0x15b   : >> { %v855_v6 = vld [vmem:[%s16438_s9 + $0x5180] sm:$0xff]  ;;  %854 = vst [vmem:[%s16434_s8 + $0x1450] sm:$0xff] %v853_v5 }
 0x15c   : >> { %856 = vst [vmem:[%s16434_s8 + $0x1460] sm:$0xff] %v855_v6  ;;  %v857_v7 = vld [vmem:[%s16438_s9 + $0x51c0] sm:$0xff] }
 0x15d   : >> { %v859_v8 = vld [vmem:[%s16438_s9 + $0x5200] sm:$0xff]  ;;  %858 = vst [vmem:[%s16434_s8 + $0x1470] sm:$0xff] %v857_v7 }
 0x15e   : >> { %v861_v9 = vld [vmem:[%s16438_s9 + $0x5240] sm:$0xff]  ;;  %860 = vst [vmem:[%s16434_s8 + $0x1480] sm:$0xff] %v859_v8 }
 0x15f   : >> { %862 = vst [vmem:[%s16434_s8 + $0x1490] sm:$0xff] %v861_v9  ;;  %v863_v10 = vld [vmem:[%s16438_s9 + $0x5280] sm:$0xff] }
 0x160   : >> { %v865_v11 = vld [vmem:[%s16438_s9 + $0x52c0] sm:$0xff]  ;;  %864 = vst [vmem:[%s16434_s8 + $0x14a0] sm:$0xff] %v863_v10 }
 0x161   : >> { %v867_v12 = vld [vmem:[%s16438_s9 + $0x5300] sm:$0xff]  ;;  %866 = vst [vmem:[%s16434_s8 + $0x14b0] sm:$0xff] %v865_v11 }
 0x162   : >> { %868 = vst [vmem:[%s16434_s8 + $0x14c0] sm:$0xff] %v867_v12  ;;  %v869_v13 = vld [vmem:[%s16438_s9 + $0x5340] sm:$0xff] }
 0x163   : >> { %v871_v14 = vld [vmem:[%s16438_s9 + $0x5380] sm:$0xff]  ;;  %870 = vst [vmem:[%s16434_s8 + $0x14d0] sm:$0xff] %v869_v13 }
 0x164   : >> { %v873_v15 = vld [vmem:[%s16438_s9 + $0x53c0] sm:$0xff]  ;;  %872 = vst [vmem:[%s16434_s8 + $0x14e0] sm:$0xff] %v871_v14 }
 0x165   : >> { %874 = vst [vmem:[%s16434_s8 + $0x14f0] sm:$0xff] %v873_v15  ;;  %v875_v16 = vld [vmem:[%s16438_s9 + $0x5400] sm:$0xff] }
 0x166   : >> { %v877_v17 = vld [vmem:[%s16438_s9 + $0x5440] sm:$0xff]  ;;  %876 = vst [vmem:[%s16434_s8 + $0x1500] sm:$0xff] %v875_v16 }
 0x167   : >> { %v879_v18 = vld [vmem:[%s16438_s9 + $0x5480] sm:$0xff]  ;;  %878 = vst [vmem:[%s16434_s8 + $0x1510] sm:$0xff] %v877_v17 }
 0x168   : >> { %880 = vst [vmem:[%s16434_s8 + $0x1520] sm:$0xff] %v879_v18  ;;  %v881_v19 = vld [vmem:[%s16438_s9 + $0x54c0] sm:$0xff] }
 0x169   : >> { %v883_v20 = vld [vmem:[%s16438_s9 + $0x5500] sm:$0xff]  ;;  %882 = vst [vmem:[%s16434_s8 + $0x1530] sm:$0xff] %v881_v19 }
 0x16a   : >> { %v885_v21 = vld [vmem:[%s16438_s9 + $0x5540] sm:$0xff]  ;;  %884 = vst [vmem:[%s16434_s8 + $0x1540] sm:$0xff] %v883_v20 }
 0x16b   : >> { %886 = vst [vmem:[%s16434_s8 + $0x1550] sm:$0xff] %v885_v21  ;;  %v887_v22 = vld [vmem:[%s16438_s9 + $0x5580] sm:$0xff] }
 0x16c   : >> { %v889_v23 = vld [vmem:[%s16438_s9 + $0x55c0] sm:$0xff]  ;;  %888 = vst [vmem:[%s16434_s8 + $0x1560] sm:$0xff] %v887_v22 }
 0x16d   : >> { %v891_v24 = vld [vmem:[%s16438_s9 + $0x5600] sm:$0xff]  ;;  %890 = vst [vmem:[%s16434_s8 + $0x1570] sm:$0xff] %v889_v23 }
 0x16e   : >> { %892 = vst [vmem:[%s16434_s8 + $0x1580] sm:$0xff] %v891_v24  ;;  %v893_v25 = vld [vmem:[%s16438_s9 + $0x5640] sm:$0xff] }
 0x16f   : >> { %v895_v26 = vld [vmem:[%s16438_s9 + $0x5680] sm:$0xff]  ;;  %894 = vst [vmem:[%s16434_s8 + $0x1590] sm:$0xff] %v893_v25 }
 0x170   : >> { %v897_v27 = vld [vmem:[%s16438_s9 + $0x56c0] sm:$0xff]  ;;  %896 = vst [vmem:[%s16434_s8 + $0x15a0] sm:$0xff] %v895_v26 }
 0x171   : >> { %898 = vst [vmem:[%s16434_s8 + $0x15b0] sm:$0xff] %v897_v27  ;;  %v899_v28 = vld [vmem:[%s16438_s9 + $0x5700] sm:$0xff] }
 0x172   : >> { %v901_v29 = vld [vmem:[%s16438_s9 + $0x5740] sm:$0xff]  ;;  %900 = vst [vmem:[%s16434_s8 + $0x15c0] sm:$0xff] %v899_v28 }
 0x173   : >> { %v903_v30 = vld [vmem:[%s16438_s9 + $0x5780] sm:$0xff]  ;;  %902 = vst [vmem:[%s16434_s8 + $0x15d0] sm:$0xff] %v901_v29 }
 0x174   : >> { %904 = vst [vmem:[%s16434_s8 + $0x15e0] sm:$0xff] %v903_v30  ;;  %v905_v31 = vld [vmem:[%s16438_s9 + $0x57c0] sm:$0xff] }
 0x175   : >> { %v907_v32 = vld [vmem:[%s16438_s9 + $0x5800] sm:$0xff]  ;;  %906 = vst [vmem:[%s16434_s8 + $0x15f0] sm:$0xff] %v905_v31 }
 0x176   : >> { %v909_v33 = vld [vmem:[%s16438_s9 + $0x5840] sm:$0xff]  ;;  %908 = vst [vmem:[%s16434_s8 + $0x1600] sm:$0xff] %v907_v32 }
 0x177   : >> { %910 = vst [vmem:[%s16434_s8 + $0x1610] sm:$0xff] %v909_v33  ;;  %v911_v34 = vld [vmem:[%s16438_s9 + $0x5880] sm:$0xff] }
 0x178   : >> { %v913_v35 = vld [vmem:[%s16438_s9 + $0x58c0] sm:$0xff]  ;;  %912 = vst [vmem:[%s16434_s8 + $0x1620] sm:$0xff] %v911_v34 }
 0x179   : >> { %v915_v36 = vld [vmem:[%s16438_s9 + $0x5900] sm:$0xff]  ;;  %914 = vst [vmem:[%s16434_s8 + $0x1630] sm:$0xff] %v913_v35 }
 0x17a   : >> { %916 = vst [vmem:[%s16434_s8 + $0x1640] sm:$0xff] %v915_v36  ;;  %v917_v37 = vld [vmem:[%s16438_s9 + $0x5940] sm:$0xff] }
 0x17b   : >> { %v919_v38 = vld [vmem:[%s16438_s9 + $0x5980] sm:$0xff]  ;;  %918 = vst [vmem:[%s16434_s8 + $0x1650] sm:$0xff] %v917_v37 }
 0x17c   : >> { %v921_v39 = vld [vmem:[%s16438_s9 + $0x59c0] sm:$0xff]  ;;  %920 = vst [vmem:[%s16434_s8 + $0x1660] sm:$0xff] %v919_v38 }
 0x17d   : >> { %922 = vst [vmem:[%s16434_s8 + $0x1670] sm:$0xff] %v921_v39  ;;  %v923_v40 = vld [vmem:[%s16438_s9 + $0x5a00] sm:$0xff] }
 0x17e   : >> { %v925_v41 = vld [vmem:[%s16438_s9 + $0x5a40] sm:$0xff]  ;;  %924 = vst [vmem:[%s16434_s8 + $0x1680] sm:$0xff] %v923_v40 }
 0x17f   : >> { %v927_v42 = vld [vmem:[%s16438_s9 + $0x5a80] sm:$0xff]  ;;  %926 = vst [vmem:[%s16434_s8 + $0x1690] sm:$0xff] %v925_v41 }
 0x180   : >> { %928 = vst [vmem:[%s16434_s8 + $0x16a0] sm:$0xff] %v927_v42  ;;  %v929_v43 = vld [vmem:[%s16438_s9 + $0x5ac0] sm:$0xff] }
 0x181   : >> { %v931_v44 = vld [vmem:[%s16438_s9 + $0x5b00] sm:$0xff]  ;;  %930 = vst [vmem:[%s16434_s8 + $0x16b0] sm:$0xff] %v929_v43 }
 0x182   : >> { %v933_v45 = vld [vmem:[%s16438_s9 + $0x5b40] sm:$0xff]  ;;  %932 = vst [vmem:[%s16434_s8 + $0x16c0] sm:$0xff] %v931_v44 }
 0x183   : >> { %934 = vst [vmem:[%s16434_s8 + $0x16d0] sm:$0xff] %v933_v45  ;;  %v935_v46 = vld [vmem:[%s16438_s9 + $0x5b80] sm:$0xff] }
 0x184   : >> { %v937_v47 = vld [vmem:[%s16438_s9 + $0x5bc0] sm:$0xff]  ;;  %936 = vst [vmem:[%s16434_s8 + $0x16e0] sm:$0xff] %v935_v46 }
 0x185   : >> { %v939_v48 = vld [vmem:[%s16438_s9 + $0x5c00] sm:$0xff]  ;;  %938 = vst [vmem:[%s16434_s8 + $0x16f0] sm:$0xff] %v937_v47 }
 0x186   : >> { %940 = vst [vmem:[%s16434_s8 + $0x1700] sm:$0xff] %v939_v48  ;;  %v941_v49 = vld [vmem:[%s16438_s9 + $0x5c40] sm:$0xff] }
 0x187   : >> { %v943_v50 = vld [vmem:[%s16438_s9 + $0x5c80] sm:$0xff]  ;;  %942 = vst [vmem:[%s16434_s8 + $0x1710] sm:$0xff] %v941_v49 }
 0x188   : >> { %v945_v51 = vld [vmem:[%s16438_s9 + $0x5cc0] sm:$0xff]  ;;  %944 = vst [vmem:[%s16434_s8 + $0x1720] sm:$0xff] %v943_v50 }
 0x189   : >> { %946 = vst [vmem:[%s16434_s8 + $0x1730] sm:$0xff] %v945_v51  ;;  %v947_v52 = vld [vmem:[%s16438_s9 + $0x5d00] sm:$0xff] }
 0x18a   : >> { %v949_v53 = vld [vmem:[%s16438_s9 + $0x5d40] sm:$0xff]  ;;  %948 = vst [vmem:[%s16434_s8 + $0x1740] sm:$0xff] %v947_v52 }
 0x18b   : >> { %v951_v54 = vld [vmem:[%s16438_s9 + $0x5d80] sm:$0xff]  ;;  %950 = vst [vmem:[%s16434_s8 + $0x1750] sm:$0xff] %v949_v53 }
 0x18c   : >> { %952 = vst [vmem:[%s16434_s8 + $0x1760] sm:$0xff] %v951_v54  ;;  %v953_v55 = vld [vmem:[%s16438_s9 + $0x5dc0] sm:$0xff] }
 0x18d   : >> { %v955_v56 = vld [vmem:[%s16438_s9 + $0x5e00] sm:$0xff]  ;;  %954 = vst [vmem:[%s16434_s8 + $0x1770] sm:$0xff] %v953_v55 }
 0x18e   : >> { %v957_v57 = vld [vmem:[%s16438_s9 + $0x5e40] sm:$0xff]  ;;  %956 = vst [vmem:[%s16434_s8 + $0x1780] sm:$0xff] %v955_v56 }
 0x18f   : >> { %958 = vst [vmem:[%s16434_s8 + $0x1790] sm:$0xff] %v957_v57  ;;  %v959_v58 = vld [vmem:[%s16438_s9 + $0x5e80] sm:$0xff] }
 0x190   : >> { %v961_v59 = vld [vmem:[%s16438_s9 + $0x5ec0] sm:$0xff]  ;;  %960 = vst [vmem:[%s16434_s8 + $0x17a0] sm:$0xff] %v959_v58 }
 0x191   : >> { %v963_v60 = vld [vmem:[%s16438_s9 + $0x5f00] sm:$0xff]  ;;  %962 = vst [vmem:[%s16434_s8 + $0x17b0] sm:$0xff] %v961_v59 }
 0x192   : >> { %964 = vst [vmem:[%s16434_s8 + $0x17c0] sm:$0xff] %v963_v60  ;;  %v965_v61 = vld [vmem:[%s16438_s9 + $0x5f40] sm:$0xff] }
 0x193   : >> { %v967_v62 = vld [vmem:[%s16438_s9 + $0x5f80] sm:$0xff]  ;;  %966 = vst [vmem:[%s16434_s8 + $0x17d0] sm:$0xff] %v965_v61 }
 0x194   : >> { %v969_v63 = vld [vmem:[%s16438_s9 + $0x5fc0] sm:$0xff]  ;;  %968 = vst [vmem:[%s16434_s8 + $0x17e0] sm:$0xff] %v967_v62 }
 0x195   : >> { %970 = vst [vmem:[%s16434_s8 + $0x17f0] sm:$0xff] %v969_v63  ;;  %v971_v0 = vld [vmem:[%s16438_s9 + $0x6000] sm:$0xff] }
 0x196   : >> { %v973_v1 = vld [vmem:[%s16438_s9 + $0x6040] sm:$0xff]  ;;  %972 = vst [vmem:[%s16434_s8 + $0x1800] sm:$0xff] %v971_v0 }
 0x197   : >> { %v975_v2 = vld [vmem:[%s16438_s9 + $0x6080] sm:$0xff]  ;;  %974 = vst [vmem:[%s16434_s8 + $0x1810] sm:$0xff] %v973_v1 }
 0x198   : >> { %976 = vst [vmem:[%s16434_s8 + $0x1820] sm:$0xff] %v975_v2  ;;  %v977_v3 = vld [vmem:[%s16438_s9 + $0x60c0] sm:$0xff] }
 0x199   : >> { %v979_v4 = vld [vmem:[%s16438_s9 + $0x6100] sm:$0xff]  ;;  %978 = vst [vmem:[%s16434_s8 + $0x1830] sm:$0xff] %v977_v3 }
 0x19a   : >> { %v981_v5 = vld [vmem:[%s16438_s9 + $0x6140] sm:$0xff]  ;;  %980 = vst [vmem:[%s16434_s8 + $0x1840] sm:$0xff] %v979_v4 }
 0x19b   : >> { %982 = vst [vmem:[%s16434_s8 + $0x1850] sm:$0xff] %v981_v5  ;;  %v983_v6 = vld [vmem:[%s16438_s9 + $0x6180] sm:$0xff] }
 0x19c   : >> { %v985_v7 = vld [vmem:[%s16438_s9 + $0x61c0] sm:$0xff]  ;;  %984 = vst [vmem:[%s16434_s8 + $0x1860] sm:$0xff] %v983_v6 }
 0x19d   : >> { %v987_v8 = vld [vmem:[%s16438_s9 + $0x6200] sm:$0xff]  ;;  %986 = vst [vmem:[%s16434_s8 + $0x1870] sm:$0xff] %v985_v7 }
 0x19e   : >> { %988 = vst [vmem:[%s16434_s8 + $0x1880] sm:$0xff] %v987_v8  ;;  %v989_v9 = vld [vmem:[%s16438_s9 + $0x6240] sm:$0xff] }
 0x19f   : >> { %v991_v10 = vld [vmem:[%s16438_s9 + $0x6280] sm:$0xff]  ;;  %990 = vst [vmem:[%s16434_s8 + $0x1890] sm:$0xff] %v989_v9 }
 0x1a0   : >> { %v993_v11 = vld [vmem:[%s16438_s9 + $0x62c0] sm:$0xff]  ;;  %992 = vst [vmem:[%s16434_s8 + $0x18a0] sm:$0xff] %v991_v10 }
 0x1a1   : >> { %994 = vst [vmem:[%s16434_s8 + $0x18b0] sm:$0xff] %v993_v11  ;;  %v995_v12 = vld [vmem:[%s16438_s9 + $0x6300] sm:$0xff] }
 0x1a2   : >> { %v997_v13 = vld [vmem:[%s16438_s9 + $0x6340] sm:$0xff]  ;;  %996 = vst [vmem:[%s16434_s8 + $0x18c0] sm:$0xff] %v995_v12 }
 0x1a3   : >> { %v999_v14 = vld [vmem:[%s16438_s9 + $0x6380] sm:$0xff]  ;;  %998 = vst [vmem:[%s16434_s8 + $0x18d0] sm:$0xff] %v997_v13 }
 0x1a4   : >> { %1000 = vst [vmem:[%s16434_s8 + $0x18e0] sm:$0xff] %v999_v14  ;;  %v1001_v15 = vld [vmem:[%s16438_s9 + $0x63c0] sm:$0xff] }
 0x1a5   : >> { %v1003_v16 = vld [vmem:[%s16438_s9 + $0x6400] sm:$0xff]  ;;  %1002 = vst [vmem:[%s16434_s8 + $0x18f0] sm:$0xff] %v1001_v15 }
 0x1a6   : >> { %v1005_v17 = vld [vmem:[%s16438_s9 + $0x6440] sm:$0xff]  ;;  %1004 = vst [vmem:[%s16434_s8 + $0x1900] sm:$0xff] %v1003_v16 }
 0x1a7   : >> { %1006 = vst [vmem:[%s16434_s8 + $0x1910] sm:$0xff] %v1005_v17  ;;  %v1007_v18 = vld [vmem:[%s16438_s9 + $0x6480] sm:$0xff] }
 0x1a8   : >> { %v1009_v19 = vld [vmem:[%s16438_s9 + $0x64c0] sm:$0xff]  ;;  %1008 = vst [vmem:[%s16434_s8 + $0x1920] sm:$0xff] %v1007_v18 }
 0x1a9   : >> { %v1011_v20 = vld [vmem:[%s16438_s9 + $0x6500] sm:$0xff]  ;;  %1010 = vst [vmem:[%s16434_s8 + $0x1930] sm:$0xff] %v1009_v19 }
 0x1aa   : >> { %1012 = vst [vmem:[%s16434_s8 + $0x1940] sm:$0xff] %v1011_v20  ;;  %v1013_v21 = vld [vmem:[%s16438_s9 + $0x6540] sm:$0xff] }
 0x1ab   : >> { %v1015_v22 = vld [vmem:[%s16438_s9 + $0x6580] sm:$0xff]  ;;  %1014 = vst [vmem:[%s16434_s8 + $0x1950] sm:$0xff] %v1013_v21 }
 0x1ac   : >> { %v1017_v23 = vld [vmem:[%s16438_s9 + $0x65c0] sm:$0xff]  ;;  %1016 = vst [vmem:[%s16434_s8 + $0x1960] sm:$0xff] %v1015_v22 }
 0x1ad   : >> { %1018 = vst [vmem:[%s16434_s8 + $0x1970] sm:$0xff] %v1017_v23  ;;  %v1019_v24 = vld [vmem:[%s16438_s9 + $0x6600] sm:$0xff] }
 0x1ae   : >> { %v1021_v25 = vld [vmem:[%s16438_s9 + $0x6640] sm:$0xff]  ;;  %1020 = vst [vmem:[%s16434_s8 + $0x1980] sm:$0xff] %v1019_v24 }
 0x1af   : >> { %v1023_v26 = vld [vmem:[%s16438_s9 + $0x6680] sm:$0xff]  ;;  %1022 = vst [vmem:[%s16434_s8 + $0x1990] sm:$0xff] %v1021_v25 }
 0x1b0   : >> { %1024 = vst [vmem:[%s16434_s8 + $0x19a0] sm:$0xff] %v1023_v26  ;;  %v1025_v27 = vld [vmem:[%s16438_s9 + $0x66c0] sm:$0xff] }
 0x1b1   : >> { %v1027_v28 = vld [vmem:[%s16438_s9 + $0x6700] sm:$0xff]  ;;  %1026 = vst [vmem:[%s16434_s8 + $0x19b0] sm:$0xff] %v1025_v27 }
 0x1b2   : >> { %v1029_v29 = vld [vmem:[%s16438_s9 + $0x6740] sm:$0xff]  ;;  %1028 = vst [vmem:[%s16434_s8 + $0x19c0] sm:$0xff] %v1027_v28 }
 0x1b3   : >> { %1030 = vst [vmem:[%s16434_s8 + $0x19d0] sm:$0xff] %v1029_v29  ;;  %v1031_v30 = vld [vmem:[%s16438_s9 + $0x6780] sm:$0xff] }
 0x1b4   : >> { %v1033_v31 = vld [vmem:[%s16438_s9 + $0x67c0] sm:$0xff]  ;;  %1032 = vst [vmem:[%s16434_s8 + $0x19e0] sm:$0xff] %v1031_v30 }
 0x1b5   : >> { %v1035_v32 = vld [vmem:[%s16438_s9 + $0x6800] sm:$0xff]  ;;  %1034 = vst [vmem:[%s16434_s8 + $0x19f0] sm:$0xff] %v1033_v31 }
 0x1b6   : >> { %1036 = vst [vmem:[%s16434_s8 + $0x1a00] sm:$0xff] %v1035_v32  ;;  %v1037_v33 = vld [vmem:[%s16438_s9 + $0x6840] sm:$0xff] }
 0x1b7   : >> { %v1039_v34 = vld [vmem:[%s16438_s9 + $0x6880] sm:$0xff]  ;;  %1038 = vst [vmem:[%s16434_s8 + $0x1a10] sm:$0xff] %v1037_v33 }
 0x1b8   : >> { %v1041_v35 = vld [vmem:[%s16438_s9 + $0x68c0] sm:$0xff]  ;;  %1040 = vst [vmem:[%s16434_s8 + $0x1a20] sm:$0xff] %v1039_v34 }
 0x1b9   : >> { %1042 = vst [vmem:[%s16434_s8 + $0x1a30] sm:$0xff] %v1041_v35  ;;  %v1043_v36 = vld [vmem:[%s16438_s9 + $0x6900] sm:$0xff] }
 0x1ba   : >> { %v1045_v37 = vld [vmem:[%s16438_s9 + $0x6940] sm:$0xff]  ;;  %1044 = vst [vmem:[%s16434_s8 + $0x1a40] sm:$0xff] %v1043_v36 }
 0x1bb   : >> { %v1047_v38 = vld [vmem:[%s16438_s9 + $0x6980] sm:$0xff]  ;;  %1046 = vst [vmem:[%s16434_s8 + $0x1a50] sm:$0xff] %v1045_v37 }
 0x1bc   : >> { %1048 = vst [vmem:[%s16434_s8 + $0x1a60] sm:$0xff] %v1047_v38  ;;  %v1049_v39 = vld [vmem:[%s16438_s9 + $0x69c0] sm:$0xff] }
 0x1bd   : >> { %v1051_v40 = vld [vmem:[%s16438_s9 + $0x6a00] sm:$0xff]  ;;  %1050 = vst [vmem:[%s16434_s8 + $0x1a70] sm:$0xff] %v1049_v39 }
 0x1be   : >> { %v1053_v41 = vld [vmem:[%s16438_s9 + $0x6a40] sm:$0xff]  ;;  %1052 = vst [vmem:[%s16434_s8 + $0x1a80] sm:$0xff] %v1051_v40 }
 0x1bf   : >> { %1054 = vst [vmem:[%s16434_s8 + $0x1a90] sm:$0xff] %v1053_v41  ;;  %v1055_v42 = vld [vmem:[%s16438_s9 + $0x6a80] sm:$0xff] }
 0x1c0   : >> { %v1057_v43 = vld [vmem:[%s16438_s9 + $0x6ac0] sm:$0xff]  ;;  %1056 = vst [vmem:[%s16434_s8 + $0x1aa0] sm:$0xff] %v1055_v42 }
 0x1c1   : >> { %v1059_v44 = vld [vmem:[%s16438_s9 + $0x6b00] sm:$0xff]  ;;  %1058 = vst [vmem:[%s16434_s8 + $0x1ab0] sm:$0xff] %v1057_v43 }
 0x1c2   : >> { %1060 = vst [vmem:[%s16434_s8 + $0x1ac0] sm:$0xff] %v1059_v44  ;;  %v1061_v45 = vld [vmem:[%s16438_s9 + $0x6b40] sm:$0xff] }
 0x1c3   : >> { %v1063_v46 = vld [vmem:[%s16438_s9 + $0x6b80] sm:$0xff]  ;;  %1062 = vst [vmem:[%s16434_s8 + $0x1ad0] sm:$0xff] %v1061_v45 }
 0x1c4   : >> { %v1065_v47 = vld [vmem:[%s16438_s9 + $0x6bc0] sm:$0xff]  ;;  %1064 = vst [vmem:[%s16434_s8 + $0x1ae0] sm:$0xff] %v1063_v46 }
 0x1c5   : >> { %1066 = vst [vmem:[%s16434_s8 + $0x1af0] sm:$0xff] %v1065_v47  ;;  %v1067_v48 = vld [vmem:[%s16438_s9 + $0x6c00] sm:$0xff] }
 0x1c6   : >> { %v1069_v49 = vld [vmem:[%s16438_s9 + $0x6c40] sm:$0xff]  ;;  %1068 = vst [vmem:[%s16434_s8 + $0x1b00] sm:$0xff] %v1067_v48 }
 0x1c7   : >> { %v1071_v50 = vld [vmem:[%s16438_s9 + $0x6c80] sm:$0xff]  ;;  %1070 = vst [vmem:[%s16434_s8 + $0x1b10] sm:$0xff] %v1069_v49 }
 0x1c8   : >> { %1072 = vst [vmem:[%s16434_s8 + $0x1b20] sm:$0xff] %v1071_v50  ;;  %v1073_v51 = vld [vmem:[%s16438_s9 + $0x6cc0] sm:$0xff] }
 0x1c9   : >> { %v1075_v52 = vld [vmem:[%s16438_s9 + $0x6d00] sm:$0xff]  ;;  %1074 = vst [vmem:[%s16434_s8 + $0x1b30] sm:$0xff] %v1073_v51 }
 0x1ca   : >> { %v1077_v53 = vld [vmem:[%s16438_s9 + $0x6d40] sm:$0xff]  ;;  %1076 = vst [vmem:[%s16434_s8 + $0x1b40] sm:$0xff] %v1075_v52 }
 0x1cb   : >> { %1078 = vst [vmem:[%s16434_s8 + $0x1b50] sm:$0xff] %v1077_v53  ;;  %v1079_v54 = vld [vmem:[%s16438_s9 + $0x6d80] sm:$0xff] }
 0x1cc   : >> { %v1081_v55 = vld [vmem:[%s16438_s9 + $0x6dc0] sm:$0xff]  ;;  %1080 = vst [vmem:[%s16434_s8 + $0x1b60] sm:$0xff] %v1079_v54 }
 0x1cd   : >> { %v1083_v56 = vld [vmem:[%s16438_s9 + $0x6e00] sm:$0xff]  ;;  %1082 = vst [vmem:[%s16434_s8 + $0x1b70] sm:$0xff] %v1081_v55 }
 0x1ce   : >> { %1084 = vst [vmem:[%s16434_s8 + $0x1b80] sm:$0xff] %v1083_v56  ;;  %v1085_v57 = vld [vmem:[%s16438_s9 + $0x6e40] sm:$0xff] }
 0x1cf   : >> { %v1087_v58 = vld [vmem:[%s16438_s9 + $0x6e80] sm:$0xff]  ;;  %1086 = vst [vmem:[%s16434_s8 + $0x1b90] sm:$0xff] %v1085_v57 }
 0x1d0   : >> { %v1089_v59 = vld [vmem:[%s16438_s9 + $0x6ec0] sm:$0xff]  ;;  %1088 = vst [vmem:[%s16434_s8 + $0x1ba0] sm:$0xff] %v1087_v58 }
 0x1d1   : >> { %1090 = vst [vmem:[%s16434_s8 + $0x1bb0] sm:$0xff] %v1089_v59  ;;  %v1091_v60 = vld [vmem:[%s16438_s9 + $0x6f00] sm:$0xff] }
 0x1d2   : >> { %v1093_v61 = vld [vmem:[%s16438_s9 + $0x6f40] sm:$0xff]  ;;  %1092 = vst [vmem:[%s16434_s8 + $0x1bc0] sm:$0xff] %v1091_v60 }
 0x1d3   : >> { %v1095_v62 = vld [vmem:[%s16438_s9 + $0x6f80] sm:$0xff]  ;;  %1094 = vst [vmem:[%s16434_s8 + $0x1bd0] sm:$0xff] %v1093_v61 }
 0x1d4   : >> { %1096 = vst [vmem:[%s16434_s8 + $0x1be0] sm:$0xff] %v1095_v62  ;;  %v1097_v63 = vld [vmem:[%s16438_s9 + $0x6fc0] sm:$0xff] }
 0x1d5   : >> { %v1099_v0 = vld [vmem:[%s16438_s9 + $0x7000] sm:$0xff]  ;;  %1098 = vst [vmem:[%s16434_s8 + $0x1bf0] sm:$0xff] %v1097_v63 }
 0x1d6   : >> { %v1101_v1 = vld [vmem:[%s16438_s9 + $0x7040] sm:$0xff]  ;;  %1100 = vst [vmem:[%s16434_s8 + $0x1c00] sm:$0xff] %v1099_v0 }
 0x1d7   : >> { %1102 = vst [vmem:[%s16434_s8 + $0x1c10] sm:$0xff] %v1101_v1  ;;  %v1103_v2 = vld [vmem:[%s16438_s9 + $0x7080] sm:$0xff] }
 0x1d8   : >> { %v1105_v3 = vld [vmem:[%s16438_s9 + $0x70c0] sm:$0xff]  ;;  %1104 = vst [vmem:[%s16434_s8 + $0x1c20] sm:$0xff] %v1103_v2 }
 0x1d9   : >> { %v1107_v4 = vld [vmem:[%s16438_s9 + $0x7100] sm:$0xff]  ;;  %1106 = vst [vmem:[%s16434_s8 + $0x1c30] sm:$0xff] %v1105_v3 }
 0x1da   : >> { %1108 = vst [vmem:[%s16434_s8 + $0x1c40] sm:$0xff] %v1107_v4  ;;  %v1109_v5 = vld [vmem:[%s16438_s9 + $0x7140] sm:$0xff] }
 0x1db   : >> { %v1111_v6 = vld [vmem:[%s16438_s9 + $0x7180] sm:$0xff]  ;;  %1110 = vst [vmem:[%s16434_s8 + $0x1c50] sm:$0xff] %v1109_v5 }
 0x1dc   : >> { %v1113_v7 = vld [vmem:[%s16438_s9 + $0x71c0] sm:$0xff]  ;;  %1112 = vst [vmem:[%s16434_s8 + $0x1c60] sm:$0xff] %v1111_v6 }
 0x1dd   : >> { %1114 = vst [vmem:[%s16434_s8 + $0x1c70] sm:$0xff] %v1113_v7  ;;  %v1115_v8 = vld [vmem:[%s16438_s9 + $0x7200] sm:$0xff] }
 0x1de   : >> { %v1117_v9 = vld [vmem:[%s16438_s9 + $0x7240] sm:$0xff]  ;;  %1116 = vst [vmem:[%s16434_s8 + $0x1c80] sm:$0xff] %v1115_v8 }
 0x1df   : >> { %v1119_v10 = vld [vmem:[%s16438_s9 + $0x7280] sm:$0xff]  ;;  %1118 = vst [vmem:[%s16434_s8 + $0x1c90] sm:$0xff] %v1117_v9 }
 0x1e0   : >> { %1120 = vst [vmem:[%s16434_s8 + $0x1ca0] sm:$0xff] %v1119_v10  ;;  %v1121_v11 = vld [vmem:[%s16438_s9 + $0x72c0] sm:$0xff] }
 0x1e1   : >> { %v1123_v12 = vld [vmem:[%s16438_s9 + $0x7300] sm:$0xff]  ;;  %1122 = vst [vmem:[%s16434_s8 + $0x1cb0] sm:$0xff] %v1121_v11 }
 0x1e2   : >> { %v1125_v13 = vld [vmem:[%s16438_s9 + $0x7340] sm:$0xff]  ;;  %1124 = vst [vmem:[%s16434_s8 + $0x1cc0] sm:$0xff] %v1123_v12 }
 0x1e3   : >> { %1126 = vst [vmem:[%s16434_s8 + $0x1cd0] sm:$0xff] %v1125_v13  ;;  %v1127_v14 = vld [vmem:[%s16438_s9 + $0x7380] sm:$0xff] }
 0x1e4   : >> { %v1129_v15 = vld [vmem:[%s16438_s9 + $0x73c0] sm:$0xff]  ;;  %1128 = vst [vmem:[%s16434_s8 + $0x1ce0] sm:$0xff] %v1127_v14 }
 0x1e5   : >> { %v1131_v16 = vld [vmem:[%s16438_s9 + $0x7400] sm:$0xff]  ;;  %1130 = vst [vmem:[%s16434_s8 + $0x1cf0] sm:$0xff] %v1129_v15 }
 0x1e6   : >> { %1132 = vst [vmem:[%s16434_s8 + $0x1d00] sm:$0xff] %v1131_v16  ;;  %v1133_v17 = vld [vmem:[%s16438_s9 + $0x7440] sm:$0xff] }
 0x1e7   : >> { %v1135_v18 = vld [vmem:[%s16438_s9 + $0x7480] sm:$0xff]  ;;  %1134 = vst [vmem:[%s16434_s8 + $0x1d10] sm:$0xff] %v1133_v17 }
 0x1e8   : >> { %v1137_v19 = vld [vmem:[%s16438_s9 + $0x74c0] sm:$0xff]  ;;  %1136 = vst [vmem:[%s16434_s8 + $0x1d20] sm:$0xff] %v1135_v18 }
 0x1e9   : >> { %1138 = vst [vmem:[%s16434_s8 + $0x1d30] sm:$0xff] %v1137_v19  ;;  %v1139_v20 = vld [vmem:[%s16438_s9 + $0x7500] sm:$0xff] }
 0x1ea   : >> { %v1141_v21 = vld [vmem:[%s16438_s9 + $0x7540] sm:$0xff]  ;;  %1140 = vst [vmem:[%s16434_s8 + $0x1d40] sm:$0xff] %v1139_v20 }
 0x1eb   : >> { %v1143_v22 = vld [vmem:[%s16438_s9 + $0x7580] sm:$0xff]  ;;  %1142 = vst [vmem:[%s16434_s8 + $0x1d50] sm:$0xff] %v1141_v21 }
 0x1ec   : >> { %1144 = vst [vmem:[%s16434_s8 + $0x1d60] sm:$0xff] %v1143_v22  ;;  %v1145_v23 = vld [vmem:[%s16438_s9 + $0x75c0] sm:$0xff] }
 0x1ed   : >> { %v1147_v24 = vld [vmem:[%s16438_s9 + $0x7600] sm:$0xff]  ;;  %1146 = vst [vmem:[%s16434_s8 + $0x1d70] sm:$0xff] %v1145_v23 }
 0x1ee   : >> { %v1149_v25 = vld [vmem:[%s16438_s9 + $0x7640] sm:$0xff]  ;;  %1148 = vst [vmem:[%s16434_s8 + $0x1d80] sm:$0xff] %v1147_v24 }
 0x1ef   : >> { %1150 = vst [vmem:[%s16434_s8 + $0x1d90] sm:$0xff] %v1149_v25  ;;  %v1151_v26 = vld [vmem:[%s16438_s9 + $0x7680] sm:$0xff] }
 0x1f0   : >> { %v1153_v27 = vld [vmem:[%s16438_s9 + $0x76c0] sm:$0xff]  ;;  %1152 = vst [vmem:[%s16434_s8 + $0x1da0] sm:$0xff] %v1151_v26 }
 0x1f1   : >> { %v1155_v28 = vld [vmem:[%s16438_s9 + $0x7700] sm:$0xff]  ;;  %1154 = vst [vmem:[%s16434_s8 + $0x1db0] sm:$0xff] %v1153_v27 }
 0x1f2   : >> { %1156 = vst [vmem:[%s16434_s8 + $0x1dc0] sm:$0xff] %v1155_v28  ;;  %v1157_v29 = vld [vmem:[%s16438_s9 + $0x7740] sm:$0xff] }
 0x1f3   : >> { %v1159_v30 = vld [vmem:[%s16438_s9 + $0x7780] sm:$0xff]  ;;  %1158 = vst [vmem:[%s16434_s8 + $0x1dd0] sm:$0xff] %v1157_v29 }
 0x1f4   : >> { %v1161_v31 = vld [vmem:[%s16438_s9 + $0x77c0] sm:$0xff]  ;;  %1160 = vst [vmem:[%s16434_s8 + $0x1de0] sm:$0xff] %v1159_v30 }
 0x1f5   : >> { %1162 = vst [vmem:[%s16434_s8 + $0x1df0] sm:$0xff] %v1161_v31  ;;  %v1163_v32 = vld [vmem:[%s16438_s9 + $0x7800] sm:$0xff] }
 0x1f6   : >> { %v1165_v33 = vld [vmem:[%s16438_s9 + $0x7840] sm:$0xff]  ;;  %1164 = vst [vmem:[%s16434_s8 + $0x1e00] sm:$0xff] %v1163_v32 }
 0x1f7   : >> { %v1167_v34 = vld [vmem:[%s16438_s9 + $0x7880] sm:$0xff]  ;;  %1166 = vst [vmem:[%s16434_s8 + $0x1e10] sm:$0xff] %v1165_v33 }
 0x1f8   : >> { %1168 = vst [vmem:[%s16434_s8 + $0x1e20] sm:$0xff] %v1167_v34  ;;  %v1169_v35 = vld [vmem:[%s16438_s9 + $0x78c0] sm:$0xff] }
 0x1f9   : >> { %v1171_v36 = vld [vmem:[%s16438_s9 + $0x7900] sm:$0xff]  ;;  %1170 = vst [vmem:[%s16434_s8 + $0x1e30] sm:$0xff] %v1169_v35 }
 0x1fa   : >> { %v1173_v37 = vld [vmem:[%s16438_s9 + $0x7940] sm:$0xff]  ;;  %1172 = vst [vmem:[%s16434_s8 + $0x1e40] sm:$0xff] %v1171_v36 }
 0x1fb   : >> { %1174 = vst [vmem:[%s16434_s8 + $0x1e50] sm:$0xff] %v1173_v37  ;;  %v1175_v38 = vld [vmem:[%s16438_s9 + $0x7980] sm:$0xff] }
 0x1fc   : >> { %v1177_v39 = vld [vmem:[%s16438_s9 + $0x79c0] sm:$0xff]  ;;  %1176 = vst [vmem:[%s16434_s8 + $0x1e60] sm:$0xff] %v1175_v38 }
 0x1fd   : >> { %v1179_v40 = vld [vmem:[%s16438_s9 + $0x7a00] sm:$0xff]  ;;  %1178 = vst [vmem:[%s16434_s8 + $0x1e70] sm:$0xff] %v1177_v39 }
 0x1fe   : >> { %1180 = vst [vmem:[%s16434_s8 + $0x1e80] sm:$0xff] %v1179_v40  ;;  %v1181_v41 = vld [vmem:[%s16438_s9 + $0x7a40] sm:$0xff] }
 0x1ff   : >> { %v1183_v42 = vld [vmem:[%s16438_s9 + $0x7a80] sm:$0xff]  ;;  %1182 = vst [vmem:[%s16434_s8 + $0x1e90] sm:$0xff] %v1181_v41 }
 0x200   : >> { %v1185_v43 = vld [vmem:[%s16438_s9 + $0x7ac0] sm:$0xff]  ;;  %1184 = vst [vmem:[%s16434_s8 + $0x1ea0] sm:$0xff] %v1183_v42 }
 0x201   : >> { %1186 = vst [vmem:[%s16434_s8 + $0x1eb0] sm:$0xff] %v1185_v43  ;;  %v1187_v44 = vld [vmem:[%s16438_s9 + $0x7b00] sm:$0xff] }
 0x202   : >> { %v1189_v45 = vld [vmem:[%s16438_s9 + $0x7b40] sm:$0xff]  ;;  %1188 = vst [vmem:[%s16434_s8 + $0x1ec0] sm:$0xff] %v1187_v44 }
 0x203   : >> { %v1191_v46 = vld [vmem:[%s16438_s9 + $0x7b80] sm:$0xff]  ;;  %1190 = vst [vmem:[%s16434_s8 + $0x1ed0] sm:$0xff] %v1189_v45 }
 0x204   : >> { %1192 = vst [vmem:[%s16434_s8 + $0x1ee0] sm:$0xff] %v1191_v46  ;;  %v1193_v47 = vld [vmem:[%s16438_s9 + $0x7bc0] sm:$0xff] }
 0x205   : >> { %v1195_v48 = vld [vmem:[%s16438_s9 + $0x7c00] sm:$0xff]  ;;  %1194 = vst [vmem:[%s16434_s8 + $0x1ef0] sm:$0xff] %v1193_v47 }
 0x206   : >> { %v1197_v49 = vld [vmem:[%s16438_s9 + $0x7c40] sm:$0xff]  ;;  %1196 = vst [vmem:[%s16434_s8 + $0x1f00] sm:$0xff] %v1195_v48 }
 0x207   : >> { %1198 = vst [vmem:[%s16434_s8 + $0x1f10] sm:$0xff] %v1197_v49  ;;  %v1199_v50 = vld [vmem:[%s16438_s9 + $0x7c80] sm:$0xff] }
 0x208   : >> { %v1201_v51 = vld [vmem:[%s16438_s9 + $0x7cc0] sm:$0xff]  ;;  %1200 = vst [vmem:[%s16434_s8 + $0x1f20] sm:$0xff] %v1199_v50 }
 0x209   : >> { %v1203_v52 = vld [vmem:[%s16438_s9 + $0x7d00] sm:$0xff]  ;;  %1202 = vst [vmem:[%s16434_s8 + $0x1f30] sm:$0xff] %v1201_v51 }
 0x20a   : >> { %1204 = vst [vmem:[%s16434_s8 + $0x1f40] sm:$0xff] %v1203_v52  ;;  %v1205_v53 = vld [vmem:[%s16438_s9 + $0x7d40] sm:$0xff] }
 0x20b   : >> { %v1207_v54 = vld [vmem:[%s16438_s9 + $0x7d80] sm:$0xff]  ;;  %1206 = vst [vmem:[%s16434_s8 + $0x1f50] sm:$0xff] %v1205_v53 }
 0x20c   : >> { %v1209_v55 = vld [vmem:[%s16438_s9 + $0x7dc0] sm:$0xff]  ;;  %1208 = vst [vmem:[%s16434_s8 + $0x1f60] sm:$0xff] %v1207_v54 }
 0x20d   : >> { %1210 = vst [vmem:[%s16434_s8 + $0x1f70] sm:$0xff] %v1209_v55  ;;  %v1211_v56 = vld [vmem:[%s16438_s9 + $0x7e00] sm:$0xff] }
 0x20e   : >> { %v1213_v57 = vld [vmem:[%s16438_s9 + $0x7e40] sm:$0xff]  ;;  %1212 = vst [vmem:[%s16434_s8 + $0x1f80] sm:$0xff] %v1211_v56 }
 0x20f   : >> { %v1215_v58 = vld [vmem:[%s16438_s9 + $0x7e80] sm:$0xff]  ;;  %1214 = vst [vmem:[%s16434_s8 + $0x1f90] sm:$0xff] %v1213_v57  ;;  %198 = sbr.rel (!%p196_p6) target bundleno = 21 (0x15), region = 125 }
 0x210   : >> { %1216 = vst [vmem:[%s16434_s8 + $0x1fa0] sm:$0xff] %v1215_v58  ;;  %v1217_v59 = vld [vmem:[%s16438_s9 + $0x7ec0] sm:$0xff] }
 0x211   : >> { %v1219_v60 = vld [vmem:[%s16438_s9 + $0x7f00] sm:$0xff]  ;;  %1218 = vst [vmem:[%s16434_s8 + $0x1fb0] sm:$0xff] %v1217_v59 }
 0x212   : >> { %v1221_v61 = vld [vmem:[%s16438_s9 + $0x7f40] sm:$0xff]  ;;  %1220 = vst [vmem:[%s16434_s8 + $0x1fc0] sm:$0xff] %v1219_v60 }
 0x213   : >> { %1222 = vst [vmem:[%s16434_s8 + $0x1fd0] sm:$0xff] %v1221_v61  ;;  %v1223_v62 = vld [vmem:[%s16438_s9 + $0x7f80] sm:$0xff] }
 0x214   : >> { %v1225_v63 = vld [vmem:[%s16438_s9 + $0x7fc0] sm:$0xff]  ;;  %1224 = vst [vmem:[%s16434_s8 + $0x1fe0] sm:$0xff] %v1223_v62  ;;  %s19221_s9 = smov %s16812_s14 }
 0x215   : >> { %1226 = vst [vmem:[%s16434_s8 + $0x1ff0] sm:$0xff] %v1225_v63  ;;  %s19220_s8 = smov %s16816_s15 }
 0x216 PF: > { %p13290_p7 = scmp.ge.s32.totalorder %s16430_s20, 1  ;;  %p3333_p8 = scmp.lt.s32.totalorder %s16430_s20, 5 }
 0x218   : > { %p3334_p9 = pnand %p13290_p7, %p3333_p8 }
 0x219   : > { %s3340_s16 = sand.u32 (!%p3334_p9), 1, %s16422_s18   ;;  %s13292_s17 = sshll.u32 (!%p3334_p9), %s16498_s21, 2 }
 0x21a   : > { %3337 = sbr.rel (%p3334_p9) target bundleno = 2251 (0x8cb), region = 73  ;;  %s13291_s23 = sshll.u32 (!%p3334_p9), %s3340_s16, 13 }
 0x21b   : > { %p3374_p10 = scmp.lt.s32.totalorder (!%p3334_p9), %s13292_s17, 15  ;;  %s13293_s24 = sshll.u32 (!%p3334_p9), %s16498_s21, 6 }
 0x21c   : > { %p3379_p11 = scmp.lt.s32.totalorder (!%p3334_p9), %s13293_s24, 255  ;;  %s17609_s18 = scalar_lea.vmem (!%p3334_p9), [#allocation2], %s13291_s23 }
 0x21d   : > { %p13296_p12 = scmp.ne.s32.totalorder (!%p3334_p9), %s16498_s21, 0 }
 0x221   : > { %s19229_s17 = smov (!%p3374_p10, %s13292_s17), 15  ;;  %s19231_s24 = smov (!%p3379_p11, %s13293_s24), 255 }
 0x222   : > { %s3376_s28 = scalar_lea.vmem %s19214_s2, %s19229_s17  ;;  %s14615_s20 = sshll.u32 %s19231_s24, 5  ;;  %v16448_v0 = vmov (!%p13296_p12), 0.0  }
 0x223   : > { %s17607_s6 = scalar_lea.vmem %s19215_s3, %s14615_s20  ;;  %3388 = sbr.rel (%p13296_p12) target bundleno = 555 (0x22b), region = 81  ;;  %3389 = vst [vmem:[#allocation3] sm:$0xff] (!%p13296_p12), %v16448_v0  ;;  %3390 = vst [vmem:[#allocation3 + $0x8] sm:$0xff] (!%p13296_p12), %v16448_v0 }
 0x224   : > { %3391 = vst [vmem:[#allocation3 + $0x10] sm:$0xff] (!%p13296_p12), %v16448_v0  ;;  %3392 = vst [vmem:[#allocation3 + $0x18] sm:$0xff] (!%p13296_p12), %v16448_v0 }
 0x225   : > { %3393 = vst [vmem:[#allocation3 + $0x20] sm:$0xff] (!%p13296_p12), %v16448_v0  ;;  %3394 = vst [vmem:[#allocation3 + $0x28] sm:$0xff] (!%p13296_p12), %v16448_v0 }
 0x226   : > { %3395 = vst [vmem:[#allocation3 + $0x30] sm:$0xff] (!%p13296_p12), %v16448_v0  ;;  %3396 = vst [vmem:[#allocation3 + $0x38] sm:$0xff] (!%p13296_p12), %v16448_v0 }
 0x227   : > { %3397 = vst [vmem:[#allocation3 + $0x40] sm:$0xff] (!%p13296_p12), %v16448_v0  ;;  %3398 = vst [vmem:[#allocation3 + $0x48] sm:$0xff] (!%p13296_p12), %v16448_v0 }
 0x228   : > { %3399 = vst [vmem:[#allocation3 + $0x50] sm:$0xff] (!%p13296_p12), %v16448_v0  ;;  %3400 = vst [vmem:[#allocation3 + $0x58] sm:$0xff] (!%p13296_p12), %v16448_v0 }
 0x229   : > { %3401 = vst [vmem:[#allocation3 + $0x60] sm:$0xff] (!%p13296_p12), %v16448_v0  ;;  %3402 = vst [vmem:[#allocation3 + $0x68] sm:$0xff] (!%p13296_p12), %v16448_v0 }
 0x22a   : > { %3403 = vst [vmem:[#allocation3 + $0x70] sm:$0xff] %v16448_v0  ;;  %3404 = vst [vmem:[#allocation3 + $0x78] sm:$0xff] %v16448_v0 }
 0x22b PF: > { %v14826_v1 = vld [vmem:[%s17609_s18 + $0x4] ss:$16 sps:$4 sm:$0xff]   ;;  %v14828_v2 = vld [vmem:[%s17609_s18 + $0xc] ss:$16 sps:$4 sm:$0xff]   ;;  %v14830_v3 = vld [vmem:[%s17609_s18] ss:$16 sps:$4 sm:$0xff]  }
 0x22c   : > { %9763 = vmatprep.subr.bf16.mxu0 %v14826_v1  ;;  %v14831_v4 = vld [vmem:[%s17609_s18 + $0x8] ss:$16 sps:$4 sm:$0xff]   ;;  %10451 = vmatprep.subr.bf16.mxu1 %v14828_v2  ;;  %v14832_v5 = vld [vmem:[%s17609_s18 + $0x24] ss:$16 sps:$4 sm:$0xff]   ;;  %v14834_v6 = vld [vmem:[%s17609_s18 + $0x2c] ss:$16 sps:$4 sm:$0xff]  }
 0x22d   : > { %9764 = vmatpush1.bf16.msra.mxu0 %v14830_v3  ;;  %10452 = vmatpush1.bf16.msra.mxu1 %v14831_v4  ;;  %v14836_v7 = vld [vmem:[%s17609_s18 + $0x20] ss:$16 sps:$4 sm:$0xff]   ;;  %v14837_v8 = vld [vmem:[%s17609_s18 + $0x28] ss:$16 sps:$4 sm:$0xff]   ;;  %v14838_v9 = vld [vmem:[%s17609_s18 + $0x44] ss:$16 sps:$4 sm:$0xff]  }
 0x22e   : > { %9765 = vmatprep.subr.bf16.mxu0 %v14832_v5  ;;  %10453 = vmatprep.subr.bf16.mxu1 %v14834_v6  ;;  %v14840_v10 = vld [vmem:[%s17609_s18 + $0x4c] ss:$16 sps:$4 sm:$0xff]   ;;  %v14842_v11 = vld [vmem:[%s17609_s18 + $0x40] ss:$16 sps:$4 sm:$0xff]   ;;  %v14843_v12 = vld [vmem:[%s17609_s18 + $0x48] ss:$16 sps:$4 sm:$0xff]  }
 0x22f   : > { %v14844_v13 = vld [vmem:[%s17609_s18 + $0x64] ss:$16 sps:$4 sm:$0xff]   ;;  %v14846_v14 = vld [vmem:[%s17609_s18 + $0x6c] ss:$16 sps:$4 sm:$0xff]   ;;  %v14848_v15 = vld [vmem:[%s17609_s18 + $0x60] ss:$16 sps:$4 sm:$0xff]  }
 0x230   : > { %v14849_v16 = vld [vmem:[%s17609_s18 + $0x68] ss:$16 sps:$4 sm:$0xff]   ;;  %v14850_v17 = vld [vmem:[%s17609_s18 + $0x84] ss:$16 sps:$4 sm:$0xff]   ;;  %v14852_v18 = vld [vmem:[%s17609_s18 + $0x8c] ss:$16 sps:$4 sm:$0xff]  }
 0x231   : > { %9766 = vmatpush1.bf16.msra.mxu0 %v14836_v7  ;;  %10454 = vmatpush1.bf16.msra.mxu1 %v14837_v8  ;;  %v14854_v19 = vld [vmem:[%s17609_s18 + $0x80] ss:$16 sps:$4 sm:$0xff]   ;;  %v14855_v20 = vld [vmem:[%s17609_s18 + $0x88] ss:$16 sps:$4 sm:$0xff]   ;;  %v14856_v21 = vld [vmem:[%s17609_s18 + $0xa4] ss:$16 sps:$4 sm:$0xff]  }
 0x232   : > { %9767 = vmatprep.subr.bf16.mxu0 %v14838_v9  ;;  %10455 = vmatprep.subr.bf16.mxu1 %v14840_v10  ;;  %v14858_v22 = vld [vmem:[%s17609_s18 + $0xac] ss:$16 sps:$4 sm:$0xff]   ;;  %v14860_v23 = vld [vmem:[%s17609_s18 + $0xa0] ss:$16 sps:$4 sm:$0xff]   ;;  %v14861_v24 = vld [vmem:[%s17609_s18 + $0xa8] ss:$16 sps:$4 sm:$0xff]  }
 0x233   : > { %v14862_v25 = vld [vmem:[%s17609_s18 + $0xc4] ss:$16 sps:$4 sm:$0xff]   ;;  %v14864_v26 = vld [vmem:[%s17609_s18 + $0xcc] ss:$16 sps:$4 sm:$0xff]   ;;  %v14866_v27 = vld [vmem:[%s17609_s18 + $0xc0] ss:$16 sps:$4 sm:$0xff]  }
 0x234   : > { %v14867_v28 = vld [vmem:[%s17609_s18 + $0xc8] ss:$16 sps:$4 sm:$0xff]   ;;  %v14868_v29 = vld [vmem:[%s17609_s18 + $0xe4] ss:$16 sps:$4 sm:$0xff]   ;;  %v14870_v30 = vld [vmem:[%s17609_s18 + $0xec] ss:$16 sps:$4 sm:$0xff]  }
 0x235   : > { %9768 = vmatpush1.bf16.msra.mxu0 %v14842_v11  ;;  %10456 = vmatpush1.bf16.msra.mxu1 %v14843_v12  ;;  %v14872_v31 = vld [vmem:[%s17609_s18 + $0xe0] ss:$16 sps:$4 sm:$0xff]   ;;  %v14873_v32 = vld [vmem:[%s17609_s18 + $0xe8] ss:$16 sps:$4 sm:$0xff]   ;;  %v14874_v33 = vld [vmem:[%s17609_s18 + $0x104] ss:$16 sps:$4 sm:$0xff]  }
 0x236   : > { %9769 = vmatprep.subr.bf16.mxu0 %v14844_v13  ;;  %10457 = vmatprep.subr.bf16.mxu1 %v14846_v14  ;;  %v14876_v34 = vld [vmem:[%s17609_s18 + $0x10c] ss:$16 sps:$4 sm:$0xff]   ;;  %v14878_v35 = vld [vmem:[%s17609_s18 + $0x100] ss:$16 sps:$4 sm:$0xff]   ;;  %v14879_v36 = vld [vmem:[%s17609_s18 + $0x108] ss:$16 sps:$4 sm:$0xff]  }
 0x237   : > { %v14880_v37 = vld [vmem:[%s17609_s18 + $0x124] ss:$16 sps:$4 sm:$0xff]   ;;  %v14882_v38 = vld [vmem:[%s17609_s18 + $0x12c] ss:$16 sps:$4 sm:$0xff]   ;;  %v14884_v39 = vld [vmem:[%s17609_s18 + $0x120] ss:$16 sps:$4 sm:$0xff]  }
 0x238   : > { %v14885_v40 = vld [vmem:[%s17609_s18 + $0x128] ss:$16 sps:$4 sm:$0xff]   ;;  %v14886_v41 = vld [vmem:[%s17609_s18 + $0x144] ss:$16 sps:$4 sm:$0xff]   ;;  %v14888_v42 = vld [vmem:[%s17609_s18 + $0x14c] ss:$16 sps:$4 sm:$0xff]  }
 0x239   : > { %9770 = vmatpush1.bf16.msra.mxu0 %v14848_v15  ;;  %10458 = vmatpush1.bf16.msra.mxu1 %v14849_v16  ;;  %v14890_v43 = vld [vmem:[%s17609_s18 + $0x140] ss:$16 sps:$4 sm:$0xff]   ;;  %v14891_v44 = vld [vmem:[%s17609_s18 + $0x148] ss:$16 sps:$4 sm:$0xff]   ;;  %v14892_v45 = vld [vmem:[%s17609_s18 + $0x164] ss:$16 sps:$4 sm:$0xff]  }
 0x23a   : > { %9771 = vmatprep.subr.bf16.mxu0 %v14850_v17  ;;  %10459 = vmatprep.subr.bf16.mxu1 %v14852_v18  ;;  %v14894_v46 = vld [vmem:[%s17609_s18 + $0x16c] ss:$16 sps:$4 sm:$0xff]   ;;  %v3405_v47 = vld [vmem:[%s19212_s0] sm:$0xff]  ;;  %v14897_v50 = vld [vmem:[%s17609_s18 + $0x168] ss:$16 sps:$4 sm:$0xff]   ;;  %p14609_p13 = scmp.ne.s32.totalorder %s16498_s21, 3 }
 0x23b   : > { %v3421_v48 = vld [vmem:[%s19212_s0 + $0x80] sm:$0xff]  ;;  %v14900_v53 = vld [vmem:[%s17609_s18 + $0x18c] ss:$16 sps:$4 sm:$0xff]   ;;  %v14903_v55 = vld [vmem:[%s17609_s18 + $0x188] ss:$16 sps:$4 sm:$0xff]  }
 0x23c   : > { %v14896_v49 = vld [vmem:[%s17609_s18 + $0x160] ss:$16 sps:$4 sm:$0xff]   ;;  %v13298_v51 = vcombine.high %v3405_v47, %v3421_v48  ;;  %v14898_v52 = vld [vmem:[%s17609_s18 + $0x184] ss:$16 sps:$4 sm:$0xff]   ;;  %v14906_v57 = vld [vmem:[%s17609_s18 + $0x1ac] ss:$16 sps:$4 sm:$0xff]   ;;  %v13297_v6 = vcombine.low %v3405_v47, %v3421_v48 }
 0x23d   : > { %9772 = vmatpush1.bf16.msra.mxu0 %v14854_v19  ;;  %10460 = vmatpush1.bf16.msra.mxu1 %v14855_v20  ;;  %v14902_v54 = vld [vmem:[%s17609_s18 + $0x180] ss:$16 sps:$4 sm:$0xff]   ;;  %v14904_v56 = vld [vmem:[%s17609_s18 + $0x1a4] ss:$16 sps:$4 sm:$0xff]   ;;  %v14909_v59 = vld [vmem:[%s17609_s18 + $0x1a8] ss:$16 sps:$4 sm:$0xff]  }
 0x23e   : > { %9773 = vmatprep.subr.bf16.mxu0 %v14856_v21  ;;  %10461 = vmatprep.subr.bf16.mxu1 %v14858_v22  ;;  %v14908_v58 = vld [vmem:[%s17609_s18 + $0x1a0] ss:$16 sps:$4 sm:$0xff]   ;;  %v14910_v60 = vld [vmem:[%s17609_s18 + $0x1c4] ss:$16 sps:$4 sm:$0xff]   ;;  %v14912_v61 = vld [vmem:[%s17609_s18 + $0x1cc] ss:$16 sps:$4 sm:$0xff]  }
 0x23f   : > { %9795 = vmatprep.mubr.bf16.mxu0 %v13298_v51  ;;  %10483 = vmatprep.mubr.bf16.mxu1 %v13298_v51  ;;  %v14914_v62 = vld [vmem:[%s17609_s18 + $0x1c0] ss:$16 sps:$4 sm:$0xff]   ;;  %v14915_v63 = vld [vmem:[%s17609_s18 + $0x1c8] ss:$16 sps:$4 sm:$0xff]   ;;  %v14916_v0 = vld [vmem:[%s17609_s18 + $0x1e4] ss:$16 sps:$4 sm:$0xff]  }
 0x240   : > { %v14918_v1 = vld [vmem:[%s17609_s18 + $0x1ec] ss:$16 sps:$4 sm:$0xff]   ;;  %v14920_v2 = vld [vmem:[%s17609_s18 + $0x1e0] ss:$16 sps:$4 sm:$0xff]   ;;  %v14921_v3 = vld [vmem:[%s17609_s18 + $0x1e8] ss:$16 sps:$4 sm:$0xff]  }
 0x241   : > { %9774 = vmatpush1.bf16.msra.mxu0 %v14860_v23  ;;  %10462 = vmatpush1.bf16.msra.mxu1 %v14861_v24  ;;  %v14924_v4 = vld [vmem:[%s17609_s18 + $0x204] ss:$16 sps:$4 sm:$0xff]   ;;  %v14927_v5 = vld [vmem:[%s17609_s18 + $0x20c] ss:$16 sps:$4 sm:$0xff]   ;;  %v14922_v7 = vld [vmem:[%s17609_s18 + $0x200] ss:$16 sps:$4 sm:$0xff]  }
 0x242   : > { %9775 = vmatprep.subr.bf16.mxu0 %v14862_v25  ;;  %10463 = vmatprep.subr.bf16.mxu1 %v14864_v26  ;;  %v14925_v8 = vld [vmem:[%s17609_s18 + $0x208] ss:$16 sps:$4 sm:$0xff]   ;;  %v14930_v9 = vld [vmem:[%s17609_s18 + $0x224] ss:$16 sps:$4 sm:$0xff]   ;;  %v14933_v10 = vld [vmem:[%s17609_s18 + $0x22c] ss:$16 sps:$4 sm:$0xff]  }
 0x243   : > { %v14928_v11 = vld [vmem:[%s17609_s18 + $0x220] ss:$16 sps:$4 sm:$0xff]   ;;  %v14931_v12 = vld [vmem:[%s17609_s18 + $0x228] ss:$16 sps:$4 sm:$0xff]   ;;  %v14936_v13 = vld [vmem:[%s17609_s18 + $0x244] ss:$16 sps:$4 sm:$0xff]  }
 0x244   : > { %v14939_v14 = vld [vmem:[%s17609_s18 + $0x24c] ss:$16 sps:$4 sm:$0xff]   ;;  %v14934_v15 = vld [vmem:[%s17609_s18 + $0x240] ss:$16 sps:$4 sm:$0xff]   ;;  %v14937_v16 = vld [vmem:[%s17609_s18 + $0x248] ss:$16 sps:$4 sm:$0xff]  }
 0x245   : > { %9776 = vmatpush1.bf16.msra.mxu0 %v14866_v27  ;;  %10464 = vmatpush1.bf16.msra.mxu1 %v14867_v28  ;;  %v14942_v17 = vld [vmem:[%s17609_s18 + $0x264] ss:$16 sps:$4 sm:$0xff]   ;;  %v14945_v18 = vld [vmem:[%s17609_s18 + $0x26c] ss:$16 sps:$4 sm:$0xff]   ;;  %v14940_v19 = vld [vmem:[%s17609_s18 + $0x260] ss:$16 sps:$4 sm:$0xff]  }
 0x246   : > { %9777 = vmatprep.subr.bf16.mxu0 %v14868_v29  ;;  %10465 = vmatprep.subr.bf16.mxu1 %v14870_v30  ;;  %v14943_v20 = vld [vmem:[%s17609_s18 + $0x268] ss:$16 sps:$4 sm:$0xff]   ;;  %v14948_v21 = vld [vmem:[%s17609_s18 + $0x284] ss:$16 sps:$4 sm:$0xff]   ;;  %v14951_v22 = vld [vmem:[%s17609_s18 + $0x28c] ss:$16 sps:$4 sm:$0xff]  }
 0x247   : > { %v14946_v23 = vld [vmem:[%s17609_s18 + $0x280] ss:$16 sps:$4 sm:$0xff]   ;;  %v14949_v24 = vld [vmem:[%s17609_s18 + $0x288] ss:$16 sps:$4 sm:$0xff]   ;;  %v14954_v25 = vld [vmem:[%s17609_s18 + $0x2a4] ss:$16 sps:$4 sm:$0xff]  }
 0x248   : > { %v14957_v26 = vld [vmem:[%s17609_s18 + $0x2ac] ss:$16 sps:$4 sm:$0xff]   ;;  %v14952_v27 = vld [vmem:[%s17609_s18 + $0x2a0] ss:$16 sps:$4 sm:$0xff]   ;;  %v14955_v28 = vld [vmem:[%s17609_s18 + $0x2a8] ss:$16 sps:$4 sm:$0xff]  }
 0x249   : > { %9778 = vmatpush1.bf16.msra.mxu0 %v14872_v31  ;;  %10466 = vmatpush1.bf16.msra.mxu1 %v14873_v32  ;;  %v14960_v29 = vld [vmem:[%s17609_s18 + $0x2c4] ss:$16 sps:$4 sm:$0xff]   ;;  %v14963_v30 = vld [vmem:[%s17609_s18 + $0x2cc] ss:$16 sps:$4 sm:$0xff]   ;;  %v14979_v47 = vld [vmem:[%s17609_s18 + $0x328] ss:$16 sps:$4 sm:$0xff]  }
 0x24a   : > { %9779 = vmatprep.subr.bf16.mxu0 %v14874_v33  ;;  %10467 = vmatprep.subr.bf16.mxu1 %v14876_v34  ;;  %v17711_v31 = vld [vmem:[%s19212_s0 + $0x8] sm:$0xff]  ;;  %v14958_v33 = vld [vmem:[%s17609_s18 + $0x2c0] ss:$16 sps:$4 sm:$0xff]   ;;  %v14984_v48 = vld [vmem:[%s17609_s18 + $0x344] ss:$16 sps:$4 sm:$0xff]  }
 0x24b   : > { %v17716_v32 = vld [vmem:[%s19212_s0 + $0x88] sm:$0xff] }
 0x24c   : > { %v14961_v34 = vld [vmem:[%s17609_s18 + $0x2c8] ss:$16 sps:$4 sm:$0xff]  }
 0x24d   : > { %9780 = vmatpush1.bf16.msra.mxu0 %v14878_v35  ;;  %10468 = vmatpush1.bf16.msra.mxu1 %v14879_v36  ;;  %v13300_v35 = vcombine.high %v17711_v31, %v17716_v32  ;;  %v14966_v36 = vld [vmem:[%s17609_s18 + $0x2e4] ss:$16 sps:$4 sm:$0xff]   ;;  %v14985_v51 = vld [vmem:[%s17609_s18 + $0x348] ss:$16 sps:$4 sm:$0xff]  }
 0x24e   : > { %9781 = vmatprep.subr.bf16.mxu0 %v14880_v37  ;;  %10469 = vmatprep.subr.bf16.mxu1 %v14882_v38  ;;  %v14969_v37 = vld [vmem:[%s17609_s18 + $0x2ec] ss:$16 sps:$4 sm:$0xff]   ;;  %v14964_v38 = vld [vmem:[%s17609_s18 + $0x2e0] ss:$16 sps:$4 sm:$0xff]  }
 0x251   : > { %9782 = vmatpush1.bf16.msra.mxu0 %v14884_v39  ;;  %10470 = vmatpush1.bf16.msra.mxu1 %v14885_v40  ;;  %v14967_v39 = vld [vmem:[%s17609_s18 + $0x2e8] ss:$16 sps:$4 sm:$0xff]   ;;  %v14972_v40 = vld [vmem:[%s17609_s18 + $0x304] ss:$16 sps:$4 sm:$0xff]  }
 0x252   : > { %9783 = vmatprep.subr.bf16.mxu0 %v14886_v41  ;;  %10471 = vmatprep.subr.bf16.mxu1 %v14888_v42  ;;  %v14975_v41 = vld [vmem:[%s17609_s18 + $0x30c] ss:$16 sps:$4 sm:$0xff]   ;;  %v14970_v42 = vld [vmem:[%s17609_s18 + $0x300] ss:$16 sps:$4 sm:$0xff]  }
 0x255   : > { %9784 = vmatpush1.bf16.msra.mxu0 %v14890_v43  ;;  %10472 = vmatpush1.bf16.msra.mxu1 %v14891_v44  ;;  %v14973_v43 = vld [vmem:[%s17609_s18 + $0x308] ss:$16 sps:$4 sm:$0xff]   ;;  %v14978_v44 = vld [vmem:[%s17609_s18 + $0x324] ss:$16 sps:$4 sm:$0xff]  }
 0x256   : > { %9785 = vmatprep.subr.bf16.mxu0 %v14892_v45  ;;  %10473 = vmatprep.subr.bf16.mxu1 %v14894_v46  ;;  %v14981_v45 = vld [vmem:[%s17609_s18 + $0x32c] ss:$16 sps:$4 sm:$0xff]   ;;  %v14976_v46 = vld [vmem:[%s17609_s18 + $0x320] ss:$16 sps:$4 sm:$0xff]  }
 0x259   : > { %9786 = vmatpush1.bf16.msra.mxu0 %v14896_v49  ;;  %10474 = vmatpush1.bf16.msra.mxu1 %v14897_v50  ;;  %v14987_v49 = vld [vmem:[%s17609_s18 + $0x34c] ss:$16 sps:$4 sm:$0xff]   ;;  %v14982_v50 = vld [vmem:[%s17609_s18 + $0x340] ss:$16 sps:$4 sm:$0xff]  }
 0x25a   : > { %9787 = vmatprep.subr.bf16.mxu0 %v14898_v52  ;;  %10475 = vmatprep.subr.bf16.mxu1 %v14900_v53  ;;  %v14990_v52 = vld [vmem:[%s17609_s18 + $0x364] ss:$16 sps:$4 sm:$0xff]   ;;  %v14993_v53 = vld [vmem:[%s17609_s18 + $0x36c] ss:$16 sps:$4 sm:$0xff]  }
 0x25d   : > { %9788 = vmatpush1.bf16.msra.mxu0 %v14902_v54  ;;  %10476 = vmatpush1.bf16.msra.mxu1 %v14903_v55  ;;  %v14988_v54 = vld [vmem:[%s17609_s18 + $0x360] ss:$16 sps:$4 sm:$0xff]   ;;  %v14991_v55 = vld [vmem:[%s17609_s18 + $0x368] ss:$16 sps:$4 sm:$0xff]  }
 0x25e   : > { %9789 = vmatprep.subr.bf16.mxu0 %v14904_v56  ;;  %10477 = vmatprep.subr.bf16.mxu1 %v14906_v57  ;;  %v14996_v56 = vld [vmem:[%s17609_s18 + $0x384] ss:$16 sps:$4 sm:$0xff]   ;;  %v14999_v57 = vld [vmem:[%s17609_s18 + $0x38c] ss:$16 sps:$4 sm:$0xff]  }
 0x261   : > { %9790 = vmatpush1.bf16.msra.mxu0 %v14908_v58  ;;  %10478 = vmatpush1.bf16.msra.mxu1 %v14909_v59  ;;  %v14994_v58 = vld [vmem:[%s17609_s18 + $0x380] ss:$16 sps:$4 sm:$0xff]   ;;  %v14997_v59 = vld [vmem:[%s17609_s18 + $0x388] ss:$16 sps:$4 sm:$0xff]  }
 0x262   : > { %9791 = vmatprep.subr.bf16.mxu0 %v14910_v60  ;;  %10479 = vmatprep.subr.bf16.mxu1 %v14912_v61  ;;  %v15002_v60 = vld [vmem:[%s17609_s18 + $0x3a4] ss:$16 sps:$4 sm:$0xff]   ;;  %v15005_v61 = vld [vmem:[%s17609_s18 + $0x3ac] ss:$16 sps:$4 sm:$0xff]  }
 0x265   : > { %9792 = vmatpush1.bf16.msra.mxu0 %v14914_v62  ;;  %10480 = vmatpush1.bf16.msra.mxu1 %v14915_v63  ;;  %v15000_v62 = vld [vmem:[%s17609_s18 + $0x3a0] ss:$16 sps:$4 sm:$0xff]   ;;  %v15003_v63 = vld [vmem:[%s17609_s18 + $0x3a8] ss:$16 sps:$4 sm:$0xff]  }
 0x266   : > { %9793 = vmatprep.subr.bf16.mxu0 %v14916_v0  ;;  %10481 = vmatprep.subr.bf16.mxu1 %v14918_v1  ;;  %v15008_v0 = vld [vmem:[%s17609_s18 + $0x3c4] ss:$16 sps:$4 sm:$0xff]   ;;  %v15011_v1 = vld [vmem:[%s17609_s18 + $0x3cc] ss:$16 sps:$4 sm:$0xff]  }
 0x269   : > { %9794 = vmatpush1.bf16.msra.mxu0 %v14920_v2  ;;  %10482 = vmatpush1.bf16.msra.mxu1 %v14921_v3  ;;  %v15006_v2 = vld [vmem:[%s17609_s18 + $0x3c0] ss:$16 sps:$4 sm:$0xff]   ;;  %v15009_v3 = vld [vmem:[%s17609_s18 + $0x3c8] ss:$16 sps:$4 sm:$0xff]  }
 0x26a   : > { %9806 = vmatprep.subr.bf16.mxu0 %v14924_v4  ;;  %10494 = vmatprep.subr.bf16.mxu1 %v14927_v5  ;;  %v15014_v4 = vld [vmem:[%s17609_s18 + $0x3e4] ss:$16 sps:$4 sm:$0xff]   ;;  %v15017_v5 = vld [vmem:[%s17609_s18 + $0x3ec] ss:$16 sps:$4 sm:$0xff]  }
 0x26c   : > { %9796 = vmatmul.mubr.bf16.vlgmr.msra.gmra.mrb[0].mxu0 %v13297_v6  ;;  %10484 = vmatmul.mubr.bf16.vlgmr.msra.gmra.mrb[0].mxu1 %v13297_v6  ;;  %v15012_v6 = vld [vmem:[%s17609_s18 + $0x3e0] ss:$16 sps:$4 sm:$0xff]  }
 0x26d   : > { %9807 = vmatpush1.bf16.msra.mxu0 %v14922_v7  ;;  %10495 = vmatpush1.bf16.msra.mxu1 %v14925_v8  ;;  %v15015_v7 = vld [vmem:[%s17609_s18 + $0x3e8] ss:$16 sps:$4 sm:$0xff]   ;;  %v15020_v8 = vld [vmem:[%s17609_s18 + $0x404] ss:$16 sps:$4 sm:$0xff]  }
 0x26e   : > { %9808 = vmatprep.subr.bf16.mxu0 %v14930_v9  ;;  %10496 = vmatprep.subr.bf16.mxu1 %v14933_v10  ;;  %v15023_v9 = vld [vmem:[%s17609_s18 + $0x40c] ss:$16 sps:$4 sm:$0xff]   ;;  %v13299_v10 = vcombine.low %v17711_v31, %v17716_v32  ;;  %v15045_v31 = vld [vmem:[%s17609_s18 + $0x488] ss:$16 sps:$4 sm:$0xff]   ;;  %v15050_v32 = vld [vmem:[%s17609_s18 + $0x4a4] ss:$16 sps:$4 sm:$0xff]  }
 0x26f   : > { %9838 = vmatprep.mubr.bf16.mxu0 %v13300_v35  ;;  %10526 = vmatprep.mubr.bf16.mxu1 %v13300_v35  ;;  %v15051_v35 = vld [vmem:[%s17609_s18 + $0x4a8] ss:$16 sps:$4 sm:$0xff]  }
 0x271   : > { %9809 = vmatpush1.bf16.msra.mxu0 %v14928_v11  ;;  %10497 = vmatpush1.bf16.msra.mxu1 %v14931_v12  ;;  %v15018_v11 = vld [vmem:[%s17609_s18 + $0x400] ss:$16 sps:$4 sm:$0xff]   ;;  %v15021_v12 = vld [vmem:[%s17609_s18 + $0x408] ss:$16 sps:$4 sm:$0xff]  }
 0x272   : > { %9810 = vmatprep.subr.bf16.mxu0 %v14936_v13  ;;  %10498 = vmatprep.subr.bf16.mxu1 %v14939_v14  ;;  %v15026_v13 = vld [vmem:[%s17609_s18 + $0x424] ss:$16 sps:$4 sm:$0xff]   ;;  %v15029_v14 = vld [vmem:[%s17609_s18 + $0x42c] ss:$16 sps:$4 sm:$0xff]  }
 0x275   : > { %9811 = vmatpush1.bf16.msra.mxu0 %v14934_v15  ;;  %10499 = vmatpush1.bf16.msra.mxu1 %v14937_v16  ;;  %v17769_v15 = vld [vmem:[%s19212_s0 + $0x10] sm:$0xff] }
 0x276   : > { %9812 = vmatprep.subr.bf16.mxu0 %v14942_v17  ;;  %10500 = vmatprep.subr.bf16.mxu1 %v14945_v18  ;;  %v17774_v16 = vld [vmem:[%s19212_s0 + $0x90] sm:$0xff] }
 0x277   : > { %v13302_v17 = vcombine.high %v17769_v15, %v17774_v16  ;;  %v15024_v18 = vld [vmem:[%s17609_s18 + $0x420] ss:$16 sps:$4 sm:$0xff]  }
 0x279   : > { %9813 = vmatpush1.bf16.msra.mxu0 %v14940_v19  ;;  %10501 = vmatpush1.bf16.msra.mxu1 %v14943_v20  ;;  %v15027_v19 = vld [vmem:[%s17609_s18 + $0x428] ss:$16 sps:$4 sm:$0xff]   ;;  %v15032_v20 = vld [vmem:[%s17609_s18 + $0x444] ss:$16 sps:$4 sm:$0xff]  }
 0x27a   : > { %9814 = vmatprep.subr.bf16.mxu0 %v14948_v21  ;;  %10502 = vmatprep.subr.bf16.mxu1 %v14951_v22  ;;  %v15035_v21 = vld [vmem:[%s17609_s18 + $0x44c] ss:$16 sps:$4 sm:$0xff]   ;;  %v15030_v22 = vld [vmem:[%s17609_s18 + $0x440] ss:$16 sps:$4 sm:$0xff]  }
 0x27d   : > { %9815 = vmatpush1.bf16.msra.mxu0 %v14946_v23  ;;  %10503 = vmatpush1.bf16.msra.mxu1 %v14949_v24  ;;  %v15033_v23 = vld [vmem:[%s17609_s18 + $0x448] ss:$16 sps:$4 sm:$0xff]   ;;  %v15038_v24 = vld [vmem:[%s17609_s18 + $0x464] ss:$16 sps:$4 sm:$0xff]  }
 0x27e   : > { %9816 = vmatprep.subr.bf16.mxu0 %v14954_v25  ;;  %10504 = vmatprep.subr.bf16.mxu1 %v14957_v26  ;;  %v15041_v25 = vld [vmem:[%s17609_s18 + $0x46c] ss:$16 sps:$4 sm:$0xff]   ;;  %v15036_v26 = vld [vmem:[%s17609_s18 + $0x460] ss:$16 sps:$4 sm:$0xff]  }
 0x281   : > { %9817 = vmatpush1.bf16.msra.mxu0 %v14952_v27  ;;  %10505 = vmatpush1.bf16.msra.mxu1 %v14955_v28  ;;  %v15039_v27 = vld [vmem:[%s17609_s18 + $0x468] ss:$16 sps:$4 sm:$0xff]   ;;  %v15044_v28 = vld [vmem:[%s17609_s18 + $0x484] ss:$16 sps:$4 sm:$0xff]  }
 0x282   : > { %9818 = vmatprep.subr.bf16.mxu0 %v14960_v29  ;;  %10506 = vmatprep.subr.bf16.mxu1 %v14963_v30  ;;  %v15047_v29 = vld [vmem:[%s17609_s18 + $0x48c] ss:$16 sps:$4 sm:$0xff]   ;;  %v15042_v30 = vld [vmem:[%s17609_s18 + $0x480] ss:$16 sps:$4 sm:$0xff]  }
 0x285   : > { %9819 = vmatpush1.bf16.msra.mxu0 %v14958_v33  ;;  %10507 = vmatpush1.bf16.msra.mxu1 %v14961_v34  ;;  %v15053_v33 = vld [vmem:[%s17609_s18 + $0x4ac] ss:$16 sps:$4 sm:$0xff]   ;;  %v15048_v34 = vld [vmem:[%s17609_s18 + $0x4a0] ss:$16 sps:$4 sm:$0xff]  }
 0x286   : > { %9820 = vmatprep.subr.bf16.mxu0 %v14966_v36  ;;  %10508 = vmatprep.subr.bf16.mxu1 %v14969_v37  ;;  %v15056_v36 = vld [vmem:[%s17609_s18 + $0x4c4] ss:$16 sps:$4 sm:$0xff]   ;;  %v15059_v37 = vld [vmem:[%s17609_s18 + $0x4cc] ss:$16 sps:$4 sm:$0xff]  }
 0x289   : > { %9821 = vmatpush1.bf16.msra.mxu0 %v14964_v38  ;;  %10509 = vmatpush1.bf16.msra.mxu1 %v14967_v39  ;;  %v15054_v38 = vld [vmem:[%s17609_s18 + $0x4c0] ss:$16 sps:$4 sm:$0xff]   ;;  %v15057_v39 = vld [vmem:[%s17609_s18 + $0x4c8] ss:$16 sps:$4 sm:$0xff]  }
 0x28a   : > { %9822 = vmatprep.subr.bf16.mxu0 %v14972_v40  ;;  %10510 = vmatprep.subr.bf16.mxu1 %v14975_v41  ;;  %v15062_v40 = vld [vmem:[%s17609_s18 + $0x4e4] ss:$16 sps:$4 sm:$0xff]   ;;  %v15065_v41 = vld [vmem:[%s17609_s18 + $0x4ec] ss:$16 sps:$4 sm:$0xff]  }
 0x28d   : > { %9823 = vmatpush1.bf16.msra.mxu0 %v14970_v42  ;;  %10511 = vmatpush1.bf16.msra.mxu1 %v14973_v43  ;;  %v15060_v42 = vld [vmem:[%s17609_s18 + $0x4e0] ss:$16 sps:$4 sm:$0xff]   ;;  %v15063_v43 = vld [vmem:[%s17609_s18 + $0x4e8] ss:$16 sps:$4 sm:$0xff]  }
 0x28e   : > { %9824 = vmatprep.subr.bf16.mxu0 %v14978_v44  ;;  %10512 = vmatprep.subr.bf16.mxu1 %v14981_v45  ;;  %v15068_v44 = vld [vmem:[%s17609_s18 + $0x504] ss:$16 sps:$4 sm:$0xff]   ;;  %v15071_v45 = vld [vmem:[%s17609_s18 + $0x50c] ss:$16 sps:$4 sm:$0xff]  }
 0x291   : > { %9825 = vmatpush1.bf16.msra.mxu0 %v14976_v46  ;;  %10513 = vmatpush1.bf16.msra.mxu1 %v14979_v47  ;;  %v15066_v46 = vld [vmem:[%s17609_s18 + $0x500] ss:$16 sps:$4 sm:$0xff]   ;;  %v15069_v47 = vld [vmem:[%s17609_s18 + $0x508] ss:$16 sps:$4 sm:$0xff]  }
 0x292   : > { %9826 = vmatprep.subr.bf16.mxu0 %v14984_v48  ;;  %10514 = vmatprep.subr.bf16.mxu1 %v14987_v49  ;;  %v15074_v48 = vld [vmem:[%s17609_s18 + $0x524] ss:$16 sps:$4 sm:$0xff]   ;;  %v15077_v49 = vld [vmem:[%s17609_s18 + $0x52c] ss:$16 sps:$4 sm:$0xff]  }
 0x295   : > { %9827 = vmatpush1.bf16.msra.mxu0 %v14982_v50  ;;  %10515 = vmatpush1.bf16.msra.mxu1 %v14985_v51  ;;  %v15072_v50 = vld [vmem:[%s17609_s18 + $0x520] ss:$16 sps:$4 sm:$0xff]   ;;  %v15075_v51 = vld [vmem:[%s17609_s18 + $0x528] ss:$16 sps:$4 sm:$0xff]  }
 0x296   : > { %9828 = vmatprep.subr.bf16.mxu0 %v14990_v52  ;;  %10516 = vmatprep.subr.bf16.mxu1 %v14993_v53  ;;  %v15080_v52 = vld [vmem:[%s17609_s18 + $0x544] ss:$16 sps:$4 sm:$0xff]   ;;  %v15083_v53 = vld [vmem:[%s17609_s18 + $0x54c] ss:$16 sps:$4 sm:$0xff]  }
 0x299   : > { %9829 = vmatpush1.bf16.msra.mxu0 %v14988_v54  ;;  %10517 = vmatpush1.bf16.msra.mxu1 %v14991_v55  ;;  %v15078_v54 = vld [vmem:[%s17609_s18 + $0x540] ss:$16 sps:$4 sm:$0xff]   ;;  %v15081_v55 = vld [vmem:[%s17609_s18 + $0x548] ss:$16 sps:$4 sm:$0xff]  }
 0x29a   : > { %9830 = vmatprep.subr.bf16.mxu0 %v14996_v56  ;;  %10518 = vmatprep.subr.bf16.mxu1 %v14999_v57  ;;  %v15086_v56 = vld [vmem:[%s17609_s18 + $0x564] ss:$16 sps:$4 sm:$0xff]   ;;  %v15089_v57 = vld [vmem:[%s17609_s18 + $0x56c] ss:$16 sps:$4 sm:$0xff]  }
 0x29d   : > { %9831 = vmatpush1.bf16.msra.mxu0 %v14994_v58  ;;  %10519 = vmatpush1.bf16.msra.mxu1 %v14997_v59  ;;  %v15084_v58 = vld [vmem:[%s17609_s18 + $0x560] ss:$16 sps:$4 sm:$0xff]   ;;  %v15087_v59 = vld [vmem:[%s17609_s18 + $0x568] ss:$16 sps:$4 sm:$0xff]  }
 0x29e   : > { %9832 = vmatprep.subr.bf16.mxu0 %v15002_v60  ;;  %10520 = vmatprep.subr.bf16.mxu1 %v15005_v61  ;;  %v15092_v60 = vld [vmem:[%s17609_s18 + $0x584] ss:$16 sps:$4 sm:$0xff]   ;;  %v15095_v61 = vld [vmem:[%s17609_s18 + $0x58c] ss:$16 sps:$4 sm:$0xff]  }
 0x2a1   : > { %9833 = vmatpush1.bf16.msra.mxu0 %v15000_v62  ;;  %10521 = vmatpush1.bf16.msra.mxu1 %v15003_v63  ;;  %v15090_v62 = vld [vmem:[%s17609_s18 + $0x580] ss:$16 sps:$4 sm:$0xff]   ;;  %v15093_v63 = vld [vmem:[%s17609_s18 + $0x588] ss:$16 sps:$4 sm:$0xff]  }
 0x2a2   : > { %9834 = vmatprep.subr.bf16.mxu0 %v15008_v0  ;;  %10522 = vmatprep.subr.bf16.mxu1 %v15011_v1  ;;  %v15098_v0 = vld [vmem:[%s17609_s18 + $0x5a4] ss:$16 sps:$4 sm:$0xff]   ;;  %v15101_v1 = vld [vmem:[%s17609_s18 + $0x5ac] ss:$16 sps:$4 sm:$0xff]  }
 0x2a5   : > { %9835 = vmatpush1.bf16.msra.mxu0 %v15006_v2  ;;  %10523 = vmatpush1.bf16.msra.mxu1 %v15009_v3  ;;  %v15096_v2 = vld [vmem:[%s17609_s18 + $0x5a0] ss:$16 sps:$4 sm:$0xff]   ;;  %v15099_v3 = vld [vmem:[%s17609_s18 + $0x5a8] ss:$16 sps:$4 sm:$0xff]  }
 0x2a6   : > { %9836 = vmatprep.subr.bf16.mxu0 %v15014_v4  ;;  %10524 = vmatprep.subr.bf16.mxu1 %v15017_v5  ;;  %v15104_v4 = vld [vmem:[%s17609_s18 + $0x5c4] ss:$16 sps:$4 sm:$0xff]   ;;  %v15107_v5 = vld [vmem:[%s17609_s18 + $0x5cc] ss:$16 sps:$4 sm:$0xff]  }
 0x2a9   : > { %9837 = vmatpush1.bf16.msra.mxu0 %v15012_v6  ;;  %10525 = vmatpush1.bf16.msra.mxu1 %v15015_v7  ;;  %v15102_v6 = vld [vmem:[%s17609_s18 + $0x5c0] ss:$16 sps:$4 sm:$0xff]   ;;  %v15105_v7 = vld [vmem:[%s17609_s18 + $0x5c8] ss:$16 sps:$4 sm:$0xff]  }
 0x2aa   : > { %9849 = vmatprep.subr.bf16.mxu0 %v15020_v8  ;;  %10537 = vmatprep.subr.bf16.mxu1 %v15023_v9  ;;  %v15110_v8 = vld [vmem:[%s17609_s18 + $0x5e4] ss:$16 sps:$4 sm:$0xff]   ;;  %v15113_v9 = vld [vmem:[%s17609_s18 + $0x5ec] ss:$16 sps:$4 sm:$0xff]  }
 0x2ac   : > { %9839 = vmatmul.mubr.bf16.vlgmr.msra.gmra.mrb[0].mxu0 %v13299_v10  ;;  %10527 = vmatmul.mubr.bf16.vlgmr.msra.gmra.mrb[0].mxu1 %v13299_v10  ;;  %v15108_v10 = vld [vmem:[%s17609_s18 + $0x5e0] ss:$16 sps:$4 sm:$0xff]  }
 0x2ad   : > { %9850 = vmatpush1.bf16.msra.mxu0 %v15018_v11  ;;  %10538 = vmatpush1.bf16.msra.mxu1 %v15021_v12  ;;  %v15111_v11 = vld [vmem:[%s17609_s18 + $0x5e8] ss:$16 sps:$4 sm:$0xff]   ;;  %v15116_v12 = vld [vmem:[%s17609_s18 + $0x604] ss:$16 sps:$4 sm:$0xff]  }
 0x2ae   : > { %9851 = vmatprep.subr.bf16.mxu0 %v15026_v13  ;;  %10539 = vmatprep.subr.bf16.mxu1 %v15029_v14  ;;  %v15119_v13 = vld [vmem:[%s17609_s18 + $0x60c] ss:$16 sps:$4 sm:$0xff]   ;;  %v15114_v14 = vld [vmem:[%s17609_s18 + $0x600] ss:$16 sps:$4 sm:$0xff]  }
 0x2af   : > { %9881 = vmatprep.mubr.bf16.mxu0 %v13302_v17  ;;  %10569 = vmatprep.mubr.bf16.mxu1 %v13302_v17  ;;  %v15117_v17 = vld [vmem:[%s17609_s18 + $0x608] ss:$16 sps:$4 sm:$0xff]  }
 0x2b1   : > { %9852 = vmatpush1.bf16.msra.mxu0 %v15024_v18  ;;  %10540 = vmatpush1.bf16.msra.mxu1 %v15027_v19  ;;  %v13301_v18 = vcombine.low %v17769_v15, %v17774_v16  ;;  %v17845_v19 = vld [vmem:[%s19212_s0 + $0x18] sm:$0xff] }
 0x2b2   : > { %9853 = vmatprep.subr.bf16.mxu0 %v15032_v20  ;;  %10541 = vmatprep.subr.bf16.mxu1 %v15035_v21  ;;  %v17850_v20 = vld [vmem:[%s19212_s0 + $0x98] sm:$0xff]  ;;  %v15122_v21 = vld [vmem:[%s17609_s18 + $0x624] ss:$16 sps:$4 sm:$0xff]  }
 0x2b3   : > { %v15125_v15 = vld [vmem:[%s17609_s18 + $0x62c] ss:$16 sps:$4 sm:$0xff]   ;;  %v13304_v16 = vcombine.high %v17845_v19, %v17850_v20 }
 0x2b5   : > { %9854 = vmatpush1.bf16.msra.mxu0 %v15030_v22  ;;  %10542 = vmatpush1.bf16.msra.mxu1 %v15033_v23  ;;  %v15120_v22 = vld [vmem:[%s17609_s18 + $0x620] ss:$16 sps:$4 sm:$0xff]   ;;  %v15123_v23 = vld [vmem:[%s17609_s18 + $0x628] ss:$16 sps:$4 sm:$0xff]  }
 0x2b6   : > { %9855 = vmatprep.subr.bf16.mxu0 %v15038_v24  ;;  %10543 = vmatprep.subr.bf16.mxu1 %v15041_v25  ;;  %v15128_v24 = vld [vmem:[%s17609_s18 + $0x644] ss:$16 sps:$4 sm:$0xff]   ;;  %v15131_v25 = vld [vmem:[%s17609_s18 + $0x64c] ss:$16 sps:$4 sm:$0xff]  }
 0x2b9   : > { %9856 = vmatpush1.bf16.msra.mxu0 %v15036_v26  ;;  %10544 = vmatpush1.bf16.msra.mxu1 %v15039_v27  ;;  %v15126_v26 = vld [vmem:[%s17609_s18 + $0x640] ss:$16 sps:$4 sm:$0xff]   ;;  %v15129_v27 = vld [vmem:[%s17609_s18 + $0x648] ss:$16 sps:$4 sm:$0xff]  }
 0x2ba   : > { %9857 = vmatprep.subr.bf16.mxu0 %v15044_v28  ;;  %10545 = vmatprep.subr.bf16.mxu1 %v15047_v29  ;;  %v15134_v28 = vld [vmem:[%s17609_s18 + $0x664] ss:$16 sps:$4 sm:$0xff]   ;;  %v15137_v29 = vld [vmem:[%s17609_s18 + $0x66c] ss:$16 sps:$4 sm:$0xff]  }
 0x2bd   : > { %9858 = vmatpush1.bf16.msra.mxu0 %v15042_v30  ;;  %10546 = vmatpush1.bf16.msra.mxu1 %v15045_v31  ;;  %v15132_v30 = vld [vmem:[%s17609_s18 + $0x660] ss:$16 sps:$4 sm:$0xff]   ;;  %v15135_v31 = vld [vmem:[%s17609_s18 + $0x668] ss:$16 sps:$4 sm:$0xff]  }
 0x2be   : > { %9859 = vmatprep.subr.bf16.mxu0 %v15050_v32  ;;  %10547 = vmatprep.subr.bf16.mxu1 %v15053_v33  ;;  %v15140_v32 = vld [vmem:[%s17609_s18 + $0x684] ss:$16 sps:$4 sm:$0xff]   ;;  %v15143_v33 = vld [vmem:[%s17609_s18 + $0x68c] ss:$16 sps:$4 sm:$0xff]  }
 0x2c1   : > { %9860 = vmatpush1.bf16.msra.mxu0 %v15048_v34  ;;  %10548 = vmatpush1.bf16.msra.mxu1 %v15051_v35  ;;  %v15138_v34 = vld [vmem:[%s17609_s18 + $0x680] ss:$16 sps:$4 sm:$0xff]   ;;  %v15141_v35 = vld [vmem:[%s17609_s18 + $0x688] ss:$16 sps:$4 sm:$0xff]  }
 0x2c2   : > { %9861 = vmatprep.subr.bf16.mxu0 %v15056_v36  ;;  %10549 = vmatprep.subr.bf16.mxu1 %v15059_v37  ;;  %v15146_v36 = vld [vmem:[%s17609_s18 + $0x6a4] ss:$16 sps:$4 sm:$0xff]   ;;  %v15149_v37 = vld [vmem:[%s17609_s18 + $0x6ac] ss:$16 sps:$4 sm:$0xff]  }
 0x2c5   : > { %9862 = vmatpush1.bf16.msra.mxu0 %v15054_v38  ;;  %10550 = vmatpush1.bf16.msra.mxu1 %v15057_v39  ;;  %v15144_v38 = vld [vmem:[%s17609_s18 + $0x6a0] ss:$16 sps:$4 sm:$0xff]   ;;  %v15147_v39 = vld [vmem:[%s17609_s18 + $0x6a8] ss:$16 sps:$4 sm:$0xff]  }
 0x2c6   : > { %9863 = vmatprep.subr.bf16.mxu0 %v15062_v40  ;;  %10551 = vmatprep.subr.bf16.mxu1 %v15065_v41  ;;  %v15152_v40 = vld [vmem:[%s17609_s18 + $0x6c4] ss:$16 sps:$4 sm:$0xff]   ;;  %v15155_v41 = vld [vmem:[%s17609_s18 + $0x6cc] ss:$16 sps:$4 sm:$0xff]  }
 0x2c9   : > { %9864 = vmatpush1.bf16.msra.mxu0 %v15060_v42  ;;  %10552 = vmatpush1.bf16.msra.mxu1 %v15063_v43  ;;  %v15150_v42 = vld [vmem:[%s17609_s18 + $0x6c0] ss:$16 sps:$4 sm:$0xff]   ;;  %v15153_v43 = vld [vmem:[%s17609_s18 + $0x6c8] ss:$16 sps:$4 sm:$0xff]  }
 0x2ca   : > { %9865 = vmatprep.subr.bf16.mxu0 %v15068_v44  ;;  %10553 = vmatprep.subr.bf16.mxu1 %v15071_v45  ;;  %v15158_v44 = vld [vmem:[%s17609_s18 + $0x6e4] ss:$16 sps:$4 sm:$0xff]   ;;  %v15161_v45 = vld [vmem:[%s17609_s18 + $0x6ec] ss:$16 sps:$4 sm:$0xff]  }
 0x2cd   : > { %9866 = vmatpush1.bf16.msra.mxu0 %v15066_v46  ;;  %10554 = vmatpush1.bf16.msra.mxu1 %v15069_v47  ;;  %v15156_v46 = vld [vmem:[%s17609_s18 + $0x6e0] ss:$16 sps:$4 sm:$0xff]   ;;  %v15159_v47 = vld [vmem:[%s17609_s18 + $0x6e8] ss:$16 sps:$4 sm:$0xff]  }
 0x2ce   : > { %9867 = vmatprep.subr.bf16.mxu0 %v15074_v48  ;;  %10555 = vmatprep.subr.bf16.mxu1 %v15077_v49  ;;  %v15164_v48 = vld [vmem:[%s17609_s18 + $0x704] ss:$16 sps:$4 sm:$0xff]   ;;  %v15167_v49 = vld [vmem:[%s17609_s18 + $0x70c] ss:$16 sps:$4 sm:$0xff]  }
 0x2d1   : > { %9868 = vmatpush1.bf16.msra.mxu0 %v15072_v50  ;;  %10556 = vmatpush1.bf16.msra.mxu1 %v15075_v51  ;;  %v15162_v50 = vld [vmem:[%s17609_s18 + $0x700] ss:$16 sps:$4 sm:$0xff]   ;;  %v15165_v51 = vld [vmem:[%s17609_s18 + $0x708] ss:$16 sps:$4 sm:$0xff]  }
 0x2d2   : > { %9869 = vmatprep.subr.bf16.mxu0 %v15080_v52  ;;  %10557 = vmatprep.subr.bf16.mxu1 %v15083_v53  ;;  %v15170_v52 = vld [vmem:[%s17609_s18 + $0x724] ss:$16 sps:$4 sm:$0xff]   ;;  %v15173_v53 = vld [vmem:[%s17609_s18 + $0x72c] ss:$16 sps:$4 sm:$0xff]  }
 0x2d5   : > { %9870 = vmatpush1.bf16.msra.mxu0 %v15078_v54  ;;  %10558 = vmatpush1.bf16.msra.mxu1 %v15081_v55  ;;  %v15168_v54 = vld [vmem:[%s17609_s18 + $0x720] ss:$16 sps:$4 sm:$0xff]   ;;  %v15171_v55 = vld [vmem:[%s17609_s18 + $0x728] ss:$16 sps:$4 sm:$0xff]  }
 0x2d6   : > { %9871 = vmatprep.subr.bf16.mxu0 %v15086_v56  ;;  %10559 = vmatprep.subr.bf16.mxu1 %v15089_v57  ;;  %v15176_v56 = vld [vmem:[%s17609_s18 + $0x744] ss:$16 sps:$4 sm:$0xff]   ;;  %v15179_v57 = vld [vmem:[%s17609_s18 + $0x74c] ss:$16 sps:$4 sm:$0xff]  }
 0x2d9   : > { %9872 = vmatpush1.bf16.msra.mxu0 %v15084_v58  ;;  %10560 = vmatpush1.bf16.msra.mxu1 %v15087_v59  ;;  %v15174_v58 = vld [vmem:[%s17609_s18 + $0x740] ss:$16 sps:$4 sm:$0xff]   ;;  %v15177_v59 = vld [vmem:[%s17609_s18 + $0x748] ss:$16 sps:$4 sm:$0xff]  }
 0x2da   : > { %9873 = vmatprep.subr.bf16.mxu0 %v15092_v60  ;;  %10561 = vmatprep.subr.bf16.mxu1 %v15095_v61  ;;  %v15182_v60 = vld [vmem:[%s17609_s18 + $0x764] ss:$16 sps:$4 sm:$0xff]   ;;  %v15185_v61 = vld [vmem:[%s17609_s18 + $0x76c] ss:$16 sps:$4 sm:$0xff]  }
 0x2dd   : > { %9874 = vmatpush1.bf16.msra.mxu0 %v15090_v62  ;;  %10562 = vmatpush1.bf16.msra.mxu1 %v15093_v63  ;;  %v15180_v62 = vld [vmem:[%s17609_s18 + $0x760] ss:$16 sps:$4 sm:$0xff]   ;;  %v15183_v63 = vld [vmem:[%s17609_s18 + $0x768] ss:$16 sps:$4 sm:$0xff]  }
 0x2de   : > { %9875 = vmatprep.subr.bf16.mxu0 %v15098_v0  ;;  %10563 = vmatprep.subr.bf16.mxu1 %v15101_v1  ;;  %v15188_v0 = vld [vmem:[%s17609_s18 + $0x784] ss:$16 sps:$4 sm:$0xff]   ;;  %v15191_v1 = vld [vmem:[%s17609_s18 + $0x78c] ss:$16 sps:$4 sm:$0xff]  }
 0x2e1   : > { %9876 = vmatpush1.bf16.msra.mxu0 %v15096_v2  ;;  %10564 = vmatpush1.bf16.msra.mxu1 %v15099_v3  ;;  %v15186_v2 = vld [vmem:[%s17609_s18 + $0x780] ss:$16 sps:$4 sm:$0xff]   ;;  %v15189_v3 = vld [vmem:[%s17609_s18 + $0x788] ss:$16 sps:$4 sm:$0xff]  }
 0x2e2   : > { %9877 = vmatprep.subr.bf16.mxu0 %v15104_v4  ;;  %10565 = vmatprep.subr.bf16.mxu1 %v15107_v5  ;;  %v15194_v4 = vld [vmem:[%s17609_s18 + $0x7a4] ss:$16 sps:$4 sm:$0xff]   ;;  %v15197_v5 = vld [vmem:[%s17609_s18 + $0x7ac] ss:$16 sps:$4 sm:$0xff]  }
 0x2e5   : > { %9878 = vmatpush1.bf16.msra.mxu0 %v15102_v6  ;;  %10566 = vmatpush1.bf16.msra.mxu1 %v15105_v7  ;;  %v15192_v6 = vld [vmem:[%s17609_s18 + $0x7a0] ss:$16 sps:$4 sm:$0xff]   ;;  %v15195_v7 = vld [vmem:[%s17609_s18 + $0x7a8] ss:$16 sps:$4 sm:$0xff]  }
 0x2e6   : > { %9879 = vmatprep.subr.bf16.mxu0 %v15110_v8  ;;  %10567 = vmatprep.subr.bf16.mxu1 %v15113_v9  ;;  %v15200_v8 = vld [vmem:[%s17609_s18 + $0x7c4] ss:$16 sps:$4 sm:$0xff]   ;;  %v15203_v9 = vld [vmem:[%s17609_s18 + $0x7cc] ss:$16 sps:$4 sm:$0xff]  }
 0x2e9   : > { %9880 = vmatpush1.bf16.msra.mxu0 %v15108_v10  ;;  %10568 = vmatpush1.bf16.msra.mxu1 %v15111_v11  ;;  %v15198_v10 = vld [vmem:[%s17609_s18 + $0x7c0] ss:$16 sps:$4 sm:$0xff]   ;;  %v15201_v11 = vld [vmem:[%s17609_s18 + $0x7c8] ss:$16 sps:$4 sm:$0xff]  }
 0x2ea   : > { %9892 = vmatprep.subr.bf16.mxu0 %v15116_v12  ;;  %10580 = vmatprep.subr.bf16.mxu1 %v15119_v13  ;;  %v15206_v12 = vld [vmem:[%s17609_s18 + $0x7e4] ss:$16 sps:$4 sm:$0xff]   ;;  %v15209_v13 = vld [vmem:[%s17609_s18 + $0x7ec] ss:$16 sps:$4 sm:$0xff]  }
 0x2ec   : > { %9882 = vmatmul.mubr.bf16.vlgmr.msra.gmra.mrb[0].mxu0 %v13301_v18  ;;  %10570 = vmatmul.mubr.bf16.vlgmr.msra.gmra.mrb[0].mxu1 %v13301_v18  ;;  %v15212_v18 = vld [vmem:[%s17609_s18 + $0x804] ss:$16 sps:$4 sm:$0xff]  }
 0x2ed   : > { %9893 = vmatpush1.bf16.msra.mxu0 %v15114_v14  ;;  %10581 = vmatpush1.bf16.msra.mxu1 %v15117_v17  ;;  %v15204_v14 = vld [vmem:[%s17609_s18 + $0x7e0] ss:$16 sps:$4 sm:$0xff]   ;;  %v15207_v17 = vld [vmem:[%s17609_s18 + $0x7e8] ss:$16 sps:$4 sm:$0xff]  }
 0x2ee   : > { %9894 = vmatprep.subr.bf16.mxu0 %v15122_v21  ;;  %10582 = vmatprep.subr.bf16.mxu1 %v15125_v15  ;;  %v15215_v21 = vld [vmem:[%s17609_s18 + $0x80c] ss:$16 sps:$4 sm:$0xff]   ;;  %v17919_v15 = vld [vmem:[%s19212_s0 + $0x20] sm:$0xff] }
 0x2ef   : > { %9924 = vmatprep.mubr.bf16.mxu0 %v13304_v16  ;;  %10612 = vmatprep.mubr.bf16.mxu1 %v13304_v16  ;;  %v13303_v16 = vcombine.low %v17845_v19, %v17850_v20  ;;  %v15216_v20 = vld [vmem:[%s17609_s18 + $0x820] ss:$16 sps:$4 sm:$0xff]  }
 0x2f1   : > { %9895 = vmatpush1.bf16.msra.mxu0 %v15120_v22  ;;  %10583 = vmatpush1.bf16.msra.mxu1 %v15123_v23  ;;  %v17926_v22 = vld [vmem:[%s19212_s0 + $0xa0] sm:$0xff] }
 0x2f2   : > { %9896 = vmatprep.subr.bf16.mxu0 %v15128_v24  ;;  %10584 = vmatprep.subr.bf16.mxu1 %v15131_v25  ;;  %v15210_v23 = vld [vmem:[%s17609_s18 + $0x800] ss:$16 sps:$4 sm:$0xff]   ;;  %v15213_v24 = vld [vmem:[%s17609_s18 + $0x808] ss:$16 sps:$4 sm:$0xff]   ;;  %v15218_v25 = vld [vmem:[%s17609_s18 + $0x824] ss:$16 sps:$4 sm:$0xff]   ;;  %v13306_v19 = vcombine.high %v17919_v15, %v17926_v22 }
 0x2f5   : > { %9897 = vmatpush1.bf16.msra.mxu0 %v15126_v26  ;;  %10585 = vmatpush1.bf16.msra.mxu1 %v15129_v27  ;;  %v15221_v26 = vld [vmem:[%s17609_s18 + $0x82c] ss:$16 sps:$4 sm:$0xff]   ;;  %v15219_v27 = vld [vmem:[%s17609_s18 + $0x828] ss:$16 sps:$4 sm:$0xff]  }
 0x2f6   : > { %9898 = vmatprep.subr.bf16.mxu0 %v15134_v28  ;;  %10586 = vmatprep.subr.bf16.mxu1 %v15137_v29  ;;  %v15224_v28 = vld [vmem:[%s17609_s18 + $0x844] ss:$16 sps:$4 sm:$0xff]   ;;  %v15227_v29 = vld [vmem:[%s17609_s18 + $0x84c] ss:$16 sps:$4 sm:$0xff]  }
 0x2f9   : > { %9899 = vmatpush1.bf16.msra.mxu0 %v15132_v30  ;;  %10587 = vmatpush1.bf16.msra.mxu1 %v15135_v31  ;;  %v15222_v30 = vld [vmem:[%s17609_s18 + $0x840] ss:$16 sps:$4 sm:$0xff]   ;;  %v15225_v31 = vld [vmem:[%s17609_s18 + $0x848] ss:$16 sps:$4 sm:$0xff]  }
 0x2fa   : > { %9900 = vmatprep.subr.bf16.mxu0 %v15140_v32  ;;  %10588 = vmatprep.subr.bf16.mxu1 %v15143_v33  ;;  %v15230_v32 = vld [vmem:[%s17609_s18 + $0x864] ss:$16 sps:$4 sm:$0xff]   ;;  %v15233_v33 = vld [vmem:[%s17609_s18 + $0x86c] ss:$16 sps:$4 sm:$0xff]  }
 0x2fd   : > { %9901 = vmatpush1.bf16.msra.mxu0 %v15138_v34  ;;  %10589 = vmatpush1.bf16.msra.mxu1 %v15141_v35  ;;  %v15228_v34 = vld [vmem:[%s17609_s18 + $0x860] ss:$16 sps:$4 sm:$0xff]   ;;  %v15231_v35 = vld [vmem:[%s17609_s18 + $0x868] ss:$16 sps:$4 sm:$0xff]  }
 0x2fe   : > { %9902 = vmatprep.subr.bf16.mxu0 %v15146_v36  ;;  %10590 = vmatprep.subr.bf16.mxu1 %v15149_v37  ;;  %v15236_v36 = vld [vmem:[%s17609_s18 + $0x884] ss:$16 sps:$4 sm:$0xff]   ;;  %v15239_v37 = vld [vmem:[%s17609_s18 + $0x88c] ss:$16 sps:$4 sm:$0xff]  }
 0x301   : > { %9903 = vmatpush1.bf16.msra.mxu0 %v15144_v38  ;;  %10591 = vmatpush1.bf16.msra.mxu1 %v15147_v39  ;;  %v15234_v38 = vld [vmem:[%s17609_s18 + $0x880] ss:$16 sps:$4 sm:$0xff]   ;;  %v15237_v39 = vld [vmem:[%s17609_s18 + $0x888] ss:$16 sps:$4 sm:$0xff]  }
 0x302   : > { %9904 = vmatprep.subr.bf16.mxu0 %v15152_v40  ;;  %10592 = vmatprep.subr.bf16.mxu1 %v15155_v41  ;;  %v15242_v40 = vld [vmem:[%s17609_s18 + $0x8a4] ss:$16 sps:$4 sm:$0xff]   ;;  %v15245_v41 = vld [vmem:[%s17609_s18 + $0x8ac] ss:$16 sps:$4 sm:$0xff]  }
 0x305   : > { %9905 = vmatpush1.bf16.msra.mxu0 %v15150_v42  ;;  %10593 = vmatpush1.bf16.msra.mxu1 %v15153_v43  ;;  %v15240_v42 = vld [vmem:[%s17609_s18 + $0x8a0] ss:$16 sps:$4 sm:$0xff]   ;;  %v15243_v43 = vld [vmem:[%s17609_s18 + $0x8a8] ss:$16 sps:$4 sm:$0xff]  }
 0x306   : > { %9906 = vmatprep.subr.bf16.mxu0 %v15158_v44  ;;  %10594 = vmatprep.subr.bf16.mxu1 %v15161_v45  ;;  %v15248_v44 = vld [vmem:[%s17609_s18 + $0x8c4] ss:$16 sps:$4 sm:$0xff]   ;;  %v15251_v45 = vld [vmem:[%s17609_s18 + $0x8cc] ss:$16 sps:$4 sm:$0xff]  }
 0x309   : > { %9907 = vmatpush1.bf16.msra.mxu0 %v15156_v46  ;;  %10595 = vmatpush1.bf16.msra.mxu1 %v15159_v47  ;;  %v15246_v46 = vld [vmem:[%s17609_s18 + $0x8c0] ss:$16 sps:$4 sm:$0xff]   ;;  %v15249_v47 = vld [vmem:[%s17609_s18 + $0x8c8] ss:$16 sps:$4 sm:$0xff]  }
 0x30a   : > { %9908 = vmatprep.subr.bf16.mxu0 %v15164_v48  ;;  %10596 = vmatprep.subr.bf16.mxu1 %v15167_v49  ;;  %v15254_v48 = vld [vmem:[%s17609_s18 + $0x8e4] ss:$16 sps:$4 sm:$0xff]   ;;  %v15257_v49 = vld [vmem:[%s17609_s18 + $0x8ec] ss:$16 sps:$4 sm:$0xff]  }
 0x30d   : > { %9909 = vmatpush1.bf16.msra.mxu0 %v15162_v50  ;;  %10597 = vmatpush1.bf16.msra.mxu1 %v15165_v51  ;;  %v15252_v50 = vld [vmem:[%s17609_s18 + $0x8e0] ss:$16 sps:$4 sm:$0xff]   ;;  %v15255_v51 = vld [vmem:[%s17609_s18 + $0x8e8] ss:$16 sps:$4 sm:$0xff]  }
 0x30e   : > { %9910 = vmatprep.subr.bf16.mxu0 %v15170_v52  ;;  %10598 = vmatprep.subr.bf16.mxu1 %v15173_v53  ;;  %v15260_v52 = vld [vmem:[%s17609_s18 + $0x904] ss:$16 sps:$4 sm:$0xff]   ;;  %v15263_v53 = vld [vmem:[%s17609_s18 + $0x90c] ss:$16 sps:$4 sm:$0xff]  }
 0x311   : > { %9911 = vmatpush1.bf16.msra.mxu0 %v15168_v54  ;;  %10599 = vmatpush1.bf16.msra.mxu1 %v15171_v55  ;;  %v15258_v54 = vld [vmem:[%s17609_s18 + $0x900] ss:$16 sps:$4 sm:$0xff]   ;;  %v15261_v55 = vld [vmem:[%s17609_s18 + $0x908] ss:$16 sps:$4 sm:$0xff]  }
 0x312   : > { %9912 = vmatprep.subr.bf16.mxu0 %v15176_v56  ;;  %10600 = vmatprep.subr.bf16.mxu1 %v15179_v57  ;;  %v15266_v56 = vld [vmem:[%s17609_s18 + $0x924] ss:$16 sps:$4 sm:$0xff]   ;;  %v15269_v57 = vld [vmem:[%s17609_s18 + $0x92c] ss:$16 sps:$4 sm:$0xff]  }
 0x315   : > { %9913 = vmatpush1.bf16.msra.mxu0 %v15174_v58  ;;  %10601 = vmatpush1.bf16.msra.mxu1 %v15177_v59  ;;  %v15264_v58 = vld [vmem:[%s17609_s18 + $0x920] ss:$16 sps:$4 sm:$0xff]   ;;  %v15267_v59 = vld [vmem:[%s17609_s18 + $0x928] ss:$16 sps:$4 sm:$0xff]  }
 0x316   : > { %9914 = vmatprep.subr.bf16.mxu0 %v15182_v60  ;;  %10602 = vmatprep.subr.bf16.mxu1 %v15185_v61  ;;  %v15272_v60 = vld [vmem:[%s17609_s18 + $0x944] ss:$16 sps:$4 sm:$0xff]   ;;  %v15275_v61 = vld [vmem:[%s17609_s18 + $0x94c] ss:$16 sps:$4 sm:$0xff]  }
 0x319   : > { %9915 = vmatpush1.bf16.msra.mxu0 %v15180_v62  ;;  %10603 = vmatpush1.bf16.msra.mxu1 %v15183_v63  ;;  %v15270_v62 = vld [vmem:[%s17609_s18 + $0x940] ss:$16 sps:$4 sm:$0xff]   ;;  %v15273_v63 = vld [vmem:[%s17609_s18 + $0x948] ss:$16 sps:$4 sm:$0xff]  }
 0x31a   : > { %9916 = vmatprep.subr.bf16.mxu0 %v15188_v0  ;;  %10604 = vmatprep.subr.bf16.mxu1 %v15191_v1  ;;  %v15278_v0 = vld [vmem:[%s17609_s18 + $0x964] ss:$16 sps:$4 sm:$0xff]   ;;  %v15281_v1 = vld [vmem:[%s17609_s18 + $0x96c] ss:$16 sps:$4 sm:$0xff]  }
 0x31d   : > { %9917 = vmatpush1.bf16.msra.mxu0 %v15186_v2  ;;  %10605 = vmatpush1.bf16.msra.mxu1 %v15189_v3  ;;  %v15276_v2 = vld [vmem:[%s17609_s18 + $0x960] ss:$16 sps:$4 sm:$0xff]   ;;  %v15279_v3 = vld [vmem:[%s17609_s18 + $0x968] ss:$16 sps:$4 sm:$0xff]  }
 0x31e   : > { %9918 = vmatprep.subr.bf16.mxu0 %v15194_v4  ;;  %10606 = vmatprep.subr.bf16.mxu1 %v15197_v5  ;;  %v15284_v4 = vld [vmem:[%s17609_s18 + $0x984] ss:$16 sps:$4 sm:$0xff]   ;;  %v15287_v5 = vld [vmem:[%s17609_s18 + $0x98c] ss:$16 sps:$4 sm:$0xff]  }
 0x321   : > { %9919 = vmatpush1.bf16.msra.mxu0 %v15192_v6  ;;  %10607 = vmatpush1.bf16.msra.mxu1 %v15195_v7  ;;  %v15282_v6 = vld [vmem:[%s17609_s18 + $0x980] ss:$16 sps:$4 sm:$0xff]   ;;  %v15285_v7 = vld [vmem:[%s17609_s18 + $0x988] ss:$16 sps:$4 sm:$0xff]  }
 0x322   : > { %9920 = vmatprep.subr.bf16.mxu0 %v15200_v8  ;;  %10608 = vmatprep.subr.bf16.mxu1 %v15203_v9  ;;  %v15290_v8 = vld [vmem:[%s17609_s18 + $0x9a4] ss:$16 sps:$4 sm:$0xff]   ;;  %v15293_v9 = vld [vmem:[%s17609_s18 + $0x9ac] ss:$16 sps:$4 sm:$0xff]  }
 0x325   : > { %9921 = vmatpush1.bf16.msra.mxu0 %v15198_v10  ;;  %10609 = vmatpush1.bf16.msra.mxu1 %v15201_v11  ;;  %v15288_v10 = vld [vmem:[%s17609_s18 + $0x9a0] ss:$16 sps:$4 sm:$0xff]   ;;  %v15291_v11 = vld [vmem:[%s17609_s18 + $0x9a8] ss:$16 sps:$4 sm:$0xff]  }
 0x326   : > { %9922 = vmatprep.subr.bf16.mxu0 %v15206_v12  ;;  %10610 = vmatprep.subr.bf16.mxu1 %v15209_v13  ;;  %v15296_v12 = vld [vmem:[%s17609_s18 + $0x9c4] ss:$16 sps:$4 sm:$0xff]   ;;  %v15299_v13 = vld [vmem:[%s17609_s18 + $0x9cc] ss:$16 sps:$4 sm:$0xff]  }
 0x329   : > { %9923 = vmatpush1.bf16.msra.mxu0 %v15204_v14  ;;  %10611 = vmatpush1.bf16.msra.mxu1 %v15207_v17  ;;  %v15294_v14 = vld [vmem:[%s17609_s18 + $0x9c0] ss:$16 sps:$4 sm:$0xff]   ;;  %v15297_v17 = vld [vmem:[%s17609_s18 + $0x9c8] ss:$16 sps:$4 sm:$0xff]  }
 0x32a   : > { %9935 = vmatprep.subr.bf16.mxu0 %v15212_v18  ;;  %10623 = vmatprep.subr.bf16.mxu1 %v15215_v21  ;;  %v15302_v18 = vld [vmem:[%s17609_s18 + $0x9e4] ss:$16 sps:$4 sm:$0xff]   ;;  %v15305_v21 = vld [vmem:[%s17609_s18 + $0x9ec] ss:$16 sps:$4 sm:$0xff]  }
 0x32c   : > { %9925 = vmatmul.mubr.bf16.vlgmr.msra.gmra.mrb[0].mxu0 %v13303_v16  ;;  %10613 = vmatmul.mubr.bf16.vlgmr.msra.gmra.mrb[0].mxu1 %v13303_v16  ;;  %v15300_v16 = vld [vmem:[%s17609_s18 + $0x9e0] ss:$16 sps:$4 sm:$0xff]  }
 0x32d   : > { %9936 = vmatpush1.bf16.msra.mxu0 %v15210_v23  ;;  %10624 = vmatpush1.bf16.msra.mxu1 %v15213_v24  ;;  %v15303_v23 = vld [vmem:[%s17609_s18 + $0x9e8] ss:$16 sps:$4 sm:$0xff]   ;;  %v15308_v24 = vld [vmem:[%s17609_s18 + $0xa04] ss:$16 sps:$4 sm:$0xff]  }
 0x32e   : > { %9937 = vmatprep.subr.bf16.mxu0 %v15218_v25  ;;  %10625 = vmatprep.subr.bf16.mxu1 %v15221_v26  ;;  %v15311_v25 = vld [vmem:[%s17609_s18 + $0xa0c] ss:$16 sps:$4 sm:$0xff]  }
 0x32f   : > { %9967 = vmatprep.mubr.bf16.mxu0 %v13306_v19  ;;  %10655 = vmatprep.mubr.bf16.mxu1 %v13306_v19  ;;  %v17997_v26 = vld [vmem:[%s19212_s0 + $0x28] sm:$0xff] }
 0x330   : > { %v18002_v19 = vld [vmem:[%s19212_s0 + $0xa8] sm:$0xff] }
 0x331   : > { %9938 = vmatpush1.bf16.msra.mxu0 %v15216_v20  ;;  %10626 = vmatpush1.bf16.msra.mxu1 %v15219_v27  ;;  %v13305_v20 = vcombine.low %v17919_v15, %v17926_v22  ;;  %v15306_v27 = vld [vmem:[%s17609_s18 + $0xa00] ss:$16 sps:$4 sm:$0xff]   ;;  %v15315_v22 = vld [vmem:[%s17609_s18 + $0xa28] ss:$16 sps:$4 sm:$0xff]  }
 0x332   : > { %9939 = vmatprep.subr.bf16.mxu0 %v15224_v28  ;;  %10627 = vmatprep.subr.bf16.mxu1 %v15227_v29  ;;  %v15309_v28 = vld [vmem:[%s17609_s18 + $0xa08] ss:$16 sps:$4 sm:$0xff]   ;;  %v15314_v29 = vld [vmem:[%s17609_s18 + $0xa24] ss:$16 sps:$4 sm:$0xff]   ;;  %v15312_v15 = vld [vmem:[%s17609_s18 + $0xa20] ss:$16 sps:$4 sm:$0xff]  }
 0x335   : > { %9940 = vmatpush1.bf16.msra.mxu0 %v15222_v30  ;;  %10628 = vmatpush1.bf16.msra.mxu1 %v15225_v31  ;;  %v15317_v30 = vld [vmem:[%s17609_s18 + $0xa2c] ss:$16 sps:$4 sm:$0xff]   ;;  %v13308_v31 = vcombine.high %v17997_v26, %v18002_v19 }
 0x336   : > { %9941 = vmatprep.subr.bf16.mxu0 %v15230_v32  ;;  %10629 = vmatprep.subr.bf16.mxu1 %v15233_v33  ;;  %v15320_v32 = vld [vmem:[%s17609_s18 + $0xa44] ss:$16 sps:$4 sm:$0xff]   ;;  %v15323_v33 = vld [vmem:[%s17609_s18 + $0xa4c] ss:$16 sps:$4 sm:$0xff]  }
 0x339   : > { %9942 = vmatpush1.bf16.msra.mxu0 %v15228_v34  ;;  %10630 = vmatpush1.bf16.msra.mxu1 %v15231_v35  ;;  %v15318_v34 = vld [vmem:[%s17609_s18 + $0xa40] ss:$16 sps:$4 sm:$0xff]   ;;  %v15321_v35 = vld [vmem:[%s17609_s18 + $0xa48] ss:$16 sps:$4 sm:$0xff]  }
 0x33a   : > { %9943 = vmatprep.subr.bf16.mxu0 %v15236_v36  ;;  %10631 = vmatprep.subr.bf16.mxu1 %v15239_v37  ;;  %v15326_v36 = vld [vmem:[%s17609_s18 + $0xa64] ss:$16 sps:$4 sm:$0xff]   ;;  %v15329_v37 = vld [vmem:[%s17609_s18 + $0xa6c] ss:$16 sps:$4 sm:$0xff]  }
 0x33d   : > { %9944 = vmatpush1.bf16.msra.mxu0 %v15234_v38  ;;  %10632 = vmatpush1.bf16.msra.mxu1 %v15237_v39  ;;  %v15324_v38 = vld [vmem:[%s17609_s18 + $0xa60] ss:$16 sps:$4 sm:$0xff]   ;;  %v15327_v39 = vld [vmem:[%s17609_s18 + $0xa68] ss:$16 sps:$4 sm:$0xff]  }
 0x33e   : > { %9945 = vmatprep.subr.bf16.mxu0 %v15242_v40  ;;  %10633 = vmatprep.subr.bf16.mxu1 %v15245_v41  ;;  %v15332_v40 = vld [vmem:[%s17609_s18 + $0xa84] ss:$16 sps:$4 sm:$0xff]   ;;  %v15335_v41 = vld [vmem:[%s17609_s18 + $0xa8c] ss:$16 sps:$4 sm:$0xff]  }
 0x341   : > { %9946 = vmatpush1.bf16.msra.mxu0 %v15240_v42  ;;  %10634 = vmatpush1.bf16.msra.mxu1 %v15243_v43  ;;  %v15330_v42 = vld [vmem:[%s17609_s18 + $0xa80] ss:$16 sps:$4 sm:$0xff]   ;;  %v15333_v43 = vld [vmem:[%s17609_s18 + $0xa88] ss:$16 sps:$4 sm:$0xff]  }
 0x342   : > { %9947 = vmatprep.subr.bf16.mxu0 %v15248_v44  ;;  %10635 = vmatprep.subr.bf16.mxu1 %v15251_v45  ;;  %v15338_v44 = vld [vmem:[%s17609_s18 + $0xaa4] ss:$16 sps:$4 sm:$0xff]   ;;  %v15341_v45 = vld [vmem:[%s17609_s18 + $0xaac] ss:$16 sps:$4 sm:$0xff]  }
 0x345   : > { %9948 = vmatpush1.bf16.msra.mxu0 %v15246_v46  ;;  %10636 = vmatpush1.bf16.msra.mxu1 %v15249_v47  ;;  %v15336_v46 = vld [vmem:[%s17609_s18 + $0xaa0] ss:$16 sps:$4 sm:$0xff]   ;;  %v15339_v47 = vld [vmem:[%s17609_s18 + $0xaa8] ss:$16 sps:$4 sm:$0xff]  }
 0x346   : > { %9949 = vmatprep.subr.bf16.mxu0 %v15254_v48  ;;  %10637 = vmatprep.subr.bf16.mxu1 %v15257_v49  ;;  %v15344_v48 = vld [vmem:[%s17609_s18 + $0xac4] ss:$16 sps:$4 sm:$0xff]   ;;  %v15347_v49 = vld [vmem:[%s17609_s18 + $0xacc] ss:$16 sps:$4 sm:$0xff]  }
 0x349   : > { %9950 = vmatpush1.bf16.msra.mxu0 %v15252_v50  ;;  %10638 = vmatpush1.bf16.msra.mxu1 %v15255_v51  ;;  %v15342_v50 = vld [vmem:[%s17609_s18 + $0xac0] ss:$16 sps:$4 sm:$0xff]   ;;  %v15345_v51 = vld [vmem:[%s17609_s18 + $0xac8] ss:$16 sps:$4 sm:$0xff]  }
 0x34a   : > { %9951 = vmatprep.subr.bf16.mxu0 %v15260_v52  ;;  %10639 = vmatprep.subr.bf16.mxu1 %v15263_v53  ;;  %v15350_v52 = vld [vmem:[%s17609_s18 + $0xae4] ss:$16 sps:$4 sm:$0xff]   ;;  %v15353_v53 = vld [vmem:[%s17609_s18 + $0xaec] ss:$16 sps:$4 sm:$0xff]  }
 0x34d   : > { %9952 = vmatpush1.bf16.msra.mxu0 %v15258_v54  ;;  %10640 = vmatpush1.bf16.msra.mxu1 %v15261_v55  ;;  %v15348_v54 = vld [vmem:[%s17609_s18 + $0xae0] ss:$16 sps:$4 sm:$0xff]   ;;  %v15351_v55 = vld [vmem:[%s17609_s18 + $0xae8] ss:$16 sps:$4 sm:$0xff]  }
 0x34e   : > { %9953 = vmatprep.subr.bf16.mxu0 %v15266_v56  ;;  %10641 = vmatprep.subr.bf16.mxu1 %v15269_v57  ;;  %v15356_v56 = vld [vmem:[%s17609_s18 + $0xb04] ss:$16 sps:$4 sm:$0xff]   ;;  %v15359_v57 = vld [vmem:[%s17609_s18 + $0xb0c] ss:$16 sps:$4 sm:$0xff]  }
 0x351   : > { %9954 = vmatpush1.bf16.msra.mxu0 %v15264_v58  ;;  %10642 = vmatpush1.bf16.msra.mxu1 %v15267_v59  ;;  %v15354_v58 = vld [vmem:[%s17609_s18 + $0xb00] ss:$16 sps:$4 sm:$0xff]   ;;  %v15357_v59 = vld [vmem:[%s17609_s18 + $0xb08] ss:$16 sps:$4 sm:$0xff]  }
 0x352   : > { %9955 = vmatprep.subr.bf16.mxu0 %v15272_v60  ;;  %10643 = vmatprep.subr.bf16.mxu1 %v15275_v61  ;;  %v15362_v60 = vld [vmem:[%s17609_s18 + $0xb24] ss:$16 sps:$4 sm:$0xff]   ;;  %v15365_v61 = vld [vmem:[%s17609_s18 + $0xb2c] ss:$16 sps:$4 sm:$0xff]  }
 0x355   : > { %9956 = vmatpush1.bf16.msra.mxu0 %v15270_v62  ;;  %10644 = vmatpush1.bf16.msra.mxu1 %v15273_v63  ;;  %v15360_v62 = vld [vmem:[%s17609_s18 + $0xb20] ss:$16 sps:$4 sm:$0xff]   ;;  %v15363_v63 = vld [vmem:[%s17609_s18 + $0xb28] ss:$16 sps:$4 sm:$0xff]  }
 0x356   : > { %9957 = vmatprep.subr.bf16.mxu0 %v15278_v0  ;;  %10645 = vmatprep.subr.bf16.mxu1 %v15281_v1  ;;  %v15368_v0 = vld [vmem:[%s17609_s18 + $0xb44] ss:$16 sps:$4 sm:$0xff]   ;;  %v15371_v1 = vld [vmem:[%s17609_s18 + $0xb4c] ss:$16 sps:$4 sm:$0xff]  }
 0x359   : > { %9958 = vmatpush1.bf16.msra.mxu0 %v15276_v2  ;;  %10646 = vmatpush1.bf16.msra.mxu1 %v15279_v3  ;;  %v15366_v2 = vld [vmem:[%s17609_s18 + $0xb40] ss:$16 sps:$4 sm:$0xff]   ;;  %v15369_v3 = vld [vmem:[%s17609_s18 + $0xb48] ss:$16 sps:$4 sm:$0xff]  }
 0x35a   : > { %9959 = vmatprep.subr.bf16.mxu0 %v15284_v4  ;;  %10647 = vmatprep.subr.bf16.mxu1 %v15287_v5  ;;  %v15374_v4 = vld [vmem:[%s17609_s18 + $0xb64] ss:$16 sps:$4 sm:$0xff]   ;;  %v15377_v5 = vld [vmem:[%s17609_s18 + $0xb6c] ss:$16 sps:$4 sm:$0xff]  }
 0x35d   : > { %9960 = vmatpush1.bf16.msra.mxu0 %v15282_v6  ;;  %10648 = vmatpush1.bf16.msra.mxu1 %v15285_v7  ;;  %v15372_v6 = vld [vmem:[%s17609_s18 + $0xb60] ss:$16 sps:$4 sm:$0xff]   ;;  %v15375_v7 = vld [vmem:[%s17609_s18 + $0xb68] ss:$16 sps:$4 sm:$0xff]  }
 0x35e   : > { %9961 = vmatprep.subr.bf16.mxu0 %v15290_v8  ;;  %10649 = vmatprep.subr.bf16.mxu1 %v15293_v9  ;;  %v15380_v8 = vld [vmem:[%s17609_s18 + $0xb84] ss:$16 sps:$4 sm:$0xff]   ;;  %v15383_v9 = vld [vmem:[%s17609_s18 + $0xb8c] ss:$16 sps:$4 sm:$0xff]  }
 0x361   : > { %9962 = vmatpush1.bf16.msra.mxu0 %v15288_v10  ;;  %10650 = vmatpush1.bf16.msra.mxu1 %v15291_v11  ;;  %v15378_v10 = vld [vmem:[%s17609_s18 + $0xb80] ss:$16 sps:$4 sm:$0xff]   ;;  %v15381_v11 = vld [vmem:[%s17609_s18 + $0xb88] ss:$16 sps:$4 sm:$0xff]  }
 0x362   : > { %9963 = vmatprep.subr.bf16.mxu0 %v15296_v12  ;;  %10651 = vmatprep.subr.bf16.mxu1 %v15299_v13  ;;  %v15386_v12 = vld [vmem:[%s17609_s18 + $0xba4] ss:$16 sps:$4 sm:$0xff]   ;;  %v15389_v13 = vld [vmem:[%s17609_s18 + $0xbac] ss:$16 sps:$4 sm:$0xff]  }
 0x365   : > { %9964 = vmatpush1.bf16.msra.mxu0 %v15294_v14  ;;  %10652 = vmatpush1.bf16.msra.mxu1 %v15297_v17  ;;  %v15384_v14 = vld [vmem:[%s17609_s18 + $0xba0] ss:$16 sps:$4 sm:$0xff]   ;;  %v15387_v17 = vld [vmem:[%s17609_s18 + $0xba8] ss:$16 sps:$4 sm:$0xff]  }
 0x366   : > { %9965 = vmatprep.subr.bf16.mxu0 %v15302_v18  ;;  %10653 = vmatprep.subr.bf16.mxu1 %v15305_v21  ;;  %v15392_v18 = vld [vmem:[%s17609_s18 + $0xbc4] ss:$16 sps:$4 sm:$0xff]   ;;  %v15395_v21 = vld [vmem:[%s17609_s18 + $0xbcc] ss:$16 sps:$4 sm:$0xff]  }
 0x369   : > { %9966 = vmatpush1.bf16.msra.mxu0 %v15300_v16  ;;  %10654 = vmatpush1.bf16.msra.mxu1 %v15303_v23  ;;  %v15390_v16 = vld [vmem:[%s17609_s18 + $0xbc0] ss:$16 sps:$4 sm:$0xff]   ;;  %v15393_v23 = vld [vmem:[%s17609_s18 + $0xbc8] ss:$16 sps:$4 sm:$0xff]  }
 0x36a   : > { %9978 = vmatprep.subr.bf16.mxu0 %v15308_v24  ;;  %10666 = vmatprep.subr.bf16.mxu1 %v15311_v25  ;;  %v15398_v24 = vld [vmem:[%s17609_s18 + $0xbe4] ss:$16 sps:$4 sm:$0xff]   ;;  %v15401_v25 = vld [vmem:[%s17609_s18 + $0xbec] ss:$16 sps:$4 sm:$0xff]  }
 0x36c   : > { %9968 = vmatmul.mubr.bf16.vlgmr.msra.gmra.mrb[0].mxu0 %v13305_v20  ;;  %10656 = vmatmul.mubr.bf16.vlgmr.msra.gmra.mrb[0].mxu1 %v13305_v20  ;;  %v15396_v20 = vld [vmem:[%s17609_s18 + $0xbe0] ss:$16 sps:$4 sm:$0xff]  }
 0x36d   : > { %9979 = vmatpush1.bf16.msra.mxu0 %v15306_v27  ;;  %10667 = vmatpush1.bf16.msra.mxu1 %v15309_v28  ;;  %v15399_v27 = vld [vmem:[%s17609_s18 + $0xbe8] ss:$16 sps:$4 sm:$0xff]   ;;  %v15404_v28 = vld [vmem:[%s17609_s18 + $0xc04] ss:$16 sps:$4 sm:$0xff]  }
 0x36e   : > { %9980 = vmatprep.subr.bf16.mxu0 %v15314_v29  ;;  %10668 = vmatprep.subr.bf16.mxu1 %v15317_v30  ;;  %v15407_v29 = vld [vmem:[%s17609_s18 + $0xc0c] ss:$16 sps:$4 sm:$0xff]   ;;  %v18075_v30 = vld [vmem:[%s19212_s0 + $0x30] sm:$0xff] }
 0x36f   : > { %10010 = vmatprep.mubr.bf16.mxu0 %v13308_v31  ;;  %10698 = vmatprep.mubr.bf16.mxu1 %v13308_v31  ;;  %v18080_v31 = vld [vmem:[%s19212_s0 + $0xb0] sm:$0xff] }
 0x371   : > { %9981 = vmatpush1.bf16.msra.mxu0 %v15312_v15  ;;  %10669 = vmatpush1.bf16.msra.mxu1 %v15315_v22  ;;  %v13307_v15 = vcombine.low %v17997_v26, %v18002_v19  ;;  %v15402_v22 = vld [vmem:[%s17609_s18 + $0xc00] ss:$16 sps:$4 sm:$0xff]   ;;  %v15411_v19 = vld [vmem:[%s17609_s18 + $0xc28] ss:$16 sps:$4 sm:$0xff]  }
 0x372   : > { %9982 = vmatprep.subr.bf16.mxu0 %v15320_v32  ;;  %10670 = vmatprep.subr.bf16.mxu1 %v15323_v33  ;;  %v15405_v32 = vld [vmem:[%s17609_s18 + $0xc08] ss:$16 sps:$4 sm:$0xff]   ;;  %v15410_v33 = vld [vmem:[%s17609_s18 + $0xc24] ss:$16 sps:$4 sm:$0xff]   ;;  %v15408_v26 = vld [vmem:[%s17609_s18 + $0xc20] ss:$16 sps:$4 sm:$0xff]  }
 0x375   : > { %9983 = vmatpush1.bf16.msra.mxu0 %v15318_v34  ;;  %10671 = vmatpush1.bf16.msra.mxu1 %v15321_v35  ;;  %v15413_v34 = vld [vmem:[%s17609_s18 + $0xc2c] ss:$16 sps:$4 sm:$0xff]   ;;  %v13310_v35 = vcombine.high %v18075_v30, %v18080_v31 }
 0x376   : > { %9984 = vmatprep.subr.bf16.mxu0 %v15326_v36  ;;  %10672 = vmatprep.subr.bf16.mxu1 %v15329_v37  ;;  %v15416_v36 = vld [vmem:[%s17609_s18 + $0xc44] ss:$16 sps:$4 sm:$0xff]   ;;  %v15419_v37 = vld [vmem:[%s17609_s18 + $0xc4c] ss:$16 sps:$4 sm:$0xff]  }
 0x379   : > { %9985 = vmatpush1.bf16.msra.mxu0 %v15324_v38  ;;  %10673 = vmatpush1.bf16.msra.mxu1 %v15327_v39  ;;  %v15414_v38 = vld [vmem:[%s17609_s18 + $0xc40] ss:$16 sps:$4 sm:$0xff]   ;;  %v15417_v39 = vld [vmem:[%s17609_s18 + $0xc48] ss:$16 sps:$4 sm:$0xff]  }
 0x37a   : > { %9986 = vmatprep.subr.bf16.mxu0 %v15332_v40  ;;  %10674 = vmatprep.subr.bf16.mxu1 %v15335_v41  ;;  %v15422_v40 = vld [vmem:[%s17609_s18 + $0xc64] ss:$16 sps:$4 sm:$0xff]   ;;  %v15425_v41 = vld [vmem:[%s17609_s18 + $0xc6c] ss:$16 sps:$4 sm:$0xff]  }
 0x37d   : > { %9987 = vmatpush1.bf16.msra.mxu0 %v15330_v42  ;;  %10675 = vmatpush1.bf16.msra.mxu1 %v15333_v43  ;;  %v15420_v42 = vld [vmem:[%s17609_s18 + $0xc60] ss:$16 sps:$4 sm:$0xff]   ;;  %v15423_v43 = vld [vmem:[%s17609_s18 + $0xc68] ss:$16 sps:$4 sm:$0xff]  }
 0x37e   : > { %9988 = vmatprep.subr.bf16.mxu0 %v15338_v44  ;;  %10676 = vmatprep.subr.bf16.mxu1 %v15341_v45  ;;  %v15428_v44 = vld [vmem:[%s17609_s18 + $0xc84] ss:$16 sps:$4 sm:$0xff]   ;;  %v15431_v45 = vld [vmem:[%s17609_s18 + $0xc8c] ss:$16 sps:$4 sm:$0xff]  }
 0x381   : > { %9989 = vmatpush1.bf16.msra.mxu0 %v15336_v46  ;;  %10677 = vmatpush1.bf16.msra.mxu1 %v15339_v47  ;;  %v15426_v46 = vld [vmem:[%s17609_s18 + $0xc80] ss:$16 sps:$4 sm:$0xff]   ;;  %v15429_v47 = vld [vmem:[%s17609_s18 + $0xc88] ss:$16 sps:$4 sm:$0xff]  }
 0x382   : > { %9990 = vmatprep.subr.bf16.mxu0 %v15344_v48  ;;  %10678 = vmatprep.subr.bf16.mxu1 %v15347_v49  ;;  %v15434_v48 = vld [vmem:[%s17609_s18 + $0xca4] ss:$16 sps:$4 sm:$0xff]   ;;  %v15437_v49 = vld [vmem:[%s17609_s18 + $0xcac] ss:$16 sps:$4 sm:$0xff]  }
 0x385   : > { %9991 = vmatpush1.bf16.msra.mxu0 %v15342_v50  ;;  %10679 = vmatpush1.bf16.msra.mxu1 %v15345_v51  ;;  %v15432_v50 = vld [vmem:[%s17609_s18 + $0xca0] ss:$16 sps:$4 sm:$0xff]   ;;  %v15435_v51 = vld [vmem:[%s17609_s18 + $0xca8] ss:$16 sps:$4 sm:$0xff]  }
 0x386   : > { %9992 = vmatprep.subr.bf16.mxu0 %v15350_v52  ;;  %10680 = vmatprep.subr.bf16.mxu1 %v15353_v53  ;;  %v15440_v52 = vld [vmem:[%s17609_s18 + $0xcc4] ss:$16 sps:$4 sm:$0xff]   ;;  %v15443_v53 = vld [vmem:[%s17609_s18 + $0xccc] ss:$16 sps:$4 sm:$0xff]  }
 0x389   : > { %9993 = vmatpush1.bf16.msra.mxu0 %v15348_v54  ;;  %10681 = vmatpush1.bf16.msra.mxu1 %v15351_v55  ;;  %v15438_v54 = vld [vmem:[%s17609_s18 + $0xcc0] ss:$16 sps:$4 sm:$0xff]   ;;  %v15441_v55 = vld [vmem:[%s17609_s18 + $0xcc8] ss:$16 sps:$4 sm:$0xff]  }
 0x38a   : > { %9994 = vmatprep.subr.bf16.mxu0 %v15356_v56  ;;  %10682 = vmatprep.subr.bf16.mxu1 %v15359_v57  ;;  %v15446_v56 = vld [vmem:[%s17609_s18 + $0xce4] ss:$16 sps:$4 sm:$0xff]   ;;  %v15449_v57 = vld [vmem:[%s17609_s18 + $0xcec] ss:$16 sps:$4 sm:$0xff]  }
 0x38d   : > { %9995 = vmatpush1.bf16.msra.mxu0 %v15354_v58  ;;  %10683 = vmatpush1.bf16.msra.mxu1 %v15357_v59  ;;  %v15444_v58 = vld [vmem:[%s17609_s18 + $0xce0] ss:$16 sps:$4 sm:$0xff]   ;;  %v15447_v59 = vld [vmem:[%s17609_s18 + $0xce8] ss:$16 sps:$4 sm:$0xff]  }
 0x38e   : > { %9996 = vmatprep.subr.bf16.mxu0 %v15362_v60  ;;  %10684 = vmatprep.subr.bf16.mxu1 %v15365_v61  ;;  %v15452_v60 = vld [vmem:[%s17609_s18 + $0xd04] ss:$16 sps:$4 sm:$0xff]   ;;  %v15455_v61 = vld [vmem:[%s17609_s18 + $0xd0c] ss:$16 sps:$4 sm:$0xff]  }
 0x391   : > { %9997 = vmatpush1.bf16.msra.mxu0 %v15360_v62  ;;  %10685 = vmatpush1.bf16.msra.mxu1 %v15363_v63  ;;  %v15450_v62 = vld [vmem:[%s17609_s18 + $0xd00] ss:$16 sps:$4 sm:$0xff]   ;;  %v15453_v63 = vld [vmem:[%s17609_s18 + $0xd08] ss:$16 sps:$4 sm:$0xff]  }
 0x392   : > { %9998 = vmatprep.subr.bf16.mxu0 %v15368_v0  ;;  %10686 = vmatprep.subr.bf16.mxu1 %v15371_v1  ;;  %v15458_v0 = vld [vmem:[%s17609_s18 + $0xd24] ss:$16 sps:$4 sm:$0xff]   ;;  %v15461_v1 = vld [vmem:[%s17609_s18 + $0xd2c] ss:$16 sps:$4 sm:$0xff]  }
 0x395   : > { %9999 = vmatpush1.bf16.msra.mxu0 %v15366_v2  ;;  %10687 = vmatpush1.bf16.msra.mxu1 %v15369_v3  ;;  %v15456_v2 = vld [vmem:[%s17609_s18 + $0xd20] ss:$16 sps:$4 sm:$0xff]   ;;  %v15459_v3 = vld [vmem:[%s17609_s18 + $0xd28] ss:$16 sps:$4 sm:$0xff]  }
 0x396   : > { %10000 = vmatprep.subr.bf16.mxu0 %v15374_v4  ;;  %10688 = vmatprep.subr.bf16.mxu1 %v15377_v5  ;;  %v15464_v4 = vld [vmem:[%s17609_s18 + $0xd44] ss:$16 sps:$4 sm:$0xff]   ;;  %v15467_v5 = vld [vmem:[%s17609_s18 + $0xd4c] ss:$16 sps:$4 sm:$0xff]  }
 0x399   : > { %10001 = vmatpush1.bf16.msra.mxu0 %v15372_v6  ;;  %10689 = vmatpush1.bf16.msra.mxu1 %v15375_v7  ;;  %v15462_v6 = vld [vmem:[%s17609_s18 + $0xd40] ss:$16 sps:$4 sm:$0xff]   ;;  %v15465_v7 = vld [vmem:[%s17609_s18 + $0xd48] ss:$16 sps:$4 sm:$0xff]  }
 0x39a   : > { %10002 = vmatprep.subr.bf16.mxu0 %v15380_v8  ;;  %10690 = vmatprep.subr.bf16.mxu1 %v15383_v9  ;;  %v15470_v8 = vld [vmem:[%s17609_s18 + $0xd64] ss:$16 sps:$4 sm:$0xff]   ;;  %v15473_v9 = vld [vmem:[%s17609_s18 + $0xd6c] ss:$16 sps:$4 sm:$0xff]  }
 0x39d   : > { %10003 = vmatpush1.bf16.msra.mxu0 %v15378_v10  ;;  %10691 = vmatpush1.bf16.msra.mxu1 %v15381_v11  ;;  %v15468_v10 = vld [vmem:[%s17609_s18 + $0xd60] ss:$16 sps:$4 sm:$0xff]   ;;  %v15471_v11 = vld [vmem:[%s17609_s18 + $0xd68] ss:$16 sps:$4 sm:$0xff]  }
 0x39e   : > { %10004 = vmatprep.subr.bf16.mxu0 %v15386_v12  ;;  %10692 = vmatprep.subr.bf16.mxu1 %v15389_v13  ;;  %v15476_v12 = vld [vmem:[%s17609_s18 + $0xd84] ss:$16 sps:$4 sm:$0xff]   ;;  %v15479_v13 = vld [vmem:[%s17609_s18 + $0xd8c] ss:$16 sps:$4 sm:$0xff]  }
 0x3a1   : > { %10005 = vmatpush1.bf16.msra.mxu0 %v15384_v14  ;;  %10693 = vmatpush1.bf16.msra.mxu1 %v15387_v17  ;;  %v15474_v14 = vld [vmem:[%s17609_s18 + $0xd80] ss:$16 sps:$4 sm:$0xff]   ;;  %v15477_v17 = vld [vmem:[%s17609_s18 + $0xd88] ss:$16 sps:$4 sm:$0xff]  }
 0x3a2   : > { %10006 = vmatprep.subr.bf16.mxu0 %v15392_v18  ;;  %10694 = vmatprep.subr.bf16.mxu1 %v15395_v21  ;;  %v15482_v18 = vld [vmem:[%s17609_s18 + $0xda4] ss:$16 sps:$4 sm:$0xff]   ;;  %v15485_v21 = vld [vmem:[%s17609_s18 + $0xdac] ss:$16 sps:$4 sm:$0xff]  }
 0x3a5   : > { %10007 = vmatpush1.bf16.msra.mxu0 %v15390_v16  ;;  %10695 = vmatpush1.bf16.msra.mxu1 %v15393_v23  ;;  %v15480_v16 = vld [vmem:[%s17609_s18 + $0xda0] ss:$16 sps:$4 sm:$0xff]   ;;  %v15483_v23 = vld [vmem:[%s17609_s18 + $0xda8] ss:$16 sps:$4 sm:$0xff]  }
 0x3a6   : > { %10008 = vmatprep.subr.bf16.mxu0 %v15398_v24  ;;  %10696 = vmatprep.subr.bf16.mxu1 %v15401_v25  ;;  %v15488_v24 = vld [vmem:[%s17609_s18 + $0xdc4] ss:$16 sps:$4 sm:$0xff]   ;;  %v15491_v25 = vld [vmem:[%s17609_s18 + $0xdcc] ss:$16 sps:$4 sm:$0xff]  }
 0x3a9   : > { %10009 = vmatpush1.bf16.msra.mxu0 %v15396_v20  ;;  %10697 = vmatpush1.bf16.msra.mxu1 %v15399_v27  ;;  %v15486_v20 = vld [vmem:[%s17609_s18 + $0xdc0] ss:$16 sps:$4 sm:$0xff]   ;;  %v15489_v27 = vld [vmem:[%s17609_s18 + $0xdc8] ss:$16 sps:$4 sm:$0xff]  }
 0x3aa   : > { %10021 = vmatprep.subr.bf16.mxu0 %v15404_v28  ;;  %10709 = vmatprep.subr.bf16.mxu1 %v15407_v29  ;;  %v15494_v28 = vld [vmem:[%s17609_s18 + $0xde4] ss:$16 sps:$4 sm:$0xff]   ;;  %v15497_v29 = vld [vmem:[%s17609_s18 + $0xdec] ss:$16 sps:$4 sm:$0xff]  }
 0x3ac   : > { %10011 = vmatmul.mubr.bf16.vlgmr.msra.gmra.mrb[0].mxu0 %v13307_v15  ;;  %10699 = vmatmul.mubr.bf16.vlgmr.msra.gmra.mrb[0].mxu1 %v13307_v15  ;;  %v15492_v15 = vld [vmem:[%s17609_s18 + $0xde0] ss:$16 sps:$4 sm:$0xff]  }
 0x3ad   : > { %10022 = vmatpush1.bf16.msra.mxu0 %v15402_v22  ;;  %10710 = vmatpush1.bf16.msra.mxu1 %v15405_v32  ;;  %v15495_v22 = vld [vmem:[%s17609_s18 + $0xde8] ss:$16 sps:$4 sm:$0xff]   ;;  %v15500_v32 = vld [vmem:[%s17609_s18 + $0xe04] ss:$16 sps:$4 sm:$0xff]  }
 0x3ae   : > { %10023 = vmatprep.subr.bf16.mxu0 %v15410_v33  ;;  %10711 = vmatprep.subr.bf16.mxu1 %v15413_v34  ;;  %v15503_v33 = vld [vmem:[%s17609_s18 + $0xe0c] ss:$16 sps:$4 sm:$0xff]  }
 0x3af   : > { %10053 = vmatprep.mubr.bf16.mxu0 %v13310_v35  ;;  %10741 = vmatprep.mubr.bf16.mxu1 %v13310_v35  ;;  %v18153_v34 = vld [vmem:[%s19212_s0 + $0x38] sm:$0xff] }
 0x3b0   : > { %v18158_v35 = vld [vmem:[%s19212_s0 + $0xb8] sm:$0xff] }
 0x3b1   : > { %10024 = vmatpush1.bf16.msra.mxu0 %v15408_v26  ;;  %10712 = vmatpush1.bf16.msra.mxu1 %v15411_v19  ;;  %v13309_v26 = vcombine.low %v18075_v30, %v18080_v31  ;;  %v15498_v19 = vld [vmem:[%s17609_s18 + $0xe00] ss:$16 sps:$4 sm:$0xff]   ;;  %v15507_v31 = vld [vmem:[%s17609_s18 + $0xe28] ss:$16 sps:$4 sm:$0xff]  }
 0x3b2   : > { %10025 = vmatprep.subr.bf16.mxu0 %v15416_v36  ;;  %10713 = vmatprep.subr.bf16.mxu1 %v15419_v37  ;;  %v15501_v36 = vld [vmem:[%s17609_s18 + $0xe08] ss:$16 sps:$4 sm:$0xff]   ;;  %v15506_v37 = vld [vmem:[%s17609_s18 + $0xe24] ss:$16 sps:$4 sm:$0xff]   ;;  %v15504_v30 = vld [vmem:[%s17609_s18 + $0xe20] ss:$16 sps:$4 sm:$0xff]  }
 0x3b5   : > { %10026 = vmatpush1.bf16.msra.mxu0 %v15414_v38  ;;  %10714 = vmatpush1.bf16.msra.mxu1 %v15417_v39  ;;  %v15509_v38 = vld [vmem:[%s17609_s18 + $0xe2c] ss:$16 sps:$4 sm:$0xff]   ;;  %v13312_v39 = vcombine.high %v18153_v34, %v18158_v35 }
 0x3b6   : > { %10027 = vmatprep.subr.bf16.mxu0 %v15422_v40  ;;  %10715 = vmatprep.subr.bf16.mxu1 %v15425_v41  ;;  %v15512_v40 = vld [vmem:[%s17609_s18 + $0xe44] ss:$16 sps:$4 sm:$0xff]   ;;  %v15515_v41 = vld [vmem:[%s17609_s18 + $0xe4c] ss:$16 sps:$4 sm:$0xff]  }
 0x3b9   : > { %10028 = vmatpush1.bf16.msra.mxu0 %v15420_v42  ;;  %10716 = vmatpush1.bf16.msra.mxu1 %v15423_v43  ;;  %v15510_v42 = vld [vmem:[%s17609_s18 + $0xe40] ss:$16 sps:$4 sm:$0xff]   ;;  %v15513_v43 = vld [vmem:[%s17609_s18 + $0xe48] ss:$16 sps:$4 sm:$0xff]  }
 0x3ba   : > { %10029 = vmatprep.subr.bf16.mxu0 %v15428_v44  ;;  %10717 = vmatprep.subr.bf16.mxu1 %v15431_v45  ;;  %v15518_v44 = vld [vmem:[%s17609_s18 + $0xe64] ss:$16 sps:$4 sm:$0xff]   ;;  %v15521_v45 = vld [vmem:[%s17609_s18 + $0xe6c] ss:$16 sps:$4 sm:$0xff]  }
 0x3bd   : > { %10030 = vmatpush1.bf16.msra.mxu0 %v15426_v46  ;;  %10718 = vmatpush1.bf16.msra.mxu1 %v15429_v47  ;;  %v15516_v46 = vld [vmem:[%s17609_s18 + $0xe60] ss:$16 sps:$4 sm:$0xff]   ;;  %v15519_v47 = vld [vmem:[%s17609_s18 + $0xe68] ss:$16 sps:$4 sm:$0xff]  }
 0x3be   : > { %10031 = vmatprep.subr.bf16.mxu0 %v15434_v48  ;;  %10719 = vmatprep.subr.bf16.mxu1 %v15437_v49  ;;  %v15524_v48 = vld [vmem:[%s17609_s18 + $0xe84] ss:$16 sps:$4 sm:$0xff]   ;;  %v15527_v49 = vld [vmem:[%s17609_s18 + $0xe8c] ss:$16 sps:$4 sm:$0xff]  }
 0x3c1   : > { %10032 = vmatpush1.bf16.msra.mxu0 %v15432_v50  ;;  %10720 = vmatpush1.bf16.msra.mxu1 %v15435_v51  ;;  %v15522_v50 = vld [vmem:[%s17609_s18 + $0xe80] ss:$16 sps:$4 sm:$0xff]   ;;  %v15525_v51 = vld [vmem:[%s17609_s18 + $0xe88] ss:$16 sps:$4 sm:$0xff]  }
 0x3c2   : > { %10033 = vmatprep.subr.bf16.mxu0 %v15440_v52  ;;  %10721 = vmatprep.subr.bf16.mxu1 %v15443_v53  ;;  %v15530_v52 = vld [vmem:[%s17609_s18 + $0xea4] ss:$16 sps:$4 sm:$0xff]   ;;  %v15533_v53 = vld [vmem:[%s17609_s18 + $0xeac] ss:$16 sps:$4 sm:$0xff]  }
 0x3c5   : > { %10034 = vmatpush1.bf16.msra.mxu0 %v15438_v54  ;;  %10722 = vmatpush1.bf16.msra.mxu1 %v15441_v55  ;;  %v15528_v54 = vld [vmem:[%s17609_s18 + $0xea0] ss:$16 sps:$4 sm:$0xff]   ;;  %v15531_v55 = vld [vmem:[%s17609_s18 + $0xea8] ss:$16 sps:$4 sm:$0xff]  }
 0x3c6   : > { %10035 = vmatprep.subr.bf16.mxu0 %v15446_v56  ;;  %10723 = vmatprep.subr.bf16.mxu1 %v15449_v57  ;;  %v15536_v56 = vld [vmem:[%s17609_s18 + $0xec4] ss:$16 sps:$4 sm:$0xff]   ;;  %v15539_v57 = vld [vmem:[%s17609_s18 + $0xecc] ss:$16 sps:$4 sm:$0xff]  }
 0x3c9   : > { %10036 = vmatpush1.bf16.msra.mxu0 %v15444_v58  ;;  %10724 = vmatpush1.bf16.msra.mxu1 %v15447_v59  ;;  %v15534_v58 = vld [vmem:[%s17609_s18 + $0xec0] ss:$16 sps:$4 sm:$0xff]   ;;  %v15537_v59 = vld [vmem:[%s17609_s18 + $0xec8] ss:$16 sps:$4 sm:$0xff]  }
 0x3ca   : > { %10037 = vmatprep.subr.bf16.mxu0 %v15452_v60  ;;  %10725 = vmatprep.subr.bf16.mxu1 %v15455_v61  ;;  %v15542_v60 = vld [vmem:[%s17609_s18 + $0xee4] ss:$16 sps:$4 sm:$0xff]   ;;  %v15545_v61 = vld [vmem:[%s17609_s18 + $0xeec] ss:$16 sps:$4 sm:$0xff]  }
 0x3cd   : > { %10038 = vmatpush1.bf16.msra.mxu0 %v15450_v62  ;;  %10726 = vmatpush1.bf16.msra.mxu1 %v15453_v63  ;;  %v15540_v62 = vld [vmem:[%s17609_s18 + $0xee0] ss:$16 sps:$4 sm:$0xff]   ;;  %v15543_v63 = vld [vmem:[%s17609_s18 + $0xee8] ss:$16 sps:$4 sm:$0xff]  }
 0x3ce   : > { %10039 = vmatprep.subr.bf16.mxu0 %v15458_v0  ;;  %10727 = vmatprep.subr.bf16.mxu1 %v15461_v1  ;;  %v15548_v0 = vld [vmem:[%s17609_s18 + $0xf04] ss:$16 sps:$4 sm:$0xff]   ;;  %v15551_v1 = vld [vmem:[%s17609_s18 + $0xf0c] ss:$16 sps:$4 sm:$0xff]  }
 0x3d1   : > { %10040 = vmatpush1.bf16.msra.mxu0 %v15456_v2  ;;  %10728 = vmatpush1.bf16.msra.mxu1 %v15459_v3  ;;  %v15546_v2 = vld [vmem:[%s17609_s18 + $0xf00] ss:$16 sps:$4 sm:$0xff]   ;;  %v15549_v3 = vld [vmem:[%s17609_s18 + $0xf08] ss:$16 sps:$4 sm:$0xff]  }
 0x3d2   : > { %10041 = vmatprep.subr.bf16.mxu0 %v15464_v4  ;;  %10729 = vmatprep.subr.bf16.mxu1 %v15467_v5  ;;  %v15554_v4 = vld [vmem:[%s17609_s18 + $0xf24] ss:$16 sps:$4 sm:$0xff]   ;;  %v15557_v5 = vld [vmem:[%s17609_s18 + $0xf2c] ss:$16 sps:$4 sm:$0xff]  }
 0x3d5   : > { %10042 = vmatpush1.bf16.msra.mxu0 %v15462_v6  ;;  %10730 = vmatpush1.bf16.msra.mxu1 %v15465_v7  ;;  %v15552_v6 = vld [vmem:[%s17609_s18 + $0xf20] ss:$16 sps:$4 sm:$0xff]   ;;  %v15555_v7 = vld [vmem:[%s17609_s18 + $0xf28] ss:$16 sps:$4 sm:$0xff]  }
 0x3d6   : > { %10043 = vmatprep.subr.bf16.mxu0 %v15470_v8  ;;  %10731 = vmatprep.subr.bf16.mxu1 %v15473_v9  ;;  %v15560_v8 = vld [vmem:[%s17609_s18 + $0xf44] ss:$16 sps:$4 sm:$0xff]   ;;  %v15563_v9 = vld [vmem:[%s17609_s18 + $0xf4c] ss:$16 sps:$4 sm:$0xff]  }
 0x3d9   : > { %10044 = vmatpush1.bf16.msra.mxu0 %v15468_v10  ;;  %10732 = vmatpush1.bf16.msra.mxu1 %v15471_v11  ;;  %v15558_v10 = vld [vmem:[%s17609_s18 + $0xf40] ss:$16 sps:$4 sm:$0xff]   ;;  %v15561_v11 = vld [vmem:[%s17609_s18 + $0xf48] ss:$16 sps:$4 sm:$0xff]  }
 0x3da   : > { %10045 = vmatprep.subr.bf16.mxu0 %v15476_v12  ;;  %10733 = vmatprep.subr.bf16.mxu1 %v15479_v13  ;;  %v15566_v12 = vld [vmem:[%s17609_s18 + $0xf64] ss:$16 sps:$4 sm:$0xff]   ;;  %v15569_v13 = vld [vmem:[%s17609_s18 + $0xf6c] ss:$16 sps:$4 sm:$0xff]  }
 0x3dd   : > { %10046 = vmatpush1.bf16.msra.mxu0 %v15474_v14  ;;  %10734 = vmatpush1.bf16.msra.mxu1 %v15477_v17  ;;  %v15564_v14 = vld [vmem:[%s17609_s18 + $0xf60] ss:$16 sps:$4 sm:$0xff]   ;;  %v15567_v17 = vld [vmem:[%s17609_s18 + $0xf68] ss:$16 sps:$4 sm:$0xff]  }
 0x3de   : > { %10047 = vmatprep.subr.bf16.mxu0 %v15482_v18  ;;  %10735 = vmatprep.subr.bf16.mxu1 %v15485_v21  ;;  %v15572_v18 = vld [vmem:[%s17609_s18 + $0xf84] ss:$16 sps:$4 sm:$0xff]   ;;  %v15575_v21 = vld [vmem:[%s17609_s18 + $0xf8c] ss:$16 sps:$4 sm:$0xff]  }
 0x3e1   : > { %10048 = vmatpush1.bf16.msra.mxu0 %v15480_v16  ;;  %10736 = vmatpush1.bf16.msra.mxu1 %v15483_v23  ;;  %v15570_v16 = vld [vmem:[%s17609_s18 + $0xf80] ss:$16 sps:$4 sm:$0xff]   ;;  %v15573_v23 = vld [vmem:[%s17609_s18 + $0xf88] ss:$16 sps:$4 sm:$0xff]  }
 0x3e2   : > { %10049 = vmatprep.subr.bf16.mxu0 %v15488_v24  ;;  %10737 = vmatprep.subr.bf16.mxu1 %v15491_v25  ;;  %v15578_v24 = vld [vmem:[%s17609_s18 + $0xfa4] ss:$16 sps:$4 sm:$0xff]   ;;  %v15581_v25 = vld [vmem:[%s17609_s18 + $0xfac] ss:$16 sps:$4 sm:$0xff]  }
 0x3e5   : > { %10050 = vmatpush1.bf16.msra.mxu0 %v15486_v20  ;;  %10738 = vmatpush1.bf16.msra.mxu1 %v15489_v27  ;;  %v15576_v20 = vld [vmem:[%s17609_s18 + $0xfa0] ss:$16 sps:$4 sm:$0xff]   ;;  %v15579_v27 = vld [vmem:[%s17609_s18 + $0xfa8] ss:$16 sps:$4 sm:$0xff]  }
 0x3e6   : > { %10051 = vmatprep.subr.bf16.mxu0 %v15494_v28  ;;  %10739 = vmatprep.subr.bf16.mxu1 %v15497_v29  ;;  %v15584_v28 = vld [vmem:[%s17609_s18 + $0xfc4] ss:$16 sps:$4 sm:$0xff]   ;;  %v15587_v29 = vld [vmem:[%s17609_s18 + $0xfcc] ss:$16 sps:$4 sm:$0xff]  }
 0x3e9   : > { %10052 = vmatpush1.bf16.msra.mxu0 %v15492_v15  ;;  %10740 = vmatpush1.bf16.msra.mxu1 %v15495_v22  ;;  %v15582_v15 = vld [vmem:[%s17609_s18 + $0xfc0] ss:$16 sps:$4 sm:$0xff]   ;;  %v15585_v22 = vld [vmem:[%s17609_s18 + $0xfc8] ss:$16 sps:$4 sm:$0xff]  }
 0x3ea   : > { %10064 = vmatprep.subr.bf16.mxu0 %v15500_v32  ;;  %10752 = vmatprep.subr.bf16.mxu1 %v15503_v33  ;;  %v15590_v32 = vld [vmem:[%s17609_s18 + $0xfe4] ss:$16 sps:$4 sm:$0xff]   ;;  %v15593_v33 = vld [vmem:[%s17609_s18 + $0xfec] ss:$16 sps:$4 sm:$0xff]  }
 0x3ec   : > { %10054 = vmatmul.mubr.bf16.vlgmr.msra.gmra.mrb[0].mxu0 %v13309_v26  ;;  %10742 = vmatmul.mubr.bf16.vlgmr.msra.gmra.mrb[0].mxu1 %v13309_v26  ;;  %v15588_v26 = vld [vmem:[%s17609_s18 + $0xfe0] ss:$16 sps:$4 sm:$0xff]  }
 0x3ed   : > { %10065 = vmatpush1.bf16.msra.mxu0 %v15498_v19  ;;  %10753 = vmatpush1.bf16.msra.mxu1 %v15501_v36  ;;  %v15591_v19 = vld [vmem:[%s17609_s18 + $0xfe8] ss:$16 sps:$4 sm:$0xff]   ;;  %v15596_v36 = vld [vmem:[%s17609_s18 + $0x1004] ss:$16 sps:$4 sm:$0xff]  }
 0x3ee   : > { %10066 = vmatprep.subr.bf16.mxu0 %v15506_v37  ;;  %10754 = vmatprep.subr.bf16.mxu1 %v15509_v38  ;;  %v15599_v37 = vld [vmem:[%s17609_s18 + $0x100c] ss:$16 sps:$4 sm:$0xff]   ;;  %v18231_v38 = vld [vmem:[%s19212_s0 + $0x40] sm:$0xff] }
 0x3ef   : > { %10096 = vmatprep.mubr.bf16.mxu0 %v13312_v39  ;;  %10784 = vmatprep.mubr.bf16.mxu1 %v13312_v39  ;;  %v18236_v39 = vld [vmem:[%s19212_s0 + $0xc0] sm:$0xff] }
 0x3f1   : > { %10067 = vmatpush1.bf16.msra.mxu0 %v15504_v30  ;;  %10755 = vmatpush1.bf16.msra.mxu1 %v15507_v31  ;;  %v13311_v30 = vcombine.low %v18153_v34, %v18158_v35  ;;  %v15594_v31 = vld [vmem:[%s17609_s18 + $0x1000] ss:$16 sps:$4 sm:$0xff]   ;;  %v15603_v35 = vld [vmem:[%s17609_s18 + $0x1028] ss:$16 sps:$4 sm:$0xff]  }
 0x3f2   : > { %10068 = vmatprep.subr.bf16.mxu0 %v15512_v40  ;;  %10756 = vmatprep.subr.bf16.mxu1 %v15515_v41  ;;  %v15597_v40 = vld [vmem:[%s17609_s18 + $0x1008] ss:$16 sps:$4 sm:$0xff]   ;;  %v15602_v41 = vld [vmem:[%s17609_s18 + $0x1024] ss:$16 sps:$4 sm:$0xff]   ;;  %v15600_v34 = vld [vmem:[%s17609_s18 + $0x1020] ss:$16 sps:$4 sm:$0xff]  }
 0x3f5   : > { %10069 = vmatpush1.bf16.msra.mxu0 %v15510_v42  ;;  %10757 = vmatpush1.bf16.msra.mxu1 %v15513_v43  ;;  %v15605_v42 = vld [vmem:[%s17609_s18 + $0x102c] ss:$16 sps:$4 sm:$0xff]   ;;  %v13314_v43 = vcombine.high %v18231_v38, %v18236_v39 }
 0x3f6   : > { %10070 = vmatprep.subr.bf16.mxu0 %v15518_v44  ;;  %10758 = vmatprep.subr.bf16.mxu1 %v15521_v45  ;;  %v15608_v44 = vld [vmem:[%s17609_s18 + $0x1044] ss:$16 sps:$4 sm:$0xff]   ;;  %v15611_v45 = vld [vmem:[%s17609_s18 + $0x104c] ss:$16 sps:$4 sm:$0xff]  }
 0x3f9   : > { %10071 = vmatpush1.bf16.msra.mxu0 %v15516_v46  ;;  %10759 = vmatpush1.bf16.msra.mxu1 %v15519_v47  ;;  %v15606_v46 = vld [vmem:[%s17609_s18 + $0x1040] ss:$16 sps:$4 sm:$0xff]   ;;  %v15609_v47 = vld [vmem:[%s17609_s18 + $0x1048] ss:$16 sps:$4 sm:$0xff]  }
 0x3fa   : > { %10072 = vmatprep.subr.bf16.mxu0 %v15524_v48  ;;  %10760 = vmatprep.subr.bf16.mxu1 %v15527_v49  ;;  %v15614_v48 = vld [vmem:[%s17609_s18 + $0x1064] ss:$16 sps:$4 sm:$0xff]   ;;  %v15617_v49 = vld [vmem:[%s17609_s18 + $0x106c] ss:$16 sps:$4 sm:$0xff]  }
 0x3fd   : > { %10073 = vmatpush1.bf16.msra.mxu0 %v15522_v50  ;;  %10761 = vmatpush1.bf16.msra.mxu1 %v15525_v51  ;;  %v15612_v50 = vld [vmem:[%s17609_s18 + $0x1060] ss:$16 sps:$4 sm:$0xff]   ;;  %v15615_v51 = vld [vmem:[%s17609_s18 + $0x1068] ss:$16 sps:$4 sm:$0xff]  }
 0x3fe   : > { %10074 = vmatprep.subr.bf16.mxu0 %v15530_v52  ;;  %10762 = vmatprep.subr.bf16.mxu1 %v15533_v53  ;;  %v15620_v52 = vld [vmem:[%s17609_s18 + $0x1084] ss:$16 sps:$4 sm:$0xff]   ;;  %v15623_v53 = vld [vmem:[%s17609_s18 + $0x108c] ss:$16 sps:$4 sm:$0xff]  }
 0x401   : > { %10075 = vmatpush1.bf16.msra.mxu0 %v15528_v54  ;;  %10763 = vmatpush1.bf16.msra.mxu1 %v15531_v55  ;;  %v15618_v54 = vld [vmem:[%s17609_s18 + $0x1080] ss:$16 sps:$4 sm:$0xff]   ;;  %v15621_v55 = vld [vmem:[%s17609_s18 + $0x1088] ss:$16 sps:$4 sm:$0xff]  }
 0x402   : > { %10076 = vmatprep.subr.bf16.mxu0 %v15536_v56  ;;  %10764 = vmatprep.subr.bf16.mxu1 %v15539_v57  ;;  %v15626_v56 = vld [vmem:[%s17609_s18 + $0x10a4] ss:$16 sps:$4 sm:$0xff]   ;;  %v15629_v57 = vld [vmem:[%s17609_s18 + $0x10ac] ss:$16 sps:$4 sm:$0xff]  }
 0x405   : > { %10077 = vmatpush1.bf16.msra.mxu0 %v15534_v58  ;;  %10765 = vmatpush1.bf16.msra.mxu1 %v15537_v59  ;;  %v15624_v58 = vld [vmem:[%s17609_s18 + $0x10a0] ss:$16 sps:$4 sm:$0xff]   ;;  %v15627_v59 = vld [vmem:[%s17609_s18 + $0x10a8] ss:$16 sps:$4 sm:$0xff]  }
 0x406   : > { %10078 = vmatprep.subr.bf16.mxu0 %v15542_v60  ;;  %10766 = vmatprep.subr.bf16.mxu1 %v15545_v61  ;;  %v15632_v60 = vld [vmem:[%s17609_s18 + $0x10c4] ss:$16 sps:$4 sm:$0xff]   ;;  %v15635_v61 = vld [vmem:[%s17609_s18 + $0x10cc] ss:$16 sps:$4 sm:$0xff]  }
 0x409   : > { %10079 = vmatpush1.bf16.msra.mxu0 %v15540_v62  ;;  %10767 = vmatpush1.bf16.msra.mxu1 %v15543_v63  ;;  %v15630_v62 = vld [vmem:[%s17609_s18 + $0x10c0] ss:$16 sps:$4 sm:$0xff]   ;;  %v15633_v63 = vld [vmem:[%s17609_s18 + $0x10c8] ss:$16 sps:$4 sm:$0xff]  }
 0x40a   : > { %10080 = vmatprep.subr.bf16.mxu0 %v15548_v0  ;;  %10768 = vmatprep.subr.bf16.mxu1 %v15551_v1  ;;  %v15638_v0 = vld [vmem:[%s17609_s18 + $0x10e4] ss:$16 sps:$4 sm:$0xff]   ;;  %v15641_v1 = vld [vmem:[%s17609_s18 + $0x10ec] ss:$16 sps:$4 sm:$0xff]  }
 0x40d   : > { %10081 = vmatpush1.bf16.msra.mxu0 %v15546_v2  ;;  %10769 = vmatpush1.bf16.msra.mxu1 %v15549_v3  ;;  %v15636_v2 = vld [vmem:[%s17609_s18 + $0x10e0] ss:$16 sps:$4 sm:$0xff]   ;;  %v15639_v3 = vld [vmem:[%s17609_s18 + $0x10e8] ss:$16 sps:$4 sm:$0xff]  }
 0x40e   : > { %10082 = vmatprep.subr.bf16.mxu0 %v15554_v4  ;;  %10770 = vmatprep.subr.bf16.mxu1 %v15557_v5  ;;  %v15644_v4 = vld [vmem:[%s17609_s18 + $0x1104] ss:$16 sps:$4 sm:$0xff]   ;;  %v15647_v5 = vld [vmem:[%s17609_s18 + $0x110c] ss:$16 sps:$4 sm:$0xff]  }
 0x411   : > { %10083 = vmatpush1.bf16.msra.mxu0 %v15552_v6  ;;  %10771 = vmatpush1.bf16.msra.mxu1 %v15555_v7  ;;  %v15642_v6 = vld [vmem:[%s17609_s18 + $0x1100] ss:$16 sps:$4 sm:$0xff]   ;;  %v15645_v7 = vld [vmem:[%s17609_s18 + $0x1108] ss:$16 sps:$4 sm:$0xff]  }
 0x412   : > { %10084 = vmatprep.subr.bf16.mxu0 %v15560_v8  ;;  %10772 = vmatprep.subr.bf16.mxu1 %v15563_v9  ;;  %v15650_v8 = vld [vmem:[%s17609_s18 + $0x1124] ss:$16 sps:$4 sm:$0xff]   ;;  %v15653_v9 = vld [vmem:[%s17609_s18 + $0x112c] ss:$16 sps:$4 sm:$0xff]  }
 0x415   : > { %10085 = vmatpush1.bf16.msra.mxu0 %v15558_v10  ;;  %10773 = vmatpush1.bf16.msra.mxu1 %v15561_v11  ;;  %v15648_v10 = vld [vmem:[%s17609_s18 + $0x1120] ss:$16 sps:$4 sm:$0xff]   ;;  %v15651_v11 = vld [vmem:[%s17609_s18 + $0x1128] ss:$16 sps:$4 sm:$0xff]  }
 0x416   : > { %10086 = vmatprep.subr.bf16.mxu0 %v15566_v12  ;;  %10774 = vmatprep.subr.bf16.mxu1 %v15569_v13  ;;  %v15656_v12 = vld [vmem:[%s17609_s18 + $0x1144] ss:$16 sps:$4 sm:$0xff]   ;;  %v15659_v13 = vld [vmem:[%s17609_s18 + $0x114c] ss:$16 sps:$4 sm:$0xff]  }
 0x419   : > { %10087 = vmatpush1.bf16.msra.mxu0 %v15564_v14  ;;  %10775 = vmatpush1.bf16.msra.mxu1 %v15567_v17  ;;  %v15654_v14 = vld [vmem:[%s17609_s18 + $0x1140] ss:$16 sps:$4 sm:$0xff]   ;;  %v15657_v17 = vld [vmem:[%s17609_s18 + $0x1148] ss:$16 sps:$4 sm:$0xff]  }
 0x41a   : > { %10088 = vmatprep.subr.bf16.mxu0 %v15572_v18  ;;  %10776 = vmatprep.subr.bf16.mxu1 %v15575_v21  ;;  %v15662_v18 = vld [vmem:[%s17609_s18 + $0x1164] ss:$16 sps:$4 sm:$0xff]   ;;  %v15665_v21 = vld [vmem:[%s17609_s18 + $0x116c] ss:$16 sps:$4 sm:$0xff]  }
 0x41d   : > { %10089 = vmatpush1.bf16.msra.mxu0 %v15570_v16  ;;  %10777 = vmatpush1.bf16.msra.mxu1 %v15573_v23  ;;  %v15660_v16 = vld [vmem:[%s17609_s18 + $0x1160] ss:$16 sps:$4 sm:$0xff]   ;;  %v15663_v23 = vld [vmem:[%s17609_s18 + $0x1168] ss:$16 sps:$4 sm:$0xff]  }
 0x41e   : > { %10090 = vmatprep.subr.bf16.mxu0 %v15578_v24  ;;  %10778 = vmatprep.subr.bf16.mxu1 %v15581_v25  ;;  %v15668_v24 = vld [vmem:[%s17609_s18 + $0x1184] ss:$16 sps:$4 sm:$0xff]   ;;  %v15671_v25 = vld [vmem:[%s17609_s18 + $0x118c] ss:$16 sps:$4 sm:$0xff]  }
 0x421   : > { %10091 = vmatpush1.bf16.msra.mxu0 %v15576_v20  ;;  %10779 = vmatpush1.bf16.msra.mxu1 %v15579_v27  ;;  %v15666_v20 = vld [vmem:[%s17609_s18 + $0x1180] ss:$16 sps:$4 sm:$0xff]   ;;  %v15669_v27 = vld [vmem:[%s17609_s18 + $0x1188] ss:$16 sps:$4 sm:$0xff]  }
 0x422   : > { %10092 = vmatprep.subr.bf16.mxu0 %v15584_v28  ;;  %10780 = vmatprep.subr.bf16.mxu1 %v15587_v29  ;;  %v15674_v28 = vld [vmem:[%s17609_s18 + $0x11a4] ss:$16 sps:$4 sm:$0xff]   ;;  %v15677_v29 = vld [vmem:[%s17609_s18 + $0x11ac] ss:$16 sps:$4 sm:$0xff]  }
 0x425   : > { %10093 = vmatpush1.bf16.msra.mxu0 %v15582_v15  ;;  %10781 = vmatpush1.bf16.msra.mxu1 %v15585_v22  ;;  %v15672_v15 = vld [vmem:[%s17609_s18 + $0x11a0] ss:$16 sps:$4 sm:$0xff]   ;;  %v15675_v22 = vld [vmem:[%s17609_s18 + $0x11a8] ss:$16 sps:$4 sm:$0xff]  }
 0x426   : > { %10094 = vmatprep.subr.bf16.mxu0 %v15590_v32  ;;  %10782 = vmatprep.subr.bf16.mxu1 %v15593_v33  ;;  %v15680_v32 = vld [vmem:[%s17609_s18 + $0x11c4] ss:$16 sps:$4 sm:$0xff]   ;;  %v15683_v33 = vld [vmem:[%s17609_s18 + $0x11cc] ss:$16 sps:$4 sm:$0xff]  }
 0x429   : > { %10095 = vmatpush1.bf16.msra.mxu0 %v15588_v26  ;;  %10783 = vmatpush1.bf16.msra.mxu1 %v15591_v19  ;;  %v15678_v26 = vld [vmem:[%s17609_s18 + $0x11c0] ss:$16 sps:$4 sm:$0xff]   ;;  %v15681_v19 = vld [vmem:[%s17609_s18 + $0x11c8] ss:$16 sps:$4 sm:$0xff]  }
 0x42a   : > { %10107 = vmatprep.subr.bf16.mxu0 %v15596_v36  ;;  %10795 = vmatprep.subr.bf16.mxu1 %v15599_v37  ;;  %v15686_v36 = vld [vmem:[%s17609_s18 + $0x11e4] ss:$16 sps:$4 sm:$0xff]   ;;  %v15689_v37 = vld [vmem:[%s17609_s18 + $0x11ec] ss:$16 sps:$4 sm:$0xff]  }
 0x42c   : > { %10097 = vmatmul.mubr.bf16.vlgmr.msra.gmra.mrb[0].mxu0 %v13311_v30  ;;  %10785 = vmatmul.mubr.bf16.vlgmr.msra.gmra.mrb[0].mxu1 %v13311_v30  ;;  %v15684_v30 = vld [vmem:[%s17609_s18 + $0x11e0] ss:$16 sps:$4 sm:$0xff]  }
 0x42d   : > { %10108 = vmatpush1.bf16.msra.mxu0 %v15594_v31  ;;  %10796 = vmatpush1.bf16.msra.mxu1 %v15597_v40  ;;  %v15687_v31 = vld [vmem:[%s17609_s18 + $0x11e8] ss:$16 sps:$4 sm:$0xff]   ;;  %v15692_v40 = vld [vmem:[%s17609_s18 + $0x1204] ss:$16 sps:$4 sm:$0xff]  }
 0x42e   : > { %10109 = vmatprep.subr.bf16.mxu0 %v15602_v41  ;;  %10797 = vmatprep.subr.bf16.mxu1 %v15605_v42  ;;  %v15695_v41 = vld [vmem:[%s17609_s18 + $0x120c] ss:$16 sps:$4 sm:$0xff]  }
 0x42f   : > { %10139 = vmatprep.mubr.bf16.mxu0 %v13314_v43  ;;  %10827 = vmatprep.mubr.bf16.mxu1 %v13314_v43  ;;  %v18309_v42 = vld [vmem:[%s19212_s0 + $0x48] sm:$0xff] }
 0x430   : > { %v18314_v43 = vld [vmem:[%s19212_s0 + $0xc8] sm:$0xff] }
 0x431   : > { %10110 = vmatpush1.bf16.msra.mxu0 %v15600_v34  ;;  %10798 = vmatpush1.bf16.msra.mxu1 %v15603_v35  ;;  %v13313_v34 = vcombine.low %v18231_v38, %v18236_v39  ;;  %v15690_v35 = vld [vmem:[%s17609_s18 + $0x1200] ss:$16 sps:$4 sm:$0xff]   ;;  %v15699_v39 = vld [vmem:[%s17609_s18 + $0x1228] ss:$16 sps:$4 sm:$0xff]  }
 0x432   : > { %10111 = vmatprep.subr.bf16.mxu0 %v15608_v44  ;;  %10799 = vmatprep.subr.bf16.mxu1 %v15611_v45  ;;  %v15693_v44 = vld [vmem:[%s17609_s18 + $0x1208] ss:$16 sps:$4 sm:$0xff]   ;;  %v15698_v45 = vld [vmem:[%s17609_s18 + $0x1224] ss:$16 sps:$4 sm:$0xff]   ;;  %v15696_v38 = vld [vmem:[%s17609_s18 + $0x1220] ss:$16 sps:$4 sm:$0xff]  }
 0x435   : > { %10112 = vmatpush1.bf16.msra.mxu0 %v15606_v46  ;;  %10800 = vmatpush1.bf16.msra.mxu1 %v15609_v47  ;;  %v15701_v46 = vld [vmem:[%s17609_s18 + $0x122c] ss:$16 sps:$4 sm:$0xff]   ;;  %v13316_v47 = vcombine.high %v18309_v42, %v18314_v43 }
 0x436   : > { %10113 = vmatprep.subr.bf16.mxu0 %v15614_v48  ;;  %10801 = vmatprep.subr.bf16.mxu1 %v15617_v49  ;;  %v15704_v48 = vld [vmem:[%s17609_s18 + $0x1244] ss:$16 sps:$4 sm:$0xff]   ;;  %v15707_v49 = vld [vmem:[%s17609_s18 + $0x124c] ss:$16 sps:$4 sm:$0xff]  }
 0x439   : > { %10114 = vmatpush1.bf16.msra.mxu0 %v15612_v50  ;;  %10802 = vmatpush1.bf16.msra.mxu1 %v15615_v51  ;;  %v15702_v50 = vld [vmem:[%s17609_s18 + $0x1240] ss:$16 sps:$4 sm:$0xff]   ;;  %v15705_v51 = vld [vmem:[%s17609_s18 + $0x1248] ss:$16 sps:$4 sm:$0xff]  }
 0x43a   : > { %10115 = vmatprep.subr.bf16.mxu0 %v15620_v52  ;;  %10803 = vmatprep.subr.bf16.mxu1 %v15623_v53  ;;  %v15710_v52 = vld [vmem:[%s17609_s18 + $0x1264] ss:$16 sps:$4 sm:$0xff]   ;;  %v15713_v53 = vld [vmem:[%s17609_s18 + $0x126c] ss:$16 sps:$4 sm:$0xff]  }
 0x43d   : > { %10116 = vmatpush1.bf16.msra.mxu0 %v15618_v54  ;;  %10804 = vmatpush1.bf16.msra.mxu1 %v15621_v55  ;;  %v15708_v54 = vld [vmem:[%s17609_s18 + $0x1260] ss:$16 sps:$4 sm:$0xff]   ;;  %v15711_v55 = vld [vmem:[%s17609_s18 + $0x1268] ss:$16 sps:$4 sm:$0xff]  }
 0x43e   : > { %10117 = vmatprep.subr.bf16.mxu0 %v15626_v56  ;;  %10805 = vmatprep.subr.bf16.mxu1 %v15629_v57  ;;  %v15716_v56 = vld [vmem:[%s17609_s18 + $0x1284] ss:$16 sps:$4 sm:$0xff]   ;;  %v15719_v57 = vld [vmem:[%s17609_s18 + $0x128c] ss:$16 sps:$4 sm:$0xff]  }
 0x441   : > { %10118 = vmatpush1.bf16.msra.mxu0 %v15624_v58  ;;  %10806 = vmatpush1.bf16.msra.mxu1 %v15627_v59  ;;  %v15714_v58 = vld [vmem:[%s17609_s18 + $0x1280] ss:$16 sps:$4 sm:$0xff]   ;;  %v15717_v59 = vld [vmem:[%s17609_s18 + $0x1288] ss:$16 sps:$4 sm:$0xff]  }
 0x442   : > { %10119 = vmatprep.subr.bf16.mxu0 %v15632_v60  ;;  %10807 = vmatprep.subr.bf16.mxu1 %v15635_v61  ;;  %v15722_v60 = vld [vmem:[%s17609_s18 + $0x12a4] ss:$16 sps:$4 sm:$0xff]   ;;  %v15725_v61 = vld [vmem:[%s17609_s18 + $0x12ac] ss:$16 sps:$4 sm:$0xff]  }
 0x445   : > { %10120 = vmatpush1.bf16.msra.mxu0 %v15630_v62  ;;  %10808 = vmatpush1.bf16.msra.mxu1 %v15633_v63  ;;  %v15720_v62 = vld [vmem:[%s17609_s18 + $0x12a0] ss:$16 sps:$4 sm:$0xff]   ;;  %v15723_v63 = vld [vmem:[%s17609_s18 + $0x12a8] ss:$16 sps:$4 sm:$0xff]  }
 0x446   : > { %10121 = vmatprep.subr.bf16.mxu0 %v15638_v0  ;;  %10809 = vmatprep.subr.bf16.mxu1 %v15641_v1  ;;  %v15728_v0 = vld [vmem:[%s17609_s18 + $0x12c4] ss:$16 sps:$4 sm:$0xff]   ;;  %v15731_v1 = vld [vmem:[%s17609_s18 + $0x12cc] ss:$16 sps:$4 sm:$0xff]  }
 0x449   : > { %10122 = vmatpush1.bf16.msra.mxu0 %v15636_v2  ;;  %10810 = vmatpush1.bf16.msra.mxu1 %v15639_v3  ;;  %v15726_v2 = vld [vmem:[%s17609_s18 + $0x12c0] ss:$16 sps:$4 sm:$0xff]   ;;  %v15729_v3 = vld [vmem:[%s17609_s18 + $0x12c8] ss:$16 sps:$4 sm:$0xff]  }
 0x44a   : > { %10123 = vmatprep.subr.bf16.mxu0 %v15644_v4  ;;  %10811 = vmatprep.subr.bf16.mxu1 %v15647_v5  ;;  %v15734_v4 = vld [vmem:[%s17609_s18 + $0x12e4] ss:$16 sps:$4 sm:$0xff]   ;;  %v15737_v5 = vld [vmem:[%s17609_s18 + $0x12ec] ss:$16 sps:$4 sm:$0xff]  }
 0x44d   : > { %10124 = vmatpush1.bf16.msra.mxu0 %v15642_v6  ;;  %10812 = vmatpush1.bf16.msra.mxu1 %v15645_v7  ;;  %v15732_v6 = vld [vmem:[%s17609_s18 + $0x12e0] ss:$16 sps:$4 sm:$0xff]   ;;  %v15735_v7 = vld [vmem:[%s17609_s18 + $0x12e8] ss:$16 sps:$4 sm:$0xff]  }
 0x44e   : > { %10125 = vmatprep.subr.bf16.mxu0 %v15650_v8  ;;  %10813 = vmatprep.subr.bf16.mxu1 %v15653_v9  ;;  %v15740_v8 = vld [vmem:[%s17609_s18 + $0x1304] ss:$16 sps:$4 sm:$0xff]   ;;  %v15743_v9 = vld [vmem:[%s17609_s18 + $0x130c] ss:$16 sps:$4 sm:$0xff]  }
 0x451   : > { %10126 = vmatpush1.bf16.msra.mxu0 %v15648_v10  ;;  %10814 = vmatpush1.bf16.msra.mxu1 %v15651_v11  ;;  %v15738_v10 = vld [vmem:[%s17609_s18 + $0x1300] ss:$16 sps:$4 sm:$0xff]   ;;  %v15741_v11 = vld [vmem:[%s17609_s18 + $0x1308] ss:$16 sps:$4 sm:$0xff]  }
 0x452   : > { %10127 = vmatprep.subr.bf16.mxu0 %v15656_v12  ;;  %10815 = vmatprep.subr.bf16.mxu1 %v15659_v13  ;;  %v15746_v12 = vld [vmem:[%s17609_s18 + $0x1324] ss:$16 sps:$4 sm:$0xff]   ;;  %v15749_v13 = vld [vmem:[%s17609_s18 + $0x132c] ss:$16 sps:$4 sm:$0xff]  }
 0x455   : > { %10128 = vmatpush1.bf16.msra.mxu0 %v15654_v14  ;;  %10816 = vmatpush1.bf16.msra.mxu1 %v15657_v17  ;;  %v15744_v14 = vld [vmem:[%s17609_s18 + $0x1320] ss:$16 sps:$4 sm:$0xff]   ;;  %v15747_v17 = vld [vmem:[%s17609_s18 + $0x1328] ss:$16 sps:$4 sm:$0xff]  }
 0x456   : > { %10129 = vmatprep.subr.bf16.mxu0 %v15662_v18  ;;  %10817 = vmatprep.subr.bf16.mxu1 %v15665_v21  ;;  %v15752_v18 = vld [vmem:[%s17609_s18 + $0x1344] ss:$16 sps:$4 sm:$0xff]   ;;  %v15755_v21 = vld [vmem:[%s17609_s18 + $0x134c] ss:$16 sps:$4 sm:$0xff]  }
 0x459   : > { %10130 = vmatpush1.bf16.msra.mxu0 %v15660_v16  ;;  %10818 = vmatpush1.bf16.msra.mxu1 %v15663_v23  ;;  %v15750_v16 = vld [vmem:[%s17609_s18 + $0x1340] ss:$16 sps:$4 sm:$0xff]   ;;  %v15753_v23 = vld [vmem:[%s17609_s18 + $0x1348] ss:$16 sps:$4 sm:$0xff]  }
 0x45a   : > { %10131 = vmatprep.subr.bf16.mxu0 %v15668_v24  ;;  %10819 = vmatprep.subr.bf16.mxu1 %v15671_v25  ;;  %v15758_v24 = vld [vmem:[%s17609_s18 + $0x1364] ss:$16 sps:$4 sm:$0xff]   ;;  %v15761_v25 = vld [vmem:[%s17609_s18 + $0x136c] ss:$16 sps:$4 sm:$0xff]  }
 0x45d   : > { %10132 = vmatpush1.bf16.msra.mxu0 %v15666_v20  ;;  %10820 = vmatpush1.bf16.msra.mxu1 %v15669_v27  ;;  %v15756_v20 = vld [vmem:[%s17609_s18 + $0x1360] ss:$16 sps:$4 sm:$0xff]   ;;  %v15759_v27 = vld [vmem:[%s17609_s18 + $0x1368] ss:$16 sps:$4 sm:$0xff]  }
 0x45e   : > { %10133 = vmatprep.subr.bf16.mxu0 %v15674_v28  ;;  %10821 = vmatprep.subr.bf16.mxu1 %v15677_v29  ;;  %v15764_v28 = vld [vmem:[%s17609_s18 + $0x1384] ss:$16 sps:$4 sm:$0xff]   ;;  %v15767_v29 = vld [vmem:[%s17609_s18 + $0x138c] ss:$16 sps:$4 sm:$0xff]  }
 0x461   : > { %10134 = vmatpush1.bf16.msra.mxu0 %v15672_v15  ;;  %10822 = vmatpush1.bf16.msra.mxu1 %v15675_v22  ;;  %v15762_v15 = vld [vmem:[%s17609_s18 + $0x1380] ss:$16 sps:$4 sm:$0xff]   ;;  %v15765_v22 = vld [vmem:[%s17609_s18 + $0x1388] ss:$16 sps:$4 sm:$0xff]  }
 0x462   : > { %10135 = vmatprep.subr.bf16.mxu0 %v15680_v32  ;;  %10823 = vmatprep.subr.bf16.mxu1 %v15683_v33  ;;  %v15770_v32 = vld [vmem:[%s17609_s18 + $0x13a4] ss:$16 sps:$4 sm:$0xff]   ;;  %v15773_v33 = vld [vmem:[%s17609_s18 + $0x13ac] ss:$16 sps:$4 sm:$0xff]  }
 0x465   : > { %10136 = vmatpush1.bf16.msra.mxu0 %v15678_v26  ;;  %10824 = vmatpush1.bf16.msra.mxu1 %v15681_v19  ;;  %v15768_v26 = vld [vmem:[%s17609_s18 + $0x13a0] ss:$16 sps:$4 sm:$0xff]   ;;  %v15771_v19 = vld [vmem:[%s17609_s18 + $0x13a8] ss:$16 sps:$4 sm:$0xff]  }
 0x466   : > { %10137 = vmatprep.subr.bf16.mxu0 %v15686_v36  ;;  %10825 = vmatprep.subr.bf16.mxu1 %v15689_v37  ;;  %v15776_v36 = vld [vmem:[%s17609_s18 + $0x13c4] ss:$16 sps:$4 sm:$0xff]   ;;  %v15779_v37 = vld [vmem:[%s17609_s18 + $0x13cc] ss:$16 sps:$4 sm:$0xff]  }
 0x469   : > { %10138 = vmatpush1.bf16.msra.mxu0 %v15684_v30  ;;  %10826 = vmatpush1.bf16.msra.mxu1 %v15687_v31  ;;  %v15774_v30 = vld [vmem:[%s17609_s18 + $0x13c0] ss:$16 sps:$4 sm:$0xff]   ;;  %v15777_v31 = vld [vmem:[%s17609_s18 + $0x13c8] ss:$16 sps:$4 sm:$0xff]  }
 0x46a   : > { %10150 = vmatprep.subr.bf16.mxu0 %v15692_v40  ;;  %10838 = vmatprep.subr.bf16.mxu1 %v15695_v41  ;;  %v15782_v40 = vld [vmem:[%s17609_s18 + $0x13e4] ss:$16 sps:$4 sm:$0xff]   ;;  %v15785_v41 = vld [vmem:[%s17609_s18 + $0x13ec] ss:$16 sps:$4 sm:$0xff]  }
 0x46c   : > { %10140 = vmatmul.mubr.bf16.vlgmr.msra.gmra.mrb[0].mxu0 %v13313_v34  ;;  %10828 = vmatmul.mubr.bf16.vlgmr.msra.gmra.mrb[0].mxu1 %v13313_v34  ;;  %v15780_v34 = vld [vmem:[%s17609_s18 + $0x13e0] ss:$16 sps:$4 sm:$0xff]  }
 0x46d   : > { %10151 = vmatpush1.bf16.msra.mxu0 %v15690_v35  ;;  %10839 = vmatpush1.bf16.msra.mxu1 %v15693_v44  ;;  %v15783_v35 = vld [vmem:[%s17609_s18 + $0x13e8] ss:$16 sps:$4 sm:$0xff]   ;;  %v15788_v44 = vld [vmem:[%s17609_s18 + $0x1404] ss:$16 sps:$4 sm:$0xff]  }
 0x46e   : > { %10152 = vmatprep.subr.bf16.mxu0 %v15698_v45  ;;  %10840 = vmatprep.subr.bf16.mxu1 %v15701_v46  ;;  %v15791_v45 = vld [vmem:[%s17609_s18 + $0x140c] ss:$16 sps:$4 sm:$0xff]   ;;  %v13315_v46 = vcombine.low %v18309_v42, %v18314_v43  ;;  %v15794_v42 = vld [vmem:[%s17609_s18 + $0x1424] ss:$16 sps:$4 sm:$0xff]  }
 0x46f   : > { %10182 = vmatprep.mubr.bf16.mxu0 %v13316_v47  ;;  %10870 = vmatprep.mubr.bf16.mxu1 %v13316_v47  ;;  %v18389_v47 = vld [vmem:[%s19212_s0 + $0x50] sm:$0xff]  ;;  %v15797_v43 = vld [vmem:[%s17609_s18 + $0x142c] ss:$16 sps:$4 sm:$0xff]  }
 0x471   : > { %10153 = vmatpush1.bf16.msra.mxu0 %v15696_v38  ;;  %10841 = vmatpush1.bf16.msra.mxu1 %v15699_v39  ;;  %v18394_v38 = vld [vmem:[%s19212_s0 + $0xd0] sm:$0xff] }
 0x472   : > { %10154 = vmatprep.subr.bf16.mxu0 %v15704_v48  ;;  %10842 = vmatprep.subr.bf16.mxu1 %v15707_v49  ;;  %v15786_v39 = vld [vmem:[%s17609_s18 + $0x1400] ss:$16 sps:$4 sm:$0xff]   ;;  %v15789_v48 = vld [vmem:[%s17609_s18 + $0x1408] ss:$16 sps:$4 sm:$0xff]   ;;  %v13318_v49 = vcombine.high %v18389_v47, %v18394_v38 }
 0x475   : > { %10155 = vmatpush1.bf16.msra.mxu0 %v15702_v50  ;;  %10843 = vmatpush1.bf16.msra.mxu1 %v15705_v51  ;;  %v15792_v50 = vld [vmem:[%s17609_s18 + $0x1420] ss:$16 sps:$4 sm:$0xff]   ;;  %v15795_v51 = vld [vmem:[%s17609_s18 + $0x1428] ss:$16 sps:$4 sm:$0xff]  }
 0x476   : > { %10156 = vmatprep.subr.bf16.mxu0 %v15710_v52  ;;  %10844 = vmatprep.subr.bf16.mxu1 %v15713_v53  ;;  %v15800_v52 = vld [vmem:[%s17609_s18 + $0x1444] ss:$16 sps:$4 sm:$0xff]   ;;  %v15803_v53 = vld [vmem:[%s17609_s18 + $0x144c] ss:$16 sps:$4 sm:$0xff]  }
 0x479   : > { %10157 = vmatpush1.bf16.msra.mxu0 %v15708_v54  ;;  %10845 = vmatpush1.bf16.msra.mxu1 %v15711_v55  ;;  %v15798_v54 = vld [vmem:[%s17609_s18 + $0x1440] ss:$16 sps:$4 sm:$0xff]   ;;  %v15801_v55 = vld [vmem:[%s17609_s18 + $0x1448] ss:$16 sps:$4 sm:$0xff]  }
 0x47a   : > { %10158 = vmatprep.subr.bf16.mxu0 %v15716_v56  ;;  %10846 = vmatprep.subr.bf16.mxu1 %v15719_v57  ;;  %v15806_v56 = vld [vmem:[%s17609_s18 + $0x1464] ss:$16 sps:$4 sm:$0xff]   ;;  %v15809_v57 = vld [vmem:[%s17609_s18 + $0x146c] ss:$16 sps:$4 sm:$0xff]  }
 0x47d   : > { %10159 = vmatpush1.bf16.msra.mxu0 %v15714_v58  ;;  %10847 = vmatpush1.bf16.msra.mxu1 %v15717_v59  ;;  %v15804_v58 = vld [vmem:[%s17609_s18 + $0x1460] ss:$16 sps:$4 sm:$0xff]   ;;  %v15807_v59 = vld [vmem:[%s17609_s18 + $0x1468] ss:$16 sps:$4 sm:$0xff]  }
 0x47e   : > { %10160 = vmatprep.subr.bf16.mxu0 %v15722_v60  ;;  %10848 = vmatprep.subr.bf16.mxu1 %v15725_v61  ;;  %v15812_v60 = vld [vmem:[%s17609_s18 + $0x1484] ss:$16 sps:$4 sm:$0xff]   ;;  %v15815_v61 = vld [vmem:[%s17609_s18 + $0x148c] ss:$16 sps:$4 sm:$0xff]  }
 0x481   : > { %10161 = vmatpush1.bf16.msra.mxu0 %v15720_v62  ;;  %10849 = vmatpush1.bf16.msra.mxu1 %v15723_v63  ;;  %v15810_v62 = vld [vmem:[%s17609_s18 + $0x1480] ss:$16 sps:$4 sm:$0xff]   ;;  %v15813_v63 = vld [vmem:[%s17609_s18 + $0x1488] ss:$16 sps:$4 sm:$0xff]  }
 0x482   : > { %10162 = vmatprep.subr.bf16.mxu0 %v15728_v0  ;;  %10850 = vmatprep.subr.bf16.mxu1 %v15731_v1  ;;  %v15818_v0 = vld [vmem:[%s17609_s18 + $0x14a4] ss:$16 sps:$4 sm:$0xff]   ;;  %v15821_v1 = vld [vmem:[%s17609_s18 + $0x14ac] ss:$16 sps:$4 sm:$0xff]  }
 0x485   : > { %10163 = vmatpush1.bf16.msra.mxu0 %v15726_v2  ;;  %10851 = vmatpush1.bf16.msra.mxu1 %v15729_v3  ;;  %v15816_v2 = vld [vmem:[%s17609_s18 + $0x14a0] ss:$16 sps:$4 sm:$0xff]   ;;  %v15819_v3 = vld [vmem:[%s17609_s18 + $0x14a8] ss:$16 sps:$4 sm:$0xff]  }
 0x486   : > { %10164 = vmatprep.subr.bf16.mxu0 %v15734_v4  ;;  %10852 = vmatprep.subr.bf16.mxu1 %v15737_v5  ;;  %v15824_v4 = vld [vmem:[%s17609_s18 + $0x14c4] ss:$16 sps:$4 sm:$0xff]   ;;  %v15827_v5 = vld [vmem:[%s17609_s18 + $0x14cc] ss:$16 sps:$4 sm:$0xff]  }
 0x489   : > { %10165 = vmatpush1.bf16.msra.mxu0 %v15732_v6  ;;  %10853 = vmatpush1.bf16.msra.mxu1 %v15735_v7  ;;  %v15822_v6 = vld [vmem:[%s17609_s18 + $0x14c0] ss:$16 sps:$4 sm:$0xff]   ;;  %v15825_v7 = vld [vmem:[%s17609_s18 + $0x14c8] ss:$16 sps:$4 sm:$0xff]  }
 0x48a   : > { %10166 = vmatprep.subr.bf16.mxu0 %v15740_v8  ;;  %10854 = vmatprep.subr.bf16.mxu1 %v15743_v9  ;;  %v15830_v8 = vld [vmem:[%s17609_s18 + $0x14e4] ss:$16 sps:$4 sm:$0xff]   ;;  %v15833_v9 = vld [vmem:[%s17609_s18 + $0x14ec] ss:$16 sps:$4 sm:$0xff]  }
 0x48d   : > { %10167 = vmatpush1.bf16.msra.mxu0 %v15738_v10  ;;  %10855 = vmatpush1.bf16.msra.mxu1 %v15741_v11  ;;  %v15828_v10 = vld [vmem:[%s17609_s18 + $0x14e0] ss:$16 sps:$4 sm:$0xff]   ;;  %v15831_v11 = vld [vmem:[%s17609_s18 + $0x14e8] ss:$16 sps:$4 sm:$0xff]  }
 0x48e   : > { %10168 = vmatprep.subr.bf16.mxu0 %v15746_v12  ;;  %10856 = vmatprep.subr.bf16.mxu1 %v15749_v13  ;;  %v15836_v12 = vld [vmem:[%s17609_s18 + $0x1504] ss:$16 sps:$4 sm:$0xff]   ;;  %v15839_v13 = vld [vmem:[%s17609_s18 + $0x150c] ss:$16 sps:$4 sm:$0xff]  }
 0x491   : > { %10169 = vmatpush1.bf16.msra.mxu0 %v15744_v14  ;;  %10857 = vmatpush1.bf16.msra.mxu1 %v15747_v17  ;;  %v15834_v14 = vld [vmem:[%s17609_s18 + $0x1500] ss:$16 sps:$4 sm:$0xff]   ;;  %v15837_v17 = vld [vmem:[%s17609_s18 + $0x1508] ss:$16 sps:$4 sm:$0xff]  }
 0x492   : > { %10170 = vmatprep.subr.bf16.mxu0 %v15752_v18  ;;  %10858 = vmatprep.subr.bf16.mxu1 %v15755_v21  ;;  %v15842_v18 = vld [vmem:[%s17609_s18 + $0x1524] ss:$16 sps:$4 sm:$0xff]   ;;  %v15845_v21 = vld [vmem:[%s17609_s18 + $0x152c] ss:$16 sps:$4 sm:$0xff]  }
 0x495   : > { %10171 = vmatpush1.bf16.msra.mxu0 %v15750_v16  ;;  %10859 = vmatpush1.bf16.msra.mxu1 %v15753_v23  ;;  %v15840_v16 = vld [vmem:[%s17609_s18 + $0x1520] ss:$16 sps:$4 sm:$0xff]   ;;  %v15843_v23 = vld [vmem:[%s17609_s18 + $0x1528] ss:$16 sps:$4 sm:$0xff]  }
 0x496   : > { %10172 = vmatprep.subr.bf16.mxu0 %v15758_v24  ;;  %10860 = vmatprep.subr.bf16.mxu1 %v15761_v25  ;;  %v15848_v24 = vld [vmem:[%s17609_s18 + $0x1544] ss:$16 sps:$4 sm:$0xff]   ;;  %v15851_v25 = vld [vmem:[%s17609_s18 + $0x154c] ss:$16 sps:$4 sm:$0xff]  }
 0x499   : > { %10173 = vmatpush1.bf16.msra.mxu0 %v15756_v20  ;;  %10861 = vmatpush1.bf16.msra.mxu1 %v15759_v27  ;;  %v15846_v20 = vld [vmem:[%s17609_s18 + $0x1540] ss:$16 sps:$4 sm:$0xff]   ;;  %v15849_v27 = vld [vmem:[%s17609_s18 + $0x1548] ss:$16 sps:$4 sm:$0xff]  }
 0x49a   : > { %10174 = vmatprep.subr.bf16.mxu0 %v15764_v28  ;;  %10862 = vmatprep.subr.bf16.mxu1 %v15767_v29  ;;  %v15854_v28 = vld [vmem:[%s17609_s18 + $0x1564] ss:$16 sps:$4 sm:$0xff]   ;;  %v15857_v29 = vld [vmem:[%s17609_s18 + $0x156c] ss:$16 sps:$4 sm:$0xff]  }
 0x49d   : > { %10175 = vmatpush1.bf16.msra.mxu0 %v15762_v15  ;;  %10863 = vmatpush1.bf16.msra.mxu1 %v15765_v22  ;;  %v15852_v15 = vld [vmem:[%s17609_s18 + $0x1560] ss:$16 sps:$4 sm:$0xff]   ;;  %v15855_v22 = vld [vmem:[%s17609_s18 + $0x1568] ss:$16 sps:$4 sm:$0xff]  }
 0x49e   : > { %10176 = vmatprep.subr.bf16.mxu0 %v15770_v32  ;;  %10864 = vmatprep.subr.bf16.mxu1 %v15773_v33  ;;  %v15860_v32 = vld [vmem:[%s17609_s18 + $0x1584] ss:$16 sps:$4 sm:$0xff]   ;;  %v15863_v33 = vld [vmem:[%s17609_s18 + $0x158c] ss:$16 sps:$4 sm:$0xff]  }
 0x4a1   : > { %10177 = vmatpush1.bf16.msra.mxu0 %v15768_v26  ;;  %10865 = vmatpush1.bf16.msra.mxu1 %v15771_v19  ;;  %v15858_v26 = vld [vmem:[%s17609_s18 + $0x1580] ss:$16 sps:$4 sm:$0xff]   ;;  %v15861_v19 = vld [vmem:[%s17609_s18 + $0x1588] ss:$16 sps:$4 sm:$0xff]  }
 0x4a2   : > { %10178 = vmatprep.subr.bf16.mxu0 %v15776_v36  ;;  %10866 = vmatprep.subr.bf16.mxu1 %v15779_v37  ;;  %v15866_v36 = vld [vmem:[%s17609_s18 + $0x15a4] ss:$16 sps:$4 sm:$0xff]   ;;  %v15869_v37 = vld [vmem:[%s17609_s18 + $0x15ac] ss:$16 sps:$4 sm:$0xff]  }
 0x4a5   : > { %10179 = vmatpush1.bf16.msra.mxu0 %v15774_v30  ;;  %10867 = vmatpush1.bf16.msra.mxu1 %v15777_v31  ;;  %v15864_v30 = vld [vmem:[%s17609_s18 + $0x15a0] ss:$16 sps:$4 sm:$0xff]   ;;  %v15867_v31 = vld [vmem:[%s17609_s18 + $0x15a8] ss:$16 sps:$4 sm:$0xff]  }
 0x4a6   : > { %10180 = vmatprep.subr.bf16.mxu0 %v15782_v40  ;;  %10868 = vmatprep.subr.bf16.mxu1 %v15785_v41  ;;  %v15872_v40 = vld [vmem:[%s17609_s18 + $0x15c4] ss:$16 sps:$4 sm:$0xff]   ;;  %v15875_v41 = vld [vmem:[%s17609_s18 + $0x15cc] ss:$16 sps:$4 sm:$0xff]  }
 0x4a9   : > { %10181 = vmatpush1.bf16.msra.mxu0 %v15780_v34  ;;  %10869 = vmatpush1.bf16.msra.mxu1 %v15783_v35  ;;  %v15870_v34 = vld [vmem:[%s17609_s18 + $0x15c0] ss:$16 sps:$4 sm:$0xff]   ;;  %v15873_v35 = vld [vmem:[%s17609_s18 + $0x15c8] ss:$16 sps:$4 sm:$0xff]  }
 0x4aa   : > { %10193 = vmatprep.subr.bf16.mxu0 %v15788_v44  ;;  %10881 = vmatprep.subr.bf16.mxu1 %v15791_v45  ;;  %v15878_v44 = vld [vmem:[%s17609_s18 + $0x15e4] ss:$16 sps:$4 sm:$0xff]   ;;  %v15881_v45 = vld [vmem:[%s17609_s18 + $0x15ec] ss:$16 sps:$4 sm:$0xff]  }
 0x4ac   : > { %10183 = vmatmul.mubr.bf16.vlgmr.msra.gmra.mrb[0].mxu0 %v13315_v46  ;;  %10871 = vmatmul.mubr.bf16.vlgmr.msra.gmra.mrb[0].mxu1 %v13315_v46  ;;  %v15876_v46 = vld [vmem:[%s17609_s18 + $0x15e0] ss:$16 sps:$4 sm:$0xff]  }
 0x4ad   : > { %10194 = vmatpush1.bf16.msra.mxu0 %v15786_v39  ;;  %10882 = vmatpush1.bf16.msra.mxu1 %v15789_v48  ;;  %v15879_v39 = vld [vmem:[%s17609_s18 + $0x15e8] ss:$16 sps:$4 sm:$0xff]   ;;  %v15884_v48 = vld [vmem:[%s17609_s18 + $0x1604] ss:$16 sps:$4 sm:$0xff]  }
 0x4ae   : > { %10195 = vmatprep.subr.bf16.mxu0 %v15794_v42  ;;  %10883 = vmatprep.subr.bf16.mxu1 %v15797_v43  ;;  %v15887_v42 = vld [vmem:[%s17609_s18 + $0x160c] ss:$16 sps:$4 sm:$0xff]   ;;  %v13317_v43 = vcombine.low %v18389_v47, %v18394_v38  ;;  %v15890_v47 = vld [vmem:[%s17609_s18 + $0x1624] ss:$16 sps:$4 sm:$0xff]  }
 0x4af   : > { %10225 = vmatprep.mubr.bf16.mxu0 %v13318_v49  ;;  %10913 = vmatprep.mubr.bf16.mxu1 %v13318_v49  ;;  %v18467_v49 = vld [vmem:[%s19212_s0 + $0x58] sm:$0xff] }
 0x4b0   : > { %v15893_v38 = vld [vmem:[%s17609_s18 + $0x162c] ss:$16 sps:$4 sm:$0xff]  }
 0x4b1   : > { %10196 = vmatpush1.bf16.msra.mxu0 %v15792_v50  ;;  %10884 = vmatpush1.bf16.msra.mxu1 %v15795_v51  ;;  %v18472_v50 = vld [vmem:[%s19212_s0 + $0xd8] sm:$0xff]  ;;  %v15882_v51 = vld [vmem:[%s17609_s18 + $0x1600] ss:$16 sps:$4 sm:$0xff]  }
 0x4b2   : > { %10197 = vmatprep.subr.bf16.mxu0 %v15800_v52  ;;  %10885 = vmatprep.subr.bf16.mxu1 %v15803_v53  ;;  %v15885_v52 = vld [vmem:[%s17609_s18 + $0x1608] ss:$16 sps:$4 sm:$0xff]   ;;  %v13320_v53 = vcombine.high %v18467_v49, %v18472_v50 }
 0x4b5   : > { %10198 = vmatpush1.bf16.msra.mxu0 %v15798_v54  ;;  %10886 = vmatpush1.bf16.msra.mxu1 %v15801_v55  ;;  %v15888_v54 = vld [vmem:[%s17609_s18 + $0x1620] ss:$16 sps:$4 sm:$0xff]   ;;  %v15891_v55 = vld [vmem:[%s17609_s18 + $0x1628] ss:$16 sps:$4 sm:$0xff]  }
 0x4b6   : > { %10199 = vmatprep.subr.bf16.mxu0 %v15806_v56  ;;  %10887 = vmatprep.subr.bf16.mxu1 %v15809_v57  ;;  %v15896_v56 = vld [vmem:[%s17609_s18 + $0x1644] ss:$16 sps:$4 sm:$0xff]   ;;  %v15899_v57 = vld [vmem:[%s17609_s18 + $0x164c] ss:$16 sps:$4 sm:$0xff]  }
 0x4b9   : > { %10200 = vmatpush1.bf16.msra.mxu0 %v15804_v58  ;;  %10888 = vmatpush1.bf16.msra.mxu1 %v15807_v59  ;;  %v15894_v58 = vld [vmem:[%s17609_s18 + $0x1640] ss:$16 sps:$4 sm:$0xff]   ;;  %v15897_v59 = vld [vmem:[%s17609_s18 + $0x1648] ss:$16 sps:$4 sm:$0xff]  }
 0x4ba   : > { %10201 = vmatprep.subr.bf16.mxu0 %v15812_v60  ;;  %10889 = vmatprep.subr.bf16.mxu1 %v15815_v61  ;;  %v15902_v60 = vld [vmem:[%s17609_s18 + $0x1664] ss:$16 sps:$4 sm:$0xff]   ;;  %v15905_v61 = vld [vmem:[%s17609_s18 + $0x166c] ss:$16 sps:$4 sm:$0xff]  }
 0x4bd   : > { %10202 = vmatpush1.bf16.msra.mxu0 %v15810_v62  ;;  %10890 = vmatpush1.bf16.msra.mxu1 %v15813_v63  ;;  %v15900_v62 = vld [vmem:[%s17609_s18 + $0x1660] ss:$16 sps:$4 sm:$0xff]   ;;  %v15903_v63 = vld [vmem:[%s17609_s18 + $0x1668] ss:$16 sps:$4 sm:$0xff]  }
 0x4be   : > { %10203 = vmatprep.subr.bf16.mxu0 %v15818_v0  ;;  %10891 = vmatprep.subr.bf16.mxu1 %v15821_v1  ;;  %v15908_v0 = vld [vmem:[%s17609_s18 + $0x1684] ss:$16 sps:$4 sm:$0xff]   ;;  %v15911_v1 = vld [vmem:[%s17609_s18 + $0x168c] ss:$16 sps:$4 sm:$0xff]  }
 0x4c1   : > { %10204 = vmatpush1.bf16.msra.mxu0 %v15816_v2  ;;  %10892 = vmatpush1.bf16.msra.mxu1 %v15819_v3  ;;  %v15906_v2 = vld [vmem:[%s17609_s18 + $0x1680] ss:$16 sps:$4 sm:$0xff]   ;;  %v15909_v3 = vld [vmem:[%s17609_s18 + $0x1688] ss:$16 sps:$4 sm:$0xff]  }
 0x4c2   : > { %10205 = vmatprep.subr.bf16.mxu0 %v15824_v4  ;;  %10893 = vmatprep.subr.bf16.mxu1 %v15827_v5  ;;  %v15914_v4 = vld [vmem:[%s17609_s18 + $0x16a4] ss:$16 sps:$4 sm:$0xff]   ;;  %v15917_v5 = vld [vmem:[%s17609_s18 + $0x16ac] ss:$16 sps:$4 sm:$0xff]  }
 0x4c5   : > { %10206 = vmatpush1.bf16.msra.mxu0 %v15822_v6  ;;  %10894 = vmatpush1.bf16.msra.mxu1 %v15825_v7  ;;  %v15912_v6 = vld [vmem:[%s17609_s18 + $0x16a0] ss:$16 sps:$4 sm:$0xff]   ;;  %v15915_v7 = vld [vmem:[%s17609_s18 + $0x16a8] ss:$16 sps:$4 sm:$0xff]  }
 0x4c6   : > { %10207 = vmatprep.subr.bf16.mxu0 %v15830_v8  ;;  %10895 = vmatprep.subr.bf16.mxu1 %v15833_v9  ;;  %v15920_v8 = vld [vmem:[%s17609_s18 + $0x16c4] ss:$16 sps:$4 sm:$0xff]   ;;  %v15923_v9 = vld [vmem:[%s17609_s18 + $0x16cc] ss:$16 sps:$4 sm:$0xff]  }
 0x4c9   : > { %10208 = vmatpush1.bf16.msra.mxu0 %v15828_v10  ;;  %10896 = vmatpush1.bf16.msra.mxu1 %v15831_v11  ;;  %v15918_v10 = vld [vmem:[%s17609_s18 + $0x16c0] ss:$16 sps:$4 sm:$0xff]   ;;  %v15921_v11 = vld [vmem:[%s17609_s18 + $0x16c8] ss:$16 sps:$4 sm:$0xff]  }
 0x4ca   : > { %10209 = vmatprep.subr.bf16.mxu0 %v15836_v12  ;;  %10897 = vmatprep.subr.bf16.mxu1 %v15839_v13  ;;  %v15926_v12 = vld [vmem:[%s17609_s18 + $0x16e4] ss:$16 sps:$4 sm:$0xff]   ;;  %v15929_v13 = vld [vmem:[%s17609_s18 + $0x16ec] ss:$16 sps:$4 sm:$0xff]  }
 0x4cd   : > { %10210 = vmatpush1.bf16.msra.mxu0 %v15834_v14  ;;  %10898 = vmatpush1.bf16.msra.mxu1 %v15837_v17  ;;  %v15924_v14 = vld [vmem:[%s17609_s18 + $0x16e0] ss:$16 sps:$4 sm:$0xff]   ;;  %v15927_v17 = vld [vmem:[%s17609_s18 + $0x16e8] ss:$16 sps:$4 sm:$0xff]  }
 0x4ce   : > { %10211 = vmatprep.subr.bf16.mxu0 %v15842_v18  ;;  %10899 = vmatprep.subr.bf16.mxu1 %v15845_v21  ;;  %v15932_v18 = vld [vmem:[%s17609_s18 + $0x1704] ss:$16 sps:$4 sm:$0xff]   ;;  %v15935_v21 = vld [vmem:[%s17609_s18 + $0x170c] ss:$16 sps:$4 sm:$0xff]  }
 0x4d1   : > { %10212 = vmatpush1.bf16.msra.mxu0 %v15840_v16  ;;  %10900 = vmatpush1.bf16.msra.mxu1 %v15843_v23  ;;  %v15930_v16 = vld [vmem:[%s17609_s18 + $0x1700] ss:$16 sps:$4 sm:$0xff]   ;;  %v15933_v23 = vld [vmem:[%s17609_s18 + $0x1708] ss:$16 sps:$4 sm:$0xff]  }
 0x4d2   : > { %10213 = vmatprep.subr.bf16.mxu0 %v15848_v24  ;;  %10901 = vmatprep.subr.bf16.mxu1 %v15851_v25  ;;  %v15938_v24 = vld [vmem:[%s17609_s18 + $0x1724] ss:$16 sps:$4 sm:$0xff]   ;;  %v15941_v25 = vld [vmem:[%s17609_s18 + $0x172c] ss:$16 sps:$4 sm:$0xff]  }
 0x4d5   : > { %10214 = vmatpush1.bf16.msra.mxu0 %v15846_v20  ;;  %10902 = vmatpush1.bf16.msra.mxu1 %v15849_v27  ;;  %v15936_v20 = vld [vmem:[%s17609_s18 + $0x1720] ss:$16 sps:$4 sm:$0xff]   ;;  %v15939_v27 = vld [vmem:[%s17609_s18 + $0x1728] ss:$16 sps:$4 sm:$0xff]  }
 0x4d6   : > { %10215 = vmatprep.subr.bf16.mxu0 %v15854_v28  ;;  %10903 = vmatprep.subr.bf16.mxu1 %v15857_v29  ;;  %v15944_v28 = vld [vmem:[%s17609_s18 + $0x1744] ss:$16 sps:$4 sm:$0xff]   ;;  %v15947_v29 = vld [vmem:[%s17609_s18 + $0x174c] ss:$16 sps:$4 sm:$0xff]  }
 0x4d9   : > { %10216 = vmatpush1.bf16.msra.mxu0 %v15852_v15  ;;  %10904 = vmatpush1.bf16.msra.mxu1 %v15855_v22  ;;  %v15942_v15 = vld [vmem:[%s17609_s18 + $0x1740] ss:$16 sps:$4 sm:$0xff]   ;;  %v15945_v22 = vld [vmem:[%s17609_s18 + $0x1748] ss:$16 sps:$4 sm:$0xff]  }
 0x4da   : > { %10217 = vmatprep.subr.bf16.mxu0 %v15860_v32  ;;  %10905 = vmatprep.subr.bf16.mxu1 %v15863_v33  ;;  %v15950_v32 = vld [vmem:[%s17609_s18 + $0x1764] ss:$16 sps:$4 sm:$0xff]   ;;  %v15953_v33 = vld [vmem:[%s17609_s18 + $0x176c] ss:$16 sps:$4 sm:$0xff]  }
 0x4dd   : > { %10218 = vmatpush1.bf16.msra.mxu0 %v15858_v26  ;;  %10906 = vmatpush1.bf16.msra.mxu1 %v15861_v19  ;;  %v15948_v26 = vld [vmem:[%s17609_s18 + $0x1760] ss:$16 sps:$4 sm:$0xff]   ;;  %v15951_v19 = vld [vmem:[%s17609_s18 + $0x1768] ss:$16 sps:$4 sm:$0xff]  }
 0x4de   : > { %10219 = vmatprep.subr.bf16.mxu0 %v15866_v36  ;;  %10907 = vmatprep.subr.bf16.mxu1 %v15869_v37  ;;  %v15956_v36 = vld [vmem:[%s17609_s18 + $0x1784] ss:$16 sps:$4 sm:$0xff]   ;;  %v15959_v37 = vld [vmem:[%s17609_s18 + $0x178c] ss:$16 sps:$4 sm:$0xff]  }
 0x4e1   : > { %10220 = vmatpush1.bf16.msra.mxu0 %v15864_v30  ;;  %10908 = vmatpush1.bf16.msra.mxu1 %v15867_v31  ;;  %v15954_v30 = vld [vmem:[%s17609_s18 + $0x1780] ss:$16 sps:$4 sm:$0xff]   ;;  %v15957_v31 = vld [vmem:[%s17609_s18 + $0x1788] ss:$16 sps:$4 sm:$0xff]  }
 0x4e2   : > { %10221 = vmatprep.subr.bf16.mxu0 %v15872_v40  ;;  %10909 = vmatprep.subr.bf16.mxu1 %v15875_v41  ;;  %v15962_v40 = vld [vmem:[%s17609_s18 + $0x17a4] ss:$16 sps:$4 sm:$0xff]   ;;  %v15965_v41 = vld [vmem:[%s17609_s18 + $0x17ac] ss:$16 sps:$4 sm:$0xff]  }
 0x4e5   : > { %10222 = vmatpush1.bf16.msra.mxu0 %v15870_v34  ;;  %10910 = vmatpush1.bf16.msra.mxu1 %v15873_v35  ;;  %v15960_v34 = vld [vmem:[%s17609_s18 + $0x17a0] ss:$16 sps:$4 sm:$0xff]   ;;  %v15963_v35 = vld [vmem:[%s17609_s18 + $0x17a8] ss:$16 sps:$4 sm:$0xff]  }
 0x4e6   : > { %10223 = vmatprep.subr.bf16.mxu0 %v15878_v44  ;;  %10911 = vmatprep.subr.bf16.mxu1 %v15881_v45  ;;  %v15968_v44 = vld [vmem:[%s17609_s18 + $0x17c4] ss:$16 sps:$4 sm:$0xff]   ;;  %v15971_v45 = vld [vmem:[%s17609_s18 + $0x17cc] ss:$16 sps:$4 sm:$0xff]  }
 0x4e9   : > { %10224 = vmatpush1.bf16.msra.mxu0 %v15876_v46  ;;  %10912 = vmatpush1.bf16.msra.mxu1 %v15879_v39  ;;  %v15966_v46 = vld [vmem:[%s17609_s18 + $0x17c0] ss:$16 sps:$4 sm:$0xff]   ;;  %v15969_v39 = vld [vmem:[%s17609_s18 + $0x17c8] ss:$16 sps:$4 sm:$0xff]  }
 0x4ea   : > { %10236 = vmatprep.subr.bf16.mxu0 %v15884_v48  ;;  %10924 = vmatprep.subr.bf16.mxu1 %v15887_v42  ;;  %v15974_v48 = vld [vmem:[%s17609_s18 + $0x17e4] ss:$16 sps:$4 sm:$0xff]   ;;  %v15977_v42 = vld [vmem:[%s17609_s18 + $0x17ec] ss:$16 sps:$4 sm:$0xff]  }
 0x4ec   : > { %10226 = vmatmul.mubr.bf16.vlgmr.msra.gmra.mrb[0].mxu0 %v13317_v43  ;;  %10914 = vmatmul.mubr.bf16.vlgmr.msra.gmra.mrb[0].mxu1 %v13317_v43  ;;  %v15972_v43 = vld [vmem:[%s17609_s18 + $0x17e0] ss:$16 sps:$4 sm:$0xff]  }
 0x4ed   : > { %10237 = vmatpush1.bf16.msra.mxu0 %v15882_v51  ;;  %10925 = vmatpush1.bf16.msra.mxu1 %v15885_v52  ;;  %v15975_v51 = vld [vmem:[%s17609_s18 + $0x17e8] ss:$16 sps:$4 sm:$0xff]   ;;  %v15980_v52 = vld [vmem:[%s17609_s18 + $0x1804] ss:$16 sps:$4 sm:$0xff]  }
 0x4ee   : > { %10238 = vmatprep.subr.bf16.mxu0 %v15890_v47  ;;  %10926 = vmatprep.subr.bf16.mxu1 %v15893_v38  ;;  %v15983_v47 = vld [vmem:[%s17609_s18 + $0x180c] ss:$16 sps:$4 sm:$0xff]   ;;  %v13319_v38 = vcombine.low %v18467_v49, %v18472_v50  ;;  %v15986_v49 = vld [vmem:[%s17609_s18 + $0x1824] ss:$16 sps:$4 sm:$0xff]  }
 0x4ef   : > { %10268 = vmatprep.mubr.bf16.mxu0 %v13320_v53  ;;  %10956 = vmatprep.mubr.bf16.mxu1 %v13320_v53  ;;  %v18545_v53 = vld [vmem:[%s19212_s0 + $0x60] sm:$0xff]  ;;  %v15989_v50 = vld [vmem:[%s17609_s18 + $0x182c] ss:$16 sps:$4 sm:$0xff]  }
 0x4f1   : > { %10239 = vmatpush1.bf16.msra.mxu0 %v15888_v54  ;;  %10927 = vmatpush1.bf16.msra.mxu1 %v15891_v55  ;;  %v18550_v54 = vld [vmem:[%s19212_s0 + $0xe0] sm:$0xff] }
 0x4f2   : > { %10240 = vmatprep.subr.bf16.mxu0 %v15896_v56  ;;  %10928 = vmatprep.subr.bf16.mxu1 %v15899_v57  ;;  %v15978_v55 = vld [vmem:[%s17609_s18 + $0x1800] ss:$16 sps:$4 sm:$0xff]   ;;  %v15981_v56 = vld [vmem:[%s17609_s18 + $0x1808] ss:$16 sps:$4 sm:$0xff]   ;;  %v13322_v57 = vcombine.high %v18545_v53, %v18550_v54 }
 0x4f5   : > { %10241 = vmatpush1.bf16.msra.mxu0 %v15894_v58  ;;  %10929 = vmatpush1.bf16.msra.mxu1 %v15897_v59  ;;  %v15984_v58 = vld [vmem:[%s17609_s18 + $0x1820] ss:$16 sps:$4 sm:$0xff]   ;;  %v15987_v59 = vld [vmem:[%s17609_s18 + $0x1828] ss:$16 sps:$4 sm:$0xff]  }
 0x4f6   : > { %10242 = vmatprep.subr.bf16.mxu0 %v15902_v60  ;;  %10930 = vmatprep.subr.bf16.mxu1 %v15905_v61  ;;  %v15992_v60 = vld [vmem:[%s17609_s18 + $0x1844] ss:$16 sps:$4 sm:$0xff]   ;;  %v15995_v61 = vld [vmem:[%s17609_s18 + $0x184c] ss:$16 sps:$4 sm:$0xff]  }
 0x4f9   : > { %10243 = vmatpush1.bf16.msra.mxu0 %v15900_v62  ;;  %10931 = vmatpush1.bf16.msra.mxu1 %v15903_v63  ;;  %v15990_v62 = vld [vmem:[%s17609_s18 + $0x1840] ss:$16 sps:$4 sm:$0xff]   ;;  %v15993_v63 = vld [vmem:[%s17609_s18 + $0x1848] ss:$16 sps:$4 sm:$0xff]  }
 0x4fa   : > { %10244 = vmatprep.subr.bf16.mxu0 %v15908_v0  ;;  %10932 = vmatprep.subr.bf16.mxu1 %v15911_v1  ;;  %v15998_v0 = vld [vmem:[%s17609_s18 + $0x1864] ss:$16 sps:$4 sm:$0xff]   ;;  %v16001_v1 = vld [vmem:[%s17609_s18 + $0x186c] ss:$16 sps:$4 sm:$0xff]  }
 0x4fd   : > { %10245 = vmatpush1.bf16.msra.mxu0 %v15906_v2  ;;  %10933 = vmatpush1.bf16.msra.mxu1 %v15909_v3  ;;  %v15996_v2 = vld [vmem:[%s17609_s18 + $0x1860] ss:$16 sps:$4 sm:$0xff]   ;;  %v15999_v3 = vld [vmem:[%s17609_s18 + $0x1868] ss:$16 sps:$4 sm:$0xff]  }
 0x4fe   : > { %10246 = vmatprep.subr.bf16.mxu0 %v15914_v4  ;;  %10934 = vmatprep.subr.bf16.mxu1 %v15917_v5  ;;  %v16004_v4 = vld [vmem:[%s17609_s18 + $0x1884] ss:$16 sps:$4 sm:$0xff]   ;;  %v16007_v5 = vld [vmem:[%s17609_s18 + $0x188c] ss:$16 sps:$4 sm:$0xff]  }
 0x501   : > { %10247 = vmatpush1.bf16.msra.mxu0 %v15912_v6  ;;  %10935 = vmatpush1.bf16.msra.mxu1 %v15915_v7  ;;  %v16002_v6 = vld [vmem:[%s17609_s18 + $0x1880] ss:$16 sps:$4 sm:$0xff]   ;;  %v16005_v7 = vld [vmem:[%s17609_s18 + $0x1888] ss:$16 sps:$4 sm:$0xff]  }
 0x502   : > { %10248 = vmatprep.subr.bf16.mxu0 %v15920_v8  ;;  %10936 = vmatprep.subr.bf16.mxu1 %v15923_v9  ;;  %v16010_v8 = vld [vmem:[%s17609_s18 + $0x18a4] ss:$16 sps:$4 sm:$0xff]   ;;  %v16013_v9 = vld [vmem:[%s17609_s18 + $0x18ac] ss:$16 sps:$4 sm:$0xff]  }
 0x505   : > { %10249 = vmatpush1.bf16.msra.mxu0 %v15918_v10  ;;  %10937 = vmatpush1.bf16.msra.mxu1 %v15921_v11  ;;  %v16008_v10 = vld [vmem:[%s17609_s18 + $0x18a0] ss:$16 sps:$4 sm:$0xff]   ;;  %v16011_v11 = vld [vmem:[%s17609_s18 + $0x18a8] ss:$16 sps:$4 sm:$0xff]  }
 0x506   : > { %10250 = vmatprep.subr.bf16.mxu0 %v15926_v12  ;;  %10938 = vmatprep.subr.bf16.mxu1 %v15929_v13  ;;  %v16016_v12 = vld [vmem:[%s17609_s18 + $0x18c4] ss:$16 sps:$4 sm:$0xff]   ;;  %v16019_v13 = vld [vmem:[%s17609_s18 + $0x18cc] ss:$16 sps:$4 sm:$0xff]  }
 0x509   : > { %10251 = vmatpush1.bf16.msra.mxu0 %v15924_v14  ;;  %10939 = vmatpush1.bf16.msra.mxu1 %v15927_v17  ;;  %v16014_v14 = vld [vmem:[%s17609_s18 + $0x18c0] ss:$16 sps:$4 sm:$0xff]   ;;  %v16017_v17 = vld [vmem:[%s17609_s18 + $0x18c8] ss:$16 sps:$4 sm:$0xff]  }
 0x50a   : > { %10252 = vmatprep.subr.bf16.mxu0 %v15932_v18  ;;  %10940 = vmatprep.subr.bf16.mxu1 %v15935_v21  ;;  %v16022_v18 = vld [vmem:[%s17609_s18 + $0x18e4] ss:$16 sps:$4 sm:$0xff]   ;;  %v16025_v21 = vld [vmem:[%s17609_s18 + $0x18ec] ss:$16 sps:$4 sm:$0xff]  }
 0x50d   : > { %10253 = vmatpush1.bf16.msra.mxu0 %v15930_v16  ;;  %10941 = vmatpush1.bf16.msra.mxu1 %v15933_v23  ;;  %v16020_v16 = vld [vmem:[%s17609_s18 + $0x18e0] ss:$16 sps:$4 sm:$0xff]   ;;  %v16023_v23 = vld [vmem:[%s17609_s18 + $0x18e8] ss:$16 sps:$4 sm:$0xff]  }
 0x50e   : > { %10254 = vmatprep.subr.bf16.mxu0 %v15938_v24  ;;  %10942 = vmatprep.subr.bf16.mxu1 %v15941_v25  ;;  %v16028_v24 = vld [vmem:[%s17609_s18 + $0x1904] ss:$16 sps:$4 sm:$0xff]   ;;  %v16031_v25 = vld [vmem:[%s17609_s18 + $0x190c] ss:$16 sps:$4 sm:$0xff]  }
 0x511   : > { %10255 = vmatpush1.bf16.msra.mxu0 %v15936_v20  ;;  %10943 = vmatpush1.bf16.msra.mxu1 %v15939_v27  ;;  %v16026_v20 = vld [vmem:[%s17609_s18 + $0x1900] ss:$16 sps:$4 sm:$0xff]   ;;  %v16029_v27 = vld [vmem:[%s17609_s18 + $0x1908] ss:$16 sps:$4 sm:$0xff]  }
 0x512   : > { %10256 = vmatprep.subr.bf16.mxu0 %v15944_v28  ;;  %10944 = vmatprep.subr.bf16.mxu1 %v15947_v29  ;;  %v16034_v28 = vld [vmem:[%s17609_s18 + $0x1924] ss:$16 sps:$4 sm:$0xff]   ;;  %v16037_v29 = vld [vmem:[%s17609_s18 + $0x192c] ss:$16 sps:$4 sm:$0xff]  }
 0x515   : > { %10257 = vmatpush1.bf16.msra.mxu0 %v15942_v15  ;;  %10945 = vmatpush1.bf16.msra.mxu1 %v15945_v22  ;;  %v16032_v15 = vld [vmem:[%s17609_s18 + $0x1920] ss:$16 sps:$4 sm:$0xff]   ;;  %v16035_v22 = vld [vmem:[%s17609_s18 + $0x1928] ss:$16 sps:$4 sm:$0xff]  }
 0x516   : > { %10258 = vmatprep.subr.bf16.mxu0 %v15950_v32  ;;  %10946 = vmatprep.subr.bf16.mxu1 %v15953_v33  ;;  %v16040_v32 = vld [vmem:[%s17609_s18 + $0x1944] ss:$16 sps:$4 sm:$0xff]   ;;  %v16043_v33 = vld [vmem:[%s17609_s18 + $0x194c] ss:$16 sps:$4 sm:$0xff]  }
 0x519   : > { %10259 = vmatpush1.bf16.msra.mxu0 %v15948_v26  ;;  %10947 = vmatpush1.bf16.msra.mxu1 %v15951_v19  ;;  %v16038_v26 = vld [vmem:[%s17609_s18 + $0x1940] ss:$16 sps:$4 sm:$0xff]   ;;  %v16041_v19 = vld [vmem:[%s17609_s18 + $0x1948] ss:$16 sps:$4 sm:$0xff]  }
 0x51a   : > { %10260 = vmatprep.subr.bf16.mxu0 %v15956_v36  ;;  %10948 = vmatprep.subr.bf16.mxu1 %v15959_v37  ;;  %v16046_v36 = vld [vmem:[%s17609_s18 + $0x1964] ss:$16 sps:$4 sm:$0xff]   ;;  %v16049_v37 = vld [vmem:[%s17609_s18 + $0x196c] ss:$16 sps:$4 sm:$0xff]  }
 0x51d   : > { %10261 = vmatpush1.bf16.msra.mxu0 %v15954_v30  ;;  %10949 = vmatpush1.bf16.msra.mxu1 %v15957_v31  ;;  %v16044_v30 = vld [vmem:[%s17609_s18 + $0x1960] ss:$16 sps:$4 sm:$0xff]   ;;  %v16047_v31 = vld [vmem:[%s17609_s18 + $0x1968] ss:$16 sps:$4 sm:$0xff]  }
 0x51e   : > { %10262 = vmatprep.subr.bf16.mxu0 %v15962_v40  ;;  %10950 = vmatprep.subr.bf16.mxu1 %v15965_v41  ;;  %v16052_v40 = vld [vmem:[%s17609_s18 + $0x1984] ss:$16 sps:$4 sm:$0xff]   ;;  %v16055_v41 = vld [vmem:[%s17609_s18 + $0x198c] ss:$16 sps:$4 sm:$0xff]  }
 0x521   : > { %10263 = vmatpush1.bf16.msra.mxu0 %v15960_v34  ;;  %10951 = vmatpush1.bf16.msra.mxu1 %v15963_v35  ;;  %v16050_v34 = vld [vmem:[%s17609_s18 + $0x1980] ss:$16 sps:$4 sm:$0xff]   ;;  %v16053_v35 = vld [vmem:[%s17609_s18 + $0x1988] ss:$16 sps:$4 sm:$0xff]  }
 0x522   : > { %10264 = vmatprep.subr.bf16.mxu0 %v15968_v44  ;;  %10952 = vmatprep.subr.bf16.mxu1 %v15971_v45  ;;  %v16058_v44 = vld [vmem:[%s17609_s18 + $0x19a4] ss:$16 sps:$4 sm:$0xff]   ;;  %v16061_v45 = vld [vmem:[%s17609_s18 + $0x19ac] ss:$16 sps:$4 sm:$0xff]  }
 0x525   : > { %10265 = vmatpush1.bf16.msra.mxu0 %v15966_v46  ;;  %10953 = vmatpush1.bf16.msra.mxu1 %v15969_v39  ;;  %v16056_v46 = vld [vmem:[%s17609_s18 + $0x19a0] ss:$16 sps:$4 sm:$0xff]   ;;  %v16059_v39 = vld [vmem:[%s17609_s18 + $0x19a8] ss:$16 sps:$4 sm:$0xff]  }
 0x526   : > { %10266 = vmatprep.subr.bf16.mxu0 %v15974_v48  ;;  %10954 = vmatprep.subr.bf16.mxu1 %v15977_v42  ;;  %v16064_v48 = vld [vmem:[%s17609_s18 + $0x19c4] ss:$16 sps:$4 sm:$0xff]   ;;  %v16067_v42 = vld [vmem:[%s17609_s18 + $0x19cc] ss:$16 sps:$4 sm:$0xff]  }
 0x529   : > { %10267 = vmatpush1.bf16.msra.mxu0 %v15972_v43  ;;  %10955 = vmatpush1.bf16.msra.mxu1 %v15975_v51  ;;  %v16062_v43 = vld [vmem:[%s17609_s18 + $0x19c0] ss:$16 sps:$4 sm:$0xff]   ;;  %v16065_v51 = vld [vmem:[%s17609_s18 + $0x19c8] ss:$16 sps:$4 sm:$0xff]  }
 0x52a   : > { %10279 = vmatprep.subr.bf16.mxu0 %v15980_v52  ;;  %10967 = vmatprep.subr.bf16.mxu1 %v15983_v47  ;;  %v16070_v52 = vld [vmem:[%s17609_s18 + $0x19e4] ss:$16 sps:$4 sm:$0xff]   ;;  %v16073_v47 = vld [vmem:[%s17609_s18 + $0x19ec] ss:$16 sps:$4 sm:$0xff]  }
 0x52c   : > { %10269 = vmatmul.mubr.bf16.vlgmr.msra.gmra.mrb[0].mxu0 %v13319_v38  ;;  %10957 = vmatmul.mubr.bf16.vlgmr.msra.gmra.mrb[0].mxu1 %v13319_v38  ;;  %v16068_v38 = vld [vmem:[%s17609_s18 + $0x19e0] ss:$16 sps:$4 sm:$0xff]  }
 0x52d   : > { %10280 = vmatpush1.bf16.msra.mxu0 %v15978_v55  ;;  %10968 = vmatpush1.bf16.msra.mxu1 %v15981_v56  ;;  %v16071_v55 = vld [vmem:[%s17609_s18 + $0x19e8] ss:$16 sps:$4 sm:$0xff]   ;;  %v16076_v56 = vld [vmem:[%s17609_s18 + $0x1a04] ss:$16 sps:$4 sm:$0xff]  }
 0x52e   : > { %10281 = vmatprep.subr.bf16.mxu0 %v15986_v49  ;;  %10969 = vmatprep.subr.bf16.mxu1 %v15989_v50  ;;  %v16079_v49 = vld [vmem:[%s17609_s18 + $0x1a0c] ss:$16 sps:$4 sm:$0xff]   ;;  %v13321_v50 = vcombine.low %v18545_v53, %v18550_v54  ;;  %v16082_v53 = vld [vmem:[%s17609_s18 + $0x1a24] ss:$16 sps:$4 sm:$0xff]  }
 0x52f   : > { %10311 = vmatprep.mubr.bf16.mxu0 %v13322_v57  ;;  %10999 = vmatprep.mubr.bf16.mxu1 %v13322_v57  ;;  %v18623_v57 = vld [vmem:[%s19212_s0 + $0x68] sm:$0xff] }
 0x530   : > { %v16085_v54 = vld [vmem:[%s17609_s18 + $0x1a2c] ss:$16 sps:$4 sm:$0xff]  }
 0x531   : > { %10282 = vmatpush1.bf16.msra.mxu0 %v15984_v58  ;;  %10970 = vmatpush1.bf16.msra.mxu1 %v15987_v59  ;;  %v18628_v58 = vld [vmem:[%s19212_s0 + $0xe8] sm:$0xff]  ;;  %v16074_v59 = vld [vmem:[%s17609_s18 + $0x1a00] ss:$16 sps:$4 sm:$0xff]  }
 0x532   : > { %10283 = vmatprep.subr.bf16.mxu0 %v15992_v60  ;;  %10971 = vmatprep.subr.bf16.mxu1 %v15995_v61  ;;  %v16077_v60 = vld [vmem:[%s17609_s18 + $0x1a08] ss:$16 sps:$4 sm:$0xff]   ;;  %v13324_v61 = vcombine.high %v18623_v57, %v18628_v58 }
 0x535   : > { %10284 = vmatpush1.bf16.msra.mxu0 %v15990_v62  ;;  %10972 = vmatpush1.bf16.msra.mxu1 %v15993_v63  ;;  %v16080_v62 = vld [vmem:[%s17609_s18 + $0x1a20] ss:$16 sps:$4 sm:$0xff]   ;;  %v16083_v63 = vld [vmem:[%s17609_s18 + $0x1a28] ss:$16 sps:$4 sm:$0xff]  }
 0x536   : > { %10285 = vmatprep.subr.bf16.mxu0 %v15998_v0  ;;  %10973 = vmatprep.subr.bf16.mxu1 %v16001_v1  ;;  %v16088_v0 = vld [vmem:[%s17609_s18 + $0x1a44] ss:$16 sps:$4 sm:$0xff]   ;;  %v16091_v1 = vld [vmem:[%s17609_s18 + $0x1a4c] ss:$16 sps:$4 sm:$0xff]  }
 0x539   : > { %10286 = vmatpush1.bf16.msra.mxu0 %v15996_v2  ;;  %10974 = vmatpush1.bf16.msra.mxu1 %v15999_v3  ;;  %v16086_v2 = vld [vmem:[%s17609_s18 + $0x1a40] ss:$16 sps:$4 sm:$0xff]   ;;  %v16089_v3 = vld [vmem:[%s17609_s18 + $0x1a48] ss:$16 sps:$4 sm:$0xff]  }
 0x53a   : > { %10287 = vmatprep.subr.bf16.mxu0 %v16004_v4  ;;  %10975 = vmatprep.subr.bf16.mxu1 %v16007_v5  ;;  %v16094_v4 = vld [vmem:[%s17609_s18 + $0x1a64] ss:$16 sps:$4 sm:$0xff]   ;;  %v16097_v5 = vld [vmem:[%s17609_s18 + $0x1a6c] ss:$16 sps:$4 sm:$0xff]  }
 0x53d   : > { %10288 = vmatpush1.bf16.msra.mxu0 %v16002_v6  ;;  %10976 = vmatpush1.bf16.msra.mxu1 %v16005_v7  ;;  %v16092_v6 = vld [vmem:[%s17609_s18 + $0x1a60] ss:$16 sps:$4 sm:$0xff]   ;;  %v16095_v7 = vld [vmem:[%s17609_s18 + $0x1a68] ss:$16 sps:$4 sm:$0xff]  }
 0x53e   : > { %10289 = vmatprep.subr.bf16.mxu0 %v16010_v8  ;;  %10977 = vmatprep.subr.bf16.mxu1 %v16013_v9  ;;  %v16100_v8 = vld [vmem:[%s17609_s18 + $0x1a84] ss:$16 sps:$4 sm:$0xff]   ;;  %v16103_v9 = vld [vmem:[%s17609_s18 + $0x1a8c] ss:$16 sps:$4 sm:$0xff]  }
 0x541   : > { %10290 = vmatpush1.bf16.msra.mxu0 %v16008_v10  ;;  %10978 = vmatpush1.bf16.msra.mxu1 %v16011_v11  ;;  %v16098_v10 = vld [vmem:[%s17609_s18 + $0x1a80] ss:$16 sps:$4 sm:$0xff]   ;;  %v16101_v11 = vld [vmem:[%s17609_s18 + $0x1a88] ss:$16 sps:$4 sm:$0xff]  }
 0x542   : > { %10291 = vmatprep.subr.bf16.mxu0 %v16016_v12  ;;  %10979 = vmatprep.subr.bf16.mxu1 %v16019_v13  ;;  %v16106_v12 = vld [vmem:[%s17609_s18 + $0x1aa4] ss:$16 sps:$4 sm:$0xff]   ;;  %v16109_v13 = vld [vmem:[%s17609_s18 + $0x1aac] ss:$16 sps:$4 sm:$0xff]  }
 0x545   : > { %10292 = vmatpush1.bf16.msra.mxu0 %v16014_v14  ;;  %10980 = vmatpush1.bf16.msra.mxu1 %v16017_v17  ;;  %v16104_v14 = vld [vmem:[%s17609_s18 + $0x1aa0] ss:$16 sps:$4 sm:$0xff]   ;;  %v16107_v17 = vld [vmem:[%s17609_s18 + $0x1aa8] ss:$16 sps:$4 sm:$0xff]  }
 0x546   : > { %10293 = vmatprep.subr.bf16.mxu0 %v16022_v18  ;;  %10981 = vmatprep.subr.bf16.mxu1 %v16025_v21  ;;  %v16112_v18 = vld [vmem:[%s17609_s18 + $0x1ac4] ss:$16 sps:$4 sm:$0xff]   ;;  %v16115_v21 = vld [vmem:[%s17609_s18 + $0x1acc] ss:$16 sps:$4 sm:$0xff]  }
 0x549   : > { %10294 = vmatpush1.bf16.msra.mxu0 %v16020_v16  ;;  %10982 = vmatpush1.bf16.msra.mxu1 %v16023_v23  ;;  %v16110_v16 = vld [vmem:[%s17609_s18 + $0x1ac0] ss:$16 sps:$4 sm:$0xff]   ;;  %v16113_v23 = vld [vmem:[%s17609_s18 + $0x1ac8] ss:$16 sps:$4 sm:$0xff]  }
 0x54a   : > { %10295 = vmatprep.subr.bf16.mxu0 %v16028_v24  ;;  %10983 = vmatprep.subr.bf16.mxu1 %v16031_v25  ;;  %v16118_v24 = vld [vmem:[%s17609_s18 + $0x1ae4] ss:$16 sps:$4 sm:$0xff]   ;;  %v16121_v25 = vld [vmem:[%s17609_s18 + $0x1aec] ss:$16 sps:$4 sm:$0xff]  }
 0x54d   : > { %10296 = vmatpush1.bf16.msra.mxu0 %v16026_v20  ;;  %10984 = vmatpush1.bf16.msra.mxu1 %v16029_v27  ;;  %v16116_v20 = vld [vmem:[%s17609_s18 + $0x1ae0] ss:$16 sps:$4 sm:$0xff]   ;;  %v16119_v27 = vld [vmem:[%s17609_s18 + $0x1ae8] ss:$16 sps:$4 sm:$0xff]  }
 0x54e   : > { %10297 = vmatprep.subr.bf16.mxu0 %v16034_v28  ;;  %10985 = vmatprep.subr.bf16.mxu1 %v16037_v29  ;;  %v16124_v28 = vld [vmem:[%s17609_s18 + $0x1b04] ss:$16 sps:$4 sm:$0xff]   ;;  %v16127_v29 = vld [vmem:[%s17609_s18 + $0x1b0c] ss:$16 sps:$4 sm:$0xff]  }
 0x551   : > { %10298 = vmatpush1.bf16.msra.mxu0 %v16032_v15  ;;  %10986 = vmatpush1.bf16.msra.mxu1 %v16035_v22  ;;  %v16122_v15 = vld [vmem:[%s17609_s18 + $0x1b00] ss:$16 sps:$4 sm:$0xff]   ;;  %v16125_v22 = vld [vmem:[%s17609_s18 + $0x1b08] ss:$16 sps:$4 sm:$0xff]  }
 0x552   : > { %10299 = vmatprep.subr.bf16.mxu0 %v16040_v32  ;;  %10987 = vmatprep.subr.bf16.mxu1 %v16043_v33  ;;  %v16130_v32 = vld [vmem:[%s17609_s18 + $0x1b24] ss:$16 sps:$4 sm:$0xff]   ;;  %v16133_v33 = vld [vmem:[%s17609_s18 + $0x1b2c] ss:$16 sps:$4 sm:$0xff]  }
 0x555   : > { %10300 = vmatpush1.bf16.msra.mxu0 %v16038_v26  ;;  %10988 = vmatpush1.bf16.msra.mxu1 %v16041_v19  ;;  %v16128_v26 = vld [vmem:[%s17609_s18 + $0x1b20] ss:$16 sps:$4 sm:$0xff]   ;;  %v16131_v19 = vld [vmem:[%s17609_s18 + $0x1b28] ss:$16 sps:$4 sm:$0xff]  }
 0x556   : > { %10301 = vmatprep.subr.bf16.mxu0 %v16046_v36  ;;  %10989 = vmatprep.subr.bf16.mxu1 %v16049_v37  ;;  %v16136_v36 = vld [vmem:[%s17609_s18 + $0x1b44] ss:$16 sps:$4 sm:$0xff]   ;;  %v16139_v37 = vld [vmem:[%s17609_s18 + $0x1b4c] ss:$16 sps:$4 sm:$0xff]  }
 0x559   : > { %10302 = vmatpush1.bf16.msra.mxu0 %v16044_v30  ;;  %10990 = vmatpush1.bf16.msra.mxu1 %v16047_v31  ;;  %v16134_v30 = vld [vmem:[%s17609_s18 + $0x1b40] ss:$16 sps:$4 sm:$0xff]   ;;  %v16137_v31 = vld [vmem:[%s17609_s18 + $0x1b48] ss:$16 sps:$4 sm:$0xff]  }
 0x55a   : > { %10303 = vmatprep.subr.bf16.mxu0 %v16052_v40  ;;  %10991 = vmatprep.subr.bf16.mxu1 %v16055_v41  ;;  %v16142_v40 = vld [vmem:[%s17609_s18 + $0x1b64] ss:$16 sps:$4 sm:$0xff]   ;;  %v16145_v41 = vld [vmem:[%s17609_s18 + $0x1b6c] ss:$16 sps:$4 sm:$0xff]  }
 0x55d   : > { %10304 = vmatpush1.bf16.msra.mxu0 %v16050_v34  ;;  %10992 = vmatpush1.bf16.msra.mxu1 %v16053_v35  ;;  %v16140_v34 = vld [vmem:[%s17609_s18 + $0x1b60] ss:$16 sps:$4 sm:$0xff]   ;;  %v16143_v35 = vld [vmem:[%s17609_s18 + $0x1b68] ss:$16 sps:$4 sm:$0xff]  }
 0x55e   : > { %10305 = vmatprep.subr.bf16.mxu0 %v16058_v44  ;;  %10993 = vmatprep.subr.bf16.mxu1 %v16061_v45  ;;  %v16148_v44 = vld [vmem:[%s17609_s18 + $0x1b84] ss:$16 sps:$4 sm:$0xff]   ;;  %v16151_v45 = vld [vmem:[%s17609_s18 + $0x1b8c] ss:$16 sps:$4 sm:$0xff]  }
 0x561   : > { %10306 = vmatpush1.bf16.msra.mxu0 %v16056_v46  ;;  %10994 = vmatpush1.bf16.msra.mxu1 %v16059_v39  ;;  %v16146_v46 = vld [vmem:[%s17609_s18 + $0x1b80] ss:$16 sps:$4 sm:$0xff]   ;;  %v16149_v39 = vld [vmem:[%s17609_s18 + $0x1b88] ss:$16 sps:$4 sm:$0xff]  }
 0x562   : > { %10307 = vmatprep.subr.bf16.mxu0 %v16064_v48  ;;  %10995 = vmatprep.subr.bf16.mxu1 %v16067_v42  ;;  %v16154_v48 = vld [vmem:[%s17609_s18 + $0x1ba4] ss:$16 sps:$4 sm:$0xff]   ;;  %v16157_v42 = vld [vmem:[%s17609_s18 + $0x1bac] ss:$16 sps:$4 sm:$0xff]  }
 0x565   : > { %10308 = vmatpush1.bf16.msra.mxu0 %v16062_v43  ;;  %10996 = vmatpush1.bf16.msra.mxu1 %v16065_v51  ;;  %v16152_v43 = vld [vmem:[%s17609_s18 + $0x1ba0] ss:$16 sps:$4 sm:$0xff]   ;;  %v16155_v51 = vld [vmem:[%s17609_s18 + $0x1ba8] ss:$16 sps:$4 sm:$0xff]  }
 0x566   : > { %10309 = vmatprep.subr.bf16.mxu0 %v16070_v52  ;;  %10997 = vmatprep.subr.bf16.mxu1 %v16073_v47  ;;  %v16160_v52 = vld [vmem:[%s17609_s18 + $0x1bc4] ss:$16 sps:$4 sm:$0xff]   ;;  %v16163_v47 = vld [vmem:[%s17609_s18 + $0x1bcc] ss:$16 sps:$4 sm:$0xff]  }
 0x569   : > { %10310 = vmatpush1.bf16.msra.mxu0 %v16068_v38  ;;  %10998 = vmatpush1.bf16.msra.mxu1 %v16071_v55  ;;  %v16158_v38 = vld [vmem:[%s17609_s18 + $0x1bc0] ss:$16 sps:$4 sm:$0xff]   ;;  %v16161_v55 = vld [vmem:[%s17609_s18 + $0x1bc8] ss:$16 sps:$4 sm:$0xff]  }
 0x56a   : > { %10322 = vmatprep.subr.bf16.mxu0 %v16076_v56  ;;  %11010 = vmatprep.subr.bf16.mxu1 %v16079_v49  ;;  %v16166_v56 = vld [vmem:[%s17609_s18 + $0x1be4] ss:$16 sps:$4 sm:$0xff]   ;;  %v16169_v49 = vld [vmem:[%s17609_s18 + $0x1bec] ss:$16 sps:$4 sm:$0xff]  }
 0x56c   : > { %10312 = vmatmul.mubr.bf16.vlgmr.msra.gmra.mrb[0].mxu0 %v13321_v50  ;;  %11000 = vmatmul.mubr.bf16.vlgmr.msra.gmra.mrb[0].mxu1 %v13321_v50  ;;  %v16164_v50 = vld [vmem:[%s17609_s18 + $0x1be0] ss:$16 sps:$4 sm:$0xff]  }
 0x56d   : > { %10323 = vmatpush1.bf16.msra.mxu0 %v16074_v59  ;;  %11011 = vmatpush1.bf16.msra.mxu1 %v16077_v60  ;;  %v16167_v59 = vld [vmem:[%s17609_s18 + $0x1be8] ss:$16 sps:$4 sm:$0xff]   ;;  %v16172_v60 = vld [vmem:[%s17609_s18 + $0x1c04] ss:$16 sps:$4 sm:$0xff]  }
 0x56e   : > { %10324 = vmatprep.subr.bf16.mxu0 %v16082_v53  ;;  %11012 = vmatprep.subr.bf16.mxu1 %v16085_v54  ;;  %v16175_v53 = vld [vmem:[%s17609_s18 + $0x1c0c] ss:$16 sps:$4 sm:$0xff]   ;;  %v13323_v54 = vcombine.low %v18623_v57, %v18628_v58  ;;  %v16178_v57 = vld [vmem:[%s17609_s18 + $0x1c24] ss:$16 sps:$4 sm:$0xff]  }
 0x56f   : > { %10354 = vmatprep.mubr.bf16.mxu0 %v13324_v61  ;;  %11042 = vmatprep.mubr.bf16.mxu1 %v13324_v61  ;;  %v18701_v61 = vld [vmem:[%s19212_s0 + $0x70] sm:$0xff]  ;;  %v16181_v58 = vld [vmem:[%s17609_s18 + $0x1c2c] ss:$16 sps:$4 sm:$0xff]  }
 0x571   : > { %10325 = vmatpush1.bf16.msra.mxu0 %v16080_v62  ;;  %11013 = vmatpush1.bf16.msra.mxu1 %v16083_v63  ;;  %v18706_v62 = vld [vmem:[%s19212_s0 + $0xf0] sm:$0xff] }
 0x572   : > { %10326 = vmatprep.subr.bf16.mxu0 %v16088_v0  ;;  %11014 = vmatprep.subr.bf16.mxu1 %v16091_v1  ;;  %v16170_v63 = vld [vmem:[%s17609_s18 + $0x1c00] ss:$16 sps:$4 sm:$0xff]   ;;  %v16173_v0 = vld [vmem:[%s17609_s18 + $0x1c08] ss:$16 sps:$4 sm:$0xff]   ;;  %v13326_v1 = vcombine.high %v18701_v61, %v18706_v62 }
 0x575   : > { %10327 = vmatpush1.bf16.msra.mxu0 %v16086_v2  ;;  %11015 = vmatpush1.bf16.msra.mxu1 %v16089_v3  ;;  %v16176_v2 = vld [vmem:[%s17609_s18 + $0x1c20] ss:$16 sps:$4 sm:$0xff]   ;;  %v16179_v3 = vld [vmem:[%s17609_s18 + $0x1c28] ss:$16 sps:$4 sm:$0xff]  }
 0x576   : > { %10328 = vmatprep.subr.bf16.mxu0 %v16094_v4  ;;  %11016 = vmatprep.subr.bf16.mxu1 %v16097_v5  ;;  %v16184_v4 = vld [vmem:[%s17609_s18 + $0x1c44] ss:$16 sps:$4 sm:$0xff]   ;;  %v16187_v5 = vld [vmem:[%s17609_s18 + $0x1c4c] ss:$16 sps:$4 sm:$0xff]  }
 0x579   : > { %10329 = vmatpush1.bf16.msra.mxu0 %v16092_v6  ;;  %11017 = vmatpush1.bf16.msra.mxu1 %v16095_v7  ;;  %v16182_v6 = vld [vmem:[%s17609_s18 + $0x1c40] ss:$16 sps:$4 sm:$0xff]   ;;  %v16185_v7 = vld [vmem:[%s17609_s18 + $0x1c48] ss:$16 sps:$4 sm:$0xff]  }
 0x57a   : > { %10330 = vmatprep.subr.bf16.mxu0 %v16100_v8  ;;  %11018 = vmatprep.subr.bf16.mxu1 %v16103_v9  ;;  %v16190_v8 = vld [vmem:[%s17609_s18 + $0x1c64] ss:$16 sps:$4 sm:$0xff]   ;;  %v16193_v9 = vld [vmem:[%s17609_s18 + $0x1c6c] ss:$16 sps:$4 sm:$0xff]  }
 0x57d   : > { %10331 = vmatpush1.bf16.msra.mxu0 %v16098_v10  ;;  %11019 = vmatpush1.bf16.msra.mxu1 %v16101_v11  ;;  %v16188_v10 = vld [vmem:[%s17609_s18 + $0x1c60] ss:$16 sps:$4 sm:$0xff]   ;;  %v16191_v11 = vld [vmem:[%s17609_s18 + $0x1c68] ss:$16 sps:$4 sm:$0xff]  }
 0x57e   : > { %10332 = vmatprep.subr.bf16.mxu0 %v16106_v12  ;;  %11020 = vmatprep.subr.bf16.mxu1 %v16109_v13  ;;  %v16196_v12 = vld [vmem:[%s17609_s18 + $0x1c84] ss:$16 sps:$4 sm:$0xff]   ;;  %v16199_v13 = vld [vmem:[%s17609_s18 + $0x1c8c] ss:$16 sps:$4 sm:$0xff]  }
 0x581   : > { %10333 = vmatpush1.bf16.msra.mxu0 %v16104_v14  ;;  %11021 = vmatpush1.bf16.msra.mxu1 %v16107_v17  ;;  %v16194_v14 = vld [vmem:[%s17609_s18 + $0x1c80] ss:$16 sps:$4 sm:$0xff]   ;;  %v16197_v17 = vld [vmem:[%s17609_s18 + $0x1c88] ss:$16 sps:$4 sm:$0xff]  }
 0x582   : > { %10334 = vmatprep.subr.bf16.mxu0 %v16112_v18  ;;  %11022 = vmatprep.subr.bf16.mxu1 %v16115_v21  ;;  %v16202_v18 = vld [vmem:[%s17609_s18 + $0x1ca4] ss:$16 sps:$4 sm:$0xff]   ;;  %v16205_v21 = vld [vmem:[%s17609_s18 + $0x1cac] ss:$16 sps:$4 sm:$0xff]  }
 0x585   : > { %10335 = vmatpush1.bf16.msra.mxu0 %v16110_v16  ;;  %11023 = vmatpush1.bf16.msra.mxu1 %v16113_v23  ;;  %v16200_v16 = vld [vmem:[%s17609_s18 + $0x1ca0] ss:$16 sps:$4 sm:$0xff]   ;;  %v16203_v23 = vld [vmem:[%s17609_s18 + $0x1ca8] ss:$16 sps:$4 sm:$0xff]  }
 0x586   : > { %10336 = vmatprep.subr.bf16.mxu0 %v16118_v24  ;;  %11024 = vmatprep.subr.bf16.mxu1 %v16121_v25  ;;  %v16208_v24 = vld [vmem:[%s17609_s18 + $0x1cc4] ss:$16 sps:$4 sm:$0xff]   ;;  %v16211_v25 = vld [vmem:[%s17609_s18 + $0x1ccc] ss:$16 sps:$4 sm:$0xff]  }
 0x589   : > { %10337 = vmatpush1.bf16.msra.mxu0 %v16116_v20  ;;  %11025 = vmatpush1.bf16.msra.mxu1 %v16119_v27  ;;  %v16206_v20 = vld [vmem:[%s17609_s18 + $0x1cc0] ss:$16 sps:$4 sm:$0xff]   ;;  %v16209_v27 = vld [vmem:[%s17609_s18 + $0x1cc8] ss:$16 sps:$4 sm:$0xff]  }
 0x58a   : > { %10338 = vmatprep.subr.bf16.mxu0 %v16124_v28  ;;  %11026 = vmatprep.subr.bf16.mxu1 %v16127_v29  ;;  %v16214_v28 = vld [vmem:[%s17609_s18 + $0x1ce4] ss:$16 sps:$4 sm:$0xff]   ;;  %v16217_v29 = vld [vmem:[%s17609_s18 + $0x1cec] ss:$16 sps:$4 sm:$0xff]  }
 0x58d   : > { %10339 = vmatpush1.bf16.msra.mxu0 %v16122_v15  ;;  %11027 = vmatpush1.bf16.msra.mxu1 %v16125_v22  ;;  %v16212_v15 = vld [vmem:[%s17609_s18 + $0x1ce0] ss:$16 sps:$4 sm:$0xff]   ;;  %v16215_v22 = vld [vmem:[%s17609_s18 + $0x1ce8] ss:$16 sps:$4 sm:$0xff]  }
 0x58e   : > { %10340 = vmatprep.subr.bf16.mxu0 %v16130_v32  ;;  %11028 = vmatprep.subr.bf16.mxu1 %v16133_v33  ;;  %v16220_v32 = vld [vmem:[%s17609_s18 + $0x1d04] ss:$16 sps:$4 sm:$0xff]   ;;  %v16223_v33 = vld [vmem:[%s17609_s18 + $0x1d0c] ss:$16 sps:$4 sm:$0xff]  }
 0x591   : > { %10341 = vmatpush1.bf16.msra.mxu0 %v16128_v26  ;;  %11029 = vmatpush1.bf16.msra.mxu1 %v16131_v19  ;;  %v16218_v26 = vld [vmem:[%s17609_s18 + $0x1d00] ss:$16 sps:$4 sm:$0xff]   ;;  %v16221_v19 = vld [vmem:[%s17609_s18 + $0x1d08] ss:$16 sps:$4 sm:$0xff]  }
 0x592   : > { %10342 = vmatprep.subr.bf16.mxu0 %v16136_v36  ;;  %11030 = vmatprep.subr.bf16.mxu1 %v16139_v37  ;;  %v16226_v36 = vld [vmem:[%s17609_s18 + $0x1d24] ss:$16 sps:$4 sm:$0xff]   ;;  %v16229_v37 = vld [vmem:[%s17609_s18 + $0x1d2c] ss:$16 sps:$4 sm:$0xff]  }
 0x595   : > { %10343 = vmatpush1.bf16.msra.mxu0 %v16134_v30  ;;  %11031 = vmatpush1.bf16.msra.mxu1 %v16137_v31  ;;  %v16224_v30 = vld [vmem:[%s17609_s18 + $0x1d20] ss:$16 sps:$4 sm:$0xff]   ;;  %v16227_v31 = vld [vmem:[%s17609_s18 + $0x1d28] ss:$16 sps:$4 sm:$0xff]  }
 0x596   : > { %10344 = vmatprep.subr.bf16.mxu0 %v16142_v40  ;;  %11032 = vmatprep.subr.bf16.mxu1 %v16145_v41  ;;  %v16232_v40 = vld [vmem:[%s17609_s18 + $0x1d44] ss:$16 sps:$4 sm:$0xff]   ;;  %v16235_v41 = vld [vmem:[%s17609_s18 + $0x1d4c] ss:$16 sps:$4 sm:$0xff]  }
 0x599   : > { %10345 = vmatpush1.bf16.msra.mxu0 %v16140_v34  ;;  %11033 = vmatpush1.bf16.msra.mxu1 %v16143_v35  ;;  %v16230_v34 = vld [vmem:[%s17609_s18 + $0x1d40] ss:$16 sps:$4 sm:$0xff]   ;;  %v16233_v35 = vld [vmem:[%s17609_s18 + $0x1d48] ss:$16 sps:$4 sm:$0xff]  }
 0x59a   : > { %10346 = vmatprep.subr.bf16.mxu0 %v16148_v44  ;;  %11034 = vmatprep.subr.bf16.mxu1 %v16151_v45  ;;  %v16238_v44 = vld [vmem:[%s17609_s18 + $0x1d64] ss:$16 sps:$4 sm:$0xff]   ;;  %v16241_v45 = vld [vmem:[%s17609_s18 + $0x1d6c] ss:$16 sps:$4 sm:$0xff]  }
 0x59d   : > { %10347 = vmatpush1.bf16.msra.mxu0 %v16146_v46  ;;  %11035 = vmatpush1.bf16.msra.mxu1 %v16149_v39  ;;  %v16236_v46 = vld [vmem:[%s17609_s18 + $0x1d60] ss:$16 sps:$4 sm:$0xff]   ;;  %v16239_v39 = vld [vmem:[%s17609_s18 + $0x1d68] ss:$16 sps:$4 sm:$0xff]  }
 0x59e   : > { %10348 = vmatprep.subr.bf16.mxu0 %v16154_v48  ;;  %11036 = vmatprep.subr.bf16.mxu1 %v16157_v42  ;;  %v16244_v48 = vld [vmem:[%s17609_s18 + $0x1d84] ss:$16 sps:$4 sm:$0xff]   ;;  %v16247_v42 = vld [vmem:[%s17609_s18 + $0x1d8c] ss:$16 sps:$4 sm:$0xff]  }
 0x5a1   : > { %10349 = vmatpush1.bf16.msra.mxu0 %v16152_v43  ;;  %11037 = vmatpush1.bf16.msra.mxu1 %v16155_v51  ;;  %v16242_v43 = vld [vmem:[%s17609_s18 + $0x1d80] ss:$16 sps:$4 sm:$0xff]   ;;  %v16245_v51 = vld [vmem:[%s17609_s18 + $0x1d88] ss:$16 sps:$4 sm:$0xff]  }
 0x5a2   : > { %10350 = vmatprep.subr.bf16.mxu0 %v16160_v52  ;;  %11038 = vmatprep.subr.bf16.mxu1 %v16163_v47  ;;  %v16250_v52 = vld [vmem:[%s17609_s18 + $0x1da4] ss:$16 sps:$4 sm:$0xff]   ;;  %v16253_v47 = vld [vmem:[%s17609_s18 + $0x1dac] ss:$16 sps:$4 sm:$0xff]  }
 0x5a5   : > { %10351 = vmatpush1.bf16.msra.mxu0 %v16158_v38  ;;  %11039 = vmatpush1.bf16.msra.mxu1 %v16161_v55  ;;  %v16248_v38 = vld [vmem:[%s17609_s18 + $0x1da0] ss:$16 sps:$4 sm:$0xff]   ;;  %v16251_v55 = vld [vmem:[%s17609_s18 + $0x1da8] ss:$16 sps:$4 sm:$0xff]  }
 0x5a6   : > { %10352 = vmatprep.subr.bf16.mxu0 %v16166_v56  ;;  %11040 = vmatprep.subr.bf16.mxu1 %v16169_v49  ;;  %v16256_v56 = vld [vmem:[%s17609_s18 + $0x1dc4] ss:$16 sps:$4 sm:$0xff]   ;;  %v16259_v49 = vld [vmem:[%s17609_s18 + $0x1dcc] ss:$16 sps:$4 sm:$0xff]  }
 0x5a9   : > { %10353 = vmatpush1.bf16.msra.mxu0 %v16164_v50  ;;  %11041 = vmatpush1.bf16.msra.mxu1 %v16167_v59  ;;  %v16254_v50 = vld [vmem:[%s17609_s18 + $0x1dc0] ss:$16 sps:$4 sm:$0xff]   ;;  %v16257_v59 = vld [vmem:[%s17609_s18 + $0x1dc8] ss:$16 sps:$4 sm:$0xff]  }
 0x5aa   : > { %10365 = vmatprep.subr.bf16.mxu0 %v16172_v60  ;;  %11053 = vmatprep.subr.bf16.mxu1 %v16175_v53  ;;  %v16262_v60 = vld [vmem:[%s17609_s18 + $0x1de4] ss:$16 sps:$4 sm:$0xff]   ;;  %v16265_v53 = vld [vmem:[%s17609_s18 + $0x1dec] ss:$16 sps:$4 sm:$0xff]  }
 0x5ac   : > { %10355 = vmatmul.mubr.bf16.vlgmr.msra.gmra.mrb[0].mxu0 %v13323_v54  ;;  %11043 = vmatmul.mubr.bf16.vlgmr.msra.gmra.mrb[0].mxu1 %v13323_v54  ;;  %v16260_v54 = vld [vmem:[%s17609_s18 + $0x1de0] ss:$16 sps:$4 sm:$0xff]  }
 0x5ad   : > { %10366 = vmatpush1.bf16.msra.mxu0 %v16170_v63  ;;  %11054 = vmatpush1.bf16.msra.mxu1 %v16173_v0  ;;  %v16263_v63 = vld [vmem:[%s17609_s18 + $0x1de8] ss:$16 sps:$4 sm:$0xff]   ;;  %v16268_v0 = vld [vmem:[%s17609_s18 + $0x1e04] ss:$16 sps:$4 sm:$0xff]  }
 0x5ae   : > { %10367 = vmatprep.subr.bf16.mxu0 %v16178_v57  ;;  %11055 = vmatprep.subr.bf16.mxu1 %v16181_v58  ;;  %v16271_v57 = vld [vmem:[%s17609_s18 + $0x1e0c] ss:$16 sps:$4 sm:$0xff]   ;;  %v13325_v58 = vcombine.low %v18701_v61, %v18706_v62  ;;  %v16274_v61 = vld [vmem:[%s17609_s18 + $0x1e24] ss:$16 sps:$4 sm:$0xff]  }
 0x5af   : > { %10397 = vmatprep.mubr.bf16.mxu0 %v13326_v1  ;;  %11085 = vmatprep.mubr.bf16.mxu1 %v13326_v1  ;;  %v18779_v1 = vld [vmem:[%s19212_s0 + $0x78] sm:$0xff] }
 0x5b0   : > { %v16277_v62 = vld [vmem:[%s17609_s18 + $0x1e2c] ss:$16 sps:$4 sm:$0xff]  }
 0x5b1   : > { %10368 = vmatpush1.bf16.msra.mxu0 %v16176_v2  ;;  %11056 = vmatpush1.bf16.msra.mxu1 %v16179_v3  ;;  %v18784_v2 = vld [vmem:[%s19212_s0 + $0xf8] sm:$0xff]  ;;  %v16266_v3 = vld [vmem:[%s17609_s18 + $0x1e00] ss:$16 sps:$4 sm:$0xff]  }
 0x5b2   : > { %10369 = vmatprep.subr.bf16.mxu0 %v16184_v4  ;;  %11057 = vmatprep.subr.bf16.mxu1 %v16187_v5  ;;  %v16269_v4 = vld [vmem:[%s17609_s18 + $0x1e08] ss:$16 sps:$4 sm:$0xff]   ;;  %v13328_v5 = vcombine.high %v18779_v1, %v18784_v2 }
 0x5b5   : > { %10370 = vmatpush1.bf16.msra.mxu0 %v16182_v6  ;;  %11058 = vmatpush1.bf16.msra.mxu1 %v16185_v7  ;;  %v16272_v6 = vld [vmem:[%s17609_s18 + $0x1e20] ss:$16 sps:$4 sm:$0xff]   ;;  %v16275_v7 = vld [vmem:[%s17609_s18 + $0x1e28] ss:$16 sps:$4 sm:$0xff]  }
 0x5b6   : > { %10371 = vmatprep.subr.bf16.mxu0 %v16190_v8  ;;  %11059 = vmatprep.subr.bf16.mxu1 %v16193_v9  ;;  %v16280_v8 = vld [vmem:[%s17609_s18 + $0x1e44] ss:$16 sps:$4 sm:$0xff]   ;;  %v16283_v9 = vld [vmem:[%s17609_s18 + $0x1e4c] ss:$16 sps:$4 sm:$0xff]  }
 0x5b9   : > { %10372 = vmatpush1.bf16.msra.mxu0 %v16188_v10  ;;  %11060 = vmatpush1.bf16.msra.mxu1 %v16191_v11  ;;  %v16278_v10 = vld [vmem:[%s17609_s18 + $0x1e40] ss:$16 sps:$4 sm:$0xff]   ;;  %v16281_v11 = vld [vmem:[%s17609_s18 + $0x1e48] ss:$16 sps:$4 sm:$0xff]  }
 0x5ba   : > { %10373 = vmatprep.subr.bf16.mxu0 %v16196_v12  ;;  %11061 = vmatprep.subr.bf16.mxu1 %v16199_v13  ;;  %v16286_v12 = vld [vmem:[%s17609_s18 + $0x1e64] ss:$16 sps:$4 sm:$0xff]   ;;  %v16289_v13 = vld [vmem:[%s17609_s18 + $0x1e6c] ss:$16 sps:$4 sm:$0xff]  }
 0x5bd   : > { %10374 = vmatpush1.bf16.msra.mxu0 %v16194_v14  ;;  %11062 = vmatpush1.bf16.msra.mxu1 %v16197_v17  ;;  %v16284_v14 = vld [vmem:[%s17609_s18 + $0x1e60] ss:$16 sps:$4 sm:$0xff]   ;;  %v16287_v17 = vld [vmem:[%s17609_s18 + $0x1e68] ss:$16 sps:$4 sm:$0xff]  }
 0x5be   : > { %10375 = vmatprep.subr.bf16.mxu0 %v16202_v18  ;;  %11063 = vmatprep.subr.bf16.mxu1 %v16205_v21  ;;  %v16292_v18 = vld [vmem:[%s17609_s18 + $0x1e84] ss:$16 sps:$4 sm:$0xff]   ;;  %v16295_v21 = vld [vmem:[%s17609_s18 + $0x1e8c] ss:$16 sps:$4 sm:$0xff]  }
 0x5c1   : > { %10376 = vmatpush1.bf16.msra.mxu0 %v16200_v16  ;;  %11064 = vmatpush1.bf16.msra.mxu1 %v16203_v23  ;;  %v16290_v16 = vld [vmem:[%s17609_s18 + $0x1e80] ss:$16 sps:$4 sm:$0xff]   ;;  %v16293_v23 = vld [vmem:[%s17609_s18 + $0x1e88] ss:$16 sps:$4 sm:$0xff]  }
 0x5c2   : > { %10377 = vmatprep.subr.bf16.mxu0 %v16208_v24  ;;  %11065 = vmatprep.subr.bf16.mxu1 %v16211_v25  ;;  %v16298_v24 = vld [vmem:[%s17609_s18 + $0x1ea4] ss:$16 sps:$4 sm:$0xff]   ;;  %v16301_v25 = vld [vmem:[%s17609_s18 + $0x1eac] ss:$16 sps:$4 sm:$0xff]  }
 0x5c5   : > { %10378 = vmatpush1.bf16.msra.mxu0 %v16206_v20  ;;  %11066 = vmatpush1.bf16.msra.mxu1 %v16209_v27  ;;  %v16296_v20 = vld [vmem:[%s17609_s18 + $0x1ea0] ss:$16 sps:$4 sm:$0xff]   ;;  %v16299_v27 = vld [vmem:[%s17609_s18 + $0x1ea8] ss:$16 sps:$4 sm:$0xff]  }
 0x5c6   : > { %10379 = vmatprep.subr.bf16.mxu0 %v16214_v28  ;;  %11067 = vmatprep.subr.bf16.mxu1 %v16217_v29  ;;  %v16304_v28 = vld [vmem:[%s17609_s18 + $0x1ec4] ss:$16 sps:$4 sm:$0xff]   ;;  %v16307_v29 = vld [vmem:[%s17609_s18 + $0x1ecc] ss:$16 sps:$4 sm:$0xff]  }
 0x5c9   : > { %10380 = vmatpush1.bf16.msra.mxu0 %v16212_v15  ;;  %11068 = vmatpush1.bf16.msra.mxu1 %v16215_v22  ;;  %v16302_v15 = vld [vmem:[%s17609_s18 + $0x1ec0] ss:$16 sps:$4 sm:$0xff]   ;;  %v16305_v22 = vld [vmem:[%s17609_s18 + $0x1ec8] ss:$16 sps:$4 sm:$0xff]  }
 0x5ca   : > { %10381 = vmatprep.subr.bf16.mxu0 %v16220_v32  ;;  %11069 = vmatprep.subr.bf16.mxu1 %v16223_v33  ;;  %v16310_v32 = vld [vmem:[%s17609_s18 + $0x1ee4] ss:$16 sps:$4 sm:$0xff]   ;;  %v16313_v33 = vld [vmem:[%s17609_s18 + $0x1eec] ss:$16 sps:$4 sm:$0xff]  }
 0x5cd   : > { %10382 = vmatpush1.bf16.msra.mxu0 %v16218_v26  ;;  %11070 = vmatpush1.bf16.msra.mxu1 %v16221_v19  ;;  %v16308_v26 = vld [vmem:[%s17609_s18 + $0x1ee0] ss:$16 sps:$4 sm:$0xff]   ;;  %v16311_v19 = vld [vmem:[%s17609_s18 + $0x1ee8] ss:$16 sps:$4 sm:$0xff]  }
 0x5ce   : > { %10383 = vmatprep.subr.bf16.mxu0 %v16226_v36  ;;  %11071 = vmatprep.subr.bf16.mxu1 %v16229_v37  ;;  %v16316_v36 = vld [vmem:[%s17609_s18 + $0x1f04] ss:$16 sps:$4 sm:$0xff]   ;;  %v16319_v37 = vld [vmem:[%s17609_s18 + $0x1f0c] ss:$16 sps:$4 sm:$0xff]  }
 0x5d1   : > { %10384 = vmatpush1.bf16.msra.mxu0 %v16224_v30  ;;  %11072 = vmatpush1.bf16.msra.mxu1 %v16227_v31  ;;  %v16314_v30 = vld [vmem:[%s17609_s18 + $0x1f00] ss:$16 sps:$4 sm:$0xff]   ;;  %v16317_v31 = vld [vmem:[%s17609_s18 + $0x1f08] ss:$16 sps:$4 sm:$0xff]  }
 0x5d2   : > { %10385 = vmatprep.subr.bf16.mxu0 %v16232_v40  ;;  %11073 = vmatprep.subr.bf16.mxu1 %v16235_v41  ;;  %v16322_v40 = vld [vmem:[%s17609_s18 + $0x1f24] ss:$16 sps:$4 sm:$0xff]   ;;  %v16325_v41 = vld [vmem:[%s17609_s18 + $0x1f2c] ss:$16 sps:$4 sm:$0xff]  }
 0x5d5   : > { %10386 = vmatpush1.bf16.msra.mxu0 %v16230_v34  ;;  %11074 = vmatpush1.bf16.msra.mxu1 %v16233_v35  ;;  %v16320_v34 = vld [vmem:[%s17609_s18 + $0x1f20] ss:$16 sps:$4 sm:$0xff]   ;;  %v16323_v35 = vld [vmem:[%s17609_s18 + $0x1f28] ss:$16 sps:$4 sm:$0xff]  }
 0x5d6   : > { %10387 = vmatprep.subr.bf16.mxu0 %v16238_v44  ;;  %11075 = vmatprep.subr.bf16.mxu1 %v16241_v45  ;;  %v16328_v44 = vld [vmem:[%s17609_s18 + $0x1f44] ss:$16 sps:$4 sm:$0xff]   ;;  %v16331_v45 = vld [vmem:[%s17609_s18 + $0x1f4c] ss:$16 sps:$4 sm:$0xff]  }
 0x5d9   : > { %10388 = vmatpush1.bf16.msra.mxu0 %v16236_v46  ;;  %11076 = vmatpush1.bf16.msra.mxu1 %v16239_v39  ;;  %v16326_v46 = vld [vmem:[%s17609_s18 + $0x1f40] ss:$16 sps:$4 sm:$0xff]   ;;  %v16329_v39 = vld [vmem:[%s17609_s18 + $0x1f48] ss:$16 sps:$4 sm:$0xff]  }
 0x5da   : > { %10389 = vmatprep.subr.bf16.mxu0 %v16244_v48  ;;  %11077 = vmatprep.subr.bf16.mxu1 %v16247_v42  ;;  %v16334_v48 = vld [vmem:[%s17609_s18 + $0x1f64] ss:$16 sps:$4 sm:$0xff]   ;;  %v16337_v42 = vld [vmem:[%s17609_s18 + $0x1f6c] ss:$16 sps:$4 sm:$0xff]  }
 0x5dd   : > { %10390 = vmatpush1.bf16.msra.mxu0 %v16242_v43  ;;  %11078 = vmatpush1.bf16.msra.mxu1 %v16245_v51  ;;  %v16332_v43 = vld [vmem:[%s17609_s18 + $0x1f60] ss:$16 sps:$4 sm:$0xff]   ;;  %v16335_v51 = vld [vmem:[%s17609_s18 + $0x1f68] ss:$16 sps:$4 sm:$0xff]  }
 0x5de   : > { %10391 = vmatprep.subr.bf16.mxu0 %v16250_v52  ;;  %11079 = vmatprep.subr.bf16.mxu1 %v16253_v47  ;;  %v16340_v52 = vld [vmem:[%s17609_s18 + $0x1f84] ss:$16 sps:$4 sm:$0xff]   ;;  %v16343_v47 = vld [vmem:[%s17609_s18 + $0x1f8c] ss:$16 sps:$4 sm:$0xff]  }
 0x5e1   : > { %10392 = vmatpush1.bf16.msra.mxu0 %v16248_v38  ;;  %11080 = vmatpush1.bf16.msra.mxu1 %v16251_v55  ;;  %v16338_v38 = vld [vmem:[%s17609_s18 + $0x1f80] ss:$16 sps:$4 sm:$0xff]   ;;  %v16341_v55 = vld [vmem:[%s17609_s18 + $0x1f88] ss:$16 sps:$4 sm:$0xff]  }
 0x5e2   : > { %10393 = vmatprep.subr.bf16.mxu0 %v16256_v56  ;;  %11081 = vmatprep.subr.bf16.mxu1 %v16259_v49  ;;  %v16346_v56 = vld [vmem:[%s17609_s18 + $0x1fa4] ss:$16 sps:$4 sm:$0xff]   ;;  %v16349_v49 = vld [vmem:[%s17609_s18 + $0x1fac] ss:$16 sps:$4 sm:$0xff]  }
 0x5e5   : > { %10394 = vmatpush1.bf16.msra.mxu0 %v16254_v50  ;;  %11082 = vmatpush1.bf16.msra.mxu1 %v16257_v59  ;;  %v16344_v50 = vld [vmem:[%s17609_s18 + $0x1fa0] ss:$16 sps:$4 sm:$0xff]   ;;  %v16347_v59 = vld [vmem:[%s17609_s18 + $0x1fa8] ss:$16 sps:$4 sm:$0xff]  }
 0x5e6   : > { %10395 = vmatprep.subr.bf16.mxu0 %v16262_v60  ;;  %11083 = vmatprep.subr.bf16.mxu1 %v16265_v53  ;;  %v16352_v60 = vld [vmem:[%s17609_s18 + $0x1fc4] ss:$16 sps:$4 sm:$0xff]   ;;  %v16355_v53 = vld [vmem:[%s17609_s18 + $0x1fcc] ss:$16 sps:$4 sm:$0xff]  }
 0x5e9   : > { %10396 = vmatpush1.bf16.msra.mxu0 %v16260_v54  ;;  %11084 = vmatpush1.bf16.msra.mxu1 %v16263_v63  ;;  %v16350_v54 = vld [vmem:[%s17609_s18 + $0x1fc0] ss:$16 sps:$4 sm:$0xff]   ;;  %v16353_v63 = vld [vmem:[%s17609_s18 + $0x1fc8] ss:$16 sps:$4 sm:$0xff]  }
 0x5ea   : > { %10408 = vmatprep.subr.bf16.mxu0 %v16268_v0  ;;  %11096 = vmatprep.subr.bf16.mxu1 %v16271_v57  ;;  %v16358_v0 = vld [vmem:[%s17609_s18 + $0x1fe4] ss:$16 sps:$4 sm:$0xff]   ;;  %v16361_v57 = vld [vmem:[%s17609_s18 + $0x1fec] ss:$16 sps:$4 sm:$0xff]  }
 0x5ec   : > { %10398 = vmatmul.mubr.bf16.vlgmr.msra.gmra.mrb[0].mxu0 %v13325_v58  ;;  %11086 = vmatmul.mubr.bf16.vlgmr.msra.gmra.mrb[0].mxu1 %v13325_v58  ;;  %v11167_v58 = vld [vmem:[%s17607_s6] sm:$0xff] }
 0x5ed   : > { %10409 = vmatpush1.bf16.msra.mxu0 %v16266_v3  ;;  %11097 = vmatpush1.bf16.msra.mxu1 %v16269_v4  ;;  %v11171_v3 = vld [vmem:[%s17607_s6 + $0x20] sm:$0xff]  ;;  %v11168_v4 = vld [vmem:[%s17607_s6 + $0x8] sm:$0xff] }
 0x5ee   : > { %10410 = vmatprep.subr.bf16.mxu0 %v16274_v61  ;;  %11098 = vmatprep.subr.bf16.mxu1 %v16277_v62  ;;  %v11172_v61 = vld [vmem:[%s17607_s6 + $0x28] sm:$0xff]  ;;  %v16356_v62 = vld [vmem:[%s17609_s18 + $0x1fe0] ss:$16 sps:$4 sm:$0xff]  }
 0x5ef   : > { %10440 = vmatprep.mubr.bf16.mxu0 %v13328_v5  ;;  %11128 = vmatprep.mubr.bf16.mxu1 %v13328_v5  ;;  %v16359_v5 = vld [vmem:[%s17609_s18 + $0x1fe8] ss:$16 sps:$4 sm:$0xff]  }
 0x5f1   : > { %10411 = vmatpush1.bf16.msra.mxu0 %v16272_v6  ;;  %11099 = vmatpush1.bf16.msra.mxu1 %v16275_v7  ;;  %v14354_v6 = vcombine.high %v11167_v58, %v11171_v3  ;;  %v14356_v7 = vcombine.high %v11168_v4, %v11172_v61 }
 0x5f2   : > { %10412 = vmatprep.subr.bf16.mxu0 %v16280_v8  ;;  %11100 = vmatprep.subr.bf16.mxu1 %v16283_v9  ;;  %v11175_v8 = vld [vmem:[%s17607_s6 + $0x40] sm:$0xff] }
 0x5f3   : > { %v11179_v9 = vld [vmem:[%s17607_s6 + $0x60] sm:$0xff] }
 0x5f5   : > { %10413 = vmatpush1.bf16.msra.mxu0 %v16278_v10  ;;  %11101 = vmatpush1.bf16.msra.mxu1 %v16281_v11  ;;  %v11176_v10 = vld [vmem:[%s17607_s6 + $0x48] sm:$0xff] }
 0x5f6   : > { %10414 = vmatprep.subr.bf16.mxu0 %v16286_v12  ;;  %11102 = vmatprep.subr.bf16.mxu1 %v16289_v13  ;;  %v11180_v11 = vld [vmem:[%s17607_s6 + $0x68] sm:$0xff]  ;;  %v13327_v12 = vcombine.low %v18779_v1, %v18784_v2  ;;  %v14353_v13 = vcombine.low %v11167_v58, %v11171_v3  ;;  %v14361_v1 = vcombine.low %v11175_v8, %v11179_v9  ;;  %v11231_v3 = vld [vmem:[%s17607_s6 + $0x200] sm:$0xff] }
 0x5f7   : > { %v14363_v2 = vcombine.low %v11176_v10, %v11180_v11 }
 0x5f9   : > { %10415 = vmatpush1.bf16.msra.mxu0 %v16284_v14  ;;  %11103 = vmatpush1.bf16.msra.mxu1 %v16287_v17  ;;  %v14355_v14 = vcombine.low %v11168_v4, %v11172_v61  ;;  %v14362_v17 = vcombine.high %v11175_v8, %v11179_v9  ;;  %v11235_v4 = vld [vmem:[%s17607_s6 + $0x220] sm:$0xff]  ;;  %v11232_v61 = vld [vmem:[%s17607_s6 + $0x208] sm:$0xff] }
 0x5fa   : > { %10416 = vmatprep.subr.bf16.mxu0 %v16292_v18  ;;  %11104 = vmatprep.subr.bf16.mxu1 %v16295_v21  ;;  %v14364_v18 = vcombine.high %v11176_v10, %v11180_v11  ;;  %v11183_v21 = vld [vmem:[%s17607_s6 + $0x80] sm:$0xff]  ;;  %v11240_v11 = vld [vmem:[%s17607_s6 + $0x248] sm:$0xff] }
 0x5fb   : > { %v11239_v9 = vld [vmem:[%s17607_s6 + $0x240] sm:$0xff] }
 0x5fc   : > { %v11243_v10 = vld [vmem:[%s17607_s6 + $0x260] sm:$0xff] }
 0x5fd   : > { %10417 = vmatpush1.bf16.msra.mxu0 %v16290_v16  ;;  %11105 = vmatpush1.bf16.msra.mxu1 %v16293_v23  ;;  %v11187_v16 = vld [vmem:[%s17607_s6 + $0xa0] sm:$0xff]  ;;  %v11184_v23 = vld [vmem:[%s17607_s6 + $0x88] sm:$0xff] }
 0x5fe   : > { %10418 = vmatprep.subr.bf16.mxu0 %v16298_v24  ;;  %11106 = vmatprep.subr.bf16.mxu1 %v16301_v25  ;;  %v11188_v24 = vld [vmem:[%s17607_s6 + $0xa8] sm:$0xff]  ;;  %v14370_v25 = vcombine.high %v11183_v21, %v11187_v16 }
 0x601   : > { %10419 = vmatpush1.bf16.msra.mxu0 %v16296_v20  ;;  %11107 = vmatpush1.bf16.msra.mxu1 %v16299_v27  ;;  %v14372_v20 = vcombine.high %v11184_v23, %v11188_v24  ;;  %v11191_v27 = vld [vmem:[%s17607_s6 + $0xc0] sm:$0xff] }
 0x602   : > { %10420 = vmatprep.subr.bf16.mxu0 %v16304_v28  ;;  %11108 = vmatprep.subr.bf16.mxu1 %v16307_v29  ;;  %v11195_v28 = vld [vmem:[%s17607_s6 + $0xe0] sm:$0xff]  ;;  %v11192_v29 = vld [vmem:[%s17607_s6 + $0xc8] sm:$0xff] }
 0x605   : > { %10421 = vmatpush1.bf16.msra.mxu0 %v16302_v15  ;;  %11109 = vmatpush1.bf16.msra.mxu1 %v16305_v22  ;;  %v11196_v15 = vld [vmem:[%s17607_s6 + $0xe8] sm:$0xff]  ;;  %v14369_v22 = vcombine.low %v11183_v21, %v11187_v16  ;;  %v11247_v21 = vld [vmem:[%s17607_s6 + $0x280] sm:$0xff] }
 0x606   : > { %10422 = vmatprep.subr.bf16.mxu0 %v16310_v32  ;;  %11110 = vmatprep.subr.bf16.mxu1 %v16313_v33  ;;  %v14371_v32 = vcombine.low %v11184_v23, %v11188_v24  ;;  %v14378_v33 = vcombine.high %v11191_v27, %v11195_v28  ;;  %v11251_v16 = vld [vmem:[%s17607_s6 + $0x2a0] sm:$0xff]  ;;  %v11248_v23 = vld [vmem:[%s17607_s6 + $0x288] sm:$0xff] }
 0x607   : > { %v11252_v24 = vld [vmem:[%s17607_s6 + $0x2a8] sm:$0xff] }
 0x609   : > { %10423 = vmatpush1.bf16.msra.mxu0 %v16308_v26  ;;  %11111 = vmatpush1.bf16.msra.mxu1 %v16311_v19  ;;  %v14380_v26 = vcombine.high %v11192_v29, %v11196_v15  ;;  %v11199_v19 = vld [vmem:[%s17607_s6 + $0x100] sm:$0xff] }
 0x60a   : > { %10424 = vmatprep.subr.bf16.mxu0 %v16316_v36  ;;  %11112 = vmatprep.subr.bf16.mxu1 %v16319_v37  ;;  %v11203_v36 = vld [vmem:[%s17607_s6 + $0x120] sm:$0xff]  ;;  %v11200_v37 = vld [vmem:[%s17607_s6 + $0x108] sm:$0xff] }
 0x60d   : > { %10425 = vmatpush1.bf16.msra.mxu0 %v16314_v30  ;;  %11113 = vmatpush1.bf16.msra.mxu1 %v16317_v31  ;;  %v11204_v30 = vld [vmem:[%s17607_s6 + $0x128] sm:$0xff]  ;;  %v14377_v31 = vcombine.low %v11191_v27, %v11195_v28  ;;  %v11255_v27 = vld [vmem:[%s17607_s6 + $0x2c0] sm:$0xff] }
 0x60e   : > { %10426 = vmatprep.subr.bf16.mxu0 %v16322_v40  ;;  %11114 = vmatprep.subr.bf16.mxu1 %v16325_v41  ;;  %v14379_v40 = vcombine.low %v11192_v29, %v11196_v15  ;;  %v14386_v41 = vcombine.high %v11199_v19, %v11203_v36  ;;  %v11259_v28 = vld [vmem:[%s17607_s6 + $0x2e0] sm:$0xff]  ;;  %v11256_v29 = vld [vmem:[%s17607_s6 + $0x2c8] sm:$0xff] }
 0x60f   : > { %v11260_v15 = vld [vmem:[%s17607_s6 + $0x2e8] sm:$0xff] }
 0x611   : > { %10427 = vmatpush1.bf16.msra.mxu0 %v16320_v34  ;;  %11115 = vmatpush1.bf16.msra.mxu1 %v16323_v35  ;;  %v14388_v34 = vcombine.high %v11200_v37, %v11204_v30  ;;  %v11207_v35 = vld [vmem:[%s17607_s6 + $0x140] sm:$0xff] }
 0x612   : > { %10428 = vmatprep.subr.bf16.mxu0 %v16328_v44  ;;  %11116 = vmatprep.subr.bf16.mxu1 %v16331_v45  ;;  %v11211_v44 = vld [vmem:[%s17607_s6 + $0x160] sm:$0xff]  ;;  %v11208_v45 = vld [vmem:[%s17607_s6 + $0x148] sm:$0xff] }
 0x615   : > { %10429 = vmatpush1.bf16.msra.mxu0 %v16326_v46  ;;  %11117 = vmatpush1.bf16.msra.mxu1 %v16329_v39  ;;  %v11212_v46 = vld [vmem:[%s17607_s6 + $0x168] sm:$0xff]  ;;  %v14385_v39 = vcombine.low %v11199_v19, %v11203_v36  ;;  %v11263_v19 = vld [vmem:[%s17607_s6 + $0x300] sm:$0xff] }
 0x616   : > { %10430 = vmatprep.subr.bf16.mxu0 %v16334_v48  ;;  %11118 = vmatprep.subr.bf16.mxu1 %v16337_v42  ;;  %v14387_v48 = vcombine.low %v11200_v37, %v11204_v30  ;;  %v14394_v42 = vcombine.high %v11207_v35, %v11211_v44  ;;  %v11267_v36 = vld [vmem:[%s17607_s6 + $0x320] sm:$0xff]  ;;  %v11264_v37 = vld [vmem:[%s17607_s6 + $0x308] sm:$0xff] }
 0x617   : > { %v11268_v30 = vld [vmem:[%s17607_s6 + $0x328] sm:$0xff] }
 0x619   : > { %10431 = vmatpush1.bf16.msra.mxu0 %v16332_v43  ;;  %11119 = vmatpush1.bf16.msra.mxu1 %v16335_v51  ;;  %v14396_v43 = vcombine.high %v11208_v45, %v11212_v46  ;;  %v11215_v51 = vld [vmem:[%s17607_s6 + $0x180] sm:$0xff] }
 0x61a   : > { %10432 = vmatprep.subr.bf16.mxu0 %v16340_v52  ;;  %11120 = vmatprep.subr.bf16.mxu1 %v16343_v47  ;;  %v11219_v52 = vld [vmem:[%s17607_s6 + $0x1a0] sm:$0xff]  ;;  %v11216_v47 = vld [vmem:[%s17607_s6 + $0x188] sm:$0xff] }
 0x61d   : > { %10433 = vmatpush1.bf16.msra.mxu0 %v16338_v38  ;;  %11121 = vmatpush1.bf16.msra.mxu1 %v16341_v55  ;;  %v11220_v38 = vld [vmem:[%s17607_s6 + $0x1a8] sm:$0xff]  ;;  %v14393_v55 = vcombine.low %v11207_v35, %v11211_v44  ;;  %v11271_v35 = vld [vmem:[%s17607_s6 + $0x340] sm:$0xff] }
 0x61e   : > { %10434 = vmatprep.subr.bf16.mxu0 %v16346_v56  ;;  %11122 = vmatprep.subr.bf16.mxu1 %v16349_v49  ;;  %v14395_v56 = vcombine.low %v11208_v45, %v11212_v46  ;;  %v14402_v49 = vcombine.high %v11215_v51, %v11219_v52  ;;  %v11275_v44 = vld [vmem:[%s17607_s6 + $0x360] sm:$0xff]  ;;  %v11272_v45 = vld [vmem:[%s17607_s6 + $0x348] sm:$0xff] }
 0x61f   : > { %v11276_v46 = vld [vmem:[%s17607_s6 + $0x368] sm:$0xff] }
 0x621   : > { %10435 = vmatpush1.bf16.msra.mxu0 %v16344_v50  ;;  %11123 = vmatpush1.bf16.msra.mxu1 %v16347_v59  ;;  %v14404_v50 = vcombine.high %v11216_v47, %v11220_v38  ;;  %v11223_v59 = vld [vmem:[%s17607_s6 + $0x1c0] sm:$0xff] }
 0x622   : > { %10436 = vmatprep.subr.bf16.mxu0 %v16352_v60  ;;  %11124 = vmatprep.subr.bf16.mxu1 %v16355_v53  ;;  %v11227_v60 = vld [vmem:[%s17607_s6 + $0x1e0] sm:$0xff]  ;;  %v11224_v53 = vld [vmem:[%s17607_s6 + $0x1c8] sm:$0xff] }
 0x625   : > { %10437 = vmatpush1.bf16.msra.mxu0 %v16350_v54  ;;  %11125 = vmatpush1.bf16.msra.mxu1 %v16353_v63  ;;  %v11228_v54 = vld [vmem:[%s17607_s6 + $0x1e8] sm:$0xff]  ;;  %v14401_v63 = vcombine.low %v11215_v51, %v11219_v52  ;;  %v14457_v51 = vcombine.low %v11271_v35, %v11275_v44  ;;  %v14459_v52 = vcombine.low %v11272_v45, %v11276_v46 }
 0x626   : > { %10438 = vmatprep.subr.bf16.mxu0 %v16358_v0  ;;  %11126 = vmatprep.subr.bf16.mxu1 %v16361_v57  ;;  %v14403_v0 = vcombine.low %v11216_v47, %v11220_v38  ;;  %v14410_v57 = vcombine.high %v11223_v59, %v11227_v60  ;;  %v14412_v58 = vcombine.high %v11224_v53, %v11228_v54  ;;  %v11279_v47 = vld [vmem:[%s17607_s6 + $0x380] sm:$0xff] }
 0x627   : > { %v11283_v38 = vld [vmem:[%s17607_s6 + $0x3a0] sm:$0xff] }
 0x629   : > { %10439 = vmatpush1.bf16.msra.mxu0 %v16356_v62  ;;  %11127 = vmatpush1.bf16.msra.mxu1 %v16359_v5  ;;  %v11236_v62 = vld [vmem:[%s17607_s6 + $0x228] sm:$0xff]  ;;  %v14409_v5 = vcombine.low %v11223_v59, %v11227_v60 }
 0x62a   : > { %12703 = vmatprep.subr.bf16.mxu0 %v14354_v6  ;;  %12789 = vmatprep.subr.bf16.mxu1 %v14356_v7  ;;  %v14411_v6 = vcombine.low %v11224_v53, %v11228_v54  ;;  %v14418_v7 = vcombine.high %v11231_v3, %v11235_v4  ;;  %v14420_v8 = vcombine.high %v11232_v61, %v11236_v62  ;;  %v11287_v53 = vld [vmem:[%s17607_s6 + $0x3c0] sm:$0xff] }
 0x62b   : > { %v11291_v54 = vld [vmem:[%s17607_s6 + $0x3e0] sm:$0xff] }
 0x62c   : > { %10441 = vmatmul.mubr.bf16.vlgmr.msra.gmra.mrb[0].mxu0 %v13327_v12  ;;  %11129 = vmatmul.mubr.bf16.vlgmr.msra.gmra.mrb[0].mxu1 %v13327_v12  ;;  %v11244_v12 = vld [vmem:[%s17607_s6 + $0x268] sm:$0xff] }
 0x62d   : > { %12704 = vmatpush1.bf16.msra.mxu0 %v14353_v13  ;;  %12790 = vmatpush1.bf16.msra.mxu1 %v14355_v14  ;;  %v14417_v13 = vcombine.low %v11231_v3, %v11235_v4  ;;  %v14419_v14 = vcombine.low %v11232_v61, %v11236_v62  ;;  %v18917_v61 = vld [vmem:[%s17607_s6 + $0x400] sm:$0xff] }
 0x62e   : > { %12705 = vmatprep.subr.bf16.mxu0 %v14362_v17  ;;  %12791 = vmatprep.subr.bf16.mxu1 %v14364_v18  ;;  %v14426_v17 = vcombine.high %v11239_v9, %v11243_v10  ;;  %v14428_v18 = vcombine.high %v11240_v11, %v11244_v12  ;;  %v18920_v62 = vld [vmem:[%s17607_s6 + $0x420] sm:$0xff] }
 0x631   : > { %12706 = vmatpush1.bf16.msra.mxu0 %v14361_v1  ;;  %12792 = vmatpush1.bf16.msra.mxu1 %v14363_v2  ;;  %v14425_v1 = vcombine.low %v11239_v9, %v11243_v10  ;;  %v14427_v2 = vcombine.low %v11240_v11, %v11244_v12  ;;  %v4463_v11 = vlaneseq }
 0x632   : > { %12707 = vmatprep.subr.bf16.mxu0 %v14370_v25  ;;  %12793 = vmatprep.subr.bf16.mxu1 %v14372_v20  ;;  %v14434_v25 = vcombine.high %v11247_v21, %v11251_v16  ;;  %v14436_v20 = vcombine.high %v11248_v23, %v11252_v24 }
 0x633   : > { %v18932_v12 = vshrl.u32 %v4463_v11, 7  ;;  %v11332_v11 = vld [vmem:[%s17607_s6 + $0x528] sm:$0xff] }
 0x635   : > { %12708 = vmatpush1.bf16.msra.mxu0 %v14369_v22  ;;  %12794 = vmatpush1.bf16.msra.mxu1 %v14371_v32  ;;  %v14433_v22 = vcombine.low %v11247_v21, %v11251_v16  ;;  %v14435_v32 = vcombine.low %v11248_v23, %v11252_v24  ;;  %v4477_v21 = vsub.s32 3, %v18932_v12 }
 0x636   : > { %12709 = vmatprep.subr.bf16.mxu0 %v14378_v33  ;;  %12795 = vmatprep.subr.bf16.mxu1 %v14380_v26  ;;  %v14442_v33 = vcombine.high %v11255_v27, %v11259_v28  ;;  %v14444_v26 = vcombine.high %v11256_v29, %v11260_v15 }
 0x639   : > { %12710 = vmatpush1.bf16.msra.mxu0 %v14377_v31  ;;  %12796 = vmatpush1.bf16.msra.mxu1 %v14379_v40  ;;  %v14441_v31 = vcombine.low %v11255_v27, %v11259_v28  ;;  %v14443_v40 = vcombine.low %v11256_v29, %v11260_v15 }
 0x63a   : > { %12711 = vmatprep.subr.bf16.mxu0 %v14386_v41  ;;  %12797 = vmatprep.subr.bf16.mxu1 %v14388_v34  ;;  %v14450_v41 = vcombine.high %v11263_v19, %v11267_v36  ;;  %v14452_v34 = vcombine.high %v11264_v37, %v11268_v30 }
 0x63d   : > { %12712 = vmatpush1.bf16.msra.mxu0 %v14385_v39  ;;  %12798 = vmatpush1.bf16.msra.mxu1 %v14387_v48  ;;  %v14449_v39 = vcombine.low %v11263_v19, %v11267_v36  ;;  %v14451_v48 = vcombine.low %v11264_v37, %v11268_v30 }
 0x63e   : > { %12713 = vmatprep.subr.bf16.mxu0 %v14394_v42  ;;  %12799 = vmatprep.subr.bf16.mxu1 %v14396_v43  ;;  %v14458_v42 = vcombine.high %v11271_v35, %v11275_v44  ;;  %v14460_v43 = vcombine.high %v11272_v45, %v11276_v46 }
 0x641   : > { %12714 = vmatpush1.bf16.msra.mxu0 %v14393_v55  ;;  %12800 = vmatpush1.bf16.msra.mxu1 %v14395_v56  ;;  %v11280_v55 = vld [vmem:[%s17607_s6 + $0x388] sm:$0xff]  ;;  %v14466_v56 = vcombine.high %v11279_v47, %v11283_v38 }
 0x642   : > { %12715 = vmatprep.subr.bf16.mxu0 %v14402_v49  ;;  %12801 = vmatprep.subr.bf16.mxu1 %v14404_v50  ;;  %v11284_v49 = vld [vmem:[%s17607_s6 + $0x3a8] sm:$0xff]  ;;  %v14465_v50 = vcombine.low %v11279_v47, %v11283_v38 }
 0x643   : > { %v14467_v59 = vcombine.low %v11280_v55, %v11284_v49  ;;  %v14468_v60 = vcombine.high %v11280_v55, %v11284_v49  ;;  %v11308_v47 = vld [vmem:[%s17607_s6 + $0x468] sm:$0xff] }
 0x645   : > { %12716 = vmatpush1.bf16.msra.mxu0 %v14401_v63  ;;  %12802 = vmatpush1.bf16.msra.mxu1 %v14403_v0  ;;  %v11288_v63 = vld [vmem:[%s17607_s6 + $0x3c8] sm:$0xff]  ;;  %v14474_v0 = vcombine.high %v11287_v53, %v11291_v54 }
 0x646   : > { %12717 = vmatprep.subr.bf16.mxu0 %v14410_v57  ;;  %12803 = vmatprep.subr.bf16.mxu1 %v14412_v58  ;;  %v11292_v57 = vld [vmem:[%s17607_s6 + $0x3e8] sm:$0xff]  ;;  %v14473_v58 = vcombine.low %v11287_v53, %v11291_v54 }
 0x647   : > { %v14475_v3 = vcombine.low %v11288_v63, %v11292_v57  ;;  %v14476_v4 = vcombine.high %v11288_v63, %v11292_v57  ;;  %v11316_v53 = vld [vmem:[%s17607_s6 + $0x4a8] sm:$0xff] }
 0x649   : > { %12718 = vmatpush1.bf16.msra.mxu0 %v14409_v5  ;;  %12804 = vmatpush1.bf16.msra.mxu1 %v14411_v6  ;;  %v18923_v5 = vld [vmem:[%s17607_s6 + $0x408] sm:$0xff]  ;;  %v14482_v6 = vcombine.high %v18917_v61, %v18920_v62 }
 0x64a   : > { %12719 = vmatprep.subr.bf16.mxu0 %v14418_v7  ;;  %12805 = vmatprep.subr.bf16.mxu1 %v14420_v8  ;;  %v11300_v7 = vld [vmem:[%s17607_s6 + $0x428] sm:$0xff]  ;;  %v14481_v8 = vcombine.low %v18917_v61, %v18920_v62 }
 0x64b   : > { %v14483_v9 = vcombine.low %v18923_v5, %v11300_v7  ;;  %v14484_v10 = vcombine.high %v18923_v5, %v11300_v7  ;;  %v11324_v61 = vld [vmem:[%s17607_s6 + $0x4e8] sm:$0xff] }
 0x64d   : > { %12720 = vmatpush1.bf16.msra.mxu0 %v14417_v13  ;;  %12806 = vmatpush1.bf16.msra.mxu1 %v14419_v14  ;;  %v4465_v13 = vsub.s32 0, %v18932_v12  ;;  %v4473_v14 = vsub.s32 2, %v18932_v12 }
 0x64e   : > { %12721 = vmatprep.subr.bf16.mxu0 %v14426_v17  ;;  %12807 = vmatprep.subr.bf16.mxu1 %v14428_v18  ;;  %v4461_v17 = vld [vmem:[%s3376_s28] sm:$0xf]  ;;  %v4469_v18 = vsub.s32 1, %v18932_v12 }
 0x64f   : > { %v4466_v16 = vrot.slane %v4461_v17, %v4465_v13  ;;  %v4474_v23 = vrot.slane %v4461_v17, %v4473_v14 }
 0x650   : > { %v4470_v24 = vrot.slane %v4461_v17, %v4469_v18 }
 0x651   : > { %12722 = vmatpush1.bf16.msra.mxu0 %v14425_v1  ;;  %12808 = vmatpush1.bf16.msra.mxu1 %v14427_v2  ;;  %v4478_v1 = vrot.slane %v4461_v17, %v4477_v21 }
 0x652   : > { %12723 = vmatprep.subr.bf16.mxu0 %v14434_v25  ;;  %12809 = vmatprep.subr.bf16.mxu1 %v14436_v20 }
 0x655   : > { %12724 = vmatpush1.bf16.msra.mxu0 %v14433_v22  ;;  %12810 = vmatpush1.bf16.msra.mxu1 %v14435_v32 }
 0x656   : > { %12725 = vmatprep.subr.bf16.mxu0 %v14442_v33  ;;  %12811 = vmatprep.subr.bf16.mxu1 %v14444_v26 }
 0x659   : > { %12726 = vmatpush1.bf16.msra.mxu0 %v14441_v31  ;;  %12812 = vmatpush1.bf16.msra.mxu1 %v14443_v40 }
 0x65a   : > { %12727 = vmatprep.subr.bf16.mxu0 %v14450_v41  ;;  %12813 = vmatprep.subr.bf16.mxu1 %v14452_v34 }
 0x65d   : > { %12728 = vmatpush1.bf16.msra.mxu0 %v14449_v39  ;;  %12814 = vmatpush1.bf16.msra.mxu1 %v14451_v48  ;;  %v11303_v48 = vld [vmem:[%s17607_s6 + $0x440] sm:$0xff] }
 0x65e   : > { %12729 = vmatprep.subr.bf16.mxu0 %v14458_v42  ;;  %12815 = vmatprep.subr.bf16.mxu1 %v14460_v43 }
 0x661   : > { %12730 = vmatpush1.bf16.msra.mxu0 %v14457_v51  ;;  %12816 = vmatpush1.bf16.msra.mxu1 %v14459_v52  ;;  %v11307_v51 = vld [vmem:[%s17607_s6 + $0x460] sm:$0xff]  ;;  %v11304_v52 = vld [vmem:[%s17607_s6 + $0x448] sm:$0xff] }
 0x662   : > { %12731 = vmatprep.subr.bf16.mxu0 %v14466_v56  ;;  %12817 = vmatprep.subr.bf16.mxu1 %v14468_v60  ;;  %v11311_v56 = vld [vmem:[%s17607_s6 + $0x480] sm:$0xff]  ;;  %v14490_v49 = vcombine.high %v11303_v48, %v11307_v51  ;;  %v11312_v60 = vld [vmem:[%s17607_s6 + $0x488] sm:$0xff]  ;;  %v14489_v54 = vcombine.low %v11303_v48, %v11307_v51  ;;  %v14491_v63 = vcombine.low %v11304_v52, %v11308_v47 }
 0x663   : > { %v14500_v57 = vcombine.high %v11312_v60, %v11316_v53  ;;  %v14499_v5 = vcombine.low %v11312_v60, %v11316_v53  ;;  %v11363_v48 = vld [vmem:[%s17607_s6 + $0x620] sm:$0xff]  ;;  %v11360_v51 = vld [vmem:[%s17607_s6 + $0x608] sm:$0xff] }
 0x664   : > { %v11371_v60 = vld [vmem:[%s17607_s6 + $0x660] sm:$0xff]  ;;  %v11368_v53 = vld [vmem:[%s17607_s6 + $0x648] sm:$0xff] }
 0x665   : > { %12732 = vmatpush1.bf16.msra.mxu0 %v14465_v50  ;;  %12818 = vmatpush1.bf16.msra.mxu1 %v14467_v59  ;;  %v14492_v50 = vcombine.high %v11304_v52, %v11308_v47  ;;  %v11315_v59 = vld [vmem:[%s17607_s6 + $0x4a0] sm:$0xff]  ;;  %v11364_v52 = vld [vmem:[%s17607_s6 + $0x628] sm:$0xff] }
 0x666   : > { %12733 = vmatprep.subr.bf16.mxu0 %v14474_v0  ;;  %12819 = vmatprep.subr.bf16.mxu1 %v14476_v4  ;;  %v14498_v0 = vcombine.high %v11311_v56, %v11315_v59  ;;  %v11320_v4 = vld [vmem:[%s17607_s6 + $0x4c8] sm:$0xff]  ;;  %v14497_v62 = vcombine.low %v11311_v56, %v11315_v59  ;;  %v11367_v59 = vld [vmem:[%s17607_s6 + $0x640] sm:$0xff] }
 0x667   : > { %v14508_v7 = vcombine.high %v11320_v4, %v11324_v61 }
 0x669   : > { %12734 = vmatpush1.bf16.msra.mxu0 %v14473_v58  ;;  %12820 = vmatpush1.bf16.msra.mxu1 %v14475_v3  ;;  %v11319_v58 = vld [vmem:[%s17607_s6 + $0x4c0] sm:$0xff] }
 0x66a   : > { %12746 = vmatprep.subr.bf16.mxu0 %v14482_v6  ;;  %12832 = vmatprep.subr.bf16.mxu1 %v14484_v10  ;;  %v11323_v3 = vld [vmem:[%s17607_s6 + $0x4e0] sm:$0xff]  ;;  %v11328_v10 = vld [vmem:[%s17607_s6 + $0x508] sm:$0xff] }
 0x66b   : > { %v14506_v6 = vcombine.high %v11319_v58, %v11323_v3  ;;  %v14505_v17 = vcombine.low %v11319_v58, %v11323_v3  ;;  %v11375_v3 = vld [vmem:[%s17607_s6 + $0x680] sm:$0xff] }
 0x6ff   : > { %v10442_v2 = vpop.f32.mrb[0].mxu0  ;;  %v11130_v25 = vpop.f32.mrb[0].mxu1 }
 0x700   : > { %v14616_v20 = vadd.f32 %v10442_v2, %v4466_v16  ;;  %v14620_v27 = vadd.f32 %v11130_v25, %v4474_v23  ;;  %v10444_v28 = vpop.f32.mrb[1].mxu0  ;;  %v11132_v29 = vpop.f32.mrb[1].mxu1  ;;  %v11339_v2 = vld [vmem:[%s17607_s6 + $0x560] sm:$0xff]  ;;  %v11336_v25 = vld [vmem:[%s17607_s6 + $0x548] sm:$0xff] }
 0x701   : > { %v14617_v15 = vadd.f32 %v10444_v28, %v4470_v24  ;;  %v14621_v22 = vadd.f32 %v11132_v29, %v4478_v1  ;;  %v10446_v32 = vpop.f32.mrb[2].mxu0  ;;  %v11134_v33 = vpop.f32.mrb[2].mxu1  ;;  %v14515_v28 = vcombine.low %v11328_v10, %v11332_v11 }
 0x702   : > { %v14618_v26 = vadd.f32 %v10446_v32, %v4466_v16  ;;  %v14622_v19 = vadd.f32 %v11134_v33, %v4474_v23  ;;  %v10448_v36 = vpop.f32.mrb[3].mxu0  ;;  %v11136_v37 = vpop.f32.mrb[3].mxu1  ;;  %v11139_v40 = vmax.f32 %v14616_v20, 0.0  ;;  %v11141_v41 = vmax.f32 %v14620_v27, 0.0  ;;  %v11340_v20 = vld [vmem:[%s17607_s6 + $0x568] sm:$0xff]  ;;  %v11347_v32 = vld [vmem:[%s17607_s6 + $0x5a0] sm:$0xff] }
 0x703   : > { %v14619_v30 = vadd.f32 %v10448_v36, %v4470_v24  ;;  %v14623_v31 = vadd.f32 %v11136_v37, %v4478_v1  ;;  %v11140_v44 = vmax.f32 %v14617_v15, 0.0  ;;  %v11142_v45 = vmax.f32 %v14621_v22, 0.0  ;;  %v11335_v1 = vld [vmem:[%s17607_s6 + $0x540] sm:$0xff]  ;;  %v11344_v33 = vld [vmem:[%s17607_s6 + $0x588] sm:$0xff] }
 0x704   : > { %v11143_v34 = vmax.f32 %v14618_v26, 0.0  ;;  %v11145_v35 = vmax.f32 %v14622_v19, 0.0  ;;  %v14507_v16 = vcombine.low %v11320_v4, %v11324_v61  ;;  %v14516_v24 = vcombine.high %v11328_v10, %v11332_v11  ;;  %v11343_v22 = vld [vmem:[%s17607_s6 + $0x580] sm:$0xff]  ;;  %v11348_v26 = vld [vmem:[%s17607_s6 + $0x5a8] sm:$0xff] }
 0x705   : > { %v11144_v46 = vmax.f32 %v14619_v30, 0.0  ;;  %v11146_v39 = vmax.f32 %v14623_v31, 0.0  ;;  %v14522_v29 = vcombine.high %v11335_v1, %v11339_v2  ;;  %v14524_v15 = vcombine.high %v11336_v25, %v11340_v20  ;;  %v11351_v31 = vld [vmem:[%s17607_s6 + $0x5c0] sm:$0xff]  ;;  %v11376_v61 = vld [vmem:[%s17607_s6 + $0x688] sm:$0xff] }
 0x706   : > { %v18952_v42 = vpack.c.bf16 %v11143_v34, %v11139_v40  ;;  %v18954_v43 = vpack.c.bf16 %v11145_v35, %v11141_v41  ;;  %v14521_v19 = vcombine.low %v11335_v1, %v11339_v2  ;;  %v14523_v36 = vcombine.low %v11336_v25, %v11340_v20  ;;  %v11355_v40 = vld [vmem:[%s17607_s6 + $0x5e0] sm:$0xff]  ;;  %v11352_v41 = vld [vmem:[%s17607_s6 + $0x5c8] sm:$0xff] }
 0x707   : > { %v18959_v38 = vpack.c.bf16 %v11144_v46, %v11140_v44  ;;  %v18961_v55 = vpack.c.bf16 %v11146_v39, %v11142_v45  ;;  %v14530_v37 = vcombine.high %v11343_v22, %v11347_v32  ;;  %v14532_v30 = vcombine.high %v11344_v33, %v11348_v26  ;;  %v11356_v34 = vld [vmem:[%s17607_s6 + $0x5e8] sm:$0xff]  ;;  %v11359_v39 = vld [vmem:[%s17607_s6 + $0x600] sm:$0xff] }
 0x708   : > { %v14529_v35 = vcombine.low %v11343_v22, %v11347_v32  ;;  %v14531_v44 = vcombine.low %v11344_v33, %v11348_v26  ;;  %v14538_v45 = vcombine.high %v11351_v31, %v11355_v40  ;;  %v14540_v46 = vcombine.high %v11352_v41, %v11356_v34  ;;  %v11379_v4 = vld [vmem:[%s17607_s6 + $0x6a0] sm:$0xff]  ;;  %v11384_v11 = vld [vmem:[%s17607_s6 + $0x6c8] sm:$0xff] }
 0x709   : > { %12735 = vmatprep.mubr.bf16.mxu0 %v18959_v38  ;;  %12821 = vmatprep.mubr.bf16.mxu1 %v18959_v38  ;;  %v14537_v47 = vcombine.low %v11351_v31, %v11355_v40  ;;  %v14539_v56 = vcombine.low %v11352_v41, %v11356_v34  ;;  %v11387_v10 = vld [vmem:[%s17607_s6 + $0x6e0] sm:$0xff]  ;;  %v11392_v20 = vld [vmem:[%s17607_s6 + $0x708] sm:$0xff] }
 0x70a   : > { %12736 = vmatmul.mubr.bf16.vlgmr.msra.gmra.mrb[4].mxu0 %v18952_v42  ;;  %12822 = vmatmul.mubr.bf16.vlgmr.msra.gmra.mrb[4].mxu1 %v18952_v42  ;;  %v11391_v2 = vld [vmem:[%s17607_s6 + $0x700] sm:$0xff]  ;;  %v11400_v26 = vld [vmem:[%s17607_s6 + $0x748] sm:$0xff] }
 0x70b   : > { %12747 = vmatpush1.bf16.msra.mxu0 %v14481_v8  ;;  %12833 = vmatpush1.bf16.msra.mxu1 %v14483_v9  ;;  %v11327_v8 = vld [vmem:[%s17607_s6 + $0x500] sm:$0xff]  ;;  %v11408_v34 = vld [vmem:[%s17607_s6 + $0x788] sm:$0xff] }
 0x70c   : > { %12778 = vmatprep.mubr.bf16.mxu0 %v18961_v55  ;;  %12864 = vmatprep.mubr.bf16.mxu1 %v18961_v55  ;;  %v11331_v9 = vld [vmem:[%s17607_s6 + $0x520] sm:$0xff] }
 0x70d   : > { %12748 = vmatprep.subr.bf16.mxu0 %v14490_v49  ;;  %12834 = vmatprep.subr.bf16.mxu1 %v14492_v50  ;;  %v14514_v23 = vcombine.high %v11327_v8, %v11331_v9  ;;  %v14513_v27 = vcombine.low %v11327_v8, %v11331_v9  ;;  %v14546_v49 = vcombine.high %v11359_v39, %v11363_v48  ;;  %v11383_v9 = vld [vmem:[%s17607_s6 + $0x6c0] sm:$0xff] }
 0x70e   : > { %v14548_v50 = vcombine.high %v11360_v51, %v11364_v52  ;;  %v11395_v25 = vld [vmem:[%s17607_s6 + $0x720] sm:$0xff] }
 0x70f   : > { %12749 = vmatpush1.bf16.msra.mxu0 %v14489_v54  ;;  %12835 = vmatpush1.bf16.msra.mxu1 %v14491_v63  ;;  %v11372_v54 = vld [vmem:[%s17607_s6 + $0x668] sm:$0xff]  ;;  %v14545_v63 = vcombine.low %v11359_v39, %v11363_v48  ;;  %v11399_v32 = vld [vmem:[%s17607_s6 + $0x740] sm:$0xff] }
 0x710   : > { %12750 = vmatprep.subr.bf16.mxu0 %v14498_v0  ;;  %12836 = vmatprep.subr.bf16.mxu1 %v14500_v57  ;;  %v14547_v0 = vcombine.low %v11360_v51, %v11364_v52  ;;  %v14554_v57 = vcombine.high %v11367_v59, %v11371_v60  ;;  %v14556_v58 = vcombine.high %v11368_v53, %v11372_v54  ;;  %v11403_v33 = vld [vmem:[%s17607_s6 + $0x760] sm:$0xff]  ;;  %v11416_v52 = vld [vmem:[%s17607_s6 + $0x7c8] sm:$0xff] }
 0x711   : > { %v11407_v40 = vld [vmem:[%s17607_s6 + $0x780] sm:$0xff] }
 0x712   : > { %v11411_v41 = vld [vmem:[%s17607_s6 + $0x7a0] sm:$0xff] }
 0x713   : > { %12751 = vmatpush1.bf16.msra.mxu0 %v14497_v62  ;;  %12837 = vmatpush1.bf16.msra.mxu1 %v14499_v5  ;;  %v11380_v62 = vld [vmem:[%s17607_s6 + $0x6a8] sm:$0xff]  ;;  %v14553_v5 = vcombine.low %v11367_v59, %v11371_v60  ;;  %v11415_v48 = vld [vmem:[%s17607_s6 + $0x7c0] sm:$0xff]  ;;  %v11169_v60 = vld [vmem:[%s17607_s6 + $0x10] sm:$0xff] }
 0x714   : > { %12752 = vmatprep.subr.bf16.mxu0 %v14506_v6  ;;  %12838 = vmatprep.subr.bf16.mxu1 %v14508_v7  ;;  %v14555_v6 = vcombine.low %v11368_v53, %v11372_v54  ;;  %v14562_v7 = vcombine.high %v11375_v3, %v11379_v4  ;;  %v14564_v8 = vcombine.high %v11376_v61, %v11380_v62  ;;  %v11419_v51 = vld [vmem:[%s17607_s6 + $0x7e0] sm:$0xff]  ;;  %v11173_v53 = vld [vmem:[%s17607_s6 + $0x30] sm:$0xff]  ;;  %v11170_v54 = vld [vmem:[%s17607_s6 + $0x18] sm:$0xff] }
 0x717   : > { %12753 = vmatpush1.bf16.msra.mxu0 %v14505_v17  ;;  %12839 = vmatpush1.bf16.msra.mxu1 %v14507_v16  ;;  %v11388_v17 = vld [vmem:[%s17607_s6 + $0x6e8] sm:$0xff]  ;;  %v14561_v16 = vcombine.low %v11375_v3, %v11379_v4  ;;  %v11177_v4 = vld [vmem:[%s17607_s6 + $0x50] sm:$0xff] }
 0x718   : > { %12754 = vmatprep.subr.bf16.mxu0 %v14514_v23  ;;  %12840 = vmatprep.subr.bf16.mxu1 %v14516_v24  ;;  %v14563_v23 = vcombine.low %v11376_v61, %v11380_v62  ;;  %v14570_v24 = vcombine.high %v11383_v9, %v11387_v10  ;;  %v14572_v1 = vcombine.high %v11384_v11, %v11388_v17  ;;  %v11181_v61 = vld [vmem:[%s17607_s6 + $0x70] sm:$0xff]  ;;  %v11178_v62 = vld [vmem:[%s17607_s6 + $0x58] sm:$0xff] }
 0x71b   : > { %12755 = vmatpush1.bf16.msra.mxu0 %v14513_v27  ;;  %12841 = vmatpush1.bf16.msra.mxu1 %v14515_v28  ;;  %v11396_v27 = vld [vmem:[%s17607_s6 + $0x728] sm:$0xff]  ;;  %v14569_v28 = vcombine.low %v11383_v9, %v11387_v10  ;;  %v11185_v10 = vld [vmem:[%s17607_s6 + $0x90] sm:$0xff] }
 0x71c   : > { %12756 = vmatprep.subr.bf16.mxu0 %v14522_v29  ;;  %12842 = vmatprep.subr.bf16.mxu1 %v14524_v15  ;;  %v14571_v29 = vcombine.low %v11384_v11, %v11388_v17  ;;  %v14578_v15 = vcombine.high %v11391_v2, %v11395_v25  ;;  %v14580_v22 = vcombine.high %v11392_v20, %v11396_v27  ;;  %v11189_v11 = vld [vmem:[%s17607_s6 + $0xb0] sm:$0xff]  ;;  %v11186_v17 = vld [vmem:[%s17607_s6 + $0x98] sm:$0xff] }
 0x71f   : > { %12757 = vmatpush1.bf16.msra.mxu0 %v14521_v19  ;;  %12843 = vmatpush1.bf16.msra.mxu1 %v14523_v36  ;;  %v11404_v19 = vld [vmem:[%s17607_s6 + $0x768] sm:$0xff]  ;;  %v14577_v36 = vcombine.low %v11391_v2, %v11395_v25  ;;  %v11193_v25 = vld [vmem:[%s17607_s6 + $0xd0] sm:$0xff] }
 0x720   : > { %12758 = vmatprep.subr.bf16.mxu0 %v14530_v37  ;;  %12844 = vmatprep.subr.bf16.mxu1 %v14532_v30  ;;  %v14579_v37 = vcombine.low %v11392_v20, %v11396_v27  ;;  %v14586_v30 = vcombine.high %v11399_v32, %v11403_v33  ;;  %v14588_v31 = vcombine.high %v11400_v26, %v11404_v19  ;;  %v11197_v20 = vld [vmem:[%s17607_s6 + $0xf0] sm:$0xff]  ;;  %v11194_v27 = vld [vmem:[%s17607_s6 + $0xd8] sm:$0xff] }
 0x723   : > { %12759 = vmatpush1.bf16.msra.mxu0 %v14529_v35  ;;  %12845 = vmatpush1.bf16.msra.mxu1 %v14531_v44  ;;  %v11412_v35 = vld [vmem:[%s17607_s6 + $0x7a8] sm:$0xff]  ;;  %v14585_v44 = vcombine.low %v11399_v32, %v11403_v33  ;;  %v11201_v32 = vld [vmem:[%s17607_s6 + $0x110] sm:$0xff] }
 0x724   : > { %12760 = vmatprep.subr.bf16.mxu0 %v14538_v45  ;;  %12846 = vmatprep.subr.bf16.mxu1 %v14540_v46  ;;  %v14587_v45 = vcombine.low %v11400_v26, %v11404_v19  ;;  %v14594_v46 = vcombine.high %v11407_v40, %v11411_v41  ;;  %v14596_v39 = vcombine.high %v11408_v34, %v11412_v35  ;;  %v11205_v33 = vld [vmem:[%s17607_s6 + $0x130] sm:$0xff]  ;;  %v11202_v26 = vld [vmem:[%s17607_s6 + $0x118] sm:$0xff] }
 0x725   : > { %v11206_v19 = vld [vmem:[%s17607_s6 + $0x138] sm:$0xff] }
 0x727   : > { %12761 = vmatpush1.bf16.msra.mxu0 %v14537_v47  ;;  %12847 = vmatpush1.bf16.msra.mxu1 %v14539_v56  ;;  %v11420_v47 = vld [vmem:[%s17607_s6 + $0x7e8] sm:$0xff]  ;;  %v14593_v56 = vcombine.low %v11407_v40, %v11411_v41  ;;  %v11209_v40 = vld [vmem:[%s17607_s6 + $0x150] sm:$0xff] }
 0x728   : > { %12762 = vmatprep.subr.bf16.mxu0 %v14546_v49  ;;  %12848 = vmatprep.subr.bf16.mxu1 %v14548_v50  ;;  %v14595_v49 = vcombine.low %v11408_v34, %v11412_v35  ;;  %v14602_v50 = vcombine.high %v11415_v48, %v11419_v51  ;;  %v14604_v59 = vcombine.high %v11416_v52, %v11420_v47  ;;  %v11213_v41 = vld [vmem:[%s17607_s6 + $0x170] sm:$0xff]  ;;  %v11210_v34 = vld [vmem:[%s17607_s6 + $0x158] sm:$0xff] }
 0x729   : > { %v11214_v35 = vld [vmem:[%s17607_s6 + $0x178] sm:$0xff] }
 0x72b   : > { %12763 = vmatpush1.bf16.msra.mxu0 %v14545_v63  ;;  %12849 = vmatpush1.bf16.msra.mxu1 %v14547_v0  ;;  %v11174_v63 = vld [vmem:[%s17607_s6 + $0x38] sm:$0xff]  ;;  %v14601_v0 = vcombine.low %v11415_v48, %v11419_v51  ;;  %v11217_v48 = vld [vmem:[%s17607_s6 + $0x190] sm:$0xff] }
 0x72c   : > { %12764 = vmatprep.subr.bf16.mxu0 %v14554_v57  ;;  %12850 = vmatprep.subr.bf16.mxu1 %v14556_v58  ;;  %v14603_v57 = vcombine.low %v11416_v52, %v11420_v47  ;;  %v14358_v58 = vcombine.high %v11169_v60, %v11173_v53  ;;  %v14360_v3 = vcombine.high %v11170_v54, %v11174_v63  ;;  %v11221_v51 = vld [vmem:[%s17607_s6 + $0x1b0] sm:$0xff]  ;;  %v11218_v52 = vld [vmem:[%s17607_s6 + $0x198] sm:$0xff] }
 0x72d   : > { %v11222_v47 = vld [vmem:[%s17607_s6 + $0x1b8] sm:$0xff] }
 0x72f   : > { %12765 = vmatpush1.bf16.msra.mxu0 %v14553_v5  ;;  %12851 = vmatpush1.bf16.msra.mxu1 %v14555_v6  ;;  %v11182_v5 = vld [vmem:[%s17607_s6 + $0x78] sm:$0xff]  ;;  %v14357_v6 = vcombine.low %v11169_v60, %v11173_v53  ;;  %v11225_v60 = vld [vmem:[%s17607_s6 + $0x1d0] sm:$0xff] }
 0x730   : > { %12766 = vmatprep.subr.bf16.mxu0 %v14562_v7  ;;  %12852 = vmatprep.subr.bf16.mxu1 %v14564_v8  ;;  %v14359_v7 = vcombine.low %v11170_v54, %v11174_v63  ;;  %v14366_v8 = vcombine.high %v11177_v4, %v11181_v61  ;;  %v14368_v9 = vcombine.high %v11178_v62, %v11182_v5  ;;  %v11229_v53 = vld [vmem:[%s17607_s6 + $0x1f0] sm:$0xff]  ;;  %v11226_v54 = vld [vmem:[%s17607_s6 + $0x1d8] sm:$0xff] }
 0x731   : > { %v11230_v63 = vld [vmem:[%s17607_s6 + $0x1f8] sm:$0xff] }
 0x733   : > { %12767 = vmatpush1.bf16.msra.mxu0 %v14561_v16  ;;  %12853 = vmatpush1.bf16.msra.mxu1 %v14563_v23  ;;  %v11190_v16 = vld [vmem:[%s17607_s6 + $0xb8] sm:$0xff]  ;;  %v14365_v23 = vcombine.low %v11177_v4, %v11181_v61  ;;  %v11233_v4 = vld [vmem:[%s17607_s6 + $0x210] sm:$0xff] }
 0x734   : > { %12768 = vmatprep.subr.bf16.mxu0 %v14570_v24  ;;  %12854 = vmatprep.subr.bf16.mxu1 %v14572_v1  ;;  %v14367_v24 = vcombine.low %v11178_v62, %v11182_v5  ;;  %v14374_v1 = vcombine.high %v11185_v10, %v11189_v11  ;;  %v14376_v2 = vcombine.high %v11186_v17, %v11190_v16  ;;  %v11237_v61 = vld [vmem:[%s17607_s6 + $0x230] sm:$0xff]  ;;  %v11234_v62 = vld [vmem:[%s17607_s6 + $0x218] sm:$0xff] }
 0x735   : > { %v11238_v5 = vld [vmem:[%s17607_s6 + $0x238] sm:$0xff] }
 0x737   : > { %12769 = vmatpush1.bf16.msra.mxu0 %v14569_v28  ;;  %12855 = vmatpush1.bf16.msra.mxu1 %v14571_v29  ;;  %v11198_v28 = vld [vmem:[%s17607_s6 + $0xf8] sm:$0xff]  ;;  %v14373_v29 = vcombine.low %v11185_v10, %v11189_v11  ;;  %v11241_v10 = vld [vmem:[%s17607_s6 + $0x250] sm:$0xff] }
 0x738   : > { %12770 = vmatprep.subr.bf16.mxu0 %v14578_v15  ;;  %12856 = vmatprep.subr.bf16.mxu1 %v14580_v22  ;;  %v14375_v15 = vcombine.low %v11186_v17, %v11190_v16  ;;  %v14384_v22 = vcombine.high %v11194_v27, %v11198_v28  ;;  %v11245_v11 = vld [vmem:[%s17607_s6 + $0x270] sm:$0xff]  ;;  %v11242_v17 = vld [vmem:[%s17607_s6 + $0x258] sm:$0xff] }
 0x739   : > { %v11246_v16 = vld [vmem:[%s17607_s6 + $0x278] sm:$0xff] }
 0x73b   : > { %12771 = vmatpush1.bf16.msra.mxu0 %v14577_v36  ;;  %12857 = vmatpush1.bf16.msra.mxu1 %v14579_v37  ;;  %v14381_v36 = vcombine.low %v11193_v25, %v11197_v20  ;;  %v14383_v37 = vcombine.low %v11194_v27, %v11198_v28  ;;  %v11250_v27 = vld [vmem:[%s17607_s6 + $0x298] sm:$0xff] }
 0x73c   : > { %12772 = vmatprep.subr.bf16.mxu0 %v14586_v30  ;;  %12858 = vmatprep.subr.bf16.mxu1 %v14588_v31  ;;  %v14390_v30 = vcombine.high %v11201_v32, %v11205_v33  ;;  %v14392_v31 = vcombine.high %v11202_v26, %v11206_v19  ;;  %v11254_v28 = vld [vmem:[%s17607_s6 + $0x2b8] sm:$0xff] }
 0x73f   : > { %12773 = vmatpush1.bf16.msra.mxu0 %v14585_v44  ;;  %12859 = vmatpush1.bf16.msra.mxu1 %v14587_v45  ;;  %v14389_v44 = vcombine.low %v11201_v32, %v11205_v33  ;;  %v14391_v45 = vcombine.low %v11202_v26, %v11206_v19  ;;  %v11257_v32 = vld [vmem:[%s17607_s6 + $0x2d0] sm:$0xff]  ;;  %v11258_v26 = vld [vmem:[%s17607_s6 + $0x2d8] sm:$0xff] }
 0x740   : > { %12774 = vmatprep.subr.bf16.mxu0 %v14594_v46  ;;  %12860 = vmatprep.subr.bf16.mxu1 %v14596_v39  ;;  %v14398_v46 = vcombine.high %v11209_v40, %v11213_v41  ;;  %v14400_v39 = vcombine.high %v11210_v34, %v11214_v35  ;;  %v11261_v33 = vld [vmem:[%s17607_s6 + $0x2f0] sm:$0xff]  ;;  %v11262_v19 = vld [vmem:[%s17607_s6 + $0x2f8] sm:$0xff] }
 0x743   : > { %12775 = vmatpush1.bf16.msra.mxu0 %v14593_v56  ;;  %12861 = vmatpush1.bf16.msra.mxu1 %v14595_v49  ;;  %v14397_v56 = vcombine.low %v11209_v40, %v11213_v41  ;;  %v14399_v49 = vcombine.low %v11210_v34, %v11214_v35  ;;  %v11265_v40 = vld [vmem:[%s17607_s6 + $0x310] sm:$0xff]  ;;  %v11266_v34 = vld [vmem:[%s17607_s6 + $0x318] sm:$0xff] }
 0x744   : > { %12776 = vmatprep.subr.bf16.mxu0 %v14602_v50  ;;  %12862 = vmatprep.subr.bf16.mxu1 %v14604_v59  ;;  %v14406_v50 = vcombine.high %v11217_v48, %v11221_v51  ;;  %v14408_v59 = vcombine.high %v11218_v52, %v11222_v47  ;;  %v11269_v41 = vld [vmem:[%s17607_s6 + $0x330] sm:$0xff]  ;;  %v11270_v35 = vld [vmem:[%s17607_s6 + $0x338] sm:$0xff] }
 0x747   : > { %12777 = vmatpush1.bf16.msra.mxu0 %v14601_v0  ;;  %12863 = vmatpush1.bf16.msra.mxu1 %v14603_v57  ;;  %v14405_v0 = vcombine.low %v11217_v48, %v11221_v51  ;;  %v14407_v57 = vcombine.low %v11218_v52, %v11222_v47  ;;  %v11273_v48 = vld [vmem:[%s17607_s6 + $0x350] sm:$0xff]  ;;  %v11274_v52 = vld [vmem:[%s17607_s6 + $0x358] sm:$0xff] }
 0x748   : > { %12875 = vmatprep.subr.bf16.mxu0 %v14358_v58  ;;  %12961 = vmatprep.subr.bf16.mxu1 %v14360_v3  ;;  %v14414_v58 = vcombine.high %v11225_v60, %v11229_v53  ;;  %v14416_v3 = vcombine.high %v11226_v54, %v11230_v63  ;;  %v11277_v51 = vld [vmem:[%s17607_s6 + $0x370] sm:$0xff]  ;;  %v11278_v47 = vld [vmem:[%s17607_s6 + $0x378] sm:$0xff] }
 0x74a   : > { %12779 = vmatmul.mubr.bf16.vlgmr.msra.gmra.mrb[4].mxu0 %v18954_v43  ;;  %12865 = vmatmul.mubr.bf16.vlgmr.msra.gmra.mrb[4].mxu1 %v18954_v43 }
 0x74b   : > { %12876 = vmatpush1.bf16.msra.mxu0 %v14357_v6  ;;  %12907 = vmatprep.mubr.bf16.mxu0 %v18959_v38  ;;  %v14413_v6 = vcombine.low %v11225_v60, %v11229_v53  ;;  %v11281_v60 = vld [vmem:[%s17607_s6 + $0x390] sm:$0xff] }
 0x74c   : > { %12962 = vmatpush1.bf16.msra.mxu1 %v14359_v7  ;;  %12993 = vmatprep.mubr.bf16.mxu1 %v18959_v38  ;;  %v14382_v38 = vcombine.high %v11193_v25, %v11197_v20  ;;  %v14415_v7 = vcombine.low %v11226_v54, %v11230_v63  ;;  %v11249_v25 = vld [vmem:[%s17607_s6 + $0x290] sm:$0xff]  ;;  %v11282_v54 = vld [vmem:[%s17607_s6 + $0x398] sm:$0xff] }
 0x74d   : > { %12877 = vmatprep.subr.bf16.mxu0 %v14366_v8  ;;  %12963 = vmatprep.subr.bf16.mxu1 %v14368_v9  ;;  %v14422_v8 = vcombine.high %v11233_v4, %v11237_v61  ;;  %v14424_v9 = vcombine.high %v11234_v62, %v11238_v5  ;;  %v11253_v20 = vld [vmem:[%s17607_s6 + $0x2b0] sm:$0xff]  ;;  %v11286_v63 = vld [vmem:[%s17607_s6 + $0x3b8] sm:$0xff] }
 0x74e   : > { %v11285_v53 = vld [vmem:[%s17607_s6 + $0x3b0] sm:$0xff] }
 0x74f   : > { %12878 = vmatpush1.bf16.msra.mxu0 %v14365_v23  ;;  %v14421_v23 = vcombine.low %v11233_v4, %v11237_v61  ;;  %v11289_v4 = vld [vmem:[%s17607_s6 + $0x3d0] sm:$0xff] }
 0x750   : > { %12964 = vmatpush1.bf16.msra.mxu1 %v14367_v24  ;;  %12879 = vmatprep.subr.bf16.mxu0 %v14374_v1  ;;  %v14423_v24 = vcombine.low %v11234_v62, %v11238_v5  ;;  %v14430_v1 = vcombine.high %v11241_v10, %v11245_v11  ;;  %v11293_v61 = vld [vmem:[%s17607_s6 + $0x3f0] sm:$0xff]  ;;  %v11290_v62 = vld [vmem:[%s17607_s6 + $0x3d8] sm:$0xff] }
 0x751   : > { %12965 = vmatprep.subr.bf16.mxu1 %v14376_v2  ;;  %v14432_v2 = vcombine.high %v11242_v17, %v11246_v16  ;;  %v11294_v5 = vld [vmem:[%s17607_s6 + $0x3f8] sm:$0xff] }
 0x753   : > { %12880 = vmatpush1.bf16.msra.mxu0 %v14373_v29  ;;  %v14429_v29 = vcombine.low %v11241_v10, %v11245_v11  ;;  %v11297_v10 = vld [vmem:[%s17607_s6 + $0x410] sm:$0xff] }
 0x754   : > { %12966 = vmatpush1.bf16.msra.mxu1 %v14375_v15  ;;  %12881 = vmatprep.subr.bf16.mxu0 %v14382_v38  ;;  %v14431_v15 = vcombine.low %v11242_v17, %v11246_v16  ;;  %v14438_v38 = vcombine.high %v11249_v25, %v11253_v20  ;;  %v11301_v11 = vld [vmem:[%s17607_s6 + $0x430] sm:$0xff]  ;;  %v11298_v17 = vld [vmem:[%s17607_s6 + $0x418] sm:$0xff] }
 0x755   : > { %12967 = vmatprep.subr.bf16.mxu1 %v14384_v22  ;;  %v14440_v22 = vcombine.high %v11250_v27, %v11254_v28  ;;  %v11302_v16 = vld [vmem:[%s17607_s6 + $0x438] sm:$0xff] }
 0x757   : > { %12882 = vmatpush1.bf16.msra.mxu0 %v14381_v36  ;;  %v14437_v36 = vcombine.low %v11249_v25, %v11253_v20  ;;  %v11305_v25 = vld [vmem:[%s17607_s6 + $0x450] sm:$0xff] }
 0x758   : > { %12968 = vmatpush1.bf16.msra.mxu1 %v14383_v37  ;;  %12883 = vmatprep.subr.bf16.mxu0 %v14390_v30  ;;  %v14439_v37 = vcombine.low %v11250_v27, %v11254_v28  ;;  %v14446_v30 = vcombine.high %v11257_v32, %v11261_v33  ;;  %v11309_v20 = vld [vmem:[%s17607_s6 + $0x470] sm:$0xff]  ;;  %v14485_v27 = vcombine.low %v11297_v10, %v11301_v11  ;;  %v11306_v28 = vld [vmem:[%s17607_s6 + $0x458] sm:$0xff] }
 0x759   : > { %12969 = vmatprep.subr.bf16.mxu1 %v14392_v31  ;;  %v14448_v31 = vcombine.high %v11258_v26, %v11262_v19 }
 0x75b   : > { %12884 = vmatpush1.bf16.msra.mxu0 %v14389_v44  ;;  %v14445_v44 = vcombine.low %v11257_v32, %v11261_v33  ;;  %v11317_v32 = vld [vmem:[%s17607_s6 + $0x4b0] sm:$0xff] }
 0x75c   : > { %12970 = vmatpush1.bf16.msra.mxu1 %v14391_v45  ;;  %12885 = vmatprep.subr.bf16.mxu0 %v14398_v46  ;;  %v14447_v45 = vcombine.low %v11258_v26, %v11262_v19  ;;  %v14454_v46 = vcombine.high %v11265_v40, %v11269_v41  ;;  %v11314_v26 = vld [vmem:[%s17607_s6 + $0x498] sm:$0xff] }
 0x75d   : > { %12971 = vmatprep.subr.bf16.mxu1 %v14400_v39  ;;  %v14456_v39 = vcombine.high %v11266_v34, %v11270_v35  ;;  %v11318_v19 = vld [vmem:[%s17607_s6 + $0x4b8] sm:$0xff] }
 0x75f   : > { %12886 = vmatpush1.bf16.msra.mxu0 %v14397_v56  ;;  %v14453_v56 = vcombine.low %v11265_v40, %v11269_v41  ;;  %v11321_v40 = vld [vmem:[%s17607_s6 + $0x4d0] sm:$0xff] }
 0x760   : > { %12972 = vmatpush1.bf16.msra.mxu1 %v14399_v49  ;;  %12887 = vmatprep.subr.bf16.mxu0 %v14406_v50  ;;  %v14455_v49 = vcombine.low %v11266_v34, %v11270_v35  ;;  %v14462_v50 = vcombine.high %v11273_v48, %v11277_v51  ;;  %v11325_v41 = vld [vmem:[%s17607_s6 + $0x4f0] sm:$0xff]  ;;  %v11322_v34 = vld [vmem:[%s17607_s6 + $0x4d8] sm:$0xff] }
 0x761   : > { %12973 = vmatprep.subr.bf16.mxu1 %v14408_v59  ;;  %v14464_v59 = vcombine.high %v11274_v52, %v11278_v47 }
 0x763   : > { %12888 = vmatpush1.bf16.msra.mxu0 %v14405_v0  ;;  %v14461_v0 = vcombine.low %v11273_v48, %v11277_v51  ;;  %v11330_v48 = vld [vmem:[%s17607_s6 + $0x518] sm:$0xff] }
 0x764   : > { %12974 = vmatpush1.bf16.msra.mxu1 %v14407_v57  ;;  %12889 = vmatprep.subr.bf16.mxu0 %v14414_v58  ;;  %v14463_v57 = vcombine.low %v11274_v52, %v11278_v47  ;;  %v14470_v58 = vcombine.high %v11281_v60, %v11285_v53  ;;  %v11334_v51 = vld [vmem:[%s17607_s6 + $0x538] sm:$0xff]  ;;  %v14509_v52 = vcombine.low %v11321_v40, %v11325_v41 }
 0x765   : > { %12975 = vmatprep.subr.bf16.mxu1 %v14416_v3  ;;  %v14472_v3 = vcombine.high %v11282_v54, %v11286_v63 }
 0x767   : > { %12890 = vmatpush1.bf16.msra.mxu0 %v14413_v6  ;;  %v14469_v6 = vcombine.low %v11281_v60, %v11285_v53  ;;  %v11338_v60 = vld [vmem:[%s17607_s6 + $0x558] sm:$0xff] }
 0x768   : > { %12976 = vmatpush1.bf16.msra.mxu1 %v14415_v7  ;;  %12891 = vmatprep.subr.bf16.mxu0 %v14422_v8  ;;  %v14471_v7 = vcombine.low %v11282_v54, %v11286_v63  ;;  %v14478_v8 = vcombine.high %v11289_v4, %v11293_v61  ;;  %v11342_v53 = vld [vmem:[%s17607_s6 + $0x578] sm:$0xff]  ;;  %v14519_v63 = vcombine.low %v11330_v48, %v11334_v51 }
 0x769   : > { %12977 = vmatprep.subr.bf16.mxu1 %v14424_v9  ;;  %v14480_v9 = vcombine.high %v11290_v62, %v11294_v5 }
 0x76b   : > { %12892 = vmatpush1.bf16.msra.mxu0 %v14421_v23  ;;  %v14477_v23 = vcombine.low %v11289_v4, %v11293_v61  ;;  %v11346_v4 = vld [vmem:[%s17607_s6 + $0x598] sm:$0xff] }
 0x76c   : > { %12978 = vmatpush1.bf16.msra.mxu1 %v14423_v24  ;;  %12893 = vmatprep.subr.bf16.mxu0 %v14430_v1  ;;  %v14479_v24 = vcombine.low %v11290_v62, %v11294_v5  ;;  %v14486_v1 = vcombine.high %v11297_v10, %v11301_v11  ;;  %v11350_v61 = vld [vmem:[%s17607_s6 + $0x5b8] sm:$0xff]  ;;  %v14527_v5 = vcombine.low %v11338_v60, %v11342_v53 }
 0x76d   : > { %12979 = vmatprep.subr.bf16.mxu1 %v14432_v2  ;;  %v14488_v2 = vcombine.high %v11298_v17, %v11302_v16  ;;  %v11354_v10 = vld [vmem:[%s17607_s6 + $0x5d8] sm:$0xff] }
 0x76e   : > { %v11358_v11 = vld [vmem:[%s17607_s6 + $0x5f8] sm:$0xff] }
 0x76f   : > { %12894 = vmatpush1.bf16.msra.mxu0 %v14429_v29  ;;  %v11310_v29 = vld [vmem:[%s17607_s6 + $0x478] sm:$0xff] }
 0x770   : > { %12980 = vmatpush1.bf16.msra.mxu1 %v14431_v15  ;;  %12895 = vmatprep.subr.bf16.mxu0 %v14438_v38  ;;  %v14487_v15 = vcombine.low %v11298_v17, %v11302_v16  ;;  %v14494_v38 = vcombine.high %v11305_v25, %v11309_v20  ;;  %v14496_v33 = vcombine.high %v11306_v28, %v11310_v29 }
 0x771   : > { %12981 = vmatprep.subr.bf16.mxu1 %v14440_v22  ;;  %v11313_v22 = vld [vmem:[%s17607_s6 + $0x490] sm:$0xff]  ;;  %v14535_v16 = vcombine.low %v11346_v4, %v11350_v61 }
 0x772   : > { %v14501_v35 = vcombine.low %v11313_v22, %v11317_v32 }
 0x773   : > { %12896 = vmatpush1.bf16.msra.mxu0 %v14437_v36  ;;  %v14493_v36 = vcombine.low %v11305_v25, %v11309_v20  ;;  %v11362_v25 = vld [vmem:[%s17607_s6 + $0x618] sm:$0xff] }
 0x774   : > { %12982 = vmatpush1.bf16.msra.mxu1 %v14439_v37  ;;  %12897 = vmatprep.subr.bf16.mxu0 %v14446_v30  ;;  %v14495_v37 = vcombine.low %v11306_v28, %v11310_v29  ;;  %v14502_v30 = vcombine.high %v11313_v22, %v11317_v32  ;;  %v11366_v20 = vld [vmem:[%s17607_s6 + $0x638] sm:$0xff]  ;;  %v14543_v28 = vcombine.low %v11354_v10, %v11358_v11  ;;  %v11373_v22 = vld [vmem:[%s17607_s6 + $0x670] sm:$0xff] }
 0x775   : > { %12983 = vmatprep.subr.bf16.mxu1 %v14448_v31  ;;  %v14504_v31 = vcombine.high %v11314_v26, %v11318_v19  ;;  %v11370_v32 = vld [vmem:[%s17607_s6 + $0x658] sm:$0xff] }
 0x777   : > { %12898 = vmatpush1.bf16.msra.mxu0 %v14445_v44  ;;  %v14503_v44 = vcombine.low %v11314_v26, %v11318_v19  ;;  %v14551_v19 = vcombine.low %v11362_v25, %v11366_v20 }
 0x778   : > { %12984 = vmatpush1.bf16.msra.mxu1 %v14447_v45  ;;  %12899 = vmatprep.subr.bf16.mxu0 %v14454_v46  ;;  %v14510_v45 = vcombine.high %v11321_v40, %v11325_v41  ;;  %v11329_v46 = vld [vmem:[%s17607_s6 + $0x510] sm:$0xff]  ;;  %v11378_v40 = vld [vmem:[%s17607_s6 + $0x698] sm:$0xff] }
 0x779   : > { %12985 = vmatprep.subr.bf16.mxu1 %v14456_v39  ;;  %v11333_v39 = vld [vmem:[%s17607_s6 + $0x530] sm:$0xff]  ;;  %v11382_v41 = vld [vmem:[%s17607_s6 + $0x6b8] sm:$0xff] }
 0x77a   : > { %v14517_v54 = vcombine.low %v11329_v46, %v11333_v39 }
 0x77b   : > { %12900 = vmatpush1.bf16.msra.mxu0 %v14453_v56  ;;  %v14518_v56 = vcombine.high %v11329_v46, %v11333_v39  ;;  %v11386_v46 = vld [vmem:[%s17607_s6 + $0x6d8] sm:$0xff] }
 0x77c   : > { %12986 = vmatpush1.bf16.msra.mxu1 %v14455_v49  ;;  %12901 = vmatprep.subr.bf16.mxu0 %v14462_v50  ;;  %v14520_v49 = vcombine.high %v11330_v48, %v11334_v51  ;;  %v11337_v50 = vld [vmem:[%s17607_s6 + $0x550] sm:$0xff]  ;;  %v11390_v39 = vld [vmem:[%s17607_s6 + $0x6f8] sm:$0xff]  ;;  %v14567_v51 = vcombine.low %v11378_v40, %v11382_v41 }
 0x77d   : > { %12987 = vmatprep.subr.bf16.mxu1 %v14464_v59  ;;  %v11341_v59 = vld [vmem:[%s17607_s6 + $0x570] sm:$0xff] }
 0x77e   : > { %v14525_v62 = vcombine.low %v11337_v50, %v11341_v59 }
 0x77f   : > { %12902 = vmatpush1.bf16.msra.mxu0 %v14461_v0  ;;  %v14526_v0 = vcombine.high %v11337_v50, %v11341_v59  ;;  %v11394_v50 = vld [vmem:[%s17607_s6 + $0x718] sm:$0xff] }
 0x780   : > { %12988 = vmatpush1.bf16.msra.mxu1 %v14463_v57  ;;  %12903 = vmatprep.subr.bf16.mxu0 %v14470_v58  ;;  %v14528_v57 = vcombine.high %v11338_v60, %v11342_v53  ;;  %v11345_v58 = vld [vmem:[%s17607_s6 + $0x590] sm:$0xff]  ;;  %v11398_v59 = vld [vmem:[%s17607_s6 + $0x738] sm:$0xff]  ;;  %v14575_v53 = vcombine.low %v11386_v46, %v11390_v39 }
 0x781   : > { %12989 = vmatprep.subr.bf16.mxu1 %v14472_v3  ;;  %v11349_v3 = vld [vmem:[%s17607_s6 + $0x5b0] sm:$0xff] }
 0x782   : > { %v14533_v17 = vcombine.low %v11345_v58, %v11349_v3 }
 0x783   : > { %12904 = vmatpush1.bf16.msra.mxu0 %v14469_v6  ;;  %v14534_v6 = vcombine.high %v11345_v58, %v11349_v3  ;;  %v11402_v58 = vld [vmem:[%s17607_s6 + $0x758] sm:$0xff] }
 0x784   : > { %12990 = vmatpush1.bf16.msra.mxu1 %v14471_v7  ;;  %12905 = vmatprep.subr.bf16.mxu0 %v14478_v8  ;;  %v14536_v7 = vcombine.high %v11346_v4, %v11350_v61  ;;  %v11353_v8 = vld [vmem:[%s17607_s6 + $0x5d0] sm:$0xff]  ;;  %v11406_v3 = vld [vmem:[%s17607_s6 + $0x778] sm:$0xff]  ;;  %v14583_v61 = vcombine.low %v11394_v50, %v11398_v59 }
 0x785   : > { %12991 = vmatprep.subr.bf16.mxu1 %v14480_v9  ;;  %v11357_v9 = vld [vmem:[%s17607_s6 + $0x5f0] sm:$0xff] }
 0x787   : > { %12906 = vmatpush1.bf16.msra.mxu0 %v14477_v23  ;;  %v14542_v23 = vcombine.high %v11353_v8, %v11357_v9 }
 0x788   : > { %12992 = vmatpush1.bf16.msra.mxu1 %v14479_v24  ;;  %12918 = vmatprep.subr.bf16.mxu0 %v14486_v1  ;;  %v14544_v24 = vcombine.high %v11354_v10, %v11358_v11  ;;  %v11361_v1 = vld [vmem:[%s17607_s6 + $0x610] sm:$0xff]  ;;  %v14591_v11 = vcombine.low %v11402_v58, %v11406_v3 }
 0x789   : > { %13004 = vmatprep.subr.bf16.mxu1 %v14488_v2  ;;  %v11365_v2 = vld [vmem:[%s17607_s6 + $0x630] sm:$0xff] }
 0x78a   : > { %12908 = vmatmul.mubr.bf16.vlgmr.msra.gmra.mrb[8].mxu0 %v18952_v42  ;;  %v14550_v29 = vcombine.high %v11361_v1, %v11365_v2  ;;  %v14549_v26 = vcombine.low %v11361_v1, %v11365_v2  ;;  %v11418_v1 = vld [vmem:[%s17607_s6 + $0x7d8] sm:$0xff] }
 0x78b   : > { %12994 = vmatmul.mubr.bf16.vlgmr.msra.gmra.mrb[8].mxu1 %v18952_v42  ;;  %12919 = vmatpush1.bf16.msra.mxu0 %v14485_v27  ;;  %v11326_v42 = vld [vmem:[%s17607_s6 + $0x4f8] sm:$0xff]  ;;  %v14541_v27 = vcombine.low %v11353_v8, %v11357_v9 }
 0x78c   : > { %12950 = vmatprep.mubr.bf16.mxu0 %v18961_v55  ;;  %13005 = vmatpush1.bf16.msra.mxu1 %v14487_v15  ;;  %v14511_v47 = vcombine.low %v11322_v34, %v11326_v42  ;;  %v14552_v15 = vcombine.high %v11362_v25, %v11366_v20  ;;  %v11410_v8 = vld [vmem:[%s17607_s6 + $0x798] sm:$0xff] }
 0x78d   : > { %13036 = vmatprep.mubr.bf16.mxu1 %v18961_v55  ;;  %12920 = vmatprep.subr.bf16.mxu0 %v14494_v38  ;;  %v14512_v55 = vcombine.high %v11322_v34, %v11326_v42  ;;  %v11369_v38 = vld [vmem:[%s17607_s6 + $0x650] sm:$0xff]  ;;  %v11414_v9 = vld [vmem:[%s17607_s6 + $0x7b8] sm:$0xff] }
 0x78e   : > { %13006 = vmatprep.subr.bf16.mxu1 %v14496_v33  ;;  %v11374_v33 = vld [vmem:[%s17607_s6 + $0x678] sm:$0xff]  ;;  %v14557_v34 = vcombine.low %v11369_v38, %v11373_v22  ;;  %v14599_v20 = vcombine.low %v11410_v8, %v11414_v9 }
 0x78f   : > { %12921 = vmatpush1.bf16.msra.mxu0 %v14493_v36  ;;  %v14558_v36 = vcombine.high %v11369_v38, %v11373_v22  ;;  %v14559_v42 = vcombine.low %v11370_v32, %v11374_v33  ;;  %v11422_v2 = vld [vmem:[%s17607_s6 + $0x7f8] sm:$0xff]  ;;  %v11147_v38 = vld [vmem:[#allocation3] sm:$0xff]  ;;  %v11149_v22 = vld [vmem:[#allocation3 + $0x10] sm:$0xff] }
 0x790   : > { %13007 = vmatpush1.bf16.msra.mxu1 %v14495_v37  ;;  %12922 = vmatprep.subr.bf16.mxu0 %v14502_v30  ;;  %v14560_v37 = vcombine.high %v11370_v32, %v11374_v33  ;;  %v11377_v30 = vld [vmem:[%s17607_s6 + $0x690] sm:$0xff]  ;;  %v11148_v32 = vld [vmem:[#allocation3 + $0x8] sm:$0xff]  ;;  %v11150_v33 = vld [vmem:[#allocation3 + $0x18] sm:$0xff] }
 0x791   : > { %13008 = vmatprep.subr.bf16.mxu1 %v14504_v31  ;;  %v11381_v31 = vld [vmem:[%s17607_s6 + $0x6b0] sm:$0xff] }
 0x792   : > { %v14565_v48 = vcombine.low %v11377_v30, %v11381_v31 }
 0x793   : > { %12923 = vmatpush1.bf16.msra.mxu0 %v14501_v35  ;;  %v14566_v35 = vcombine.high %v11377_v30, %v11381_v31 }
 0x794   : > { %13009 = vmatpush1.bf16.msra.mxu1 %v14503_v44  ;;  %12924 = vmatprep.subr.bf16.mxu0 %v14510_v45  ;;  %v14568_v44 = vcombine.high %v11378_v40, %v11382_v41  ;;  %v11385_v45 = vld [vmem:[%s17607_s6 + $0x6d0] sm:$0xff] }
 0x795   : > { %13010 = vmatprep.subr.bf16.mxu1 %v14512_v55  ;;  %v11389_v55 = vld [vmem:[%s17607_s6 + $0x6f0] sm:$0xff] }
 0x796   : > { %v14573_v60 = vcombine.low %v11385_v45, %v11389_v55 }
 0x797   : > { %12925 = vmatpush1.bf16.msra.mxu0 %v14509_v52  ;;  %v14574_v52 = vcombine.high %v11385_v45, %v11389_v55 }
 0x798   : > { %13011 = vmatpush1.bf16.msra.mxu1 %v14511_v47  ;;  %12926 = vmatprep.subr.bf16.mxu0 %v14518_v56  ;;  %v14576_v47 = vcombine.high %v11386_v46, %v11390_v39  ;;  %v11393_v56 = vld [vmem:[%s17607_s6 + $0x710] sm:$0xff] }
 0x799   : > { %13012 = vmatprep.subr.bf16.mxu1 %v14520_v49  ;;  %v11397_v49 = vld [vmem:[%s17607_s6 + $0x730] sm:$0xff] }
 0x79a   : > { %v14581_v4 = vcombine.low %v11393_v56, %v11397_v49 }
 0x79b   : > { %12927 = vmatpush1.bf16.msra.mxu0 %v14517_v54  ;;  %v14582_v54 = vcombine.high %v11393_v56, %v11397_v49  ;;  %v11153_v56 = vld [vmem:[#allocation3 + $0x30] sm:$0xff]  ;;  %v11152_v49 = vld [vmem:[#allocation3 + $0x28] sm:$0xff] }
 0x79c   : > { %13013 = vmatpush1.bf16.msra.mxu1 %v14519_v63  ;;  %12928 = vmatprep.subr.bf16.mxu0 %v14526_v0  ;;  %v14584_v63 = vcombine.high %v11394_v50, %v11398_v59  ;;  %v11401_v0 = vld [vmem:[%s17607_s6 + $0x750] sm:$0xff]  ;;  %v11154_v59 = vld [vmem:[#allocation3 + $0x38] sm:$0xff] }
 0x79d   : > { %13014 = vmatprep.subr.bf16.mxu1 %v14528_v57  ;;  %v11405_v57 = vld [vmem:[%s17607_s6 + $0x770] sm:$0xff] }
 0x79e   : > { %v14589_v10 = vcombine.low %v11401_v0, %v11405_v57 }
 0x79f   : > { %12929 = vmatpush1.bf16.msra.mxu0 %v14525_v62  ;;  %v14590_v62 = vcombine.high %v11401_v0, %v11405_v57  ;;  %v11161_v0 = vld [vmem:[#allocation3 + $0x70] sm:$0xff]  ;;  %v11160_v57 = vld [vmem:[#allocation3 + $0x68] sm:$0xff] }
 0x7a0   : > { %13015 = vmatpush1.bf16.msra.mxu1 %v14527_v5  ;;  %12930 = vmatprep.subr.bf16.mxu0 %v14534_v6  ;;  %v14592_v5 = vcombine.high %v11402_v58, %v11406_v3  ;;  %v11409_v6 = vld [vmem:[%s17607_s6 + $0x790] sm:$0xff] }
 0x7a1   : > { %13016 = vmatprep.subr.bf16.mxu1 %v14536_v7  ;;  %v11413_v7 = vld [vmem:[%s17607_s6 + $0x7b0] sm:$0xff] }
 0x7a2   : > { %v14597_v25 = vcombine.low %v11409_v6, %v11413_v7 }
 0x7a3   : > { %12931 = vmatpush1.bf16.msra.mxu0 %v14533_v17  ;;  %v14598_v17 = vcombine.high %v11409_v6, %v11413_v7 }
 0x7a4   : > { %13017 = vmatpush1.bf16.msra.mxu1 %v14535_v16  ;;  %12932 = vmatprep.subr.bf16.mxu0 %v14542_v23  ;;  %v14600_v16 = vcombine.high %v11410_v8, %v11414_v9  ;;  %v11417_v23 = vld [vmem:[%s17607_s6 + $0x7d0] sm:$0xff] }
 0x7a5   : > { %13018 = vmatprep.subr.bf16.mxu1 %v14544_v24  ;;  %v11421_v24 = vld [vmem:[%s17607_s6 + $0x7f0] sm:$0xff] }
 0x7a7   : > { %12933 = vmatpush1.bf16.msra.mxu0 %v14541_v27  ;;  %v14606_v27 = vcombine.high %v11417_v23, %v11421_v24 }
 0x7a8   : > { %13019 = vmatpush1.bf16.msra.mxu1 %v14543_v28  ;;  %12934 = vmatprep.subr.bf16.mxu0 %v14550_v29  ;;  %v14608_v28 = vcombine.high %v11418_v1, %v11422_v2  ;;  %v14605_v29 = vcombine.low %v11417_v23, %v11421_v24  ;;  %v13099_v23 = vld [vmem:[%s19216_s4] sm:$0xff] (!%p14609_p13) }
 0x7a9   : > { %13020 = vmatprep.subr.bf16.mxu1 %v14552_v15  ;;  %v14607_v15 = vcombine.low %v11418_v1, %v11422_v2  ;;  %v13119_v1 = vsub.s32 (!%p14609_p13), 4, %v18932_v12  ;;  %v13123_v2 = vsub.s32 (!%p14609_p13), 5, %v18932_v12 }
 0x7ab   : > { %12935 = vmatpush1.bf16.msra.mxu0 %v14549_v26 }
 0x7ac   : > { %13021 = vmatpush1.bf16.msra.mxu1 %v14551_v19  ;;  %12936 = vmatprep.subr.bf16.mxu0 %v14558_v36  ;;  %v11155_v36 = vld [vmem:[#allocation3 + $0x40] sm:$0xff] }
 0x7ad   : > { %13022 = vmatprep.subr.bf16.mxu1 %v14560_v37  ;;  %v11157_v37 = vld [vmem:[#allocation3 + $0x50] sm:$0xff] }
 0x7af   : > { %12937 = vmatpush1.bf16.msra.mxu0 %v14557_v34  ;;  %v11156_v34 = vld [vmem:[#allocation3 + $0x48] sm:$0xff] }
 0x7b0   : > { %13023 = vmatpush1.bf16.msra.mxu1 %v14559_v42  ;;  %12938 = vmatprep.subr.bf16.mxu0 %v14566_v35  ;;  %v11158_v42 = vld [vmem:[#allocation3 + $0x58] sm:$0xff] }
 0x7b1   : > { %13024 = vmatprep.subr.bf16.mxu1 %v14568_v44 }
 0x7b3   : > { %12939 = vmatpush1.bf16.msra.mxu0 %v14565_v48 }
 0x7b4   : > { %13025 = vmatpush1.bf16.msra.mxu1 %v14567_v51  ;;  %12940 = vmatprep.subr.bf16.mxu0 %v14574_v52 }
 0x7b5   : > { %13026 = vmatprep.subr.bf16.mxu1 %v14576_v47  ;;  %v11151_v47 = vld [vmem:[#allocation3 + $0x20] sm:$0xff] }
 0x7b7   : > { %12941 = vmatpush1.bf16.msra.mxu0 %v14573_v60  ;;  %v11159_v60 = vld [vmem:[#allocation3 + $0x60] sm:$0xff] }
 0x7b8   : > { %13027 = vmatpush1.bf16.msra.mxu1 %v14575_v53  ;;  %12942 = vmatprep.subr.bf16.mxu0 %v14582_v54 }
 0x7b9   : > { %13028 = vmatprep.subr.bf16.mxu1 %v14584_v63 }
 0x7bb   : > { %12943 = vmatpush1.bf16.msra.mxu0 %v14581_v4 }
 0x7bc   : > { %13029 = vmatpush1.bf16.msra.mxu1 %v14583_v61  ;;  %12944 = vmatprep.subr.bf16.mxu0 %v14590_v62  ;;  %v11162_v62 = vld [vmem:[#allocation3 + $0x78] sm:$0xff] }
 0x7bd   : > { %13030 = vmatprep.subr.bf16.mxu1 %v14592_v5 }
 0x7bf   : > { %12945 = vmatpush1.bf16.msra.mxu0 %v14589_v10 }
 0x7c0   : > { %13031 = vmatpush1.bf16.msra.mxu1 %v14591_v11  ;;  %12946 = vmatprep.subr.bf16.mxu0 %v14598_v17 }
 0x7c1   : > { %13032 = vmatprep.subr.bf16.mxu1 %v14600_v16 }
 0x7c3   : > { %12947 = vmatpush1.bf16.msra.mxu0 %v14597_v25  ;;  %v13127_v25 = vsub.s32 (!%p14609_p13), 6, %v18932_v12 }
 0x7c4   : > { %13033 = vmatpush1.bf16.msra.mxu1 %v14599_v20  ;;  %12948 = vmatprep.subr.bf16.mxu0 %v14606_v27  ;;  %v13104_v20 = vrot.slane (!%p14609_p13), %v13099_v23, %v4465_v13  ;;  %v13108_v27 = vrot.slane (!%p14609_p13), %v13099_v23, %v4469_v18 }
 0x7c5   : > { %13034 = vmatprep.subr.bf16.mxu1 %v14608_v28 }
 0x7c7   : > { %12949 = vmatpush1.bf16.msra.mxu0 %v14605_v29  ;;  %v13112_v29 = vrot.slane (!%p14609_p13), %v13099_v23, %v4473_v14 }
 0x7c8   : > { %13035 = vmatpush1.bf16.msra.mxu1 %v14607_v15 }
 0x7ca   : > { %12951 = vmatmul.mubr.bf16.vlgmr.msra.gmra.mrb[8].mxu0 %v18954_v43 }
 0x7cb   : > { %13037 = vmatmul.mubr.bf16.vlgmr.msra.gmra.mrb[8].mxu1 %v18954_v43 }
 0x81d   : > { %v12780_v26 = vpop.f32.mrb[4].mxu0  ;;  %v12866_v19 = vpop.f32.mrb[4].mxu1 }
 0x81e   : > { %v13047_v30 = vadd.f32 %v12780_v26, %v11147_v38  ;;  %v13049_v31 = vadd.f32 %v12866_v19, %v11149_v22  ;;  %v12782_v40 = vpop.f32.mrb[5].mxu0  ;;  %v12868_v41 = vpop.f32.mrb[5].mxu1  ;;  %v13116_v38 = vrot.slane (!%p14609_p13), %v13099_v23, %v4477_v21  ;;  %v13124_v26 = vrot.slane (!%p14609_p13), %v13099_v23, %v13123_v2 }
 0x81f   : > { %v13048_v35 = vadd.f32 %v12782_v40, %v11148_v32  ;;  %v13050_v44 = vadd.f32 %v12868_v41, %v11150_v33  ;;  %v12784_v45 = vpop.f32.mrb[6].mxu0  ;;  %v12870_v55 = vpop.f32.mrb[6].mxu1  ;;  %v13120_v32 = vrot.slane (!%p14609_p13), %v13099_v23, %v13119_v1 }
 0x820   : > { %13063 = vst [vmem:[#allocation3] sm:$0xff] %v13047_v30  ;;  %13065 = vst [vmem:[#allocation3 + $0x10] sm:$0xff] %v13049_v31  ;;  %v13055_v43 = vadd.f32 %v12784_v45, %v11155_v36  ;;  %v13057_v46 = vadd.f32 %v12870_v55, %v11157_v37  ;;  %v12786_v39 = vpop.f32.mrb[7].mxu0  ;;  %v12872_v48 = vpop.f32.mrb[7].mxu1  ;;  %v13128_v36 = vrot.slane (!%p14609_p13), %v13099_v23, %v13127_v25  ;;  %v13131_v37 = vsub.s32 (!%p14609_p13), 7, %v18932_v12 }
 0x821   : > { %13064 = vst [vmem:[#allocation3 + $0x8] sm:$0xff] %v13048_v35  ;;  %13066 = vst [vmem:[#allocation3 + $0x18] sm:$0xff] %v13050_v44  ;;  %v13056_v51 = vadd.f32 %v12786_v39, %v11156_v34  ;;  %v13058_v52 = vadd.f32 %v12872_v48, %v11158_v42 }
 0x822   : > { %13071 = vst [vmem:[#allocation3 + $0x40] sm:$0xff] %v13055_v43  ;;  %13073 = vst [vmem:[#allocation3 + $0x50] sm:$0xff] %v13057_v46  ;;  %v13132_v44 = vrot.slane (!%p14609_p13), %v13099_v23, %v13131_v37 }
 0x823   : > { %13072 = vst [vmem:[#allocation3 + $0x48] sm:$0xff] %v13056_v51  ;;  %13074 = vst [vmem:[#allocation3 + $0x58] sm:$0xff] %v13058_v52 }
 0x827   : > { %v13083_v16 = vld [vmem:[#allocation3] sm:$0xff] (!%p14609_p13)  ;;  %v13085_v28 = vld [vmem:[#allocation3 + $0x10] sm:$0xff] (!%p14609_p13) }
 0x828   : > { %v13084_v24 = vld [vmem:[#allocation3 + $0x8] sm:$0xff] (!%p14609_p13)  ;;  %v13086_v15 = vld [vmem:[#allocation3 + $0x18] sm:$0xff] (!%p14609_p13)  ;;  %v13141_v13 = vadd.f32 (!%p14609_p13), %v13104_v20, %v13083_v16  ;;  %v13143_v31 = vadd.f32 (!%p14609_p13), %v13112_v29, %v13085_v28 }
 0x829   : > { %v13142_v30 = vadd.f32 (!%p14609_p13), %v13108_v27, %v13084_v24  ;;  %v13144_v18 = vadd.f32 (!%p14609_p13), %v13116_v38, %v13086_v15  ;;  %v13091_v41 = vld [vmem:[#allocation3 + $0x40] sm:$0xff] (!%p14609_p13)  ;;  %v13093_v21 = vld [vmem:[#allocation3 + $0x50] sm:$0xff] (!%p14609_p13) }
 0x82a   : > { %v13092_v34 = vld [vmem:[#allocation3 + $0x48] sm:$0xff] (!%p14609_p13)  ;;  %v13094_v45 = vld [vmem:[#allocation3 + $0x58] sm:$0xff] (!%p14609_p13)  ;;  %v13157_v43 = vmax.f32 (!%p14609_p13), %v13141_v13, 0.0  ;;  %v13159_v39 = vmax.f32 (!%p14609_p13), %v13143_v31, 0.0 }
 0x82b   : > { %v13158_v46 = vmax.f32 (!%p14609_p13), %v13142_v30, 0.0  ;;  %v13160_v48 = vmax.f32 (!%p14609_p13), %v13144_v18, 0.0 }
 0x82c   : > { %13173 = vst [vmem:[#allocation3] sm:$0xff] (!%p14609_p13), %v13157_v43  ;;  %13175 = vst [vmem:[#allocation3 + $0x10] sm:$0xff] (!%p14609_p13), %v13159_v39 }
 0x82d   : > { %13174 = vst [vmem:[#allocation3 + $0x8] sm:$0xff] (!%p14609_p13), %v13158_v46  ;;  %13176 = vst [vmem:[#allocation3 + $0x18] sm:$0xff] (!%p14609_p13), %v13160_v48 }
 0x89d   : > { %v12952_v50 = vpop.f32.mrb[8].mxu0 }
 0x89e   : > { %v13051_v53 = vadd.f32 %v12952_v50, %v11151_v47  ;;  %v13038_v54 = vpop.f32.mrb[8].mxu1  ;;  %v12954_v63 = vpop.f32.mrb[9].mxu0  ;;  %13082 = sbr.rel (%p14609_p13) target bundleno = 2225 (0x8b1), region = 85  ;;  %v13149_v50 = vadd.f32 (!%p14609_p13), %v13104_v20, %v13091_v41 }
 0x89f   : > { %v13053_v58 = vadd.f32 %v13038_v54, %v11153_v56  ;;  %v13052_v3 = vadd.f32 %v12954_v63, %v11152_v49  ;;  %v13040_v4 = vpop.f32.mrb[9].mxu1  ;;  %v12956_v61 = vpop.f32.mrb[10].mxu0 }
 0x8a0   : > { %13067 = vst [vmem:[#allocation3 + $0x20] sm:$0xff] %v13051_v53  ;;  %v13054_v5 = vadd.f32 %v13040_v4, %v11154_v59  ;;  %v13059_v6 = vadd.f32 %v12956_v61, %v11159_v60  ;;  %v13042_v7 = vpop.f32.mrb[10].mxu1  ;;  %v12958_v8 = vpop.f32.mrb[11].mxu0  ;;  %v13150_v59 = vadd.f32 (!%p14609_p13), %v13108_v27, %v13092_v34  ;;  %v13151_v60 = vadd.f32 (!%p14609_p13), %v13112_v29, %v13093_v21 }
 0x8a1   : > { %13069 = vst [vmem:[#allocation3 + $0x30] sm:$0xff] %v13053_v58  ;;  %13068 = vst [vmem:[#allocation3 + $0x28] sm:$0xff] %v13052_v3  ;;  %v13061_v9 = vadd.f32 %v13042_v7, %v11161_v0  ;;  %v13060_v10 = vadd.f32 %v12958_v8, %v11160_v57  ;;  %v13044_v11 = vpop.f32.mrb[11].mxu1  ;;  %v13152_v53 = vadd.f32 (!%p14609_p13), %v13116_v38, %v13094_v45  ;;  %v13165_v3 = vmax.f32 (!%p14609_p13), %v13149_v50, 0.0 }
 0x8a2   : > { %13070 = vst [vmem:[#allocation3 + $0x38] sm:$0xff] %v13054_v5  ;;  %13075 = vst [vmem:[#allocation3 + $0x60] sm:$0xff] %v13059_v6  ;;  %v13062_v17 = vadd.f32 %v13044_v11, %v11162_v62  ;;  %v13166_v4 = vmax.f32 (!%p14609_p13), %v13150_v59, 0.0  ;;  %v13167_v61 = vmax.f32 (!%p14609_p13), %v13151_v60, 0.0 }
 0x8a3   : > { %13077 = vst [vmem:[#allocation3 + $0x70] sm:$0xff] %v13061_v9  ;;  %13076 = vst [vmem:[#allocation3 + $0x68] sm:$0xff] %v13060_v10  ;;  %v13168_v62 = vmax.f32 (!%p14609_p13), %v13152_v53, 0.0 }
 0x8a4   : > { %13078 = vst [vmem:[#allocation3 + $0x78] sm:$0xff] %v13062_v17  ;;  %13181 = vst [vmem:[#allocation3 + $0x40] sm:$0xff] (!%p14609_p13), %v13165_v3 }
 0x8a5   : > { %13182 = vst [vmem:[#allocation3 + $0x48] sm:$0xff] %v13166_v4  ;;  %13183 = vst [vmem:[#allocation3 + $0x50] sm:$0xff] %v13167_v61 }
 0x8a6   : > { %13184 = vst [vmem:[#allocation3 + $0x58] sm:$0xff] %v13168_v62 }
 0x8a7   : > { %v13087_v22 = vld [vmem:[#allocation3 + $0x20] sm:$0xff] }
 0x8a8   : > { %v13088_v33 = vld [vmem:[#allocation3 + $0x28] sm:$0xff]  ;;  %v13089_v19 = vld [vmem:[#allocation3 + $0x30] sm:$0xff]  ;;  %v13145_v14 = vadd.f32 %v13120_v32, %v13087_v22 }
 0x8a9   : > { %v13090_v40 = vld [vmem:[#allocation3 + $0x38] sm:$0xff]  ;;  %v13146_v42 = vadd.f32 %v13124_v26, %v13088_v33  ;;  %v13147_v35 = vadd.f32 %v13128_v36, %v13089_v19  ;;  %v13095_v55 = vld [vmem:[#allocation3 + $0x60] sm:$0xff] }
 0x8aa   : > { %v13096_v51 = vld [vmem:[#allocation3 + $0x68] sm:$0xff]  ;;  %v13097_v12 = vld [vmem:[#allocation3 + $0x70] sm:$0xff]  ;;  %v13161_v52 = vmax.f32 %v13145_v14, 0.0  ;;  %v13148_v49 = vadd.f32 %v13132_v44, %v13090_v40  ;;  %v13153_v0 = vadd.f32 %v13120_v32, %v13095_v55 }
 0x8ab   : > { %v13162_v47 = vmax.f32 %v13146_v42, 0.0  ;;  %v13163_v56 = vmax.f32 %v13147_v35, 0.0  ;;  %v13098_v54 = vld [vmem:[#allocation3 + $0x78] sm:$0xff]  ;;  %v13154_v57 = vadd.f32 %v13124_v26, %v13096_v51  ;;  %v13155_v58 = vadd.f32 %v13128_v36, %v13097_v12 }
 0x8ac   : > { %13177 = vst [vmem:[#allocation3 + $0x20] sm:$0xff] %v13161_v52  ;;  %v13164_v63 = vmax.f32 %v13148_v49, 0.0  ;;  %v13169_v5 = vmax.f32 %v13153_v0, 0.0  ;;  %v13156_v8 = vadd.f32 %v13132_v44, %v13098_v54 }
 0x8ad   : > { %13178 = vst [vmem:[#allocation3 + $0x28] sm:$0xff] %v13162_v47  ;;  %13179 = vst [vmem:[#allocation3 + $0x30] sm:$0xff] %v13163_v56  ;;  %v13170_v6 = vmax.f32 %v13154_v57, 0.0  ;;  %v13171_v7 = vmax.f32 %v13155_v58, 0.0 }
 0x8ae   : > { %13180 = vst [vmem:[#allocation3 + $0x38] sm:$0xff] %v13164_v63  ;;  %13185 = vst [vmem:[#allocation3 + $0x60] sm:$0xff] %v13169_v5  ;;  %v13172_v9 = vmax.f32 %v13156_v8, 0.0 }
 0x8af   : > { %13186 = vst [vmem:[#allocation3 + $0x68] sm:$0xff] %v13170_v6  ;;  %13187 = vst [vmem:[#allocation3 + $0x70] sm:$0xff] %v13171_v7 }
 0x8b0   : > { %13188 = vst [vmem:[#allocation3 + $0x78] sm:$0xff] %v13172_v9 }
 0x8b1 PF: > { %p14764_p0 = scmp.eq.s32.totalorder %s16498_s21, 3  ;;  %s16449_s6 = smov [#allocation3]  }
 0x8b2   : > { %s13195_s20 = sshll.u32 %s16449_s6, 4  ;;  %s13196_s20 = int_to_ptr.vmem [resolvable:$true] %s13195_s20 }
 0x8b3   : > { %s16362_s29 = scalar_lea.vmem %s13196_s20, 2048  ;;  %p16369_p4 = scmp.lt.s32.totalorder %s13196_s20, %s13196_s20 }
 0x8b4   : > { %p16363_p1 = scmp.ne.s32.totalorder %s13196_s20, %s16362_s29  ;;  %p16370_p5 = scmp.lt.s32.totalorder %s16362_s29, %s16362_s29 }
 0x8b6   : > { %p16364_p2 = pnand %p16363_p1, %p14764_p0  ;;  %p16371_p6 = por %p16370_p5, %p16369_p4 }
 0x8b8   : > { %p16365_p3 = pneg %p16364_p2 }
 0x8ba   : > { %p16372_p7 = pnand %p16371_p6, %p16365_p3 }
 0x8bc   : > { %16375 = shalt.err (!%p16372_p7)
}
 0x8bd   : > { %s16376_s8 = scalar_lea.hbm %s19217_s5, 2048 }
 0x8be   : > { %p16377_p8 = scmp.ne.s32.totalorder %s19217_s5, %s16376_s8  ;;  %p16382_p11 = scmp.lt.u32.totalorder %s16376_s8, %s19217_s5 }
 0x8c0   : > { %p16378_p9 = pnand %p16377_p8, %p14764_p0 }
 0x8c2   : > { %p16379_p10 = pneg %p16378_p9 }
 0x8c4   : > { %p16384_p12 = pnand %p16382_p11, %p16379_p10 }
 0x8c6   : > { %16387 = shalt.err (!%p16384_p12)
}
 0x8c7   : > { %s16450_s13 = smov 1024   ;;  %s16451_s14 = smov 64  }
 0x8c8   : > { %14761 = dma.vmem_to_hbm [thread:$0]  (%p14764_p0), %s13196_s20, 2048, %s19217_s5, [#allocation4], %s16450_s13, %s16450_s13, %s16451_s14  }
 0x8c9   : > { %16417 = dma.done.wait (%p14764_p0), [#allocation4], 2048  }
 0x8ca   : > { %16419 = vsyncadd (%p14764_p0), [#allocation4], 4294965248 }
 0x8cb PF: > { %p13_p13 = scmp.ge.s32.totalorder %s16501_s22, 6   ;;  %s19223_s18 = smov %s16426_s19 }
 0x8cc   : > { %s19224_s19 = smov %s16510_s25  ;;  %s19225_s20 = smov %s16501_s22 }
 0x8cd   :  { %15 = sbr.rel (!%p13_p13) target bundleno = 2 (0x2), region = 136 }
 0x8d4   :  { %13211 = vsyncpa [#allocation4], 1 }
 0x8d5   :  { %13213 = vsyncpa [#allocation4 + $0x1], 1 }

</bundles_post_ra>
